<compile_context>
chip_gen: v5e
topology: v5e:2x2
jax: 0.10.0
libtpu: 0.0.40
codegen_flags: <defaults>
</compile_context>

<pallas_src>
import jax
import jax.numpy as jnp
from jax.experimental import pallas as pl
from jax.experimental.pallas import tpu as pltpu

EPS = 1e-5


def _round_up(x, m):
    return ((x + m - 1) // m) * m


def _vmem_limit_bytes():
    # Per-generation limit: ~7/8 of physical VMEM, capped at 112 MiB.
    try:
        cap = int(pltpu.get_tpu_info().vmem_capacity_bytes)
    except Exception:
        cap = 64 * 1024 * 1024
    return max(32 * 1024 * 1024, min(cap - cap // 8, 112 * 1024 * 1024))


def _make_resnet_block_kernel(H, W, C, dense_chw):
    Wp = _round_up(W + 2, 8)      # padded row pitch (sublane aligned -> dy tap offsets aligned)
    L = H * Wp                    # conv-output slab length (includes Wp-W junk cols per row)
    inv_n = 1.0 / (H * W)

    def build_padded_rows(t):
        # t: (H, w_src, C) with valid image columns in [0, W).  Returns padded rows
        # [left_reflect | row | right_reflect | zeros] flattened to (H*Wp, C).
        pieces = [t[:, 1:2, :], t[:, :W, :], t[:, W - 2:W - 1, :]]
        if Wp > W + 2:
            pieces.append(jnp.zeros((H, Wp - W - 2, C), t.dtype))
        return jnp.concatenate(pieces, axis=1).reshape(L, C)

    def fill_reflect_pad(pad_ref, rows):
        # rows = padded rows 1..H.  Padded row 0 <- row 2, row H+1 <- row H-1
        # (nn.ReflectionPad2d(1)).  Every store is contiguous and sublane-aligned.
        pad_ref[pl.ds(Wp, L), :] = rows
        pad_ref[pl.ds(0, Wp), :] = rows[Wp:2 * Wp, :]
        pad_ref[pl.ds((H + 1) * Wp, Wp), :] = rows[(H - 2) * Wp:(H - 1) * Wp, :]

    def conv3x3(pad_ref, w, b):
        # w: (9, Cin, Cout) in the input dtype, b: (1, Cout) f32.
        # 9 MXU dots on contiguous slabs (no strided slices, no reshapes per tap),
        # f32 accumulation, accumulator initialized with the broadcast bias.
        # TODO(synk): for C >= 128 fuse the 3 dx taps per dy into one K=3C dot (im2col-lite).
        acc = jnp.broadcast_to(b, (L, C))
        for k in range(9):
            dy, dx = divmod(k, 3)
            slab = pad_ref[pl.ds(dy * Wp + dx, L), :]
            acc = acc + jnp.dot(slab, w[k], preferred_element_type=jnp.float32)
        return acc                                         # (L, C) f32

    def instance_norm(y, valid, relu):
        # InstanceNorm2d(affine=False, eps=1e-5): biased variance over the H*W valid
        # positions only (junk columns removed with a select, not a multiply).
        s = jnp.sum(jnp.where(valid, y, 0.0), axis=0, keepdims=True)
        ss = jnp.sum(jnp.where(valid, y * y, 0.0), axis=0, keepdims=True)
        mean = s * inv_n
        var = jnp.maximum(ss * inv_n - mean * mean, 0.0)   # clamp: one-pass var can go < 0
        out = (y - mean) * jax.lax.rsqrt(var + EPS)
        return jnp.maximum(out, 0.0) if relu else out

    def kernel(x_ref, w1_ref, b1_ref, w2_ref, b2_ref, o_ref, pad_ref):
        @pl.when(pl.program_id(0) == 0)
        def _():  # tail slack row (only read by discarded junk outputs): keep it finite
            pad_ref[pl.ds((H + 2) * Wp, Wp), :] = jnp.zeros((Wp, C), pad_ref.dtype)

        w1 = w1_ref[...]                                   # (9, C, C) input dtype, no per-step cast
        w2 = w2_ref[...]
        b1 = b1_ref[...]                                   # (1, C) f32
        b2 = b2_ref[...]

        col = jax.lax.broadcasted_iota(jnp.int32, (L, 1), 0) % Wp
        valid = col < W                                    # mask of real image columns

        # --- ReflectionPad2d(1) -> Conv2d(3x3, bias) -> InstanceNorm2d -> ReLU ---
        fill_reflect_pad(pad_ref, build_padded_rows(x_ref[0]))
        y = conv3x3(pad_ref, w1, b1)
        y = instance_norm(y, valid, relu=True)
        # TODO(synk): use_dropout=True path (nn.Dropout(0.5)) not implemented; config uses False.

        # --- ReflectionPad2d(1) -> Conv2d(3x3, bias) -> InstanceNorm2d ---
        fill_reflect_pad(pad_ref,
                         build_padded_rows(y.reshape(H, Wp, C)).astype(pad_ref.dtype))
        y = conv3x3(pad_ref, w2, b2)
        y = instance_norm(y, valid, relu=False)

        # --- residual add: x re-read here, not held live across the convs ---
        out = x_ref[0].astype(jnp.float32) + y.reshape(H, Wp, C)[:, :W, :]
        if dense_chw:
            # lane axis = H*W (multiple of 128): unmasked stores, already NCHW-flat.
            o_ref[0] = jnp.transpose(out.reshape(H * W, C)).astype(o_ref.dtype)
        else:
            # C already a lane multiple (or nothing is): store (H, W, C) directly.
            o_ref[0] = out.astype(o_ref.dtype)

    return kernel


def _build_call(N, H, W, C, dtype, dense_chw):
    Wp = _round_up(W + 2, 8)
    out_block = (1, C, H * W) if dense_chw else (1, H, W, C)
    out_map = (lambda n: (n, 0, 0)) if dense_chw else (lambda n: (n, 0, 0, 0))
    # Grid-invariant operands: whole array in VMEM, outside the (double-buffered) pipeline.
    vmem_whole = pl.BlockSpec(memory_space=pltpu.MemorySpace.VMEM)
    return pl.pallas_call(
        _make_resnet_block_kernel(H, W, C, dense_chw),
        out_shape=jax.ShapeDtypeStruct((N,) + out_block[1:], dtype),
        grid=(N,),
        in_specs=[
            pl.BlockSpec((1, H, W, C), lambda n: (n, 0, 0, 0)),   # x
            vmem_whole,                                           # w1 (9, C, C)
            vmem_whole,                                           # b1 (1, C)
            vmem_whole,                                           # w2 (9, C, C)
            vmem_whole,                                           # b2 (1, C)
        ],
        out_specs=pl.BlockSpec(out_block, out_map),
        scratch_shapes=[pltpu.VMEM(((H + 3) * Wp, C), dtype)],    # flat padded-image scratch
        compiler_params=pltpu.CompilerParams(
            # TODO(synk): add an H-strip parallel axis (with two-pass norm) to feed both
            # v7x TensorCores at small batch; batch-only grid is enough here.
            dimension_semantics=("parallel",),
            vmem_limit_bytes=_vmem_limit_bytes(),
        ),
    )


def resnet_block(x_nchw, w1, b1, w2, b2):
    # x: (N, C, H, W); w1/w2: HWIO = (3, 3, cin, cout); b1/b2: (cout,).
    N, C, H, W = x_nchw.shape
    x = jnp.transpose(x_nchw, (0, 2, 3, 1))            # NCHW -> NHWC once at the boundary
    dt = x.dtype
    w1r = w1.reshape(9, C, C).astype(dt)               # per-tap (cin, cout) slabs, cast ONCE
    w2r = w2.reshape(9, C, C).astype(dt)
    b1r = b1.reshape(1, C).astype(jnp.float32)
    b2r = b2.reshape(1, C).astype(jnp.float32)

    # Static layout choice: (H,W,C) stores are already lane-dense when C % 128 == 0; only
    # transpose in-kernel to (C, HW) when C is small but HW is a lane multiple.
    dense_chw = (C % 128 != 0) and ((H * W) % 128 == 0)
    out = _build_call(N, H, W, C, dt, dense_chw)(x, w1r, b1r, w2r, b2r)
    if dense_chw:
        return out.reshape(N, C, H, W)                 # already NCHW-flat
    return jnp.transpose(out, (0, 3, 1, 2))            # NHWC -> NCHW


def reference(x_nchw, w1, b1, w2, b2):
    # Pure-JAX reference (correctness check only).
    x = jnp.transpose(x_nchw, (0, 2, 3, 1)).astype(jnp.float32)

    def pad(t):
        return jnp.pad(t, ((0, 0), (1, 1), (1, 1), (0, 0)), mode="reflect")

    def conv(t, w, b):
        y = jax.lax.conv_general_dilated(
            t, w, (1, 1), "VALID", dimension_numbers=("NHWC", "HWIO", "NHWC"))
        return y + b[None, None, None, :]

    def inorm(t):
        m = jnp.mean(t, axis=(1, 2), keepdims=True)
        v = jnp.mean(jnp.square(t - m), axis=(1, 2), keepdims=True)
        return (t - m) * jax.lax.rsqrt(v + EPS)

    y = jnp.maximum(inorm(conv(pad(x), w1, b1)), 0.0)
    y = inorm(conv(pad(y), w2, b2))
    return jnp.transpose(x + y, (0, 3, 1, 2))


if __name__ == "__main__":
    key = jax.random.PRNGKey(0)
    kx, kw1, kb1, kw2, kb2 = jax.random.split(key, 5)

    N, C, H, W = 2, 4, 16, 16
    x = jax.random.normal(kx, (N, C, H, W), jnp.float32)
    # Conv weights stored as HWIO = (kh, kw, in, out) (same params as PyTorch OIHW layout).
    w1 = 0.1 * jax.random.normal(kw1, (3, 3, C, C), jnp.float32)
    b1 = 0.01 * jax.random.normal(kb1, (C,), jnp.float32)
    w2 = 0.1 * jax.random.normal(kw2, (3, 3, C, C), jnp.float32)
    b2 = 0.01 * jax.random.normal(kb2, (C,), jnp.float32)

    out = jax.block_until_ready(resnet_block(x, w1, b1, w2, b2))
    ref = jax.block_until_ready(reference(x, w1, b1, w2, b2))

    assert out.shape == (N, C, H, W) and out.dtype == jnp.float32
    assert jnp.allclose(out, ref, atol=1e-4, rtol=1e-4), "mismatch vs. reference"
    print("KERNEL_OK")
</pallas_src>

<mosaic_0001>
module attributes {stable_mosaic.version = 11 : i64} {
  func.func @kernel(%arg0: i32, %arg1: memref<1x16x16x4xf32, #tpu.memory_space<vmem>>, %arg2: memref<9x4x4xf32, #tpu.memory_space<vmem>>, %arg3: memref<1x4xf32, #tpu.memory_space<vmem>>, %arg4: memref<9x4x4xf32, #tpu.memory_space<vmem>>, %arg5: memref<1x4xf32, #tpu.memory_space<vmem>>, %arg6: memref<1x4x256xf32, #tpu.memory_space<vmem>>, %arg7: memref<456x4xf32, #tpu.memory_space<vmem>>) attributes {dimension_semantics = [#tpu.dimension_semantics<parallel>], iteration_bounds = array<i64: 2>, scalar_prefetch = 0 : i64, scratch_operands = 1 : i64, tpu.core_type = #tpu.core_type<tc>, window_params = [{transform_indices = @transform_0, window_bounds = array<i64: 1, 16, 16, 4>}, {pipeline_mode = #tpu.pipeline_mode<synchronous>, transform_indices = @transform_1, window_bounds = array<i64: 9, 4, 4>}, {pipeline_mode = #tpu.pipeline_mode<synchronous>, transform_indices = @transform_2, window_bounds = array<i64: 1, 4>}, {pipeline_mode = #tpu.pipeline_mode<synchronous>, transform_indices = @transform_3, window_bounds = array<i64: 9, 4, 4>}, {pipeline_mode = #tpu.pipeline_mode<synchronous>, transform_indices = @transform_4, window_bounds = array<i64: 1, 4>}, {transform_indices = @transform_5, window_bounds = array<i64: 1, 4, 256>}]} {
    %c0_i32 = arith.constant 0 : i32
    %0 = arith.cmpi eq, %arg0, %c0_i32 : i32
    %1 = arith.extui %0 : i1 to i32
    %c0_i32_0 = arith.constant 0 : i32
    %2 = arith.cmpi ne, %1, %c0_i32_0 : i32
    scf.if %2 {
      %cst_100 = arith.constant 0.000000e+00 : f32
      %212 = vector.broadcast %cst_100 : f32 to vector<24x4xf32>
      %c432 = arith.constant 432 : index
      %c0_101 = arith.constant 0 : index
      %213 = vector.load %arg7[%c432, %c0_101] : memref<456x4xf32, #tpu.memory_space<vmem>>, vector<24x4xf32>
      tpu.vector_store %arg7[%c432, %c0_101], %212 {strides = array<i32>} : memref<456x4xf32, #tpu.memory_space<vmem>>, vector<24x4xf32>,
    } else {
    }
    %c0 = arith.constant 0 : index
    %c0_1 = arith.constant 0 : index
    %c0_2 = arith.constant 0 : index
    %3 = vector.load %arg2[%c0, %c0_1, %c0_2] : memref<9x4x4xf32, #tpu.memory_space<vmem>>, vector<9x4x4xf32>
    %c0_3 = arith.constant 0 : index
    %c0_4 = arith.constant 0 : index
    %c0_5 = arith.constant 0 : index
    %4 = vector.load %arg4[%c0_3, %c0_4, %c0_5] : memref<9x4x4xf32, #tpu.memory_space<vmem>>, vector<9x4x4xf32>
    %c0_6 = arith.constant 0 : index
    %c0_7 = arith.constant 0 : index
    %5 = vector.load %arg3[%c0_6, %c0_7] : memref<1x4xf32, #tpu.memory_space<vmem>>, vector<1x4xf32>
    %c0_8 = arith.constant 0 : index
    %c0_9 = arith.constant 0 : index
    %6 = vector.load %arg5[%c0_8, %c0_9] : memref<1x4xf32, #tpu.memory_space<vmem>>, vector<1x4xf32>
    %7 = tpu.iota {dimensions = array<i32: 0>} : vector<384x1xi32>
    %c24_i32 = arith.constant 24 : i32
    %c0_i32_10 = arith.constant 0 : i32
    %8 = arith.cmpi eq, %c24_i32, %c0_i32_10 : i32
    %c1_i32 = arith.constant 1 : i32
    %9 = arith.select %8, %c1_i32, %c24_i32 : i32
    %10 = vector.broadcast %9 : i32 to vector<384x1xi32>
    %11 = arith.remsi %7, %10 : vector<384x1xi32>
    %c0_i32_11 = arith.constant 0 : i32
    %12 = vector.broadcast %c0_i32_11 : i32 to vector<384x1xi32>
    %13 = arith.cmpi ne, %11, %12 : vector<384x1xi32>
    %c0_i32_12 = arith.constant 0 : i32
    %14 = vector.broadcast %c0_i32_12 : i32 to vector<384x1xi32>
    %15 = arith.cmpi slt, %11, %14 : vector<384x1xi32>
    %c0_i32_13 = arith.constant 0 : i32
    %16 = arith.cmpi slt, %9, %c0_i32_13 : i32
    %17 = vector.broadcast %16 : i1 to vector<384x1xi1>
    %18 = vector.broadcast %17 : vector<384x1xi1> to vector<384x1xi1>
    %19 = arith.xori %15, %18 : vector<384x1xi1>
    %20 = arith.andi %19, %13 : vector<384x1xi1>
    %21 = vector.broadcast %9 : i32 to vector<384x1xi32>
    %22 = arith.addi %11, %21 : vector<384x1xi32>
    %23 = arith.select %20, %22, %11 : vector<384x1xi1>, vector<384x1xi32>
    %c16_i32 = arith.constant 16 : i32
    %24 = vector.broadcast %c16_i32 : i32 to vector<384x1xi32>
    %25 = arith.cmpi slt, %23, %24 : vector<384x1xi32>
    %c0_14 = arith.constant 0 : index
    %c0_15 = arith.constant 0 : index
    %c0_16 = arith.constant 0 : index
    %c0_17 = arith.constant 0 : index
    %26 = vector.load %arg1[%c0_14, %c0_15, %c0_16, %c0_17] : memref<1x16x16x4xf32, #tpu.memory_space<vmem>>, vector<1x16x16x4xf32>
    %27 = vector.shape_cast %26 : vector<1x16x16x4xf32> to vector<16x16x4xf32>
    %28 = vector.extract_strided_slice %27 {offsets = [0, 1, 0], sizes = [16, 1, 4], strides = [1, 1, 1]} : vector<16x16x4xf32> to vector<16x1x4xf32>
    %29 = vector.extract_strided_slice %27 {offsets = [0, 14, 0], sizes = [16, 1, 4], strides = [1, 1, 1]} : vector<16x16x4xf32> to vector<16x1x4xf32>
    %cst = arith.constant 0.000000e+00 : f32
    %30 = vector.broadcast %cst : f32 to vector<16x6x4xf32>
    %31 = tpu.concatenate %28, %27, %29, %30 in 1 : vector<16x1x4xf32>, vector<16x16x4xf32>, vector<16x1x4xf32>, vector<16x6x4xf32> -> vector<16x24x4xf32>
    %32 = vector.shape_cast %31 : vector<16x24x4xf32> to vector<384x4xf32>
    %c24 = arith.constant 24 : index
    %c0_18 = arith.constant 0 : index
    %33 = vector.load %arg7[%c24, %c0_18] : memref<456x4xf32, #tpu.memory_space<vmem>>, vector<384x4xf32>
    tpu.vector_store %arg7[%c24, %c0_18], %32 {strides = array<i32>} : memref<456x4xf32, #tpu.memory_space<vmem>>, vector<384x4xf32>,
    %34 = vector.extract_strided_slice %32 {offsets = [24, 0], sizes = [24, 4], strides = [1, 1]} : vector<384x4xf32> to vector<24x4xf32>
    %c0_19 = arith.constant 0 : index
    %c0_20 = arith.constant 0 : index
    %35 = vector.load %arg7[%c0_19, %c0_20] : memref<456x4xf32, #tpu.memory_space<vmem>>, vector<24x4xf32>
    tpu.vector_store %arg7[%c0_19, %c0_20], %34 {strides = array<i32>} : memref<456x4xf32, #tpu.memory_space<vmem>>, vector<24x4xf32>,
    %36 = vector.extract_strided_slice %32 {offsets = [336, 0], sizes = [24, 4], strides = [1, 1]} : vector<384x4xf32> to vector<24x4xf32>
    %c408 = arith.constant 408 : index
    %c0_21 = arith.constant 0 : index
    %37 = vector.load %arg7[%c408, %c0_21] : memref<456x4xf32, #tpu.memory_space<vmem>>, vector<24x4xf32>
    tpu.vector_store %arg7[%c408, %c0_21], %36 {strides = array<i32>} : memref<456x4xf32, #tpu.memory_space<vmem>>, vector<24x4xf32>,
    %38 = vector.shape_cast %5 : vector<1x4xf32> to vector<1x4xf32>
    %39 = vector.broadcast %38 : vector<1x4xf32> to vector<384x4xf32>
    %c0_22 = arith.constant 0 : index
    %c0_23 = arith.constant 0 : index
    %40 = vector.load %arg7[%c0_22, %c0_23] : memref<456x4xf32, #tpu.memory_space<vmem>>, vector<384x4xf32>
    %41 = vector.extract_strided_slice %3 {offsets = [0, 0, 0], sizes = [1, 4, 4], strides = [1, 1, 1]} : vector<9x4x4xf32> to vector<1x4x4xf32>
    %42 = vector.shape_cast %41 : vector<1x4x4xf32> to vector<4x4xf32>
    %cst_24 = arith.constant dense<0.000000e+00> : vector<384x4xf32>
    %43 = tpu.matmul %40, %42, %cst_24 {dimension_numbers = #tpu.dot_dimension_numbers<[1], [0], [0], [1], [0, 0, 1, 1], [], []>} : vector<384x4xf32>, vector<4x4xf32>, vector<384x4xf32> -> vector<384x4xf32>
    %44 = arith.addf %39, %43 : vector<384x4xf32>
    %c1 = arith.constant 1 : index
    %c0_25 = arith.constant 0 : index
    %45 = vector.load %arg7[%c1, %c0_25] : memref<456x4xf32, #tpu.memory_space<vmem>>, vector<384x4xf32>
    %46 = vector.extract_strided_slice %3 {offsets = [1, 0, 0], sizes = [1, 4, 4], strides = [1, 1, 1]} : vector<9x4x4xf32> to vector<1x4x4xf32>
    %47 = vector.shape_cast %46 : vector<1x4x4xf32> to vector<4x4xf32>
    %cst_26 = arith.constant dense<0.000000e+00> : vector<384x4xf32>
    %48 = tpu.matmul %45, %47, %cst_26 {dimension_numbers = #tpu.dot_dimension_numbers<[1], [0], [0], [1], [0, 0, 1, 1], [], []>} : vector<384x4xf32>, vector<4x4xf32>, vector<384x4xf32> -> vector<384x4xf32>
    %49 = arith.addf %44, %48 : vector<384x4xf32>
    %c2 = arith.constant 2 : index
    %c0_27 = arith.constant 0 : index
    %50 = vector.load %arg7[%c2, %c0_27] : memref<456x4xf32, #tpu.memory_space<vmem>>, vector<384x4xf32>
    %51 = vector.extract_strided_slice %3 {offsets = [2, 0, 0], sizes = [1, 4, 4], strides = [1, 1, 1]} : vector<9x4x4xf32> to vector<1x4x4xf32>
    %52 = vector.shape_cast %51 : vector<1x4x4xf32> to vector<4x4xf32>
    %cst_28 = arith.constant dense<0.000000e+00> : vector<384x4xf32>
    %53 = tpu.matmul %50, %52, %cst_28 {dimension_numbers = #tpu.dot_dimension_numbers<[1], [0], [0], [1], [0, 0, 1, 1], [], []>} : vector<384x4xf32>, vector<4x4xf32>, vector<384x4xf32> -> vector<384x4xf32>
    %54 = arith.addf %49, %53 : vector<384x4xf32>
    %c24_29 = arith.constant 24 : index
    %c0_30 = arith.constant 0 : index
    %55 = vector.load %arg7[%c24_29, %c0_30] : memref<456x4xf32, #tpu.memory_space<vmem>>, vector<384x4xf32>
    %56 = vector.extract_strided_slice %3 {offsets = [3, 0, 0], sizes = [1, 4, 4], strides = [1, 1, 1]} : vector<9x4x4xf32> to vector<1x4x4xf32>
    %57 = vector.shape_cast %56 : vector<1x4x4xf32> to vector<4x4xf32>
    %cst_31 = arith.constant dense<0.000000e+00> : vector<384x4xf32>
    %58 = tpu.matmul %55, %57, %cst_31 {dimension_numbers = #tpu.dot_dimension_numbers<[1], [0], [0], [1], [0, 0, 1, 1], [], []>} : vector<384x4xf32>, vector<4x4xf32>, vector<384x4xf32> -> vector<384x4xf32>
    %59 = arith.addf %54, %58 : vector<384x4xf32>
    %c25 = arith.constant 25 : index
    %c0_32 = arith.constant 0 : index
    %60 = vector.load %arg7[%c25, %c0_32] : memref<456x4xf32, #tpu.memory_space<vmem>>, vector<384x4xf32>
    %61 = vector.extract_strided_slice %3 {offsets = [4, 0, 0], sizes = [1, 4, 4], strides = [1, 1, 1]} : vector<9x4x4xf32> to vector<1x4x4xf32>
    %62 = vector.shape_cast %61 : vector<1x4x4xf32> to vector<4x4xf32>
    %cst_33 = arith.constant dense<0.000000e+00> : vector<384x4xf32>
    %63 = tpu.matmul %60, %62, %cst_33 {dimension_numbers = #tpu.dot_dimension_numbers<[1], [0], [0], [1], [0, 0, 1, 1], [], []>} : vector<384x4xf32>, vector<4x4xf32>, vector<384x4xf32> -> vector<384x4xf32>
    %64 = arith.addf %59, %63 : vector<384x4xf32>
    %c26 = arith.constant 26 : index
    %c0_34 = arith.constant 0 : index
    %65 = vector.load %arg7[%c26, %c0_34] : memref<456x4xf32, #tpu.memory_space<vmem>>, vector<384x4xf32>
    %66 = vector.extract_strided_slice %3 {offsets = [5, 0, 0], sizes = [1, 4, 4], strides = [1, 1, 1]} : vector<9x4x4xf32> to vector<1x4x4xf32>
    %67 = vector.shape_cast %66 : vector<1x4x4xf32> to vector<4x4xf32>
    %cst_35 = arith.constant dense<0.000000e+00> : vector<384x4xf32>
    %68 = tpu.matmul %65, %67, %cst_35 {dimension_numbers = #tpu.dot_dimension_numbers<[1], [0], [0], [1], [0, 0, 1, 1], [], []>} : vector<384x4xf32>, vector<4x4xf32>, vector<384x4xf32> -> vector<384x4xf32>
    %69 = arith.addf %64, %68 : vector<384x4xf32>
    %c48 = arith.constant 48 : index
    %c0_36 = arith.constant 0 : index
    %70 = vector.load %arg7[%c48, %c0_36] : memref<456x4xf32, #tpu.memory_space<vmem>>, vector<384x4xf32>
    %71 = vector.extract_strided_slice %3 {offsets = [6, 0, 0], sizes = [1, 4, 4], strides = [1, 1, 1]} : vector<9x4x4xf32> to vector<1x4x4xf32>
    %72 = vector.shape_cast %71 : vector<1x4x4xf32> to vector<4x4xf32>
    %cst_37 = arith.constant dense<0.000000e+00> : vector<384x4xf32>
    %73 = tpu.matmul %70, %72, %cst_37 {dimension_numbers = #tpu.dot_dimension_numbers<[1], [0], [0], [1], [0, 0, 1, 1], [], []>} : vector<384x4xf32>, vector<4x4xf32>, vector<384x4xf32> -> vector<384x4xf32>
    %74 = arith.addf %69, %73 : vector<384x4xf32>
    %c49 = arith.constant 49 : index
    %c0_38 = arith.constant 0 : index
    %75 = vector.load %arg7[%c49, %c0_38] : memref<456x4xf32, #tpu.memory_space<vmem>>, vector<384x4xf32>
    %76 = vector.extract_strided_slice %3 {offsets = [7, 0, 0], sizes = [1, 4, 4], strides = [1, 1, 1]} : vector<9x4x4xf32> to vector<1x4x4xf32>
    %77 = vector.shape_cast %76 : vector<1x4x4xf32> to vector<4x4xf32>
    %cst_39 = arith.constant dense<0.000000e+00> : vector<384x4xf32>
    %78 = tpu.matmul %75, %77, %cst_39 {dimension_numbers = #tpu.dot_dimension_numbers<[1], [0], [0], [1], [0, 0, 1, 1], [], []>} : vector<384x4xf32>, vector<4x4xf32>, vector<384x4xf32> -> vector<384x4xf32>
    %79 = arith.addf %74, %78 : vector<384x4xf32>
    %c50 = arith.constant 50 : index
    %c0_40 = arith.constant 0 : index
    %80 = vector.load %arg7[%c50, %c0_40] : memref<456x4xf32, #tpu.memory_space<vmem>>, vector<384x4xf32>
    %81 = vector.extract_strided_slice %3 {offsets = [8, 0, 0], sizes = [1, 4, 4], strides = [1, 1, 1]} : vector<9x4x4xf32> to vector<1x4x4xf32>
    %82 = vector.shape_cast %81 : vector<1x4x4xf32> to vector<4x4xf32>
    %cst_41 = arith.constant dense<0.000000e+00> : vector<384x4xf32>
    %83 = tpu.matmul %80, %82, %cst_41 {dimension_numbers = #tpu.dot_dimension_numbers<[1], [0], [0], [1], [0, 0, 1, 1], [], []>} : vector<384x4xf32>, vector<4x4xf32>, vector<384x4xf32> -> vector<384x4xf32>
    %84 = arith.addf %79, %83 : vector<384x4xf32>
    %cst_42 = arith.constant 0.000000e+00 : f32
    %85 = vector.shape_cast %25 : vector<384x1xi1> to vector<384x1xi1>
    %86 = vector.broadcast %85 : vector<384x1xi1> to vector<384x4xi1>
    %87 = vector.broadcast %cst_42 : f32 to vector<384x4xf32>
    %88 = arith.select %86, %84, %87 : vector<384x4xi1>, vector<384x4xf32>
    %cst_43 = arith.constant dense<0.000000e+00> : vector<4xf32>
    %89 = vector.multi_reduction <add>, %88, %cst_43 [0] : vector<384x4xf32> to vector<4xf32>
    %90 = vector.shape_cast %89 : vector<4xf32> to vector<1x4xf32>
    %91 = arith.mulf %84, %84 : vector<384x4xf32>
    %cst_44 = arith.constant 0.000000e+00 : f32
    %92 = vector.shape_cast %25 : vector<384x1xi1> to vector<384x1xi1>
    %93 = vector.broadcast %92 : vector<384x1xi1> to vector<384x4xi1>
    %94 = vector.broadcast %cst_44 : f32 to vector<384x4xf32>
    %95 = arith.select %93, %91, %94 : vector<384x4xi1>, vector<384x4xf32>
    %cst_45 = arith.constant dense<0.000000e+00> : vector<4xf32>
    %96 = vector.multi_reduction <add>, %95, %cst_45 [0] : vector<384x4xf32> to vector<4xf32>
    %97 = vector.shape_cast %96 : vector<4xf32> to vector<1x4xf32>
    %cst_46 = arith.constant 3.906250e-03 : f32
    %98 = vector.broadcast %cst_46 : f32 to vector<1x4xf32>
    %99 = arith.mulf %90, %98 : vector<1x4xf32>
    %cst_47 = arith.constant 3.906250e-03 : f32
    %100 = vector.broadcast %cst_47 : f32 to vector<1x4xf32>
    %101 = arith.mulf %97, %100 : vector<1x4xf32>
    %102 = arith.mulf %99, %99 : vector<1x4xf32>
    %103 = arith.subf %101, %102 : vector<1x4xf32>
    %cst_48 = arith.constant 0.000000e+00 : f32
    %104 = vector.broadcast %cst_48 : f32 to vector<1x4xf32>
    %105 = arith.maximumf %103, %104 : vector<1x4xf32>
    %106 = vector.broadcast %99 : vector<1x4xf32> to vector<384x4xf32>
    %107 = arith.subf %84, %106 : vector<384x4xf32>
    %cst_49 = arith.constant 9.99999974E-6 : f32
    %108 = vector.broadcast %cst_49 : f32 to vector<1x4xf32>
    %109 = arith.addf %105, %108 : vector<1x4xf32>
    %110 = math.rsqrt %109 : vector<1x4xf32>
    %111 = vector.broadcast %110 : vector<1x4xf32> to vector<384x4xf32>
    %112 = arith.mulf %107, %111 : vector<384x4xf32>
    %cst_50 = arith.constant 0.000000e+00 : f32
    %113 = vector.broadcast %cst_50 : f32 to vector<384x4xf32>
    %114 = arith.maximumf %112, %113 : vector<384x4xf32>
    %115 = vector.shape_cast %114 : vector<384x4xf32> to vector<16x24x4xf32>
    %116 = vector.extract_strided_slice %115 {offsets = [0, 1, 0], sizes = [16, 1, 4], strides = [1, 1, 1]} : vector<16x24x4xf32> to vector<16x1x4xf32>
    %117 = vector.extract_strided_slice %115 {offsets = [0, 0, 0], sizes = [16, 16, 4], strides = [1, 1, 1]} : vector<16x24x4xf32> to vector<16x16x4xf32>
    %118 = vector.extract_strided_slice %115 {offsets = [0, 14, 0], sizes = [16, 1, 4], strides = [1, 1, 1]} : vector<16x24x4xf32> to vector<16x1x4xf32>
    %cst_51 = arith.constant 0.000000e+00 : f32
    %119 = vector.broadcast %cst_51 : f32 to vector<16x6x4xf32>
    %120 = tpu.concatenate %116, %117, %118, %119 in 1 : vector<16x1x4xf32>, vector<16x16x4xf32>, vector<16x1x4xf32>, vector<16x6x4xf32> -> vector<16x24x4xf32>
    %121 = vector.shape_cast %120 : vector<16x24x4xf32> to vector<384x4xf32>
    %c24_52 = arith.constant 24 : index
    %c0_53 = arith.constant 0 : index
    %122 = vector.load %arg7[%c24_52, %c0_53] : memref<456x4xf32, #tpu.memory_space<vmem>>, vector<384x4xf32>
    tpu.vector_store %arg7[%c24_52, %c0_53], %121 {strides = array<i32>} : memref<456x4xf32, #tpu.memory_space<vmem>>, vector<384x4xf32>,
    %123 = vector.extract_strided_slice %121 {offsets = [24, 0], sizes = [24, 4], strides = [1, 1]} : vector<384x4xf32> to vector<24x4xf32>
    %c0_54 = arith.constant 0 : index
    %c0_55 = arith.constant 0 : index
    %124 = vector.load %arg7[%c0_54, %c0_55] : memref<456x4xf32, #tpu.memory_space<vmem>>, vector<24x4xf32>
    tpu.vector_store %arg7[%c0_54, %c0_55], %123 {strides = array<i32>} : memref<456x4xf32, #tpu.memory_space<vmem>>, vector<24x4xf32>,
    %125 = vector.extract_strided_slice %121 {offsets = [336, 0], sizes = [24, 4], strides = [1, 1]} : vector<384x4xf32> to vector<24x4xf32>
    %c408_56 = arith.constant 408 : index
    %c0_57 = arith.constant 0 : index
    %126 = vector.load %arg7[%c408_56, %c0_57] : memref<456x4xf32, #tpu.memory_space<vmem>>, vector<24x4xf32>
    tpu.vector_store %arg7[%c408_56, %c0_57], %125 {strides = array<i32>} : memref<456x4xf32, #tpu.memory_space<vmem>>, vector<24x4xf32>,
    %127 = vector.shape_cast %6 : vector<1x4xf32> to vector<1x4xf32>
    %128 = vector.broadcast %127 : vector<1x4xf32> to vector<384x4xf32>
    %c0_58 = arith.constant 0 : index
    %c0_59 = arith.constant 0 : index
    %129 = vector.load %arg7[%c0_58, %c0_59] : memref<456x4xf32, #tpu.memory_space<vmem>>, vector<384x4xf32>
    %130 = vector.extract_strided_slice %4 {offsets = [0, 0, 0], sizes = [1, 4, 4], strides = [1, 1, 1]} : vector<9x4x4xf32> to vector<1x4x4xf32>
    %131 = vector.shape_cast %130 : vector<1x4x4xf32> to vector<4x4xf32>
    %cst_60 = arith.constant dense<0.000000e+00> : vector<384x4xf32>
    %132 = tpu.matmul %129, %131, %cst_60 {dimension_numbers = #tpu.dot_dimension_numbers<[1], [0], [0], [1], [0, 0, 1, 1], [], []>} : vector<384x4xf32>, vector<4x4xf32>, vector<384x4xf32> -> vector<384x4xf32>
    %133 = arith.addf %128, %132 : vector<384x4xf32>
    %c1_61 = arith.constant 1 : index
    %c0_62 = arith.constant 0 : index
    %134 = vector.load %arg7[%c1_61, %c0_62] : memref<456x4xf32, #tpu.memory_space<vmem>>, vector<384x4xf32>
    %135 = vector.extract_strided_slice %4 {offsets = [1, 0, 0], sizes = [1, 4, 4], strides = [1, 1, 1]} : vector<9x4x4xf32> to vector<1x4x4xf32>
    %136 = vector.shape_cast %135 : vector<1x4x4xf32> to vector<4x4xf32>
    %cst_63 = arith.constant dense<0.000000e+00> : vector<384x4xf32>
    %137 = tpu.matmul %134, %136, %cst_63 {dimension_numbers = #tpu.dot_dimension_numbers<[1], [0], [0], [1], [0, 0, 1, 1], [], []>} : vector<384x4xf32>, vector<4x4xf32>, vector<384x4xf32> -> vector<384x4xf32>
    %138 = arith.addf %133, %137 : vector<384x4xf32>
    %c2_64 = arith.constant 2 : index
    %c0_65 = arith.constant 0 : index
    %139 = vector.load %arg7[%c2_64, %c0_65] : memref<456x4xf32, #tpu.memory_space<vmem>>, vector<384x4xf32>
    %140 = vector.extract_strided_slice %4 {offsets = [2, 0, 0], sizes = [1, 4, 4], strides = [1, 1, 1]} : vector<9x4x4xf32> to vector<1x4x4xf32>
    %141 = vector.shape_cast %140 : vector<1x4x4xf32> to vector<4x4xf32>
    %cst_66 = arith.constant dense<0.000000e+00> : vector<384x4xf32>
    %142 = tpu.matmul %139, %141, %cst_66 {dimension_numbers = #tpu.dot_dimension_numbers<[1], [0], [0], [1], [0, 0, 1, 1], [], []>} : vector<384x4xf32>, vector<4x4xf32>, vector<384x4xf32> -> vector<384x4xf32>
    %143 = arith.addf %138, %142 : vector<384x4xf32>
    %c24_67 = arith.constant 24 : index
    %c0_68 = arith.constant 0 : index
    %144 = vector.load %arg7[%c24_67, %c0_68] : memref<456x4xf32, #tpu.memory_space<vmem>>, vector<384x4xf32>
    %145 = vector.extract_strided_slice %4 {offsets = [3, 0, 0], sizes = [1, 4, 4], strides = [1, 1, 1]} : vector<9x4x4xf32> to vector<1x4x4xf32>
    %146 = vector.shape_cast %145 : vector<1x4x4xf32> to vector<4x4xf32>
    %cst_69 = arith.constant dense<0.000000e+00> : vector<384x4xf32>
    %147 = tpu.matmul %144, %146, %cst_69 {dimension_numbers = #tpu.dot_dimension_numbers<[1], [0], [0], [1], [0, 0, 1, 1], [], []>} : vector<384x4xf32>, vector<4x4xf32>, vector<384x4xf32> -> vector<384x4xf32>
    %148 = arith.addf %143, %147 : vector<384x4xf32>
    %c25_70 = arith.constant 25 : index
    %c0_71 = arith.constant 0 : index
    %149 = vector.load %arg7[%c25_70, %c0_71] : memref<456x4xf32, #tpu.memory_space<vmem>>, vector<384x4xf32>
    %150 = vector.extract_strided_slice %4 {offsets = [4, 0, 0], sizes = [1, 4, 4], strides = [1, 1, 1]} : vector<9x4x4xf32> to vector<1x4x4xf32>
    %151 = vector.shape_cast %150 : vector<1x4x4xf32> to vector<4x4xf32>
    %cst_72 = arith.constant dense<0.000000e+00> : vector<384x4xf32>
    %152 = tpu.matmul %149, %151, %cst_72 {dimension_numbers = #tpu.dot_dimension_numbers<[1], [0], [0], [1], [0, 0, 1, 1], [], []>} : vector<384x4xf32>, vector<4x4xf32>, vector<384x4xf32> -> vector<384x4xf32>
    %153 = arith.addf %148, %152 : vector<384x4xf32>
    %c26_73 = arith.constant 26 : index
    %c0_74 = arith.constant 0 : index
    %154 = vector.load %arg7[%c26_73, %c0_74] : memref<456x4xf32, #tpu.memory_space<vmem>>, vector<384x4xf32>
    %155 = vector.extract_strided_slice %4 {offsets = [5, 0, 0], sizes = [1, 4, 4], strides = [1, 1, 1]} : vector<9x4x4xf32> to vector<1x4x4xf32>
    %156 = vector.shape_cast %155 : vector<1x4x4xf32> to vector<4x4xf32>
    %cst_75 = arith.constant dense<0.000000e+00> : vector<384x4xf32>
    %157 = tpu.matmul %154, %156, %cst_75 {dimension_numbers = #tpu.dot_dimension_numbers<[1], [0], [0], [1], [0, 0, 1, 1], [], []>} : vector<384x4xf32>, vector<4x4xf32>, vector<384x4xf32> -> vector<384x4xf32>
    %158 = arith.addf %153, %157 : vector<384x4xf32>
    %c48_76 = arith.constant 48 : index
    %c0_77 = arith.constant 0 : index
    %159 = vector.load %arg7[%c48_76, %c0_77] : memref<456x4xf32, #tpu.memory_space<vmem>>, vector<384x4xf32>
    %160 = vector.extract_strided_slice %4 {offsets = [6, 0, 0], sizes = [1, 4, 4], strides = [1, 1, 1]} : vector<9x4x4xf32> to vector<1x4x4xf32>
    %161 = vector.shape_cast %160 : vector<1x4x4xf32> to vector<4x4xf32>
    %cst_78 = arith.constant dense<0.000000e+00> : vector<384x4xf32>
    %162 = tpu.matmul %159, %161, %cst_78 {dimension_numbers = #tpu.dot_dimension_numbers<[1], [0], [0], [1], [0, 0, 1, 1], [], []>} : vector<384x4xf32>, vector<4x4xf32>, vector<384x4xf32> -> vector<384x4xf32>
    %163 = arith.addf %158, %162 : vector<384x4xf32>
    %c49_79 = arith.constant 49 : index
    %c0_80 = arith.constant 0 : index
    %164 = vector.load %arg7[%c49_79, %c0_80] : memref<456x4xf32, #tpu.memory_space<vmem>>, vector<384x4xf32>
    %165 = vector.extract_strided_slice %4 {offsets = [7, 0, 0], sizes = [1, 4, 4], strides = [1, 1, 1]} : vector<9x4x4xf32> to vector<1x4x4xf32>
    %166 = vector.shape_cast %165 : vector<1x4x4xf32> to vector<4x4xf32>
    %cst_81 = arith.constant dense<0.000000e+00> : vector<384x4xf32>
    %167 = tpu.matmul %164, %166, %cst_81 {dimension_numbers = #tpu.dot_dimension_numbers<[1], [0], [0], [1], [0, 0, 1, 1], [], []>} : vector<384x4xf32>, vector<4x4xf32>, vector<384x4xf32> -> vector<384x4xf32>
    %168 = arith.addf %163, %167 : vector<384x4xf32>
    %c50_82 = arith.constant 50 : index
    %c0_83 = arith.constant 0 : index
    %169 = vector.load %arg7[%c50_82, %c0_83] : memref<456x4xf32, #tpu.memory_space<vmem>>, vector<384x4xf32>
    %170 = vector.extract_strided_slice %4 {offsets = [8, 0, 0], sizes = [1, 4, 4], strides = [1, 1, 1]} : vector<9x4x4xf32> to vector<1x4x4xf32>
    %171 = vector.shape_cast %170 : vector<1x4x4xf32> to vector<4x4xf32>
    %cst_84 = arith.constant dense<0.000000e+00> : vector<384x4xf32>
    %172 = tpu.matmul %169, %171, %cst_84 {dimension_numbers = #tpu.dot_dimension_numbers<[1], [0], [0], [1], [0, 0, 1, 1], [], []>} : vector<384x4xf32>, vector<4x4xf32>, vector<384x4xf32> -> vector<384x4xf32>
    %173 = arith.addf %168, %172 : vector<384x4xf32>
    %cst_85 = arith.constant 0.000000e+00 : f32
    %174 = vector.shape_cast %25 : vector<384x1xi1> to vector<384x1xi1>
    %175 = vector.broadcast %174 : vector<384x1xi1> to vector<384x4xi1>
    %176 = vector.broadcast %cst_85 : f32 to vector<384x4xf32>
    %177 = arith.select %175, %173, %176 : vector<384x4xi1>, vector<384x4xf32>
    %cst_86 = arith.constant dense<0.000000e+00> : vector<4xf32>
    %178 = vector.multi_reduction <add>, %177, %cst_86 [0] : vector<384x4xf32> to vector<4xf32>
    %179 = vector.shape_cast %178 : vector<4xf32> to vector<1x4xf32>
    %180 = arith.mulf %173, %173 : vector<384x4xf32>
    %cst_87 = arith.constant 0.000000e+00 : f32
    %181 = vector.shape_cast %25 : vector<384x1xi1> to vector<384x1xi1>
    %182 = vector.broadcast %181 : vector<384x1xi1> to vector<384x4xi1>
    %183 = vector.broadcast %cst_87 : f32 to vector<384x4xf32>
    %184 = arith.select %182, %180, %183 : vector<384x4xi1>, vector<384x4xf32>
    %cst_88 = arith.constant dense<0.000000e+00> : vector<4xf32>
    %185 = vector.multi_reduction <add>, %184, %cst_88 [0] : vector<384x4xf32> to vector<4xf32>
    %186 = vector.shape_cast %185 : vector<4xf32> to vector<1x4xf32>
    %cst_89 = arith.constant 3.906250e-03 : f32
    %187 = vector.broadcast %cst_89 : f32 to vector<1x4xf32>
    %188 = arith.mulf %179, %187 : vector<1x4xf32>
    %cst_90 = arith.constant 3.906250e-03 : f32
    %189 = vector.broadcast %cst_90 : f32 to vector<1x4xf32>
    %190 = arith.mulf %186, %189 : vector<1x4xf32>
    %191 = arith.mulf %188, %188 : vector<1x4xf32>
    %192 = arith.subf %190, %191 : vector<1x4xf32>
    %cst_91 = arith.constant 0.000000e+00 : f32
    %193 = vector.broadcast %cst_91 : f32 to vector<1x4xf32>
    %194 = arith.maximumf %192, %193 : vector<1x4xf32>
    %195 = vector.broadcast %188 : vector<1x4xf32> to vector<384x4xf32>
    %196 = arith.subf %173, %195 : vector<384x4xf32>
    %cst_92 = arith.constant 9.99999974E-6 : f32
    %197 = vector.broadcast %cst_92 : f32 to vector<1x4xf32>
    %198 = arith.addf %194, %197 : vector<1x4xf32>
    %199 = math.rsqrt %198 : vector<1x4xf32>
    %200 = vector.broadcast %199 : vector<1x4xf32> to vector<384x4xf32>
    %201 = arith.mulf %196, %200 : vector<384x4xf32>
    %c0_93 = arith.constant 0 : index
    %c0_94 = arith.constant 0 : index
    %c0_95 = arith.constant 0 : index
    %c0_96 = arith.constant 0 : index
    %202 = vector.load %arg1[%c0_93, %c0_94, %c0_95, %c0_96] : memref<1x16x16x4xf32, #tpu.memory_space<vmem>>, vector<1x16x16x4xf32>
    %203 = vector.shape_cast %202 : vector<1x16x16x4xf32> to vector<16x16x4xf32>
    %204 = vector.shape_cast %201 : vector<384x4xf32> to vector<16x24x4xf32>
    %205 = vector.extract_strided_slice %204 {offsets = [0, 0, 0], sizes = [16, 16, 4], strides = [1, 1, 1]} : vector<16x24x4xf32> to vector<16x16x4xf32>
    %206 = arith.addf %203, %205 : vector<16x16x4xf32>
    %207 = vector.shape_cast %206 : vector<16x16x4xf32> to vector<256x4xf32>
    %208 = tpu.transpose %207, [1, 0] : vector<256x4xf32> -> vector<4x256xf32>
    %c0_97 = arith.constant 0 : index
    %c0_98 = arith.constant 0 : index
    %c0_99 = arith.constant 0 : index
    %209 = vector.load %arg6[%c0_97, %c0_98, %c0_99] : memref<1x4x256xf32, #tpu.memory_space<vmem>>, vector<1x4x256xf32>
    %210 = vector.shape_cast %209 : vector<1x4x256xf32> to vector<4x256xf32>
    %211 = vector.shape_cast %208 : vector<4x256xf32> to vector<1x4x256xf32>
    tpu.vector_store %arg6[%c0_97, %c0_98, %c0_99], %211 {strides = array<i32>} : memref<1x4x256xf32, #tpu.memory_space<vmem>>, vector<1x4x256xf32>,
    return
  }
  func.func @transform_0(%arg0: i32) -> (i32, i32, i32, i32) {
    %c0_i32 = arith.constant 0 : i32
    %c0_i32_0 = arith.constant 0 : i32
    %c0_i32_1 = arith.constant 0 : i32
    %c0_i32_2 = arith.constant 0 : i32
    return %arg0, %c0_i32, %c0_i32_0, %c0_i32_1 : i32, i32, i32, i32
  }
  func.func @transform_1(%arg0: i32) -> (i32, i32, i32) {
    %c0_i32 = arith.constant 0 : i32
    %c0_i32_0 = arith.constant 0 : i32
    %c0_i32_1 = arith.constant 0 : i32
    %c0_i32_2 = arith.constant 0 : i32
    return %c0_i32, %c0_i32_0, %c0_i32_1 : i32, i32, i32
  }
  func.func @transform_2(%arg0: i32) -> (i32, i32) {
    %c0_i32 = arith.constant 0 : i32
    %c0_i32_0 = arith.constant 0 : i32
    %c0_i32_1 = arith.constant 0 : i32
    return %c0_i32, %c0_i32_0 : i32, i32
  }
  func.func @transform_3(%arg0: i32) -> (i32, i32, i32) {
    %c0_i32 = arith.constant 0 : i32
    %c0_i32_0 = arith.constant 0 : i32
    %c0_i32_1 = arith.constant 0 : i32
    %c0_i32_2 = arith.constant 0 : i32
    return %c0_i32, %c0_i32_0, %c0_i32_1 : i32, i32, i32
  }
  func.func @transform_4(%arg0: i32) -> (i32, i32) {
    %c0_i32 = arith.constant 0 : i32
    %c0_i32_0 = arith.constant 0 : i32
    %c0_i32_1 = arith.constant 0 : i32
    return %c0_i32, %c0_i32_0 : i32, i32
  }
  func.func @transform_5(%arg0: i32) -> (i32, i32, i32) {
    %c0_i32 = arith.constant 0 : i32
    %c0_i32_0 = arith.constant 0 : i32
    %c0_i32_1 = arith.constant 0 : i32
    return %arg0, %c0_i32, %c0_i32_0 : i32, i32, i32
  }
}

</mosaic_0001>

<bundles_post_ra>
// kernel: tpu_custom_call.1
= control target key start
LH: loop header
LB: loop body
LE: loop exit
PB: predicated region body
PF: predicated region fallthrough
CT: control target
= control target key end

     0   :  { %10 = vsyncpa [#allocation4], 0  ;;  %s17349_s0 = inlined_call_operand.vmem [shape: f32[2,16,16,4], index: 0, kind: input, shape index: {}]   ;;  %s17350_s1 = inlined_call_operand.vmem [shape: f32[9,4,4], index: 1, kind: input, shape index: {}]   ;;  %s17351_s2 = inlined_call_operand.vmem [shape: f32[1,4], index: 2, kind: input, shape index: {}]   ;;  %s17352_s3 = inlined_call_operand.vmem [shape: f32[9,4,4], index: 3, kind: input, shape index: {}]   ;;  %s17353_s4 = inlined_call_operand.vmem [shape: f32[1,4], index: 4, kind: input, shape index: {}]   ;;  %s17354_s5 = inlined_call_operand.hbm [shape: f32[2,4,256], index: 5, kind: output, shape index: {}]  }
   0x1   :  { %12 = vsyncpa [#allocation4 + $0x1], 0  ;;  %s12116_s18 = smov 0   ;;  %s12118_s19 = smov 0  }
   0x2   :  { %s12120_s20 = smov 0   ;;  %s12122_s21 = smov 0  }
   0x3 LB: > { %s12137_s22 = sadd.s32 4294967295, %s12082_s21   ;;  %s11072_s23 = sadd.s32 4294967294, %s12082_s21   ;;  %s12082_s21 = sphi %s12122_s21, %s18861_s21   ;;  %s12078_s20 = sphi %s12120_s20, %s18860_s20   ;;  %s12074_s19 = sphi %s12118_s19, %s18859_s19   ;;  %s12070_s18 = sphi %s12116_s18, %s18858_s18  }
   0x4   : > { %s12141_s24 = sadd.s32 1, %s12082_s21   ;;  %s135_s25 = sadd.s32 1, %s12078_s20 }
   0x5   : > { %s132_s26 = ssub.s32 %s12082_s21, %s12141_s24  ;;  %p145_p0 = scmp.ne.s32.totalorder %s12078_s20, %s12074_s19 }
   0x6   : > { %p133_p1 = scmp.eq.s32.totalorder %s132_s26, 0  ;;  %p146_p2 = scmp.eq.s32.totalorder %s12137_s22, 1 }
   0x7   : > { %p151_p3 = scmp.ne.s32.totalorder %s12074_s19, %s12070_s18  ;;  %p152_p4 = scmp.eq.s32.totalorder %s11072_s23, 1 }
   0x8   : > { %s12152_s27 = scalar_select %p133_p1, %s12078_s20, %s135_s25  }
   0x9   : > { %p12154_p5 = por %p146_p2, %p145_p0  ;;  %p12158_p6 = por %p152_p4, %p151_p3 }
   0xa   : > { %p11075_p7 = scmp.ge.s32.totalorder %s12082_s21, 1  ;;  %p190_p8 = scmp.lt.s32.totalorder %s12082_s21, 3 }
   0xc   : > { %p191_p9 = pnand %p11075_p7, %p190_p8 }
   0xe   : > { %194 = sbr.rel (%p191_p9) target bundleno = 2834 (0xb12), region = 40 }
  0x13   : > { %s215_s30 = sand.u32 1, %s12074_s19   ;;  %p218_p10 = scmp.lt.s32.totalorder %s12137_s22, 1 }
  0x14   : > { %s12168_s6 = sshll.u32 %s215_s30, 3  ;;  %p11079_p11 = scmp.ne.s32.totalorder %s12137_s22, 0 }
  0x15   : > { %s219_s7 = scalar_select %p218_p10, %s12137_s22, 1 }
  0x16   : > { %s217_s12 = scalar_lea.vmem [#allocation3], %s12168_s6  ;;  %226 = sbr.rel (%p11079_p11) target bundleno = 29 (0x1d), region = 44 }
  0x17   : > { %s11967_s8 = sshll.u32 %s219_s7, 8 }
  0x18   : > { %s12174_s11 = scalar_lea.vmem %s17349_s0, %s11967_s8 }
  0x1b   : > { %vm227_vm0 = vcmask 31744   ;;  %v12084_v0 = vmov 0.0  }
  0x1c   : > { %228 = vst.msk [vmem:[#allocation2 + $0x1b0] sm:$0xff] %vm227_vm0, %v12084_v0 }
  0x1d PF: > { %v231_v1 = vld [vmem:[%s17350_s1] sm:$0xf]  ;;  %vm17377_vm1 = vcmask 1043456   ;;  %v1994_v2 = vld [vmem:[%s12174_s11 + $0x70] sm:$0xff]  ;;  %vm17376_vm2 = vcmask 1040384   ;;  %vm17428_vm3 = vcmask 31744  }
  0x1e   : > { %11969 = vmatpush.msk.msra.mxu2 %vm17377_vm1, %v231_v1  ;;  %v2035_v3 = vrot.slane %v1994_v2, 1  ;;  %v2098_v4 = vrot.slane %v1994_v2, 7  ;;  %v233_v5 = vld [vmem:[%s17350_s1 + $0x8] sm:$0xf]  ;;  %v232_v6 = vld [vmem:[%s17350_s1 + $0x4] sm:$0xf]  ;;  %11080 = vmatpush.msk.msra.mxu0 %vm17377_vm1, %v231_v1 }
  0x1f   : > { %11970 = vmatpush.msk.msra.mxu3 %vm17377_vm1, %v232_v6  ;;  %v1995_v7 = vld [vmem:[%s12174_s11 + $0x78] sm:$0xff]  ;;  %v234_v8 = vld [vmem:[%s17350_s1 + $0xc] sm:$0xf]  ;;  %v1982_v9 = vld [vmem:[%s12174_s11 + $0x10] sm:$0xff]  ;;  %11129 = vmatpush.msk.msra.mxu1 %vm17377_vm1, %v232_v6  ;;  %vm17375_vm4 = vcmask 1041408   ;;  %s11968_s7 = sshll.u32 %s12137_s22, 3 }
  0x20   : > { %11178 = vmatpush.msk.msrb.mxu2 %vm17377_vm1, %v233_v5  ;;  %v2212_v10 = vsel %vm17376_vm2, %v2035_v3, %v2098_v4  ;;  %v2099_v11 = vrot.slane %v1995_v7, 7  ;;  %v2029_v12 = vrot.slane %v1982_v9, 1  ;;  %v2080_v13 = vrot.slane %v1982_v9, 7  ;;  %v235_v14 = vld [vmem:[%s17350_s1 + $0x10] sm:$0xf]  ;;  %v1983_v15 = vld [vmem:[%s12174_s11 + $0x18] sm:$0xff]  ;;  %s11008_s10 = scalar_lea.hbm %s17354_s5, %s11968_s7 }
  0x21   : > { %11227 = vmatpush.msk.msrb.mxu3 %vm17377_vm1, %v234_v8  ;;  %2276 = vst.msk [vmem:[#allocation2 + $0xc0] sm:$0xff] %vm17428_vm3, %v2212_v10  ;;  %v2180_v16 = vrot.slane %v1995_v7, 5  ;;  %11276 = vmatpush.msk.msrb.mxu0 %vm17377_vm1, %v235_v14  ;;  %v2081_v17 = vrot.slane %v1983_v15, 7  ;;  %v1996_v18 = vld [vmem:[%s12174_s11 + $0x80] sm:$0xff]  ;;  %v2174_v19 = vrot.slane %v1983_v15, 5  ;;  %v1997_v24 = vld [vmem:[%s12174_s11 + $0x88] sm:$0xff] }
  0x22   : > { %v2100_v20 = vsel %vm17376_vm2, %v2098_v4, %v2099_v11  ;;  %v2206_v21 = vsel %vm17376_vm2, %v2029_v12, %v2080_v13  ;;  %v2036_v22 = vrot.slane %v1996_v18, 1  ;;  %v2101_v23 = vrot.slane %v1996_v18, 7  ;;  %v1980_v26 = vld [vmem:[%s12174_s11] sm:$0xff]  ;;  %v1981_v32 = vld [vmem:[%s12174_s11 + $0x8] sm:$0xff]  ;;  %v1998_v37 = vld [vmem:[%s12174_s11 + $0x90] sm:$0xff]  ;;  %s11010_s13 = sshll.u32 %s217_s12, 4  ;;  %s11011_s13 = int_to_ptr.vmem [resolvable:$true] %s11010_s13 }
  0x23   : > { %2277 = vst.msk [vmem:[#allocation2 + $0xc8] sm:$0xff] %vm17428_vm3, %v2100_v20  ;;  %v2228_v25 = vsel %vm17376_vm2, %v2099_v11, %v2180_v16  ;;  %v2082_v28 = vsel %vm17376_vm2, %v2080_v13, %v2081_v17  ;;  %v2222_v29 = vsel %vm17376_vm2, %v2081_v17, %v2174_v19  ;;  %v2102_v30 = vrot.slane %v1997_v24, 7  ;;  %v1999_v55 = vld [vmem:[%s12174_s11 + $0x98] sm:$0xff]  ;;  %v2000_v5 = vld [vmem:[%s12174_s11 + $0xa0] sm:$0xff]  ;;  %v2001_v13 = vld [vmem:[%s12174_s11 + $0xa8] sm:$0xff]  ;;  %s11012_s14 = sshll.u32 %s11008_s10, 4  ;;  %s11013_s14 = int_to_ptr.hbm [resolvable:$true] %s11012_s14 }
  0x24   : > { %2303 = vst.msk [vmem:[#allocation2] sm:$0xff] %vm17428_vm3, %v2206_v21  ;;  %v2245_v27 = vsel %vm17375_vm4, %v2228_v25, 0.0  ;;  %v2181_v31 = vrot.slane %v1997_v24, 5  ;;  %v2213_v33 = vsel %vm17376_vm2, %v2036_v22, %v2101_v23  ;;  %v2028_v34 = vrot.slane %v1980_v26, 1  ;;  %v1984_v17 = vld [vmem:[%s12174_s11 + $0x20] sm:$0xff]  ;;  %s12034_s22 = sshra.s32 %s11013_s14, 4  ;;  %s12035_s22 = int_to_ptr.hbm [resolvable:$true] %s12034_s22 }
  0x25   : > { %2258 = vst.msk [vmem:[#allocation2 + $0x30] sm:$0xff] %vm17428_vm3, %v2206_v21  ;;  %v2077_v35 = vrot.slane %v1980_v26, 7  ;;  %v2239_v36 = vsel %vm17375_vm4, %v2222_v29, 0.0  ;;  %v2078_v40 = vrot.slane %v1981_v32, 7  ;;  %v2103_v41 = vsel %vm17376_vm2, %v2101_v23, %v2102_v30  ;;  %s12036_s15 = scalar_lea.hbm %s12035_s22, 8  ;;  %s12040_s23 = scalar_lea.hbm %s17354_s5, 16 }
  0x26   : > { %2278 = vst.msk [vmem:[#allocation2 + $0xd0] sm:$0xff] %vm17428_vm3, %v2245_v27  ;;  %v2229_v39 = vsel %vm17376_vm2, %v2102_v30, %v2181_v31  ;;  %v2037_v42 = vrot.slane %v1998_v37, 1  ;;  %v2104_v43 = vrot.slane %v1998_v37, 7  ;;  %v2173_v44 = vrot.slane %v1981_v32, 5  ;;  %p12037_p12 = scmp.ne.s32.totalorder %s12035_s22, %s12036_s15  ;;  %p12041_p1 = scmp.lt.s32.totalorder %s12035_s22, %s17354_s5 }
  0x27   : > { %2304 = vst.msk [vmem:[#allocation2 + $0x8] sm:$0xff] %vm17428_vm3, %v2082_v28  ;;  %v2205_v46 = vsel %vm17376_vm2, %v2028_v34, %v2077_v35  ;;  %v2246_v48 = vsel %vm17375_vm4, %v2229_v39, 0.0  ;;  %v2079_v50 = vsel %vm17376_vm2, %v2077_v35, %v2078_v40  ;;  %v2105_v57 = vrot.slane %v1999_v55, 7  ;;  %v2002_v34 = vld [vmem:[%s12174_s11 + $0xb0] sm:$0xff]  ;;  %p12042_p2 = scmp.lt.s32.totalorder %s12040_s23, %s12036_s15 }
  0x28   : > { %v2336_v38 = vld [vmem:[#allocation2 + $0xc0] sm:$0xff]  ;;  %2259 = vst.msk [vmem:[#allocation2 + $0x38] sm:$0xff] %vm17428_vm3, %v2082_v28  ;;  %v2221_v49 = vsel %vm17376_vm2, %v2078_v40, %v2173_v44  ;;  %v2214_v51 = vsel %vm17376_vm2, %v2037_v42, %v2104_v43  ;;  %v2182_v62 = vrot.slane %v1999_v55, 5  ;;  %v2038_v7 = vrot.slane %v2000_v5, 1  ;;  %v1985_v28 = vld [vmem:[%s12174_s11 + $0x28] sm:$0xff]  ;;  %p12038_p13 = pnand %p12037_p12, %p12154_p5 }
  0x29   : > { %11105 = vmatmul.msk.f32.vlgmr.msra.gmra.mxu2 %vm17428_vm3, %v2336_v38  ;;  %2279 = vst.msk [vmem:[#allocation2 + $0xd8] sm:$0xff] %vm17428_vm3, %v2213_v33  ;;  %v2238_v54 = vsel %vm17375_vm4, %v2221_v49, 0.0  ;;  %v2106_v59 = vsel %vm17376_vm2, %v2104_v43, %v2105_v57  ;;  %v2107_v8 = vrot.slane %v2000_v5, 7  ;;  %v2108_v15 = vrot.slane %v2001_v13, 7  ;;  %v1986_v49 = vld [vmem:[%s12174_s11 + $0x30] sm:$0xff]  ;;  %p12043_p3 = por %p12042_p2, %p12041_p1 }
  0x2a   : > { %v2741_v45 = vld [vmem:[#allocation2 + $0xc1] sm:$0xff]  ;;  %2305 = vst.msk [vmem:[#allocation2 + $0x10] sm:$0xff] %vm17428_vm3, %v2239_v36  ;;  %v2230_v1 = vsel %vm17376_vm2, %v2105_v57, %v2182_v62  ;;  %v2030_v19 = vrot.slane %v1984_v17, 1  ;;  %v2083_v20 = vrot.slane %v1984_v17, 7  ;;  %v2183_v24 = vrot.slane %v2001_v13, 5  ;;  %p12039_p0 = pneg %p12038_p13 }
  0x2b   : > { %11154 = vmatmul.msk.f32.vlgmr.msra.gmra.mxu3 %vm17428_vm3, %v2741_v45  ;;  %v2312_v47 = vld [vmem:[#allocation2] sm:$0xff]  ;;  %2260 = vst.msk [vmem:[#allocation2 + $0x40] sm:$0xff] %vm17428_vm3, %v2239_v36  ;;  %v2337_v52 = vld [vmem:[#allocation2 + $0xc8] sm:$0xff]  ;;  %v2247_v2 = vsel %vm17375_vm4, %v2230_v1, 0.0  ;;  %v2215_v10 = vsel %vm17376_vm2, %v2038_v7, %v2107_v8  ;;  %v2109_v18 = vsel %vm17376_vm2, %v2107_v8, %v2108_v15  ;;  %v2084_v30 = vrot.slane %v1985_v28, 7  ;;  %v2003_v45 = vld [vmem:[%s12174_s11 + $0xb8] sm:$0xff] }
  0x2c   : > { %11081 = vmatmul.msk.f32.vlgmr.msra.gmra.mxu0 %vm17428_vm3, %v2312_v47  ;;  %2280 = vst.msk [vmem:[#allocation2 + $0xe0] sm:$0xff] %vm17428_vm3, %v2103_v41  ;;  %v2207_v22 = vsel %vm17376_vm2, %v2030_v19, %v2083_v20  ;;  %v2231_v27 = vsel %vm17376_vm2, %v2108_v15, %v2183_v24  ;;  %v2039_v36 = vrot.slane %v2002_v34, 1  ;;  %v2110_v37 = vrot.slane %v2002_v34, 7  ;;  %v12307_v38 = vld [vmem:[#allocation2 + $0x30] sm:$0xff]  ;;  %v2005_v15 = vld [vmem:[%s12174_s11 + $0xc8] sm:$0xff]  ;;  %p12044_p4 = pnand %p12043_p3, %p12039_p0 }
  0x2d   : > { %2255 = vst.msk [vmem:[#allocation2 + $0x18] sm:$0xff] %vm17428_vm3, %v2205_v46  ;;  %v2742_v56 = vld [vmem:[#allocation2 + $0xc9] sm:$0xff]  ;;  %v2248_v29 = vsel %vm17375_vm4, %v2231_v27, 0.0  ;;  %v2085_v32 = vsel %vm17376_vm2, %v2083_v20, %v2084_v30  ;;  %v2175_v39 = vrot.slane %v1985_v28, 5  ;;  %v2111_v47 = vrot.slane %v2003_v45, 7  ;;  %v1988_v20 = vld [vmem:[%s12174_s11 + $0x40] sm:$0xff] }
  0x2e   : > { %v2717_v53 = vld [vmem:[#allocation2 + $0x1] sm:$0xff]  ;;  %2281 = vst.msk [vmem:[#allocation2 + $0xe8] sm:$0xff] %vm17428_vm3, %v2246_v48  ;;  %v2338_v61 = vld [vmem:[#allocation2 + $0xd0] sm:$0xff]  ;;  %v2216_v40 = vsel %vm17376_vm2, %v2039_v36, %v2110_v37  ;;  %v2089_v24 = vrot.slane %v1988_v20, 7 }
  0x2f   : > { %11130 = vmatmul.msk.f32.vlgmr.msra.gmra.mxu1 %vm17428_vm3, %v2717_v53  ;;  %2256 = vst.msk [vmem:[#allocation2 + $0x20] sm:$0xff] %vm17428_vm3, %v2079_v50  ;;  %v2313_v58 = vld [vmem:[#allocation2 + $0x8] sm:$0xff]  ;;  %v2223_v41 = vsel %vm17376_vm2, %v2084_v30, %v2175_v39  ;;  %v12315_v42 = vld [vmem:[#allocation2 + $0x31] sm:$0xff]  ;;  %v2112_v50 = vsel %vm17376_vm2, %v2110_v37, %v2111_v47 }
  0x30   : > { %2282 = vst.msk [vmem:[#allocation2 + $0xf0] sm:$0xff] %vm17428_vm3, %v2214_v51  ;;  %v2743_v63 = vld [vmem:[#allocation2 + $0xd1] sm:$0xff]  ;;  %v2240_v43 = vsel %vm17375_vm4, %v2223_v41, 0.0  ;;  %v2031_v51 = vrot.slane %v1986_v49, 1  ;;  %v1989_v34 = vld [vmem:[%s12174_s11 + $0x48] sm:$0xff] }
  0x31   : > { %11106 = vmatmul.msk.f32.gmra.mxu2 %vm17428_vm3, %v2337_v52  ;;  %2257 = vst.msk [vmem:[#allocation2 + $0x28] sm:$0xff] %vm17428_vm3, %v2238_v54  ;;  %v2718_v60 = vld [vmem:[#allocation2 + $0x9] sm:$0xff]  ;;  %v2339_v4 = vld [vmem:[#allocation2 + $0xd8] sm:$0xff]  ;;  %v2086_v52 = vrot.slane %v1986_v49, 7  ;;  %v2090_v36 = vrot.slane %v1989_v34, 7 }
  0x32   : > { %2283 = vst.msk [vmem:[#allocation2 + $0xf8] sm:$0xff] %vm17428_vm3, %v2106_v59  ;;  %v2314_v0 = vld [vmem:[#allocation2 + $0x10] sm:$0xff]  ;;  %v12323_v48 = vld [vmem:[#allocation2 + $0x38] sm:$0xff] }
  0x33   : > { %11155 = vmatmul.msk.f32.gmra.mxu3 %vm17428_vm3, %v2742_v56  ;;  %2284 = vst.msk [vmem:[#allocation2 + $0x100] sm:$0xff] %vm17428_vm3, %v2247_v2  ;;  %v2744_v6 = vld [vmem:[#allocation2 + $0xd9] sm:$0xff]  ;;  %v2208_v54 = vsel %vm17376_vm2, %v2031_v51, %v2086_v52  ;;  %v2184_v56 = vrot.slane %v2003_v45, 5  ;;  %v2091_v39 = vsel %vm17376_vm2, %v2089_v24, %v2090_v36  ;;  %v2006_v41 = vld [vmem:[%s12174_s11 + $0xd0] sm:$0xff] }
  0x34   : > { %11082 = vmatmul.msk.f32.gmra.mxu0 %vm17428_vm3, %v2313_v58  ;;  %v2719_v3 = vld [vmem:[#allocation2 + $0x11] sm:$0xff]  ;;  %2285 = vst.msk [vmem:[#allocation2 + $0x108] sm:$0xff] %vm17428_vm3, %v2215_v10  ;;  %v2340_v12 = vld [vmem:[#allocation2 + $0xe0] sm:$0xff]  ;;  %v2116_v45 = vrot.slane %v2006_v41, 7 }
  0x35   : > { %v12262_v9 = vld [vmem:[#allocation2 + $0x18] sm:$0xff]  ;;  %v2745_v14 = vld [vmem:[#allocation2 + $0xe1] sm:$0xff]  ;;  %2286 = vst.msk [vmem:[#allocation2 + $0x110] sm:$0xff] %vm17428_vm3, %v2109_v18  ;;  %v2232_v59 = vsel %vm17376_vm2, %v2111_v47, %v2184_v56  ;;  %v2114_v18 = vrot.slane %v2005_v15, 7  ;;  %v2177_v47 = vrot.slane %v1989_v34, 5 }
  0x36   : > { %v12269_v11 = vld [vmem:[#allocation2 + $0x19] sm:$0xff]  ;;  %2261 = vst.msk [vmem:[#allocation2 + $0x48] sm:$0xff] %vm17428_vm3, %v2207_v22  ;;  %v2341_v23 = vld [vmem:[#allocation2 + $0xe8] sm:$0xff] }
  0x37   : > { %11131 = vmatmul.msk.f32.gmra.mxu1 %vm17428_vm3, %v2718_v60  ;;  %v12275_v16 = vld [vmem:[#allocation2 + $0x20] sm:$0xff]  ;;  %v2746_v25 = vld [vmem:[#allocation2 + $0xe9] sm:$0xff]  ;;  %2287 = vst.msk [vmem:[#allocation2 + $0x118] sm:$0xff] %vm17428_vm3, %v2248_v29  ;;  %v1987_v60 = vld [vmem:[%s12174_s11 + $0x38] sm:$0xff]  ;;  %v2185_v29 = vrot.slane %v2005_v15, 5 }
  0x38   : > { %v12283_v21 = vld [vmem:[#allocation2 + $0x21] sm:$0xff]  ;;  %v12299_v31 = vld [vmem:[#allocation2 + $0x29] sm:$0xff]  ;;  %2262 = vst.msk [vmem:[#allocation2 + $0x50] sm:$0xff] %vm17428_vm3, %v2085_v32  ;;  %v12331_v53 = vld [vmem:[#allocation2 + $0x39] sm:$0xff]  ;;  %v2087_v62 = vrot.slane %v1987_v60, 7  ;;  %v2176_v7 = vrot.slane %v1987_v60, 5 }
  0x39   : > { %11107 = vmatmul.msk.f32.gmra.mxu2 %vm17428_vm3, %v2338_v61  ;;  %v12290_v26 = vld [vmem:[#allocation2 + $0x28] sm:$0xff]  ;;  %v2342_v33 = vld [vmem:[#allocation2 + $0xf0] sm:$0xff]  ;;  %2288 = vst.msk [vmem:[#allocation2 + $0x120] sm:$0xff] %vm17428_vm3, %v2216_v40  ;;  %v2343_v44 = vld [vmem:[#allocation2 + $0xf8] sm:$0xff]  ;;  %v2249_v61 = vsel %vm17375_vm4, %v2232_v59, 0.0 }
  0x3a   : > { %v2747_v35 = vld [vmem:[#allocation2 + $0xf1] sm:$0xff]  ;;  %2263 = vst.msk [vmem:[#allocation2 + $0x58] sm:$0xff] %vm17428_vm3, %v2240_v43  ;;  %v2748_v46 = vld [vmem:[#allocation2 + $0xf9] sm:$0xff]  ;;  %v2224_v10 = vsel %vm17376_vm2, %v2087_v62, %v2176_v7 }
  0x3b   : > { %11156 = vmatmul.msk.f32.gmra.mxu3 %vm17428_vm3, %v2743_v63  ;;  %2289 = vst.msk [vmem:[#allocation2 + $0x128] sm:$0xff] %vm17428_vm3, %v2112_v50  ;;  %v2344_v55 = vld [vmem:[#allocation2 + $0x100] sm:$0xff]  ;;  %v2345_v1 = vld [vmem:[#allocation2 + $0x108] sm:$0xff]  ;;  %v2241_v13 = vsel %vm17375_vm4, %v2224_v10, 0.0  ;;  %v2225_v50 = vsel %vm17376_vm2, %v2090_v36, %v2177_v47  ;;  %v1990_v60 = vld [vmem:[%s12174_s11 + $0x50] sm:$0xff] }
  0x3c   : > { %11083 = vmatmul.msk.f32.gmra.mxu0 %vm17428_vm3, %v2314_v0  ;;  %2264 = vst.msk [vmem:[#allocation2 + $0x60] sm:$0xff] %vm17428_vm3, %v2208_v54  ;;  %v2749_v57 = vld [vmem:[#allocation2 + $0x101] sm:$0xff]  ;;  %v2088_v0 = vsel %vm17376_vm2, %v2086_v52, %v2087_v62  ;;  %v2242_v52 = vsel %vm17375_vm4, %v2225_v50, 0.0  ;;  %v2033_v62 = vrot.slane %v1990_v60, 1  ;;  %v1991_v10 = vld [vmem:[%s12174_s11 + $0x58] sm:$0xff] }
  0x3d   : > { %v12338_v58 = vld [vmem:[#allocation2 + $0x40] sm:$0xff]  ;;  %2290 = vst.msk [vmem:[#allocation2 + $0x130] sm:$0xff] %vm17428_vm3, %v2249_v61  ;;  %v2009_v36 = vld [vmem:[%s12174_s11 + $0xe8] sm:$0xff] }
  0x3e   : > { %v12347_v63 = vld [vmem:[#allocation2 + $0x41] sm:$0xff]  ;;  %2265 = vst.msk [vmem:[#allocation2 + $0x68] sm:$0xff] %vm17428_vm3, %v2088_v0  ;;  %v2751_v17 = vld [vmem:[#allocation2 + $0x111] sm:$0xff]  ;;  %v2092_v0 = vrot.slane %v1990_v60, 7 }
  0x3f   : > { %11132 = vmatmul.msk.f32.gmra.mxu1 %vm17428_vm3, %v2719_v3  ;;  %v2004_v2 = vld [vmem:[%s12174_s11 + $0xc0] sm:$0xff]  ;;  %v2750_v3 = vld [vmem:[#allocation2 + $0x109] sm:$0xff]  ;;  %2266 = vst.msk [vmem:[#allocation2 + $0x70] sm:$0xff] %vm17428_vm3, %v2241_v13  ;;  %v2347_v28 = vld [vmem:[#allocation2 + $0x118] sm:$0xff] }
  0x40   : > { %v2113_v5 = vrot.slane %v2004_v2, 7  ;;  %v12371_v19 = vld [vmem:[#allocation2 + $0x50] sm:$0xff]  ;;  %v2752_v30 = vld [vmem:[#allocation2 + $0x119] sm:$0xff]  ;;  %2268 = vst.msk [vmem:[#allocation2 + $0x80] sm:$0xff] %vm17428_vm3, %v2091_v39 }
  0x41   : > { %11108 = vmatmul.msk.f32.gmra.mxu2 %vm17428_vm3, %v2339_v4  ;;  %v2040_v4 = vrot.slane %v2004_v2, 1  ;;  %v12386_v32 = vld [vmem:[#allocation2 + $0x58] sm:$0xff]  ;;  %v2348_v40 = vld [vmem:[#allocation2 + $0x120] sm:$0xff]  ;;  %2269 = vst.msk [vmem:[#allocation2 + $0x88] sm:$0xff] %vm17428_vm3, %v2242_v52  ;;  %v2210_v2 = vsel %vm17376_vm2, %v2033_v62, %v2092_v0 }
  0x42   : > { %v2115_v22 = vsel %vm17376_vm2, %v2113_v5, %v2114_v18  ;;  %v2753_v43 = vld [vmem:[#allocation2 + $0x121] sm:$0xff]  ;;  %2270 = vst.msk [vmem:[#allocation2 + $0x90] sm:$0xff] %vm17428_vm3, %v2210_v2 }
  0x43   : > { %11157 = vmatmul.msk.f32.gmra.mxu3 %vm17428_vm3, %v2744_v6  ;;  %v12355_v6 = vld [vmem:[#allocation2 + $0x48] sm:$0xff]  ;;  %v2217_v8 = vsel %vm17376_vm2, %v2040_v4, %v2113_v5  ;;  %2292 = vst.msk [vmem:[#allocation2 + $0x140] sm:$0xff] %vm17428_vm3, %v2115_v22  ;;  %v12395_v37 = vld [vmem:[#allocation2 + $0x59] sm:$0xff] }
  0x44   : > { %11084 = vmatmul.msk.f32.gmra.mxu0 %vm17428_vm3, %v12262_v9  ;;  %2291 = vst.msk [vmem:[#allocation2 + $0x138] sm:$0xff] %vm17428_vm3, %v2217_v8  ;;  %v2349_v54 = vld [vmem:[#allocation2 + $0x128] sm:$0xff] }
  0x45   : > { %v12411_v51 = vld [vmem:[#allocation2 + $0x61] sm:$0xff]  ;;  %v2754_v56 = vld [vmem:[#allocation2 + $0x129] sm:$0xff] }
  0x46   : > { %v12419_v59 = vld [vmem:[#allocation2 + $0x68] sm:$0xff]  ;;  %v12434_v7 = vld [vmem:[#allocation2 + $0x70] sm:$0xff] }
  0x47   : > { %11133 = vmatmul.msk.f32.gmra.mxu1 %vm17428_vm3, %v12269_v11 }
  0x49   : > { %11109 = vmatmul.msk.f32.gmra.mxu2 %vm17428_vm3, %v2340_v12  ;;  %v12363_v12 = vld [vmem:[#allocation2 + $0x49] sm:$0xff] }
  0x4b   : > { %11158 = vmatmul.msk.f32.gmra.mxu3 %vm17428_vm3, %v2745_v14  ;;  %v2346_v14 = vld [vmem:[#allocation2 + $0x110] sm:$0xff]  ;;  %v2756_v22 = vld [vmem:[#allocation2 + $0x139] sm:$0xff] }
  0x4c   : > { %11085 = vmatmul.msk.f32.gmra.mxu0 %vm17428_vm3, %v12275_v16  ;;  %v2755_v5 = vld [vmem:[#allocation2 + $0x131] sm:$0xff] }
  0x4f   : > { %11134 = vmatmul.msk.f32.gmra.mxu1 %vm17428_vm3, %v12283_v21 }
  0x51   : > { %11110 = vmatmul.msk.f32.gmra.mxu2 %vm17428_vm3, %v2341_v23  ;;  %v2032_v23 = vrot.slane %v1988_v20, 1  ;;  %v2008_v20 = vld [vmem:[%s12174_s11 + $0xe0] sm:$0xff] }
  0x53   : > { %11159 = vmatmul.msk.f32.gmra.mxu3 %vm17428_vm3, %v2746_v25  ;;  %v12379_v25 = vld [vmem:[#allocation2 + $0x51] sm:$0xff]  ;;  %v2209_v27 = vsel %vm17376_vm2, %v2032_v23, %v2089_v24  ;;  %v2042_v23 = vrot.slane %v2008_v20, 1  ;;  %v2119_v24 = vrot.slane %v2008_v20, 7 }
  0x54   : > { %11086 = vmatmul.msk.f32.gmra.mxu0 %vm17428_vm3, %v12290_v26  ;;  %2267 = vst.msk [vmem:[#allocation2 + $0x78] sm:$0xff] %vm17428_vm3, %v2209_v27 }
  0x57   : > { %11135 = vmatmul.msk.f32.gmra.mxu1 %vm17428_vm3, %v12299_v31 }
  0x59   : > { %11111 = vmatmul.msk.f32.gmra.mxu2 %vm17428_vm3, %v2342_v33  ;;  %v2233_v33 = vsel %vm17376_vm2, %v2114_v18, %v2185_v29  ;;  %v2351_v18 = vld [vmem:[#allocation2 + $0x138] sm:$0xff]  ;;  %v2219_v29 = vsel %vm17376_vm2, %v2042_v23, %v2119_v24 }
  0x5a   : > { %2297 = vst.msk [vmem:[#allocation2 + $0x168] sm:$0xff] %vm17428_vm3, %v2219_v29 }
  0x5b   : > { %11160 = vmatmul.msk.f32.gmra.mxu3 %vm17428_vm3, %v2747_v35  ;;  %v2250_v35 = vsel %vm17375_vm4, %v2233_v33, 0.0  ;;  %v12443_v15 = vld [vmem:[#allocation2 + $0x71] sm:$0xff]  ;;  %v12459_v33 = vld [vmem:[#allocation2 + $0x79] sm:$0xff]  ;;  %2306 = vst.msk [vmem:[#allocation2 + $0x198] sm:$0xff] %vm17428_vm3, %v2219_v29 }
  0x5c   : > { %11087 = vmatmul.msk.f32.gmra.mxu0 %vm17428_vm3, %v12307_v38  ;;  %2293 = vst.msk [vmem:[#allocation2 + $0x148] sm:$0xff] %vm17428_vm3, %v2250_v35  ;;  %v12451_v27 = vld [vmem:[#allocation2 + $0x78] sm:$0xff]  ;;  %v2352_v35 = vld [vmem:[#allocation2 + $0x140] sm:$0xff]  ;;  %v12520_v29 = vld [vmem:[%s12174_s11 + $0xf0] sm:$0xff] }
  0x5d   : > { %17583 = vst [vmem:[#allocation8_spill] sm:$0xff] %v12520_v29 }
  0x5f   : > { %11136 = vmatmul.msk.f32.gmra.mxu1 %vm17428_vm3, %v12315_v42 }
  0x61   : > { %11112 = vmatmul.msk.f32.gmra.mxu2 %vm17428_vm3, %v2343_v44  ;;  %v2041_v44 = vrot.slane %v2006_v41, 1  ;;  %v12471_v41 = vld [vmem:[%s17351_s2] ss:$0 sm:$0xff] }
  0x63   : > { %11161 = vmatmul.msk.f32.gmra.mxu3 %vm17428_vm3, %v2748_v46  ;;  %v12403_v46 = vld [vmem:[#allocation2 + $0x60] sm:$0xff]  ;;  %v2218_v49 = vsel %vm17376_vm2, %v2041_v44, %v2116_v45 }
  0x64   : > { %11088 = vmatmul.msk.f32.gmra.mxu0 %vm17428_vm3, %v12323_v48  ;;  %2294 = vst.msk [vmem:[#allocation2 + $0x150] sm:$0xff] %vm17428_vm3, %v2218_v49  ;;  %v2757_v39 = vld [vmem:[#allocation2 + $0x141] sm:$0xff] }
  0x65   : > { %v12475_v44 = vld [vmem:[#allocation2 + $0x80] sm:$0xff] }
  0x67   : > { %11137 = vmatmul.msk.f32.gmra.mxu1 %vm17428_vm3, %v12331_v53 }
  0x69   : > { %11113 = vmatmul.msk.f32.gmra.mxu2 %vm17428_vm3, %v2344_v55  ;;  %v2007_v55 = vld [vmem:[%s12174_s11 + $0xd8] sm:$0xff] }
  0x6a   : > { %v2186_v4 = vrot.slane %v2007_v55, 5 }
  0x6b   : > { %11162 = vmatmul.msk.f32.gmra.mxu3 %vm17428_vm3, %v2749_v57  ;;  %v2117_v57 = vrot.slane %v2007_v55, 7  ;;  %v12485_v55 = vld [vmem:[#allocation2 + $0x81] sm:$0xff]  ;;  %v2758_v2 = vld [vmem:[#allocation2 + $0x149] sm:$0xff] }
  0x6c   : > { %11089 = vmatmul.msk.f32.gmra.mxu0 %vm17428_vm3, %v12338_v58 }
  0x6d   : > { %v2118_v61 = vsel %vm17376_vm2, %v2116_v45, %v2117_v57  ;;  %v2234_v8 = vsel %vm17376_vm2, %v2117_v57, %v2186_v4  ;;  %v1992_v45 = vld [vmem:[%s12174_s11 + $0x60] sm:$0xff]  ;;  %v12498_v4 = vld [vmem:[#allocation2 + $0x88] sm:$0xff] }
  0x6e   : > { %2295 = vst.msk [vmem:[#allocation2 + $0x158] sm:$0xff] %vm17428_vm3, %v2118_v61  ;;  %v2251_v13 = vsel %vm17375_vm4, %v2234_v8, 0.0  ;;  %v2034_v49 = vrot.slane %v1992_v45, 1  ;;  %v2095_v50 = vrot.slane %v1992_v45, 7  ;;  %v2353_v61 = vld [vmem:[#allocation2 + $0x148] sm:$0xff] }
  0x6f   : > { %11138 = vmatmul.msk.f32.gmra.mxu1 %vm17428_vm3, %v12347_v63  ;;  %2296 = vst.msk [vmem:[#allocation2 + $0x160] sm:$0xff] %vm17428_vm3, %v2251_v13  ;;  %v1993_v8 = vld [vmem:[%s12174_s11 + $0x68] sm:$0xff] }
  0x70   : > { %v2096_v13 = vrot.slane %v1993_v8, 7 }
  0x71   : > { %11114 = vmatmul.msk.f32.gmra.mxu2 %vm17428_vm3, %v2345_v1  ;;  %v12427_v1 = vld [vmem:[#allocation2 + $0x69] sm:$0xff] }
  0x72   : > { %v2097_v20 = vsel %vm17376_vm2, %v2095_v50, %v2096_v13 }
  0x73   : > { %11163 = vmatmul.msk.f32.gmra.mxu3 %vm17428_vm3, %v2750_v3  ;;  %v2350_v3 = vld [vmem:[#allocation2 + $0x130] sm:$0xff]  ;;  %2274 = vst.msk [vmem:[#allocation2 + $0xb0] sm:$0xff] %vm17428_vm3, %v2097_v20 }
  0x74   : > { %11090 = vmatmul.msk.f32.gmra.mxu0 %vm17428_vm3, %v12355_v6 }
  0x77   : > { %11139 = vmatmul.msk.f32.gmra.mxu1 %vm17428_vm3, %v12363_v12 }
  0x79   : > { %11115 = vmatmul.msk.f32.gmra.mxu2 %vm17428_vm3, %v2346_v14  ;;  %v2093_v14 = vrot.slane %v1991_v10, 7 }
  0x7b   : > { %11164 = vmatmul.msk.f32.gmra.mxu3 %vm17428_vm3, %v2751_v17  ;;  %v2094_v17 = vsel %vm17376_vm2, %v2092_v0, %v2093_v14  ;;  %v2187_v0 = vrot.slane %v2009_v36, 5 }
  0x7c   : > { %11091 = vmatmul.msk.f32.gmra.mxu0 %vm17428_vm3, %v12371_v19  ;;  %2271 = vst.msk [vmem:[#allocation2 + $0x98] sm:$0xff] %vm17428_vm3, %v2094_v17 }
  0x7f   : > { %11140 = vmatmul.msk.f32.gmra.mxu1 %vm17428_vm3, %v12379_v25 }
  0x81   : > { %11116 = vmatmul.msk.f32.gmra.mxu2 %vm17428_vm3, %v2347_v28  ;;  %v2178_v28 = vrot.slane %v1991_v10, 5 }
  0x83   : > { %11165 = vmatmul.msk.f32.gmra.mxu3 %vm17428_vm3, %v2752_v30  ;;  %v2226_v30 = vsel %vm17376_vm2, %v2093_v14, %v2178_v28 }
  0x84   : > { %11092 = vmatmul.msk.f32.gmra.mxu0 %vm17428_vm3, %v12386_v32  ;;  %v2243_v34 = vsel %vm17375_vm4, %v2226_v30, 0.0  ;;  %v2759_v30 = vld [vmem:[#allocation2 + $0x151] sm:$0xff] }
  0x85   : > { %2272 = vst.msk [vmem:[#allocation2 + $0xa0] sm:$0xff] %vm17428_vm3, %v2243_v34  ;;  %v2043_v34 = vrot.slane %v12520_v29, 1 }
  0x87   : > { %11141 = vmatmul.msk.f32.gmra.mxu1 %vm17428_vm3, %v12395_v37 }
  0x89   : > { %11117 = vmatmul.msk.f32.gmra.mxu2 %vm17428_vm3, %v2348_v40  ;;  %v2120_v40 = vrot.slane %v2009_v36, 7 }
  0x8b   : > { %11166 = vmatmul.msk.f32.gmra.mxu3 %vm17428_vm3, %v2753_v43  ;;  %v2121_v47 = vsel %vm17376_vm2, %v2119_v24, %v2120_v40  ;;  %v2354_v24 = vld [vmem:[#allocation2 + $0x150] sm:$0xff] }
  0x8c   : > { %11093 = vmatmul.msk.f32.gmra.mxu0 %vm17428_vm3, %v12403_v46  ;;  %2298 = vst.msk [vmem:[#allocation2 + $0x170] sm:$0xff] %vm17428_vm3, %v2121_v47 }
  0x8d   : > { %2307 = vst.msk [vmem:[#allocation2 + $0x1a0] sm:$0xff] %vm17428_vm3, %v2121_v47 }
  0x8f   : > { %11142 = vmatmul.msk.f32.gmra.mxu1 %vm17428_vm3, %v12411_v51 }
  0x91   : > { %11118 = vmatmul.msk.f32.gmra.mxu2 %vm17428_vm3, %v2349_v54 }
  0x93   : > { %11167 = vmatmul.msk.f32.gmra.mxu3 %vm17428_vm3, %v2754_v56  ;;  %v2211_v56 = vsel %vm17376_vm2, %v2034_v49, %v2095_v50 }
  0x94   : > { %11094 = vmatmul.msk.f32.gmra.mxu0 %vm17428_vm3, %v12419_v59  ;;  %2273 = vst.msk [vmem:[#allocation2 + $0xa8] sm:$0xff] %vm17428_vm3, %v2211_v56 }
  0x97   : > { %11143 = vmatmul.msk.f32.gmra.mxu1 %vm17428_vm3, %v12427_v1 }
  0x99   : > { %11119 = vmatmul.msk.f32.gmra.mxu2 %vm17428_vm3, %v2350_v3 }
  0x9b   : > { %11168 = vmatmul.msk.f32.gmra.mxu3 %vm17428_vm3, %v2755_v5  ;;  %v2235_v5 = vsel %vm17376_vm2, %v2120_v40, %v2187_v0  ;;  %v2179_v40 = vrot.slane %v1993_v8, 5  ;;  %v12551_v8 = vld [vmem:[#allocation2 + $0x98] sm:$0xff] }
  0x9c   : > { %11095 = vmatmul.msk.f32.gmra.mxu0 %vm17428_vm3, %v12434_v7  ;;  %v2252_v10 = vsel %vm17375_vm4, %v2235_v5, 0.0 }
  0x9d   : > { %2299 = vst.msk [vmem:[#allocation2 + $0x178] sm:$0xff] %vm17428_vm3, %v2252_v10  ;;  %v2227_v47 = vsel %vm17376_vm2, %v2096_v13, %v2179_v40  ;;  %v12568_v40 = vld [vmem:[#allocation2 + $0xa0] sm:$0xff] }
  0x9e   : > { %2308 = vst.msk [vmem:[#allocation2 + $0x1a8] sm:$0xff] %vm17428_vm3, %v2252_v10  ;;  %v2244_v56 = vsel %vm17375_vm4, %v2227_v47, 0.0  ;;  %v238_v47 = vld [vmem:[%s17350_s1 + $0x1c] sm:$0xf] }
  0x9f   : > { %11144 = vmatmul.msk.f32.gmra.mxu1 %vm17428_vm3, %v12443_v15  ;;  %2275 = vst.msk [vmem:[#allocation2 + $0xb8] sm:$0xff] %vm17428_vm3, %v2244_v56  ;;  %11423 = vmatpush.msk.msra.mxu3 %vm17377_vm1, %v238_v47 }
  0xa1   : > { %11120 = vmatmul.msk.f32.gmra.mxu2 %vm17428_vm3, %v2351_v18  ;;  %v12509_v18 = vld [vmem:[#allocation2 + $0x89] sm:$0xff] }
  0xa3   : > { %11169 = vmatmul.msk.f32.gmra.mxu3 %vm17428_vm3, %v2756_v22 }
  0xa4   : > { %11096 = vmatmul.msk.f32.gmra.mxu0 %vm17428_vm3, %v12451_v27 }
  0xa7   : > { %11145 = vmatmul.msk.f32.gmra.mxu1 %vm17428_vm3, %v12459_v33 }
  0xa9   : > { %11121 = vmatmul.msk.f32.gmra.mxu2 %vm17428_vm3, %v2352_v35  ;;  %v12473_v43 = vpop.f32.mrf.mxu0  ;;  %v17355_v35 = vrot.slane %v12520_v29, 7  ;;  %v12635_v29 = vld [vmem:[#allocation2 + $0xb8] sm:$0xff] }
  0xab   : > { %11170 = vmatmul.msk.f32.gmra.mxu3 %vm17428_vm3, %v2757_v39  ;;  %v12527_v39 = vld [vmem:[#allocation2 + $0x90] sm:$0xff]  ;;  %v2220_v45 = vsel %vm17376_vm2, %v2043_v34, %v17355_v35 }
  0xac   : > { %v2597_v52 = vpop.f32.mrf.mxu2  ;;  %v12481_v54 = vpop.f32.mrf.mxu1  ;;  %11097 = vmatmul.msk.f32.gmra.mxu0 %vm17428_vm3, %v12475_v44  ;;  %2300 = vst.msk [vmem:[#allocation2 + $0x180] sm:$0xff] %vm17428_vm3, %v2220_v45  ;;  %v237_v45 = vld [vmem:[%s17350_s1 + $0x18] sm:$0xf] }
  0xad   : > { %v2693_v57 = vadd.f32 %v12471_v41, %v2597_v52  ;;  %v12539_v52 = vld [vmem:[#allocation2 + $0x91] sm:$0xff]  ;;  %11374 = vmatpush.msk.msra.mxu2 %vm17377_vm1, %v237_v45 }
  0xae   : > { %v3001_v60 = vpop.f32.mrf.mxu3  ;;  %v236_v45 = vld [vmem:[%s17350_s1 + $0x14] sm:$0xf] }
  0xaf   : > { %v12491_v62 = vadd.f32 %v3001_v60, %v2693_v57  ;;  %11146 = vmatmul.msk.f32.gmra.mxu1 %vm17428_vm3, %v12485_v55 }
  0xb0   : > { %11325 = vmatpush.msk.msrb.mxu1 %vm17377_vm1, %v236_v45 }
  0xb1   : > { %17581 = vst [vmem:[#allocation6_spill] sm:$0xff] %v12491_v62  ;;  %11122 = vmatmul.msk.f32.gmra.mxu2 %vm17428_vm3, %v2353_v61  ;;  %v12496_v3 = vpop.f32.mrf.mxu0  ;;  %v2355_v61 = vld [vmem:[#allocation2 + $0x158] sm:$0xff] }
  0xb3   : > { %11171 = vmatmul.msk.f32.gmra.mxu3 %vm17428_vm3, %v2758_v2  ;;  %v2760_v2 = vld [vmem:[#allocation2 + $0x159] sm:$0xff] }
  0xb4   : > { %v2600_v14 = vpop.f32.mrf.mxu2  ;;  %v12505_v17 = vpop.f32.mrf.mxu1  ;;  %11098 = vmatmul.msk.f32.gmra.mxu0 %vm17428_vm3, %v12498_v4 }
  0xb5   : > { %v2694_v22 = vadd.f32 %v12471_v41, %v2600_v14  ;;  %v12558_v14 = vld [vmem:[#allocation2 + $0x99] sm:$0xff] }
  0xb6   : > { %v3004_v23 = vpop.f32.mrf.mxu3 }
  0xb7   : > { %v12515_v28 = vadd.f32 %v3004_v23, %v2694_v22  ;;  %11147 = vmatmul.msk.f32.gmra.mxu1 %vm17428_vm3, %v12509_v18  ;;  %v2356_v23 = vld [vmem:[#allocation2 + $0x160] sm:$0xff] }
  0xb9   : > { %17582 = vst [vmem:[#allocation7_spill] sm:$0xff] %v12515_v28  ;;  %11123 = vmatmul.msk.f32.gmra.mxu2 %vm17428_vm3, %v2354_v24  ;;  %v12525_v36 = vpop.f32.mrf.mxu0 }
  0xbb   : > { %11172 = vmatmul.msk.f32.gmra.mxu3 %vm17428_vm3, %v2759_v30  ;;  %v2761_v30 = vld [vmem:[#allocation2 + $0x161] sm:$0xff] }
  0xbc   : > { %v2603_v49 = vpop.f32.mrf.mxu2  ;;  %v12535_v50 = vpop.f32.mrf.mxu1  ;;  %11099 = vmatmul.msk.f32.gmra.mxu0 %vm17428_vm3, %v12527_v39 }
  0xbd   : > { %v2695_v57 = vadd.f32 %v12471_v41, %v2603_v49 }
  0xbe   : > { %v3007_v60 = vpop.f32.mrf.mxu3 }
  0xbf   : > { %v12544_v0 = vadd.f32 %v3007_v60, %v2695_v57  ;;  %11148 = vmatmul.msk.f32.gmra.mxu1 %vm17428_vm3, %v12539_v52  ;;  %v12582_v57 = vld [vmem:[#allocation2 + $0xa1] sm:$0xff] }
  0xc1   : > { %17584 = vst [vmem:[#allocation9_spill] sm:$0xff] %v12544_v0  ;;  %11124 = vmatmul.msk.f32.gmra.mxu2 %vm17428_vm3, %v2355_v61  ;;  %v12549_v5 = vpop.f32.mrf.mxu0  ;;  %v12618_v0 = vld [vmem:[#allocation2 + $0xb0] sm:$0xff] }
  0xc3   : > { %11173 = vmatmul.msk.f32.gmra.mxu3 %vm17428_vm3, %v2760_v2  ;;  %v2357_v2 = vld [vmem:[#allocation2 + $0x168] sm:$0xff] }
  0xc4   : > { %v2606_v10 = vpop.f32.mrf.mxu2  ;;  %v12554_v13 = vpop.f32.mrf.mxu1  ;;  %11100 = vmatmul.msk.f32.gmra.mxu0 %vm17428_vm3, %v12551_v8 }
  0xc5   : > { %v2696_v20 = vadd.f32 %v12471_v41, %v2606_v10 }
  0xc6   : > { %v3010_v22 = vpop.f32.mrf.mxu3 }
  0xc7   : > { %v12561_v24 = vadd.f32 %v3010_v22, %v2696_v20  ;;  %11149 = vmatmul.msk.f32.gmra.mxu1 %vm17428_vm3, %v12558_v14  ;;  %v2762_v20 = vld [vmem:[#allocation2 + $0x169] sm:$0xff] }
  0xc9   : > { %17585 = vst [vmem:[#allocation10_spill] sm:$0xff] %v12561_v24  ;;  %11125 = vmatmul.msk.f32.gmra.mxu2 %vm17428_vm3, %v2356_v23  ;;  %v12566_v34 = vpop.f32.mrf.mxu0  ;;  %v12593_v23 = vld [vmem:[#allocation2 + $0xa8] sm:$0xff] }
  0xcb   : > { %11174 = vmatmul.msk.f32.gmra.mxu3 %vm17428_vm3, %v2761_v30  ;;  %v239_v30 = vld [vmem:[%s17350_s1 + $0x20] sm:$0xf] }
  0xcc   : > { %v2609_v49 = vpop.f32.mrf.mxu2  ;;  %v12578_v56 = vpop.f32.mrf.mxu1  ;;  %11101 = vmatmul.msk.f32.gmra.mxu0 %vm17428_vm3, %v12568_v40 }
  0xcd   : > { %v2697_v60 = vadd.f32 %v12471_v41, %v2609_v49  ;;  %11472 = vmatpush.msk.msra.mxu0 %vm17377_vm1, %v239_v30  ;;  %v12625_v30 = vld [vmem:[#allocation2 + $0xb1] sm:$0xff] }
  0xce   : > { %v3013_v61 = vpop.f32.mrf.mxu3 }
  0xcf   : > { %v12586_v10 = vadd.f32 %v3013_v61, %v2697_v60  ;;  %11150 = vmatmul.msk.f32.gmra.mxu1 %vm17428_vm3, %v12582_v57  ;;  %v12606_v60 = vld [vmem:[#allocation2 + $0xa9] sm:$0xff] }
  0xd1   : > { %17586 = vst [vmem:[#allocation11_spill] sm:$0xff] %v12586_v10  ;;  %11126 = vmatmul.msk.f32.gmra.mxu2 %vm17428_vm3, %v2357_v2  ;;  %v12591_v22 = vpop.f32.mrf.mxu0  ;;  %v2763_v10 = vld [vmem:[#allocation2 + $0x171] sm:$0xff] }
  0xd3   : > { %11175 = vmatmul.msk.f32.gmra.mxu3 %vm17428_vm3, %v2762_v20  ;;  %v2358_v20 = vld [vmem:[#allocation2 + $0x170] sm:$0xff] }
  0xd4   : > { %v2612_v47 = vpop.f32.mrf.mxu2  ;;  %v12602_v49 = vpop.f32.mrf.mxu1  ;;  %11102 = vmatmul.msk.f32.gmra.mxu0 %vm17428_vm3, %v12593_v23 }
  0xd5   : > { %v2698_v61 = vadd.f32 %v12471_v41, %v2612_v47 }
  0xd6   : > { %v3016_v2 = vpop.f32.mrf.mxu3 }
  0xd7   : > { %v12611_v35 = vadd.f32 %v3016_v2, %v2698_v61  ;;  %11151 = vmatmul.msk.f32.gmra.mxu1 %vm17428_vm3, %v12606_v60 }
  0xd9   : > { %17587 = vst [vmem:[#allocation12_spill] sm:$0xff] %v12611_v35  ;;  %11127 = vmatmul.msk.f32.gmra.mxu2 %vm17428_vm3, %v2358_v20  ;;  %v12616_v24 = vpop.f32.mrf.mxu0  ;;  %v2359_v35 = vld [vmem:[#allocation2 + $0x178] sm:$0xff] }
  0xda   : > { %17588 = vst [vmem:[#allocation13_spill] sm:$0xff] %v12616_v24  ;;  %v2764_v20 = vld [vmem:[#allocation2 + $0x179] sm:$0xff] }
  0xdb   : > { %11176 = vmatmul.msk.f32.gmra.mxu3 %vm17428_vm3, %v2763_v10 }
  0xdc   : > { %v2615_v45 = vpop.f32.mrf.mxu2  ;;  %v12621_v47 = vpop.f32.mrf.mxu1  ;;  %11103 = vmatmul.msk.f32.gmra.mxu0 %vm17428_vm3, %v12618_v0 }
  0xdd   : > { %17589 = vst [vmem:[#allocation14_spill] sm:$0xff] %v12621_v47  ;;  %v2699_v61 = vadd.f32 %v12471_v41, %v2615_v45  ;;  %v12642_v45 = vld [vmem:[#allocation2 + $0xb9] sm:$0xff] }
  0xde   : > { %v3019_v2 = vpop.f32.mrf.mxu3 }
  0xdf   : > { %v12628_v28 = vadd.f32 %v3019_v2, %v2699_v61  ;;  %11152 = vmatmul.msk.f32.gmra.mxu1 %vm17428_vm3, %v12625_v30 }
  0xe1   : > { %17590 = vst [vmem:[#allocation15_spill] sm:$0xff] %v12628_v28  ;;  %11128 = vmatmul.msk.f32.gmra.mxu2 %vm17428_vm3, %v2359_v35  ;;  %v12633_v10 = vpop.f32.mrf.mxu0  ;;  %v3121_v28 = vld [vmem:[#allocation2 + $0x2] sm:$0xff] }
  0xe2   : > { %17591 = vst [vmem:[#allocation16_spill] sm:$0xff] %v12633_v10 }
  0xe3   : > { %11177 = vmatmul.msk.f32.gmra.mxu3 %vm17428_vm3, %v2764_v20 }
  0xe4   : > { %v2618_v62 = vpop.f32.mrf.mxu2  ;;  %v12638_v47 = vpop.f32.mrf.mxu1  ;;  %11104 = vmatmul.msk.f32.gmra.mxu0 %vm17428_vm3, %v12635_v29 }
  0xe5   : > { %17592 = vst [vmem:[#allocation17_spill] sm:$0xff] %v12638_v47  ;;  %v2700_v61 = vadd.f32 %v12471_v41, %v2618_v62  ;;  %v4333_v62 = vld [vmem:[#allocation2 + $0x1a] sm:$0xff] }
  0xe6   : > { %v3022_v2 = vpop.f32.mrf.mxu3 }
  0xe7   : > { %v12645_v24 = vadd.f32 %v3022_v2, %v2700_v61  ;;  %11153 = vmatmul.msk.f32.gmra.mxu1 %vm17428_vm3, %v12642_v45 }
  0xe9   : > { %17593 = vst [vmem:[#allocation18_spill] sm:$0xff] %v12645_v24  ;;  %11179 = vmatmul.msk.f32.vlgmr.msrb.gmra.mxu2 %vm17428_vm3, %v3121_v28  ;;  %v12650_v35 = vpop.f32.mrf.mxu0  ;;  %v3122_v24 = vld [vmem:[#allocation2 + $0xa] sm:$0xff] }
  0xeb   : > { %11228 = vmatmul.msk.f32.vlgmr.msrb.gmra.mxu3 %vm17428_vm3, %v12262_v9 }
  0xec   : > { %v2621_v20 = vpop.f32.mrf.mxu2  ;;  %v12654_v47 = vpop.f32.mrf.mxu1  ;;  %11277 = vmatmul.msk.f32.vlgmr.msrb.gmra.mxu0 %vm17428_vm3, %v12269_v11  ;;  %v4334_v11 = vld [vmem:[#allocation2 + $0x22] sm:$0xff] }
  0xed   : > { %17594 = vst [vmem:[#allocation19_spill] sm:$0xff] %v12654_v47  ;;  %v2701_v61 = vadd.f32 %v12471_v41, %v2621_v20 }
  0xee   : > { %v3025_v2 = vpop.f32.mrf.mxu3 }
  0xef   : > { %v12659_v10 = vadd.f32 %v3025_v2, %v2701_v61  ;;  %11326 = vmatmul.msk.f32.vlgmr.msrb.gmra.mxu1 %vm17428_vm3, %v4333_v62  ;;  %v3123_v2 = vld [vmem:[#allocation2 + $0x12] sm:$0xff] }
  0xf1   : > { %17595 = vst [vmem:[#allocation20_spill] sm:$0xff] %v12659_v10  ;;  %11180 = vmatmul.msk.f32.gmra.mxu2 %vm17428_vm3, %v3122_v24  ;;  %v12663_v28 = vpop.f32.mrf.mxu0 }
  0xf3   : > { %11229 = vmatmul.msk.f32.gmra.mxu3 %vm17428_vm3, %v12275_v16 }
  0xf4   : > { %v2624_v9 = vpop.f32.mrf.mxu2  ;;  %v12667_v47 = vpop.f32.mrf.mxu1  ;;  %11278 = vmatmul.msk.f32.gmra.mxu0 %vm17428_vm3, %v12283_v21  ;;  %v4335_v21 = vld [vmem:[#allocation2 + $0x2a] sm:$0xff] }
  0xf5   : > { %17596 = vst [vmem:[#allocation21_spill] sm:$0xff] %v12667_v47  ;;  %v2702_v20 = vadd.f32 %v12471_v41, %v2624_v9 }
  0xf6   : > { %v3028_v61 = vpop.f32.mrf.mxu3 }
  0xf7   : > { %v12672_v10 = vadd.f32 %v3028_v61, %v2702_v20  ;;  %11327 = vmatmul.msk.f32.gmra.mxu1 %vm17428_vm3, %v4334_v11 }
  0xf9   : > { %17597 = vst [vmem:[#allocation22_spill] sm:$0xff] %v12672_v10  ;;  %11181 = vmatmul.msk.f32.gmra.mxu2 %vm17428_vm3, %v3123_v2  ;;  %v12676_v24 = vpop.f32.mrf.mxu0 }
  0xfb   : > { %11230 = vmatmul.msk.f32.gmra.mxu3 %vm17428_vm3, %v12290_v26 }
  0xfc   : > { %v2627_v16 = vpop.f32.mrf.mxu2  ;;  %v12680_v47 = vpop.f32.mrf.mxu1  ;;  %11279 = vmatmul.msk.f32.gmra.mxu0 %vm17428_vm3, %v12299_v31  ;;  %v4336_v31 = vld [vmem:[#allocation2 + $0x32] sm:$0xff] }
  0xfd   : > { %v2703_v9 = vadd.f32 %v12471_v41, %v2627_v16 }
  0xfe   : > { %v3031_v20 = vpop.f32.mrf.mxu3 }
  0xff   : > { %v12685_v61 = vadd.f32 %v3031_v20, %v2703_v9  ;;  %11328 = vmatmul.msk.f32.gmra.mxu1 %vm17428_vm3, %v4335_v21 }
 0x101   : > { %17598 = vst [vmem:[#allocation23_spill] sm:$0xff] %v12685_v61  ;;  %11182 = vmatmul.msk.f32.gmra.mxu2 %vm17428_vm3, %v4333_v62  ;;  %v12689_v2 = vpop.f32.mrf.mxu0 }
 0x103   : > { %11231 = vmatmul.msk.f32.gmra.mxu3 %vm17428_vm3, %v12307_v38 }
 0x104   : > { %v2630_v26 = vpop.f32.mrf.mxu2  ;;  %v12693_v10 = vpop.f32.mrf.mxu1  ;;  %11280 = vmatmul.msk.f32.gmra.mxu0 %vm17428_vm3, %v12315_v42  ;;  %v4337_v42 = vld [vmem:[#allocation2 + $0x3a] sm:$0xff] }
 0x105   : > { %v2704_v16 = vadd.f32 %v12471_v41, %v2630_v26 }
 0x106   : > { %v3034_v9 = vpop.f32.mrf.mxu3 }
 0x107   : > { %v12698_v20 = vadd.f32 %v3034_v9, %v2704_v16  ;;  %11329 = vmatmul.msk.f32.gmra.mxu1 %vm17428_vm3, %v4336_v31 }
 0x109   : > { %17599 = vst [vmem:[#allocation24_spill] sm:$0xff] %v12698_v20  ;;  %11183 = vmatmul.msk.f32.gmra.mxu2 %vm17428_vm3, %v4334_v11  ;;  %v12702_v62 = vpop.f32.mrf.mxu0 }
 0x10b   : > { %11232 = vmatmul.msk.f32.gmra.mxu3 %vm17428_vm3, %v12323_v48 }
 0x10c   : > { %v2633_v38 = vpop.f32.mrf.mxu2  ;;  %v12706_v61 = vpop.f32.mrf.mxu1  ;;  %11281 = vmatmul.msk.f32.gmra.mxu0 %vm17428_vm3, %v12331_v53  ;;  %v4338_v53 = vld [vmem:[#allocation2 + $0x42] sm:$0xff] }
 0x10d   : > { %v2705_v26 = vadd.f32 %v12471_v41, %v2633_v38 }
 0x10e   : > { %v3037_v16 = vpop.f32.mrf.mxu3 }
 0x10f   : > { %v12711_v9 = vadd.f32 %v3037_v16, %v2705_v26  ;;  %11330 = vmatmul.msk.f32.gmra.mxu1 %vm17428_vm3, %v4337_v42 }
 0x111   : > { %17600 = vst [vmem:[#allocation25_spill] sm:$0xff] %v12711_v9  ;;  %11184 = vmatmul.msk.f32.gmra.mxu2 %vm17428_vm3, %v4335_v21  ;;  %v12715_v11 = vpop.f32.mrf.mxu0 }
 0x113   : > { %11233 = vmatmul.msk.f32.gmra.mxu3 %vm17428_vm3, %v12338_v58 }
 0x114   : > { %v2636_v48 = vpop.f32.mrf.mxu2  ;;  %v12719_v20 = vpop.f32.mrf.mxu1  ;;  %11282 = vmatmul.msk.f32.gmra.mxu0 %vm17428_vm3, %v12347_v63  ;;  %v4339_v63 = vld [vmem:[#allocation2 + $0x4a] sm:$0xff] }
 0x115   : > { %v2706_v38 = vadd.f32 %v12471_v41, %v2636_v48 }
 0x116   : > { %v3040_v26 = vpop.f32.mrf.mxu3 }
 0x117   : > { %v12724_v16 = vadd.f32 %v3040_v26, %v2706_v38  ;;  %11331 = vmatmul.msk.f32.gmra.mxu1 %vm17428_vm3, %v4338_v53 }
 0x119   : > { %17601 = vst [vmem:[#allocation26_spill] sm:$0xff] %v12724_v16  ;;  %11185 = vmatmul.msk.f32.gmra.mxu2 %vm17428_vm3, %v4336_v31  ;;  %v12728_v21 = vpop.f32.mrf.mxu0 }
 0x11b   : > { %11234 = vmatmul.msk.f32.gmra.mxu3 %vm17428_vm3, %v12355_v6 }
 0x11c   : > { %v2639_v58 = vpop.f32.mrf.mxu2  ;;  %v12732_v9 = vpop.f32.mrf.mxu1  ;;  %11283 = vmatmul.msk.f32.gmra.mxu0 %vm17428_vm3, %v12363_v12  ;;  %v4340_v12 = vld [vmem:[#allocation2 + $0x52] sm:$0xff] }
 0x11d   : > { %v2707_v48 = vadd.f32 %v12471_v41, %v2639_v58 }
 0x11e   : > { %v3043_v38 = vpop.f32.mrf.mxu3 }
 0x11f   : > { %v12737_v26 = vadd.f32 %v3043_v38, %v2707_v48  ;;  %11332 = vmatmul.msk.f32.gmra.mxu1 %vm17428_vm3, %v4339_v63 }
 0x121   : > { %17602 = vst [vmem:[#allocation27_spill] sm:$0xff] %v12737_v26  ;;  %11186 = vmatmul.msk.f32.gmra.mxu2 %vm17428_vm3, %v4337_v42  ;;  %v12741_v31 = vpop.f32.mrf.mxu0 }
 0x123   : > { %11235 = vmatmul.msk.f32.gmra.mxu3 %vm17428_vm3, %v12371_v19 }
 0x124   : > { %v2642_v6 = vpop.f32.mrf.mxu2  ;;  %v12745_v16 = vpop.f32.mrf.mxu1  ;;  %11284 = vmatmul.msk.f32.gmra.mxu0 %vm17428_vm3, %v12379_v25  ;;  %v4341_v25 = vld [vmem:[#allocation2 + $0x5a] sm:$0xff] }
 0x125   : > { %v2708_v58 = vadd.f32 %v12471_v41, %v2642_v6 }
 0x126   : > { %v3046_v48 = vpop.f32.mrf.mxu3 }
 0x127   : > { %v12750_v38 = vadd.f32 %v3046_v48, %v2708_v58  ;;  %11333 = vmatmul.msk.f32.gmra.mxu1 %vm17428_vm3, %v4340_v12 }
 0x129   : > { %17603 = vst [vmem:[#allocation28_spill] sm:$0xff] %v12750_v38  ;;  %11187 = vmatmul.msk.f32.gmra.mxu2 %vm17428_vm3, %v4338_v53  ;;  %v12754_v42 = vpop.f32.mrf.mxu0 }
 0x12b   : > { %11236 = vmatmul.msk.f32.gmra.mxu3 %vm17428_vm3, %v12386_v32 }
 0x12c   : > { %v2645_v19 = vpop.f32.mrf.mxu2  ;;  %v12758_v26 = vpop.f32.mrf.mxu1  ;;  %11285 = vmatmul.msk.f32.gmra.mxu0 %vm17428_vm3, %v12395_v37  ;;  %v4342_v37 = vld [vmem:[#allocation2 + $0x62] sm:$0xff] }
 0x12d   : > { %v2709_v6 = vadd.f32 %v12471_v41, %v2645_v19 }
 0x12e   : > { %v3049_v58 = vpop.f32.mrf.mxu3 }
 0x12f   : > { %v12763_v48 = vadd.f32 %v3049_v58, %v2709_v6  ;;  %11334 = vmatmul.msk.f32.gmra.mxu1 %vm17428_vm3, %v4341_v25 }
 0x131   : > { %17604 = vst [vmem:[#allocation29_spill] sm:$0xff] %v12763_v48  ;;  %11188 = vmatmul.msk.f32.gmra.mxu2 %vm17428_vm3, %v4339_v63  ;;  %v12767_v53 = vpop.f32.mrf.mxu0 }
 0x133   : > { %11237 = vmatmul.msk.f32.gmra.mxu3 %vm17428_vm3, %v12403_v46 }
 0x134   : > { %v2648_v32 = vpop.f32.mrf.mxu2  ;;  %v12771_v38 = vpop.f32.mrf.mxu1  ;;  %11286 = vmatmul.msk.f32.gmra.mxu0 %vm17428_vm3, %v12411_v51  ;;  %v4343_v51 = vld [vmem:[#allocation2 + $0x6a] sm:$0xff] }
 0x135   : > { %v2710_v19 = vadd.f32 %v12471_v41, %v2648_v32 }
 0x136   : > { %v3052_v6 = vpop.f32.mrf.mxu3 }
 0x137   : > { %v12776_v58 = vadd.f32 %v3052_v6, %v2710_v19  ;;  %11335 = vmatmul.msk.f32.gmra.mxu1 %vm17428_vm3, %v4342_v37 }
 0x139   : > { %17605 = vst [vmem:[#allocation30_spill] sm:$0xff] %v12776_v58  ;;  %11189 = vmatmul.msk.f32.gmra.mxu2 %vm17428_vm3, %v4340_v12  ;;  %v12780_v63 = vpop.f32.mrf.mxu0 }
 0x13b   : > { %11238 = vmatmul.msk.f32.gmra.mxu3 %vm17428_vm3, %v12419_v59 }
 0x13c   : > { %v2651_v46 = vpop.f32.mrf.mxu2  ;;  %v12784_v48 = vpop.f32.mrf.mxu1  ;;  %11287 = vmatmul.msk.f32.gmra.mxu0 %vm17428_vm3, %v12427_v1  ;;  %v4344_v1 = vld [vmem:[#allocation2 + $0x72] sm:$0xff] }
 0x13d   : > { %v2711_v32 = vadd.f32 %v12471_v41, %v2651_v46 }
 0x13e   : > { %v3055_v19 = vpop.f32.mrf.mxu3 }
 0x13f   : > { %v12789_v6 = vadd.f32 %v3055_v19, %v2711_v32  ;;  %11336 = vmatmul.msk.f32.gmra.mxu1 %vm17428_vm3, %v4343_v51 }
 0x141   : > { %17606 = vst [vmem:[#allocation31_spill] sm:$0xff] %v12789_v6  ;;  %11190 = vmatmul.msk.f32.gmra.mxu2 %vm17428_vm3, %v4341_v25  ;;  %v12793_v12 = vpop.f32.mrf.mxu0 }
 0x143   : > { %11239 = vmatmul.msk.f32.gmra.mxu3 %vm17428_vm3, %v12434_v7 }
 0x144   : > { %v2654_v59 = vpop.f32.mrf.mxu2  ;;  %v12797_v58 = vpop.f32.mrf.mxu1  ;;  %11288 = vmatmul.msk.f32.gmra.mxu0 %vm17428_vm3, %v12443_v15  ;;  %v4345_v15 = vld [vmem:[#allocation2 + $0x7a] sm:$0xff] }
 0x145   : > { %v2712_v46 = vadd.f32 %v12471_v41, %v2654_v59 }
 0x146   : > { %v3058_v32 = vpop.f32.mrf.mxu3 }
 0x147   : > { %v12802_v19 = vadd.f32 %v3058_v32, %v2712_v46  ;;  %11337 = vmatmul.msk.f32.gmra.mxu1 %vm17428_vm3, %v4344_v1 }
 0x149   : > { %17607 = vst [vmem:[#allocation32_spill] sm:$0xff] %v12802_v19  ;;  %11191 = vmatmul.msk.f32.gmra.mxu2 %vm17428_vm3, %v4342_v37  ;;  %v12806_v25 = vpop.f32.mrf.mxu0 }
 0x14b   : > { %11240 = vmatmul.msk.f32.gmra.mxu3 %vm17428_vm3, %v12451_v27 }
 0x14c   : > { %v2657_v7 = vpop.f32.mrf.mxu2  ;;  %v12810_v6 = vpop.f32.mrf.mxu1  ;;  %11289 = vmatmul.msk.f32.gmra.mxu0 %vm17428_vm3, %v12459_v33  ;;  %v4346_v33 = vld [vmem:[#allocation2 + $0x82] sm:$0xff] }
 0x14d   : > { %v2713_v59 = vadd.f32 %v12471_v41, %v2657_v7 }
 0x14e   : > { %v3061_v46 = vpop.f32.mrf.mxu3 }
 0x14f   : > { %v12815_v32 = vadd.f32 %v3061_v46, %v2713_v59  ;;  %11338 = vmatmul.msk.f32.gmra.mxu1 %vm17428_vm3, %v4345_v15 }
 0x151   : > { %17608 = vst [vmem:[#allocation33_spill] sm:$0xff] %v12815_v32  ;;  %11192 = vmatmul.msk.f32.gmra.mxu2 %vm17428_vm3, %v4343_v51  ;;  %v12819_v37 = vpop.f32.mrf.mxu0 }
 0x153   : > { %11241 = vmatmul.msk.f32.gmra.mxu3 %vm17428_vm3, %v12475_v44 }
 0x154   : > { %v2660_v27 = vpop.f32.mrf.mxu2  ;;  %v12823_v19 = vpop.f32.mrf.mxu1  ;;  %11290 = vmatmul.msk.f32.gmra.mxu0 %vm17428_vm3, %v12485_v55  ;;  %v4347_v55 = vld [vmem:[#allocation2 + $0x8a] sm:$0xff] }
 0x155   : > { %v2714_v7 = vadd.f32 %v12471_v41, %v2660_v27 }
 0x156   : > { %v3064_v59 = vpop.f32.mrf.mxu3 }
 0x157   : > { %v12828_v46 = vadd.f32 %v3064_v59, %v2714_v7  ;;  %11339 = vmatmul.msk.f32.gmra.mxu1 %vm17428_vm3, %v4346_v33 }
 0x159   : > { %17609 = vst [vmem:[#allocation34_spill] sm:$0xff] %v12828_v46  ;;  %11193 = vmatmul.msk.f32.gmra.mxu2 %vm17428_vm3, %v4344_v1  ;;  %v12832_v51 = vpop.f32.mrf.mxu0 }
 0x15b   : > { %11242 = vmatmul.msk.f32.gmra.mxu3 %vm17428_vm3, %v12498_v4 }
 0x15c   : > { %v2663_v44 = vpop.f32.mrf.mxu2  ;;  %v12836_v32 = vpop.f32.mrf.mxu1  ;;  %11291 = vmatmul.msk.f32.gmra.mxu0 %vm17428_vm3, %v12509_v18  ;;  %v4348_v18 = vld [vmem:[#allocation2 + $0x92] sm:$0xff] }
 0x15d   : > { %v2715_v27 = vadd.f32 %v12471_v41, %v2663_v44 }
 0x15e   : > { %v3067_v7 = vpop.f32.mrf.mxu3 }
 0x15f   : > { %v12841_v59 = vadd.f32 %v3067_v7, %v2715_v27  ;;  %11340 = vmatmul.msk.f32.gmra.mxu1 %vm17428_vm3, %v4347_v55  ;;  %v2669_v7 = vadd.f32 %v12471_v41, %v12473_v43 }
 0x161   : > { %17610 = vst [vmem:[#allocation35_spill] sm:$0xff] %v12841_v59  ;;  %11194 = vmatmul.msk.f32.gmra.mxu2 %vm17428_vm3, %v4345_v15  ;;  %v12845_v1 = vpop.f32.mrf.mxu0  ;;  %v3073_v15 = vadd.f32 %v12481_v54, %v2669_v7 }
 0x162   : > { %17611 = vst [vmem:[#allocation36_spill] sm:$0xff] %v12845_v1 }
 0x163   : > { %11243 = vmatmul.msk.f32.gmra.mxu3 %vm17428_vm3, %v12527_v39 }
 0x164   : > { %v2666_v4 = vpop.f32.mrf.mxu2  ;;  %v12849_v46 = vpop.f32.mrf.mxu1  ;;  %11292 = vmatmul.msk.f32.gmra.mxu0 %vm17428_vm3, %v12539_v52 }
 0x165   : > { %17612 = vst [vmem:[#allocation37_spill] sm:$0xff] %v12849_v46  ;;  %v2716_v44 = vadd.f32 %v12471_v41, %v2666_v4  ;;  %v4349_v4 = vld [vmem:[#allocation2 + $0x9a] sm:$0xff] }
 0x166   : > { %v3070_v27 = vpop.f32.mrf.mxu3 }
 0x167   : > { %v12856_v59 = vadd.f32 %v3070_v27, %v2716_v44  ;;  %11341 = vmatmul.msk.f32.gmra.mxu1 %vm17428_vm3, %v4348_v18  ;;  %v2670_v44 = vadd.f32 %v12471_v41, %v12496_v3  ;;  %v4350_v3 = vld [vmem:[#allocation2 + $0xa2] sm:$0xff] }
 0x169   : > { %11195 = vmatmul.msk.f32.gmra.mxu2 %vm17428_vm3, %v4346_v33  ;;  %v4141_v39 = vpop.f32.mrf.mxu0 }
 0x16b   : > { %11244 = vmatmul.msk.f32.gmra.mxu3 %vm17428_vm3, %v12551_v8  ;;  %v3074_v8 = vadd.f32 %v12505_v17, %v2670_v44 }
 0x16c   : > { %v3333_v52 = vpop.f32.mrf.mxu2  ;;  %v4545_v46 = vpop.f32.mrf.mxu1  ;;  %11293 = vmatmul.msk.f32.gmra.mxu0 %vm17428_vm3, %v12558_v14 }
 0x16d   : > { %v3477_v1 = vadd.f32 %v3333_v52, %v3073_v15 }
 0x16e   : > { %v3737_v43 = vpop.f32.mrf.mxu3 }
 0x16f   : > { %v3881_v27 = vadd.f32 %v3737_v43, %v3477_v1  ;;  %11342 = vmatmul.msk.f32.gmra.mxu1 %vm17428_vm3, %v4349_v4 }
 0x171   : > { %v4285_v33 = vadd.f32 %v4141_v39, %v3881_v27  ;;  %11196 = vmatmul.msk.f32.gmra.mxu2 %vm17428_vm3, %v4347_v55  ;;  %v4144_v54 = vpop.f32.mrf.mxu0  ;;  %v2671_v39 = vadd.f32 %v12471_v41, %v12525_v36  ;;  %v4351_v36 = vld [vmem:[#allocation2 + $0xaa] sm:$0xff] }
 0x173   : > { %v12870_v7 = vadd.f32 %v4545_v46, %v4285_v33  ;;  %11245 = vmatmul.msk.f32.gmra.mxu3 %vm17428_vm3, %v12568_v40  ;;  %v3075_v40 = vadd.f32 %v12535_v50, %v2671_v39  ;;  %v2673_v39 = vadd.f32 %v12471_v41, %v12566_v34  ;;  %v4353_v34 = vld [vmem:[#allocation2 + $0xba] sm:$0xff] }
 0x174   : > { %v3336_v14 = vpop.f32.mrf.mxu2  ;;  %v4548_v15 = vpop.f32.mrf.mxu1  ;;  %11294 = vmatmul.msk.f32.gmra.mxu0 %vm17428_vm3, %v12582_v57 }
 0x175   : > { %v3478_v1 = vadd.f32 %v3336_v14, %v3074_v8 }
 0x176   : > { %v3740_v52 = vpop.f32.mrf.mxu3 }
 0x177   : > { %v3882_v55 = vadd.f32 %v3740_v52, %v3478_v1  ;;  %11343 = vmatmul.msk.f32.gmra.mxu1 %vm17428_vm3, %v4350_v3 }
 0x179   : > { %v4286_v17 = vadd.f32 %v4144_v54, %v3882_v55  ;;  %11197 = vmatmul.msk.f32.gmra.mxu2 %vm17428_vm3, %v4348_v18  ;;  %v4147_v46 = vpop.f32.mrf.mxu0  ;;  %v2672_v54 = vadd.f32 %v12471_v41, %v12549_v5  ;;  %v4352_v5 = vld [vmem:[#allocation2 + $0xb2] sm:$0xff] }
 0x17b   : > { %v12881_v43 = vadd.f32 %v4548_v15, %v4286_v17  ;;  %11246 = vmatmul.msk.f32.gmra.mxu3 %vm17428_vm3, %v12593_v23  ;;  %v3076_v23 = vadd.f32 %v12554_v13, %v2672_v54 }
 0x17c   : > { %v3339_v57 = vpop.f32.mrf.mxu2  ;;  %v4551_v44 = vpop.f32.mrf.mxu1  ;;  %11295 = vmatmul.msk.f32.gmra.mxu0 %vm17428_vm3, %v12606_v60 }
 0x17d   : > { %v3479_v27 = vadd.f32 %v3339_v57, %v3075_v40 }
 0x17e   : > { %v3743_v33 = vpop.f32.mrf.mxu3 }
 0x17f   : > { %v3883_v18 = vadd.f32 %v3743_v33, %v3479_v27  ;;  %11344 = vmatmul.msk.f32.gmra.mxu1 %vm17428_vm3, %v4351_v36 }
 0x181   : > { %v4287_v50 = vadd.f32 %v4147_v46, %v3883_v18  ;;  %11198 = vmatmul.msk.f32.gmra.mxu2 %vm17428_vm3, %v4349_v4  ;;  %v4150_v8 = vpop.f32.mrf.mxu0 }
 0x183   : > { %v12892_v14 = vadd.f32 %v4551_v44, %v4287_v50  ;;  %11247 = vmatmul.msk.f32.gmra.mxu3 %vm17428_vm3, %v12618_v0  ;;  %v3077_v0 = vadd.f32 %v12578_v56, %v2673_v39  ;;  %v2674_v44 = vadd.f32 %v12471_v41, %v12591_v22  ;;  %v3546_v56 = vld [vmem:[#allocation2 + $0xc0] sm:$0xff]  ;;  %v3951_v39 = vld [vmem:[#allocation2 + $0xc9] sm:$0xff] }
 0x184   : > { %v3342_v60 = vpop.f32.mrf.mxu2  ;;  %v4554_v15 = vpop.f32.mrf.mxu1  ;;  %11296 = vmatmul.msk.f32.gmra.mxu0 %vm17428_vm3, %v12625_v30  ;;  %v4354_v22 = vld [vmem:[#allocation2 + $0xc2] sm:$0xff] }
 0x185   : > { %v3480_v1 = vadd.f32 %v3342_v60, %v3076_v23  ;;  %v3078_v54 = vadd.f32 %v12602_v49, %v2674_v44  ;;  %v17613_v60 = vld [vmem:[#allocation13_spill] sm:$0xff]  ;;  %v17615_v44 = vld [vmem:[#allocation16_spill] sm:$0xff] }
 0x186   : > { %v3746_v52 = vpop.f32.mrf.mxu3 }
 0x187   : > { %v3884_v4 = vadd.f32 %v3746_v52, %v3480_v1  ;;  %11345 = vmatmul.msk.f32.gmra.mxu1 %vm17428_vm3, %v4352_v5 }
 0x189   : > { %v4288_v13 = vadd.f32 %v4150_v8, %v3884_v4  ;;  %11199 = vmatmul.msk.f32.gmra.mxu2 %vm17428_vm3, %v4350_v3  ;;  %v4153_v55 = vpop.f32.mrf.mxu0  ;;  %v17614_v4 = vld [vmem:[#allocation14_spill] sm:$0xff] }
 0x18b   : > { %v12903_v17 = vadd.f32 %v4554_v15, %v4288_v13  ;;  %11248 = vmatmul.msk.f32.gmra.mxu3 %vm17428_vm3, %v12635_v29  ;;  %v3950_v29 = vld [vmem:[#allocation2 + $0xc1] sm:$0xff]  ;;  %v2675_v15 = vadd.f32 %v12471_v41, %v17613_v60  ;;  %v4356_v60 = vld [vmem:[#allocation2 + $0xd2] sm:$0xff] }
 0x18c   : > { %v3345_v30 = vpop.f32.mrf.mxu2  ;;  %v4557_v46 = vpop.f32.mrf.mxu1  ;;  %11297 = vmatmul.msk.f32.gmra.mxu0 %vm17428_vm3, %v12642_v45 }
 0x18d   : > { %v3481_v40 = vadd.f32 %v3345_v30, %v3077_v0  ;;  %v3079_v13 = vadd.f32 %v17614_v4, %v2675_v15  ;;  %v3953_v4 = vld [vmem:[#allocation2 + $0xd9] sm:$0xff] }
 0x18e   : > { %v3749_v57 = vpop.f32.mrf.mxu3 }
 0x18f   : > { %v3885_v3 = vadd.f32 %v3749_v57, %v3481_v40  ;;  %11346 = vmatmul.msk.f32.gmra.mxu1 %vm17428_vm3, %v4353_v34 }
 0x191   : > { %v4289_v27 = vadd.f32 %v4153_v55, %v3885_v3  ;;  %11200 = vmatmul.msk.f32.gmra.mxu2 %vm17428_vm3, %v4351_v36  ;;  %v4156_v33 = vpop.f32.mrf.mxu0  ;;  %v3547_v36 = vld [vmem:[#allocation2 + $0xc8] sm:$0xff]  ;;  %v2676_v3 = vadd.f32 %v12471_v41, %v17615_v44 }
 0x193   : > { %v12914_v18 = vadd.f32 %v4557_v46, %v4289_v27  ;;  %11249 = vmatmul.msk.f32.gmra.mxu3 %vm17428_vm3, %v3546_v56  ;;  %v4355_v46 = vld [vmem:[#allocation2 + $0xca] sm:$0xff] }
 0x194   : > { %v3348_v45 = vpop.f32.mrf.mxu2  ;;  %v4560_v50 = vpop.f32.mrf.mxu1  ;;  %11298 = vmatmul.msk.f32.gmra.mxu0 %vm17428_vm3, %v3950_v29  ;;  %v3952_v29 = vld [vmem:[#allocation2 + $0xd1] sm:$0xff] }
 0x195   : > { %v3482_v8 = vadd.f32 %v3348_v45, %v3078_v54  ;;  %v17616_v54 = vld [vmem:[#allocation17_spill] sm:$0xff] }
 0x196   : > { %v3752_v23 = vpop.f32.mrf.mxu3  ;;  %v3080_v45 = vadd.f32 %v17616_v54, %v2676_v3  ;;  %v17620_v54 = vld [vmem:[#allocation21_spill] sm:$0xff] }
 0x197   : > { %v3886_v1 = vadd.f32 %v3752_v23, %v3482_v8  ;;  %11347 = vmatmul.msk.f32.gmra.mxu1 %vm17428_vm3, %v4354_v22 }
 0x199   : > { %v4290_v52 = vadd.f32 %v4156_v33, %v3886_v1  ;;  %11201 = vmatmul.msk.f32.gmra.mxu2 %vm17428_vm3, %v4352_v5  ;;  %v4159_v49 = vpop.f32.mrf.mxu0  ;;  %v3548_v5 = vld [vmem:[#allocation2 + $0xd0] sm:$0xff] }
 0x19b   : > { %v12923_v55 = vadd.f32 %v4560_v50, %v4290_v52  ;;  %11250 = vmatmul.msk.f32.gmra.mxu3 %vm17428_vm3, %v3547_v36  ;;  %v2677_v36 = vadd.f32 %v12471_v41, %v12650_v35  ;;  %v4357_v35 = vld [vmem:[#allocation2 + $0xda] sm:$0xff] }
 0x19c   : > { %v3351_v0 = vpop.f32.mrf.mxu2  ;;  %v4563_v30 = vpop.f32.mrf.mxu1  ;;  %11299 = vmatmul.msk.f32.gmra.mxu0 %vm17428_vm3, %v3951_v39 }
 0x19d   : > { %v3483_v40 = vadd.f32 %v3351_v0, %v3079_v13  ;;  %v17618_v13 = vld [vmem:[#allocation19_spill] sm:$0xff] }
 0x19e   : > { %v3755_v57 = vpop.f32.mrf.mxu3  ;;  %v3081_v0 = vadd.f32 %v17618_v13, %v2677_v36 }
 0x19f   : > { %v3887_v56 = vadd.f32 %v3755_v57, %v3483_v40  ;;  %11348 = vmatmul.msk.f32.gmra.mxu1 %vm17428_vm3, %v4355_v46 }
 0x1a1   : > { %v4291_v27 = vadd.f32 %v4159_v49, %v3887_v56  ;;  %11202 = vmatmul.msk.f32.gmra.mxu2 %vm17428_vm3, %v4353_v34  ;;  %v4162_v33 = vpop.f32.mrf.mxu0  ;;  %v3549_v34 = vld [vmem:[#allocation2 + $0xd8] sm:$0xff]  ;;  %v2678_v56 = vadd.f32 %v12471_v41, %v12663_v28  ;;  %v4358_v28 = vld [vmem:[#allocation2 + $0xe2] sm:$0xff] }
 0x1a3   : > { %v12932_v50 = vadd.f32 %v4563_v30, %v4291_v27  ;;  %11251 = vmatmul.msk.f32.gmra.mxu3 %vm17428_vm3, %v3548_v5 }
 0x1a4   : > { %v3354_v8 = vpop.f32.mrf.mxu2  ;;  %v4566_v23 = vpop.f32.mrf.mxu1  ;;  %11300 = vmatmul.msk.f32.gmra.mxu0 %vm17428_vm3, %v3952_v29  ;;  %v3954_v29 = vld [vmem:[#allocation2 + $0xe1] sm:$0xff] }
 0x1a5   : > { %17617 = vst [vmem:[#allocation13_spill] sm:$0xff] %v12932_v50  ;;  %v3484_v15 = vadd.f32 %v3354_v8, %v3080_v45  ;;  %v3082_v45 = vadd.f32 %v17620_v54, %v2678_v56  ;;  %v2680_v56 = vadd.f32 %v12471_v41, %v12689_v2 }
 0x1a6   : > { %v3758_v1 = vpop.f32.mrf.mxu3 }
 0x1a7   : > { %v3888_v52 = vadd.f32 %v3758_v1, %v3484_v15  ;;  %11349 = vmatmul.msk.f32.gmra.mxu1 %vm17428_vm3, %v4356_v60 }
 0x1a9   : > { %v4292_v49 = vadd.f32 %v4162_v33, %v3888_v52  ;;  %11203 = vmatmul.msk.f32.gmra.mxu2 %vm17428_vm3, %v4354_v22  ;;  %v4165_v39 = vpop.f32.mrf.mxu0  ;;  %v3550_v22 = vld [vmem:[#allocation2 + $0xe0] sm:$0xff]  ;;  %v2679_v52 = vadd.f32 %v12471_v41, %v12676_v24  ;;  %v4359_v24 = vld [vmem:[#allocation2 + $0xea] sm:$0xff]  ;;  %v4360_v41 = vld [vmem:[#allocation2 + $0xf2] sm:$0xff] }
 0x1ab   : > { %v12941_v30 = vadd.f32 %v4566_v23, %v4292_v49  ;;  %11252 = vmatmul.msk.f32.gmra.mxu3 %vm17428_vm3, %v3549_v34  ;;  %v3083_v13 = vadd.f32 %v12680_v47, %v2679_v52 }
 0x1ac   : > { %v3357_v40 = vpop.f32.mrf.mxu2  ;;  %v4569_v57 = vpop.f32.mrf.mxu1  ;;  %11301 = vmatmul.msk.f32.gmra.mxu0 %vm17428_vm3, %v3953_v4  ;;  %v3955_v4 = vld [vmem:[#allocation2 + $0xe9] sm:$0xff] }
 0x1ad   : > { %17619 = vst [vmem:[#allocation14_spill] sm:$0xff] %v12941_v30  ;;  %v3485_v44 = vadd.f32 %v3357_v40, %v3081_v0 }
 0x1ae   : > { %v3761_v3 = vpop.f32.mrf.mxu3 }
 0x1af   : > { %v3889_v5 = vadd.f32 %v3761_v3, %v3485_v44  ;;  %11350 = vmatmul.msk.f32.gmra.mxu1 %vm17428_vm3, %v4357_v35 }
 0x1b1   : > { %v4293_v27 = vadd.f32 %v4165_v39, %v3889_v5  ;;  %11204 = vmatmul.msk.f32.gmra.mxu2 %vm17428_vm3, %v4355_v46  ;;  %v4168_v33 = vpop.f32.mrf.mxu0  ;;  %v3551_v46 = vld [vmem:[#allocation2 + $0xe8] sm:$0xff] }
 0x1b3   : > { %v12950_v8 = vadd.f32 %v4569_v57, %v4293_v27  ;;  %11253 = vmatmul.msk.f32.gmra.mxu3 %vm17428_vm3, %v3550_v22  ;;  %v3956_v27 = vld [vmem:[#allocation2 + $0xf1] sm:$0xff] }
 0x1b4   : > { %v3360_v23 = vpop.f32.mrf.mxu2  ;;  %v4572_v15 = vpop.f32.mrf.mxu1  ;;  %11302 = vmatmul.msk.f32.gmra.mxu0 %vm17428_vm3, %v3954_v29 }
 0x1b5   : > { %17621 = vst [vmem:[#allocation16_spill] sm:$0xff] %v12950_v8  ;;  %v3486_v1 = vadd.f32 %v3360_v23, %v3082_v45 }
 0x1b6   : > { %v3764_v36 = vpop.f32.mrf.mxu3 }
 0x1b7   : > { %v3890_v34 = vadd.f32 %v3764_v36, %v3486_v1  ;;  %11351 = vmatmul.msk.f32.gmra.mxu1 %vm17428_vm3, %v4358_v28  ;;  %v3553_v1 = vld [vmem:[#allocation2 + $0xf8] sm:$0xff] }
 0x1b9   : > { %v4294_v49 = vadd.f32 %v4168_v33, %v3890_v34  ;;  %11205 = vmatmul.msk.f32.gmra.mxu2 %vm17428_vm3, %v4356_v60  ;;  %v4171_v39 = vpop.f32.mrf.mxu0  ;;  %v3552_v60 = vld [vmem:[#allocation2 + $0xf0] sm:$0xff]  ;;  %v3084_v33 = vadd.f32 %v12693_v10, %v2680_v56  ;;  %v3957_v34 = vld [vmem:[#allocation2 + $0xf9] sm:$0xff]  ;;  %v3958_v56 = vld [vmem:[#allocation2 + $0x101] sm:$0xff] }
 0x1bb   : > { %v12959_v0 = vadd.f32 %v4572_v15, %v4294_v49  ;;  %11254 = vmatmul.msk.f32.gmra.mxu3 %vm17428_vm3, %v3551_v46  ;;  %v12975_v15 = vld [vmem:[%s17351_s2] ss:$0 sm:$0xff] }
 0x1bc   : > { %v3363_v40 = vpop.f32.mrf.mxu2  ;;  %v4575_v57 = vpop.f32.mrf.mxu1  ;;  %11303 = vmatmul.msk.f32.gmra.mxu0 %vm17428_vm3, %v3955_v4 }
 0x1bd   : > { %17622 = vst [vmem:[#allocation17_spill] sm:$0xff] %v12959_v0  ;;  %v3487_v44 = vadd.f32 %v3363_v40, %v3083_v13 }
 0x1be   : > { %v3767_v3 = vpop.f32.mrf.mxu3 }
 0x1bf   : > { %v3891_v5 = vadd.f32 %v3767_v3, %v3487_v44  ;;  %11352 = vmatmul.msk.f32.gmra.mxu1 %vm17428_vm3, %v4359_v24 }
 0x1c1   : > { %v4295_v22 = vadd.f32 %v4171_v39, %v3891_v5  ;;  %11206 = vmatmul.msk.f32.gmra.mxu2 %vm17428_vm3, %v4357_v35  ;;  %v4174_v47 = vpop.f32.mrf.mxu0  ;;  %v2681_v35 = vadd.f32 %v12975_v15, %v12702_v62  ;;  %v4361_v62 = vld [vmem:[#allocation2 + $0xfa] sm:$0xff] }
 0x1c3   : > { %v12968_v29 = vadd.f32 %v4575_v57, %v4295_v22  ;;  %11255 = vmatmul.msk.f32.gmra.mxu3 %vm17428_vm3, %v3552_v60  ;;  %v3085_v46 = vadd.f32 %v12706_v61, %v2681_v35  ;;  %v2682_v57 = vadd.f32 %v12975_v15, %v12715_v11  ;;  %v4362_v11 = vld [vmem:[#allocation2 + $0x102] sm:$0xff] }
 0x1c4   : > { %v3366_v54 = vpop.f32.mrf.mxu2  ;;  %v4578_v45 = vpop.f32.mrf.mxu1  ;;  %11304 = vmatmul.msk.f32.gmra.mxu0 %vm17428_vm3, %v3956_v27 }
 0x1c5   : > { %17623 = vst [vmem:[#allocation19_spill] sm:$0xff] %v12968_v29  ;;  %v3488_v2 = vadd.f32 %v3366_v54, %v3084_v33  ;;  %v3086_v5 = vadd.f32 %v12719_v20, %v2682_v57  ;;  %v2683_v54 = vadd.f32 %v12975_v15, %v12728_v21  ;;  %v4363_v21 = vld [vmem:[#allocation2 + $0x10a] sm:$0xff] }
 0x1c6   : > { %v3770_v23 = vpop.f32.mrf.mxu3 }
 0x1c7   : > { %v3892_v10 = vadd.f32 %v3770_v23, %v3488_v2  ;;  %11353 = vmatmul.msk.f32.gmra.mxu1 %vm17428_vm3, %v4360_v41  ;;  %v3959_v23 = vld [vmem:[#allocation2 + $0x109] sm:$0xff]  ;;  %v3087_v35 = vadd.f32 %v12732_v9, %v2683_v54 }
 0x1c9   : > { %v4296_v36 = vadd.f32 %v4174_v47, %v3892_v10  ;;  %11207 = vmatmul.msk.f32.gmra.mxu2 %vm17428_vm3, %v4358_v28  ;;  %v4177_v52 = vpop.f32.mrf.mxu0  ;;  %v3554_v28 = vld [vmem:[#allocation2 + $0x100] sm:$0xff] }
 0x1cb   : > { %v12982_v49 = vadd.f32 %v4578_v45, %v4296_v36  ;;  %11256 = vmatmul.msk.f32.gmra.mxu3 %vm17428_vm3, %v3553_v1 }
 0x1cc   : > { %v3369_v39 = vpop.f32.mrf.mxu2  ;;  %v4581_v4 = vpop.f32.mrf.mxu1  ;;  %11305 = vmatmul.msk.f32.gmra.mxu0 %vm17428_vm3, %v3957_v34 }
 0x1cd   : > { %17624 = vst [vmem:[#allocation21_spill] sm:$0xff] %v12982_v49  ;;  %v3489_v13 = vadd.f32 %v3369_v39, %v3085_v46  ;;  %v2684_v46 = vadd.f32 %v12975_v15, %v12741_v31  ;;  %v4364_v31 = vld [vmem:[#allocation2 + $0x112] sm:$0xff] }
 0x1ce   : > { %v3773_v40 = vpop.f32.mrf.mxu3 }
 0x1cf   : > { %v3893_v44 = vadd.f32 %v3773_v40, %v3489_v13  ;;  %11354 = vmatmul.msk.f32.gmra.mxu1 %vm17428_vm3, %v4361_v62  ;;  %v3960_v13 = vld [vmem:[#allocation2 + $0x111] sm:$0xff]  ;;  %v3088_v40 = vadd.f32 %v12745_v16, %v2684_v46 }
 0x1d1   : > { %v4297_v3 = vadd.f32 %v4177_v52, %v3893_v44  ;;  %11208 = vmatmul.msk.f32.gmra.mxu2 %vm17428_vm3, %v4359_v24  ;;  %v4180_v61 = vpop.f32.mrf.mxu0  ;;  %v3555_v24 = vld [vmem:[#allocation2 + $0x108] sm:$0xff] }
 0x1d3   : > { %v12991_v60 = vadd.f32 %v4581_v4, %v4297_v3  ;;  %11257 = vmatmul.msk.f32.gmra.mxu3 %vm17428_vm3, %v3554_v28 }
 0x1d4   : > { %v3372_v22 = vpop.f32.mrf.mxu2  ;;  %v4584_v47 = vpop.f32.mrf.mxu1  ;;  %11306 = vmatmul.msk.f32.gmra.mxu0 %vm17428_vm3, %v3958_v56  ;;  %v2685_v56 = vadd.f32 %v12975_v15, %v12754_v42  ;;  %v4365_v42 = vld [vmem:[#allocation2 + $0x11a] sm:$0xff] }
 0x1d5   : > { %17625 = vst [vmem:[#allocation38_spill] sm:$0xff] %v12991_v60  ;;  %v3490_v27 = vadd.f32 %v3372_v22, %v3086_v5 }
 0x1d6   : > { %v3776_v33 = vpop.f32.mrf.mxu3 }
 0x1d7   : > { %v3894_v45 = vadd.f32 %v3776_v33, %v3490_v27  ;;  %11355 = vmatmul.msk.f32.gmra.mxu1 %vm17428_vm3, %v4362_v11  ;;  %v3089_v27 = vadd.f32 %v12758_v26, %v2685_v56 }
 0x1d9   : > { %v4298_v2 = vadd.f32 %v4180_v61, %v3894_v45  ;;  %11209 = vmatmul.msk.f32.gmra.mxu2 %vm17428_vm3, %v4360_v41  ;;  %v4183_v20 = vpop.f32.mrf.mxu0  ;;  %v3556_v41 = vld [vmem:[#allocation2 + $0x110] sm:$0xff] }
 0x1db   : > { %v13000_v10 = vadd.f32 %v4584_v47, %v4298_v2  ;;  %11258 = vmatmul.msk.f32.gmra.mxu3 %vm17428_vm3, %v3555_v24  ;;  %v3961_v47 = vld [vmem:[#allocation2 + $0x119] sm:$0xff] }
 0x1dc   : > { %v3375_v1 = vpop.f32.mrf.mxu2  ;;  %v4587_v36 = vpop.f32.mrf.mxu1  ;;  %11307 = vmatmul.msk.f32.gmra.mxu0 %vm17428_vm3, %v3959_v23 }
 0x1dd   : > { %17626 = vst [vmem:[#allocation39_spill] sm:$0xff] %v13000_v10  ;;  %v3491_v52 = vadd.f32 %v3375_v1, %v3087_v35  ;;  %v3962_v1 = vld [vmem:[#allocation2 + $0x121] sm:$0xff] }
 0x1de   : > { %v3779_v34 = vpop.f32.mrf.mxu3 }
 0x1df   : > { %v3895_v39 = vadd.f32 %v3779_v34, %v3491_v52  ;;  %11356 = vmatmul.msk.f32.gmra.mxu1 %vm17428_vm3, %v4363_v21 }
 0x1e1   : > { %v4299_v4 = vadd.f32 %v4183_v20, %v3895_v39  ;;  %11210 = vmatmul.msk.f32.gmra.mxu2 %vm17428_vm3, %v4361_v62  ;;  %v4186_v9 = vpop.f32.mrf.mxu0  ;;  %v3557_v62 = vld [vmem:[#allocation2 + $0x118] sm:$0xff]  ;;  %v2686_v20 = vadd.f32 %v12975_v15, %v12767_v53  ;;  %v4366_v53 = vld [vmem:[#allocation2 + $0x122] sm:$0xff] }
 0x1e3   : > { %v13009_v57 = vadd.f32 %v4587_v36, %v4299_v4  ;;  %11259 = vmatmul.msk.f32.gmra.mxu3 %vm17428_vm3, %v3556_v41  ;;  %v3090_v36 = vadd.f32 %v12771_v38, %v2686_v20  ;;  %v2687_v4 = vadd.f32 %v12975_v15, %v12780_v63  ;;  %v4367_v63 = vld [vmem:[#allocation2 + $0x12a] sm:$0xff] }
 0x1e4   : > { %v3378_v44 = vpop.f32.mrf.mxu2  ;;  %v4590_v28 = vpop.f32.mrf.mxu1  ;;  %11308 = vmatmul.msk.f32.gmra.mxu0 %vm17428_vm3, %v3960_v13 }
 0x1e5   : > { %17627 = vst [vmem:[#allocation40_spill] sm:$0xff] %v13009_v57  ;;  %v3492_v3 = vadd.f32 %v3378_v44, %v3088_v40  ;;  %v3963_v40 = vld [vmem:[#allocation2 + $0x129] sm:$0xff]  ;;  %v3091_v44 = vadd.f32 %v12784_v48, %v2687_v4  ;;  %v2690_v4 = vadd.f32 %v12975_v15, %v12819_v37 }
 0x1e6   : > { %v3782_v61 = vpop.f32.mrf.mxu3  ;;  %v4370_v37 = vld [vmem:[#allocation2 + $0x142] sm:$0xff] }
 0x1e7   : > { %v3896_v5 = vadd.f32 %v3782_v61, %v3492_v3  ;;  %11357 = vmatmul.msk.f32.gmra.mxu1 %vm17428_vm3, %v4364_v31 }
 0x1e9   : > { %v4300_v22 = vadd.f32 %v4186_v9, %v3896_v5  ;;  %11211 = vmatmul.msk.f32.gmra.mxu2 %vm17428_vm3, %v4362_v11  ;;  %v4189_v16 = vpop.f32.mrf.mxu0  ;;  %v3558_v11 = vld [vmem:[#allocation2 + $0x120] sm:$0xff] }
 0x1eb   : > { %v13018_v33 = vadd.f32 %v4590_v28, %v4300_v22  ;;  %11260 = vmatmul.msk.f32.gmra.mxu3 %vm17428_vm3, %v3557_v62  ;;  %v2688_v62 = vadd.f32 %v12975_v15, %v12793_v12  ;;  %v4368_v12 = vld [vmem:[#allocation2 + $0x132] sm:$0xff] }
 0x1ec   : > { %v3381_v54 = vpop.f32.mrf.mxu2  ;;  %v4593_v45 = vpop.f32.mrf.mxu1  ;;  %11309 = vmatmul.msk.f32.gmra.mxu0 %vm17428_vm3, %v3961_v47  ;;  %v3964_v47 = vld [vmem:[#allocation2 + $0x131] sm:$0xff] }
 0x1ed   : > { %17628 = vst [vmem:[#allocation41_spill] sm:$0xff] %v13018_v33  ;;  %v3493_v24 = vadd.f32 %v3381_v54, %v3089_v27  ;;  %v3092_v27 = vadd.f32 %v12797_v58, %v2688_v62 }
 0x1ee   : > { %v3785_v2 = vpop.f32.mrf.mxu3 }
 0x1ef   : > { %v3897_v23 = vadd.f32 %v3785_v2, %v3493_v24  ;;  %11358 = vmatmul.msk.f32.gmra.mxu1 %vm17428_vm3, %v4365_v42 }
 0x1f1   : > { %v4301_v35 = vadd.f32 %v4189_v16, %v3897_v23  ;;  %11212 = vmatmul.msk.f32.gmra.mxu2 %vm17428_vm3, %v4363_v21  ;;  %v4192_v26 = vpop.f32.mrf.mxu0  ;;  %v3559_v21 = vld [vmem:[#allocation2 + $0x128] sm:$0xff]  ;;  %v2689_v23 = vadd.f32 %v12975_v15, %v12806_v25  ;;  %v4369_v25 = vld [vmem:[#allocation2 + $0x13a] sm:$0xff] }
 0x1f3   : > { %v13027_v52 = vadd.f32 %v4593_v45, %v4301_v35  ;;  %11261 = vmatmul.msk.f32.gmra.mxu3 %vm17428_vm3, %v3558_v11 }
 0x1f4   : > { %v3384_v34 = vpop.f32.mrf.mxu2  ;;  %v4596_v46 = vpop.f32.mrf.mxu1  ;;  %11310 = vmatmul.msk.f32.gmra.mxu0 %vm17428_vm3, %v3962_v1  ;;  %v3093_v1 = vadd.f32 %v12810_v6, %v2689_v23 }
 0x1f5   : > { %17629 = vst [vmem:[#allocation42_spill] sm:$0xff] %v13027_v52  ;;  %v3494_v39 = vadd.f32 %v3384_v34, %v3090_v36 }
 0x1f6   : > { %v3788_v41 = vpop.f32.mrf.mxu3 }
 0x1f7   : > { %v3898_v9 = vadd.f32 %v3788_v41, %v3494_v39  ;;  %11359 = vmatmul.msk.f32.gmra.mxu1 %vm17428_vm3, %v4366_v53 }
 0x1f9   : > { %v4302_v13 = vadd.f32 %v4192_v26, %v3898_v9  ;;  %11213 = vmatmul.msk.f32.gmra.mxu2 %vm17428_vm3, %v4364_v31  ;;  %v4195_v38 = vpop.f32.mrf.mxu0  ;;  %v3560_v31 = vld [vmem:[#allocation2 + $0x130] sm:$0xff]  ;;  %v3965_v26 = vld [vmem:[#allocation2 + $0x139] sm:$0xff] }
 0x1fb   : > { %v13036_v28 = vadd.f32 %v4596_v46, %v4302_v13  ;;  %11262 = vmatmul.msk.f32.gmra.mxu3 %vm17428_vm3, %v3559_v21  ;;  %v3966_v13 = vld [vmem:[#allocation2 + $0x141] sm:$0xff] }
 0x1fc   : > { %v3387_v3 = vpop.f32.mrf.mxu2  ;;  %v4599_v61 = vpop.f32.mrf.mxu1  ;;  %11311 = vmatmul.msk.f32.gmra.mxu0 %vm17428_vm3, %v3963_v40 }
 0x1fd   : > { %17630 = vst [vmem:[#allocation43_spill] sm:$0xff] %v13036_v28  ;;  %v3495_v56 = vadd.f32 %v3387_v3, %v3091_v44 }
 0x1fe   : > { %v3791_v5 = vpop.f32.mrf.mxu3 }
 0x1ff   : > { %v3899_v22 = vadd.f32 %v3791_v5, %v3495_v56  ;;  %11360 = vmatmul.msk.f32.gmra.mxu1 %vm17428_vm3, %v4367_v63  ;;  %v2691_v5 = vadd.f32 %v12975_v15, %v12832_v51 }
 0x201   : > { %v4303_v16 = vadd.f32 %v4195_v38, %v3899_v22  ;;  %11214 = vmatmul.msk.f32.gmra.mxu2 %vm17428_vm3, %v4365_v42  ;;  %v4198_v48 = vpop.f32.mrf.mxu0  ;;  %v3561_v42 = vld [vmem:[#allocation2 + $0x138] sm:$0xff]  ;;  %v3094_v38 = vadd.f32 %v12823_v19, %v2690_v4 }
 0x203   : > { %v13045_v54 = vadd.f32 %v4599_v61, %v4303_v16  ;;  %11263 = vmatmul.msk.f32.gmra.mxu3 %vm17428_vm3, %v3560_v31  ;;  %v3967_v31 = vld [vmem:[#allocation2 + $0x149] sm:$0xff]  ;;  %v3095_v16 = vadd.f32 %v12836_v32, %v2691_v5  ;;  %v3566_v5 = vld [vmem:[#allocation2 + $0x160] sm:$0xff] }
 0x204   : > { %v3390_v45 = vpop.f32.mrf.mxu2  ;;  %v4602_v24 = vpop.f32.mrf.mxu1  ;;  %11312 = vmatmul.msk.f32.gmra.mxu0 %vm17428_vm3, %v3964_v47 }
 0x205   : > { %17631 = vst [vmem:[#allocation44_spill] sm:$0xff] %v13045_v54  ;;  %v3496_v2 = vadd.f32 %v3390_v45, %v3092_v27  ;;  %v4371_v27 = vld [vmem:[#allocation2 + $0x14a] sm:$0xff] }
 0x206   : > { %v3794_v20 = vpop.f32.mrf.mxu3 }
 0x207   : > { %v3900_v11 = vadd.f32 %v3794_v20, %v3496_v2  ;;  %11361 = vmatmul.msk.f32.gmra.mxu1 %vm17428_vm3, %v4368_v12  ;;  %v17635_v2 = vld [vmem:[#allocation36_spill] sm:$0xff] }
 0x208   : > { %v2692_v20 = vadd.f32 %v12975_v15, %v17635_v2 }
 0x209   : > { %v4304_v35 = vadd.f32 %v4198_v48, %v3900_v11  ;;  %11215 = vmatmul.msk.f32.gmra.mxu2 %vm17428_vm3, %v4366_v53  ;;  %v4201_v58 = vpop.f32.mrf.mxu0  ;;  %v3562_v53 = vld [vmem:[#allocation2 + $0x140] sm:$0xff] }
 0x20b   : > { %v13054_v36 = vadd.f32 %v4602_v24, %v4304_v35  ;;  %11264 = vmatmul.msk.f32.gmra.mxu3 %vm17428_vm3, %v3561_v42  ;;  %v3968_v42 = vld [vmem:[#allocation2 + $0x151] sm:$0xff] }
 0x20c   : > { %v3393_v34 = vpop.f32.mrf.mxu2  ;;  %v4605_v46 = vpop.f32.mrf.mxu1  ;;  %11313 = vmatmul.msk.f32.gmra.mxu0 %vm17428_vm3, %v3965_v26  ;;  %v17636_v35 = vld [vmem:[#allocation37_spill] sm:$0xff] }
 0x20d   : > { %17632 = vst [vmem:[#allocation45_spill] sm:$0xff] %v13054_v36  ;;  %v3497_v39 = vadd.f32 %v3393_v34, %v3093_v1  ;;  %v4372_v34 = vld [vmem:[#allocation2 + $0x152] sm:$0xff] }
 0x20e   : > { %v3797_v41 = vpop.f32.mrf.mxu3 }
 0x20f   : > { %v3901_v9 = vadd.f32 %v3797_v41, %v3497_v39  ;;  %11362 = vmatmul.msk.f32.gmra.mxu1 %vm17428_vm3, %v4369_v25 }
 0x211   : > { %v4305_v21 = vadd.f32 %v4201_v58, %v3901_v9  ;;  %11216 = vmatmul.msk.f32.gmra.mxu2 %vm17428_vm3, %v4367_v63  ;;  %v4204_v6 = vpop.f32.mrf.mxu0  ;;  %v3563_v63 = vld [vmem:[#allocation2 + $0x148] sm:$0xff]  ;;  %v3096_v58 = vadd.f32 %v17636_v35, %v2692_v20 }
 0x213   : > { %v13063_v40 = vadd.f32 %v4605_v46, %v4305_v21  ;;  %11265 = vmatmul.msk.f32.gmra.mxu3 %vm17428_vm3, %v3562_v53  ;;  %v3969_v53 = vld [vmem:[#allocation2 + $0x159] sm:$0xff] }
 0x214   : > { %v3396_v44 = vpop.f32.mrf.mxu2  ;;  %v4608_v3 = vpop.f32.mrf.mxu1  ;;  %11314 = vmatmul.msk.f32.gmra.mxu0 %vm17428_vm3, %v3966_v13  ;;  %v4373_v13 = vld [vmem:[#allocation2 + $0x15a] sm:$0xff] }
 0x215   : > { %17633 = vst [vmem:[#allocation46_spill] sm:$0xff] %v13063_v40  ;;  %v3498_v61 = vadd.f32 %v3396_v44, %v3094_v38  ;;  %v17639_v38 = vld [vmem:[#allocation6_spill] sm:$0xff] }
 0x216   : > { %v3800_v56 = vpop.f32.mrf.mxu3 }
 0x217   : > { %v3902_v62 = vadd.f32 %v3800_v56, %v3498_v61  ;;  %11363 = vmatmul.msk.f32.gmra.mxu1 %vm17428_vm3, %v4370_v37  ;;  %v2011_v56 = vld [vmem:[%s12174_s11 + $0xf8] sm:$0xff] }
 0x219   : > { %v4306_v22 = vadd.f32 %v4204_v6, %v3902_v62  ;;  %11217 = vmatmul.msk.f32.gmra.mxu2 %vm17428_vm3, %v4368_v12  ;;  %v4207_v19 = vpop.f32.mrf.mxu0  ;;  %v3564_v12 = vld [vmem:[#allocation2 + $0x150] sm:$0xff]  ;;  %v2123_v62 = vrot.slane %v2011_v56, 7 }
 0x21b   : > { %v13072_v48 = vadd.f32 %v4608_v3, %v4306_v22  ;;  %11266 = vmatmul.msk.f32.gmra.mxu3 %vm17428_vm3, %v3563_v63  ;;  %v3970_v22 = vld [vmem:[#allocation2 + $0x161] sm:$0xff] }
 0x21c   : > { %v3399_v47 = vpop.f32.mrf.mxu2  ;;  %11315 = vmatmul.msk.f32.gmra.mxu0 %vm17428_vm3, %v3967_v31  ;;  %v4611_v24 = vpop.f32.mrf.mxu1 }
 0x21d   : > { %17634 = vst [vmem:[#allocation47_spill] sm:$0xff] %v13072_v48  ;;  %v3499_v51 = vadd.f32 %v3399_v47, %v3095_v16 }
 0x21e   : > { %v3803_v45 = vpop.f32.mrf.mxu3 }
 0x21f   : > { %v3903_v23 = vadd.f32 %v3803_v45, %v3499_v51  ;;  %11364 = vmatmul.msk.f32.gmra.mxu1 %vm17428_vm3, %v4371_v27  ;;  %v4374_v51 = vld [vmem:[#allocation2 + $0x162] sm:$0xff] }
 0x220   : > { %v17642_v45 = vld [vmem:[#allocation7_spill] sm:$0xff] }
 0x221   : > { %v4307_v11 = vadd.f32 %v4207_v19, %v3903_v23  ;;  %11218 = vmatmul.msk.f32.gmra.mxu2 %vm17428_vm3, %v4369_v25  ;;  %v4210_v32 = vpop.f32.mrf.mxu0  ;;  %v3565_v25 = vld [vmem:[#allocation2 + $0x158] sm:$0xff]  ;;  %v17640_v19 = vld [vmem:[#allocation8_spill] sm:$0xff] }
 0x222   : > { %v17641_v31 = vrot.slane %v17640_v19, 7  ;;  %v3567_v23 = vld [vmem:[#allocation2 + $0x168] sm:$0xff]  ;;  %v17645_v19 = vld [vmem:[#allocation11_spill] sm:$0xff] }
 0x223   : > { %v13081_v26 = vadd.f32 %v4611_v24, %v4307_v11  ;;  %11267 = vmatmul.msk.f32.gmra.mxu3 %vm17428_vm3, %v3564_v12 }
 0x224   : > { %v3402_v1 = vpop.f32.mrf.mxu2  ;;  %11316 = vmatmul.msk.f32.gmra.mxu0 %vm17428_vm3, %v3968_v42  ;;  %v4614_v41 = vpop.f32.mrf.mxu1  ;;  %v2124_v16 = vsel %vm17376_vm2, %v17641_v31, %v2123_v62 }
 0x225   : > { %17637 = vst [vmem:[#allocation36_spill] sm:$0xff] %v13081_v26  ;;  %v3500_v15 = vadd.f32 %v3402_v1, %v3096_v58  ;;  %v4375_v1 = vld [vmem:[#allocation2 + $0x16a] sm:$0xff]  ;;  %v4747_v26 = vld [vmem:[#allocation2 + $0x80] sm:$0xff] }
 0x226   : > { %v3806_v46 = vpop.f32.mrf.mxu3  ;;  %2301 = vst.msk [vmem:[#allocation2 + $0x188] sm:$0xff] %vm17428_vm3, %v2124_v16 }
 0x227   : > { %v3904_v39 = vadd.f32 %v3806_v46, %v3500_v15  ;;  %11365 = vmatmul.msk.f32.gmra.mxu1 %vm17428_vm3, %v4372_v34  ;;  %v17643_v15 = vld [vmem:[#allocation9_spill] sm:$0xff] }
 0x229   : > { %v4308_v4 = vadd.f32 %v4210_v32, %v3904_v39  ;;  %11219 = vmatmul.msk.f32.gmra.mxu2 %vm17428_vm3, %v4370_v37  ;;  %v4213_v9 = vpop.f32.mrf.mxu0  ;;  %v3971_v32 = vld [vmem:[#allocation2 + $0x169] sm:$0xff] }
 0x22b   : > { %v13087_v21 = vadd.f32 %v4614_v41, %v4308_v4  ;;  %11268 = vmatmul.msk.f32.gmra.mxu3 %vm17428_vm3, %v3565_v25 }
 0x22c   : > { %v3405_v6 = vpop.f32.mrf.mxu2  ;;  %11317 = vmatmul.msk.f32.gmra.mxu0 %vm17428_vm3, %v3969_v53 }
 0x22d   : > { %17638 = vst [vmem:[#allocation37_spill] sm:$0xff] %v13087_v21  ;;  %v3501_v44 = vadd.f32 %v3405_v6, %v17639_v38  ;;  %v4376_v6 = vld [vmem:[#allocation2 + $0x172] sm:$0xff] }
 0x22e   : > { %v3809_v3 = vpop.f32.mrf.mxu3  ;;  %v17644_v38 = vld [vmem:[#allocation10_spill] sm:$0xff] }
 0x22f   : > { %v3905_v61 = vadd.f32 %v3809_v3, %v3501_v44  ;;  %11366 = vmatmul.msk.f32.gmra.mxu1 %vm17428_vm3, %v4373_v13 }
 0x231   : > { %v13094_v37 = vadd.f32 %v4213_v9, %v3905_v61  ;;  %11220 = vmatmul.msk.f32.gmra.mxu2 %vm17428_vm3, %v4371_v27  ;;  %v4216_v63 = vpop.f32.mrf.mxu0  ;;  %v2188_v27 = vrot.slane %v2011_v56, 5  ;;  %v3972_v9 = vld [vmem:[#allocation2 + $0x171] sm:$0xff] }
 0x232   : > { %v3569_v56 = vld [vmem:[#allocation2 + $0x178] sm:$0xff] }
 0x233   : > { %11269 = vmatmul.msk.f32.gmra.mxu3 %vm17428_vm3, %v3566_v5  ;;  %v2236_v42 = vsel %vm17376_vm2, %v2123_v62, %v2188_v27  ;;  %v3973_v62 = vld [vmem:[#allocation2 + $0x179] sm:$0xff]  ;;  %v4378_v27 = vld [vmem:[#allocation2 + $0x182] sm:$0xff] }
 0x234   : > { %v3408_v47 = vpop.f32.mrf.mxu2  ;;  %11318 = vmatmul.msk.f32.gmra.mxu0 %vm17428_vm3, %v3970_v22  ;;  %v2253_v35 = vsel %vm17375_vm4, %v2236_v42, 0.0  ;;  %v4377_v22 = vld [vmem:[#allocation2 + $0x17a] sm:$0xff] }
 0x235   : > { %v3502_v24 = vadd.f32 %v3408_v47, %v17642_v45  ;;  %2302 = vst.msk [vmem:[#allocation2 + $0x190] sm:$0xff] %vm17428_vm3, %v2253_v35  ;;  %v3570_v45 = vld [vmem:[#allocation2 + $0x180] sm:$0xff]  ;;  %v3571_v35 = vld [vmem:[#allocation2 + $0x188] sm:$0xff] }
 0x236   : > { %v3812_v2 = vpop.f32.mrf.mxu3 }
 0x237   : > { %v3906_v20 = vadd.f32 %v3812_v2, %v3502_v24  ;;  %11367 = vmatmul.msk.f32.gmra.mxu1 %vm17428_vm3, %v4374_v51  ;;  %v3974_v2 = vld [vmem:[#allocation2 + $0x181] sm:$0xff] }
 0x239   : > { %v13105_v12 = vadd.f32 %v4216_v63, %v3906_v20  ;;  %11221 = vmatmul.msk.f32.gmra.mxu2 %vm17428_vm3, %v4372_v34  ;;  %v4219_v11 = vpop.f32.mrf.mxu0  ;;  %v3568_v34 = vld [vmem:[#allocation2 + $0x170] sm:$0xff] }
 0x23b   : > { %11270 = vmatmul.msk.f32.gmra.mxu3 %vm17428_vm3, %v3567_v23  ;;  %v17646_v23 = vld [vmem:[#allocation12_spill] sm:$0xff] }
 0x23c   : > { %v3411_v58 = vpop.f32.mrf.mxu2  ;;  %11319 = vmatmul.msk.f32.gmra.mxu0 %vm17428_vm3, %v3971_v32 }
 0x23d   : > { %v3503_v46 = vadd.f32 %v3411_v58, %v17643_v15  ;;  %v3975_v15 = vld [vmem:[#allocation2 + $0x189] sm:$0xff] }
 0x23e   : > { %v3815_v39 = vpop.f32.mrf.mxu3 }
 0x23f   : > { %v3907_v41 = vadd.f32 %v3815_v39, %v3503_v46  ;;  %11368 = vmatmul.msk.f32.gmra.mxu1 %vm17428_vm3, %v4375_v1  ;;  %v13139_v46 = vpop.f32.mrf.mxu1 }
 0x241   : > { %v13115_v25 = vadd.f32 %v4219_v11, %v3907_v41  ;;  %11222 = vmatmul.msk.f32.gmra.mxu2 %vm17428_vm3, %v4373_v13  ;;  %v4222_v4 = vpop.f32.mrf.mxu0  ;;  %v4379_v41 = vld [vmem:[#allocation2 + $0x18a] sm:$0xff] }
 0x243   : > { %11271 = vmatmul.msk.f32.gmra.mxu3 %vm17428_vm3, %v3568_v34  ;;  %v17647_v34 = vld [vmem:[#allocation15_spill] sm:$0xff] }
 0x244   : > { %v3414_v53 = vpop.f32.mrf.mxu2  ;;  %11320 = vmatmul.msk.f32.gmra.mxu0 %vm17428_vm3, %v3972_v9 }
 0x245   : > { %v3504_v44 = vadd.f32 %v3414_v53, %v17644_v38  ;;  %v3572_v38 = vld [vmem:[#allocation2 + $0x190] sm:$0xff] }
 0x246   : > { %v3818_v3 = vpop.f32.mrf.mxu3 }
 0x247   : > { %v3908_v61 = vadd.f32 %v3818_v3, %v3504_v44  ;;  %11369 = vmatmul.msk.f32.gmra.mxu1 %vm17428_vm3, %v4376_v6  ;;  %v3976_v3 = vld [vmem:[#allocation2 + $0x191] sm:$0xff] }
 0x249   : > { %v13122_v5 = vadd.f32 %v4222_v4, %v3908_v61  ;;  %11223 = vmatmul.msk.f32.gmra.mxu2 %vm17428_vm3, %v4374_v51  ;;  %v4225_v13 = vpop.f32.mrf.mxu0  ;;  %v13149_v61 = vpop.f32.mrf.mxu1 }
 0x24b   : > { %11272 = vmatmul.msk.f32.gmra.mxu3 %vm17428_vm3, %v3569_v56 }
 0x24c   : > { %v3417_v63 = vpop.f32.mrf.mxu2  ;;  %11321 = vmatmul.msk.f32.gmra.mxu0 %vm17428_vm3, %v3973_v62  ;;  %v17648_v62 = vld [vmem:[#allocation18_spill] sm:$0xff] }
 0x24d   : > { %v3505_v31 = vadd.f32 %v3417_v63, %v17645_v19 }
 0x24e   : > { %v3821_v16 = vpop.f32.mrf.mxu3 }
 0x24f   : > { %v3909_v47 = vadd.f32 %v3821_v16, %v3505_v31  ;;  %11370 = vmatmul.msk.f32.gmra.mxu1 %vm17428_vm3, %v4377_v22  ;;  %v4737_v31 = vld [vmem:[#allocation2 + $0x30] sm:$0xff] }
 0x251   : > { %v13129_v24 = vadd.f32 %v4225_v13, %v3909_v47  ;;  %11224 = vmatmul.msk.f32.gmra.mxu2 %vm17428_vm3, %v4375_v1  ;;  %v4228_v51 = vpop.f32.mrf.mxu0  ;;  %v4380_v13 = vld [vmem:[#allocation2 + $0x192] sm:$0xff] }
 0x252   : > { %v5141_v47 = vld [vmem:[#allocation2 + $0x31] sm:$0xff] }
 0x253   : > { %11273 = vmatmul.msk.f32.gmra.mxu3 %vm17428_vm3, %v3570_v45 }
 0x254   : > { %v3420_v20 = vpop.f32.mrf.mxu2  ;;  %11322 = vmatmul.msk.f32.gmra.mxu0 %vm17428_vm3, %v3974_v2 }
 0x255   : > { %v3506_v11 = vadd.f32 %v3420_v20, %v17646_v23  ;;  %v17649_v20 = vld [vmem:[#allocation20_spill] sm:$0xff]  ;;  %v13160_v23 = vpop.f32.mrf.mxu1 }
 0x256   : > { %v3824_v32 = vpop.f32.mrf.mxu3 }
 0x257   : > { %v3910_v42 = vadd.f32 %v3824_v32, %v3506_v11  ;;  %11371 = vmatmul.msk.f32.gmra.mxu1 %vm17428_vm3, %v4378_v27  ;;  %v4738_v32 = vld [vmem:[#allocation2 + $0x38] sm:$0xff] }
 0x259   : > { %v13136_v58 = vadd.f32 %v4228_v51, %v3910_v42  ;;  %11225 = vmatmul.msk.f32.gmra.mxu2 %vm17428_vm3, %v4376_v6  ;;  %v4231_v1 = vpop.f32.mrf.mxu0  ;;  %v5545_v51 = vld [vmem:[#allocation2 + $0x32] sm:$0xff] }
 0x25b   : > { %11274 = vmatmul.msk.f32.gmra.mxu3 %vm17428_vm3, %v3571_v35  ;;  %v5142_v35 = vld [vmem:[#allocation2 + $0x39] sm:$0xff] }
 0x25c   : > { %v3423_v39 = vpop.f32.mrf.mxu2  ;;  %11323 = vmatmul.msk.f32.gmra.mxu0 %vm17428_vm3, %v3975_v15 }
 0x25d   : > { %v3507_v4 = vadd.f32 %v3423_v39, %v17647_v34  ;;  %v5546_v39 = vld [vmem:[#allocation2 + $0x3a] sm:$0xff] }
 0x25e   : > { %v3827_v9 = vpop.f32.mrf.mxu3  ;;  %v17650_v34 = vld [vmem:[#allocation22_spill] sm:$0xff] }
 0x25f   : > { %v3911_v53 = vadd.f32 %v3827_v9, %v3507_v4  ;;  %11372 = vmatmul.msk.f32.gmra.mxu1 %vm17428_vm3, %v4379_v41 }
 0x261   : > { %v13145_v44 = vadd.f32 %v4231_v1, %v3911_v53  ;;  %11226 = vmatmul.msk.f32.gmra.mxu2 %vm17428_vm3, %v4377_v22  ;;  %v4234_v6 = vpop.f32.mrf.mxu0  ;;  %v4739_v53 = vld [vmem:[#allocation2 + $0x40] sm:$0xff] }
 0x263   : > { %11275 = vmatmul.msk.f32.gmra.mxu3 %vm17428_vm3, %v3572_v38 }
 0x264   : > { %v3426_v56 = vpop.f32.mrf.mxu2  ;;  %11324 = vmatmul.msk.f32.gmra.mxu0 %vm17428_vm3, %v3976_v3  ;;  %v5143_v3 = vld [vmem:[#allocation2 + $0x41] sm:$0xff] }
 0x265   : > { %v3508_v63 = vadd.f32 %v3426_v56, %v17648_v62  ;;  %v5547_v62 = vld [vmem:[#allocation2 + $0x42] sm:$0xff] }
 0x266   : > { %v3830_v19 = vpop.f32.mrf.mxu3 }
 0x267   : > { %v3912_v16 = vadd.f32 %v3830_v19, %v3508_v63  ;;  %11373 = vmatmul.msk.f32.gmra.mxu1 %vm17428_vm3, %v4380_v13  ;;  %v17651_v19 = vld [vmem:[#allocation23_spill] sm:$0xff] }
 0x269   : > { %v13154_v45 = vadd.f32 %v4234_v6, %v3912_v16  ;;  %11375 = vmatmul.msk.f32.vlgmr.msra.gmra.mxu2 %vm17428_vm3, %v4737_v31  ;;  %v4237_v22 = vpop.f32.mrf.mxu0  ;;  %v13168_v6 = vpop.f32.mrf.mxu1 }
 0x26b   : > { %11424 = vmatmul.msk.f32.vlgmr.msra.gmra.mxu3 %vm17428_vm3, %v5141_v47  ;;  %v4740_v47 = vld [vmem:[#allocation2 + $0x48] sm:$0xff] }
 0x26c   : > { %v3429_v2 = vpop.f32.mrf.mxu2  ;;  %11473 = vmatmul.msk.f32.vlgmr.msra.gmra.mxu0 %vm17428_vm3, %v5545_v51  ;;  %v5144_v51 = vld [vmem:[#allocation2 + $0x49] sm:$0xff] }
 0x26d   : > { %v3509_v27 = vadd.f32 %v3429_v2, %v17649_v20 }
 0x26e   : > { %v3833_v11 = vpop.f32.mrf.mxu3 }
 0x26f   : > { %v3913_v42 = vadd.f32 %v3833_v11, %v3509_v27  ;;  %v5548_v27 = vld [vmem:[#allocation2 + $0x4a] sm:$0xff] }
 0x271   : > { %v13162_v1 = vadd.f32 %v4237_v22, %v3913_v42  ;;  %11376 = vmatmul.msk.f32.gmra.mxu2 %vm17428_vm3, %v4738_v32  ;;  %v4240_v15 = vpop.f32.mrf.mxu0  ;;  %v13179_v11 = vpop.f32.mrf.mxu1  ;;  %v17652_v42 = vld [vmem:[#allocation24_spill] sm:$0xff] }
 0x273   : > { %11425 = vmatmul.msk.f32.gmra.mxu3 %vm17428_vm3, %v5142_v35 }
 0x274   : > { %v3432_v41 = vpop.f32.mrf.mxu2  ;;  %11474 = vmatmul.msk.f32.gmra.mxu0 %vm17428_vm3, %v5546_v39  ;;  %v4741_v39 = vld [vmem:[#allocation2 + $0x50] sm:$0xff] }
 0x275   : > { %v3510_v4 = vadd.f32 %v3432_v41, %v17650_v34  ;;  %v5145_v34 = vld [vmem:[#allocation2 + $0x51] sm:$0xff] }
 0x276   : > { %v3836_v9 = vpop.f32.mrf.mxu3 }
 0x277   : > { %v3914_v38 = vadd.f32 %v3836_v9, %v3510_v4 }
 0x279   : > { %v13170_v56 = vadd.f32 %v4240_v15, %v3914_v38  ;;  %11377 = vmatmul.msk.f32.gmra.mxu2 %vm17428_vm3, %v4739_v53  ;;  %v4243_v13 = vpop.f32.mrf.mxu0  ;;  %v5549_v53 = vld [vmem:[#allocation2 + $0x52] sm:$0xff]  ;;  %v13188_v38 = vpop.f32.mrf.mxu1 }
 0x27b   : > { %11426 = vmatmul.msk.f32.gmra.mxu3 %vm17428_vm3, %v5143_v3 }
 0x27c   : > { %v3435_v63 = vpop.f32.mrf.mxu2  ;;  %11475 = vmatmul.msk.f32.gmra.mxu0 %vm17428_vm3, %v5547_v62 }
 0x27d   : > { %v3511_v31 = vadd.f32 %v3435_v63, %v17651_v19  ;;  %v4742_v19 = vld [vmem:[#allocation2 + $0x58] sm:$0xff] }
 0x27e   : > { %v3839_v16 = vpop.f32.mrf.mxu3 }
 0x27f   : > { %v3915_v22 = vadd.f32 %v3839_v16, %v3511_v31  ;;  %v5146_v16 = vld [vmem:[#allocation2 + $0x59] sm:$0xff] }
 0x281   : > { %v13176_v2 = vadd.f32 %v4243_v13, %v3915_v22  ;;  %11378 = vmatmul.msk.f32.gmra.mxu2 %vm17428_vm3, %v4740_v47  ;;  %v4246_v20 = vpop.f32.mrf.mxu0  ;;  %v17653_v13 = vld [vmem:[#allocation25_spill] sm:$0xff] }
 0x283   : > { %11427 = vmatmul.msk.f32.gmra.mxu3 %vm17428_vm3, %v5144_v51  ;;  %v5550_v51 = vld [vmem:[#allocation2 + $0x5a] sm:$0xff] }
 0x284   : > { %v3438_v32 = vpop.f32.mrf.mxu2  ;;  %11476 = vmatmul.msk.f32.gmra.mxu0 %vm17428_vm3, %v5548_v27  ;;  %v17654_v27 = vld [vmem:[#allocation26_spill] sm:$0xff] }
 0x285   : > { %v3512_v35 = vadd.f32 %v3438_v32, %v17652_v42  ;;  %v13198_v42 = vpop.f32.mrf.mxu1 }
 0x286   : > { %v3842_v15 = vpop.f32.mrf.mxu3 }
 0x287   : > { %v3916_v41 = vadd.f32 %v3842_v15, %v3512_v35  ;;  %v4743_v15 = vld [vmem:[#allocation2 + $0x60] sm:$0xff] }
 0x289   : > { %v13184_v4 = vadd.f32 %v4246_v20, %v3916_v41  ;;  %11379 = vmatmul.msk.f32.gmra.mxu2 %vm17428_vm3, %v4741_v39  ;;  %v4249_v9 = vpop.f32.mrf.mxu0  ;;  %v5147_v41 = vld [vmem:[#allocation2 + $0x61] sm:$0xff] }
 0x28b   : > { %11428 = vmatmul.msk.f32.gmra.mxu3 %vm17428_vm3, %v5145_v34 }
 0x28c   : > { %v3441_v3 = vpop.f32.mrf.mxu2  ;;  %11477 = vmatmul.msk.f32.gmra.mxu0 %vm17428_vm3, %v5549_v53  ;;  %v5551_v53 = vld [vmem:[#allocation2 + $0x62] sm:$0xff] }
 0x28d   : > { %v3513_v62 = vadd.f32 %v3441_v3, %v17653_v13  ;;  %v17655_v13 = vld [vmem:[#allocation27_spill] sm:$0xff] }
 0x28e   : > { %v3845_v63 = vpop.f32.mrf.mxu3 }
 0x28f   : > { %v3917_v31 = vadd.f32 %v3845_v63, %v3513_v62 }
 0x291   : > { %v13192_v47 = vadd.f32 %v4249_v9, %v3917_v31  ;;  %11380 = vmatmul.msk.f32.gmra.mxu2 %vm17428_vm3, %v4742_v19  ;;  %v4252_v22 = vpop.f32.mrf.mxu0  ;;  %v4744_v19 = vld [vmem:[#allocation2 + $0x68] sm:$0xff] }
 0x293   : > { %11429 = vmatmul.msk.f32.gmra.mxu3 %vm17428_vm3, %v5146_v16  ;;  %v13206_v16 = vpop.f32.mrf.mxu1 }
 0x294   : > { %v3444_v20 = vpop.f32.mrf.mxu2  ;;  %11478 = vmatmul.msk.f32.gmra.mxu0 %vm17428_vm3, %v5550_v51  ;;  %v5148_v51 = vld [vmem:[#allocation2 + $0x69] sm:$0xff] }
 0x295   : > { %v3514_v32 = vadd.f32 %v3444_v20, %v17654_v27  ;;  %v5552_v27 = vld [vmem:[#allocation2 + $0x6a] sm:$0xff] }
 0x296   : > { %v3848_v35 = vpop.f32.mrf.mxu3 }
 0x297   : > { %v3918_v39 = vadd.f32 %v3848_v35, %v3514_v32  ;;  %v17656_v35 = vld [vmem:[#allocation28_spill] sm:$0xff] }
 0x299   : > { %v13200_v34 = vadd.f32 %v4252_v22, %v3918_v39  ;;  %11381 = vmatmul.msk.f32.gmra.mxu2 %vm17428_vm3, %v4743_v15  ;;  %v4255_v9 = vpop.f32.mrf.mxu0 }
 0x29b   : > { %11430 = vmatmul.msk.f32.gmra.mxu3 %vm17428_vm3, %v5147_v41  ;;  %v4745_v41 = vld [vmem:[#allocation2 + $0x70] sm:$0xff] }
 0x29c   : > { %v3447_v3 = vpop.f32.mrf.mxu2  ;;  %11479 = vmatmul.msk.f32.gmra.mxu0 %vm17428_vm3, %v5551_v53 }
 0x29d   : > { %v3515_v62 = vadd.f32 %v3447_v3, %v17655_v13  ;;  %v5149_v3 = vld [vmem:[#allocation2 + $0x71] sm:$0xff] }
 0x29e   : > { %v3851_v63 = vpop.f32.mrf.mxu3 }
 0x29f   : > { %v3919_v31 = vadd.f32 %v3851_v63, %v3515_v62  ;;  %v5553_v62 = vld [vmem:[#allocation2 + $0x72] sm:$0xff]  ;;  %v13217_v63 = vpop.f32.mrf.mxu1 }
 0x2a1   : > { %v13208_v20 = vadd.f32 %v4255_v9, %v3919_v31  ;;  %11382 = vmatmul.msk.f32.gmra.mxu2 %vm17428_vm3, %v4744_v19  ;;  %v4258_v22 = vpop.f32.mrf.mxu0  ;;  %v17658_v31 = vld [vmem:[#allocation29_spill] sm:$0xff] }
 0x2a3   : > { %11431 = vmatmul.msk.f32.gmra.mxu3 %vm17428_vm3, %v5148_v51 }
 0x2a4   : > { %v3450_v32 = vpop.f32.mrf.mxu2  ;;  %11480 = vmatmul.msk.f32.gmra.mxu0 %vm17428_vm3, %v5552_v27 }
 0x2a5   : > { %v3516_v15 = vadd.f32 %v3450_v32, %v17656_v35  ;;  %v4746_v32 = vld [vmem:[#allocation2 + $0x78] sm:$0xff] }
 0x2a6   : > { %v3854_v39 = vpop.f32.mrf.mxu3 }
 0x2a7   : > { %v3920_v53 = vadd.f32 %v3854_v39, %v3516_v15  ;;  %v5150_v15 = vld [vmem:[#allocation2 + $0x79] sm:$0xff] }
 0x2a9   : > { %v13214_v13 = vadd.f32 %v4258_v22, %v3920_v53  ;;  %11383 = vmatmul.msk.f32.gmra.mxu2 %vm17428_vm3, %v4745_v41  ;;  %v4261_v9 = vpop.f32.mrf.mxu0  ;;  %v5554_v41 = vld [vmem:[#allocation2 + $0x7a] sm:$0xff]  ;;  %v13226_v53 = vpop.f32.mrf.mxu1 }
 0x2ab   : > { %17657 = vst [vmem:[#allocation6_spill] sm:$0xff] %v13214_v13  ;;  %11432 = vmatmul.msk.f32.gmra.mxu3 %vm17428_vm3, %v5149_v3  ;;  %v5152_v13 = vld [vmem:[#allocation2 + $0x89] sm:$0xff] }
 0x2ac   : > { %v3453_v19 = vpop.f32.mrf.mxu2  ;;  %11481 = vmatmul.msk.f32.gmra.mxu0 %vm17428_vm3, %v5553_v62  ;;  %v17660_v62 = vld [vmem:[#allocation30_spill] sm:$0xff] }
 0x2ad   : > { %v3517_v51 = vadd.f32 %v3453_v19, %v17658_v31  ;;  %v251_v19 = vlaneseq }
 0x2ae   : > { %v3857_v27 = vpop.f32.mrf.mxu3 }
 0x2af   : > { %v3921_v35 = vadd.f32 %v3857_v27, %v3517_v51  ;;  %v13230_v27 = vshrl.u32 %v251_v19, 7 }
 0x2b1   : > { %v13222_v39 = vadd.f32 %v4261_v9, %v3921_v35  ;;  %11384 = vmatmul.msk.f32.gmra.mxu2 %vm17428_vm3, %v4746_v32  ;;  %v4264_v22 = vpop.f32.mrf.mxu0  ;;  %v5151_v9 = vld [vmem:[#allocation2 + $0x81] sm:$0xff]  ;;  %v13246_v28 = vadd.s32 8, %v13230_v27  ;;  %v13262_v60 = vadd.s32 16, %v13230_v27 }
 0x2b3   : > { %17659 = vst [vmem:[#allocation8_spill] sm:$0xff] %v13222_v39  ;;  %11433 = vmatmul.msk.f32.gmra.mxu3 %vm17428_vm3, %v5150_v15  ;;  %v5555_v15 = vld [vmem:[#allocation2 + $0x82] sm:$0xff]  ;;  %v303_v39 = vand.u32 65535, %v13230_v27 }
 0x2b4   : > { %v3456_v3 = vpop.f32.mrf.mxu2  ;;  %11482 = vmatmul.msk.f32.gmra.mxu0 %vm17428_vm3, %v5554_v41  ;;  %v304_v41 = vshrl.u32 %v13230_v27, 16 }
 0x2b5   : > { %v3518_v21 = vadd.f32 %v3456_v3, %v17660_v62  ;;  %v307_v3 = vmul.u32 43690, %v303_v39 }
 0x2b6   : > { %v3860_v31 = vpop.f32.mrf.mxu3  ;;  %v13240_v48 = vmul.u32 43691, %v304_v41  ;;  %v309_v36 = vmul.u32 43690, %v304_v41  ;;  %v332_v41 = vand.u32 65535, %v13246_v28 }
 0x2b7   : > { %v3922_v51 = vadd.f32 %v3860_v31, %v3518_v21  ;;  %v17662_v21 = vld [vmem:[#allocation31_spill] sm:$0xff]  ;;  %v306_v31 = vmul.u32 43691, %v303_v39 }
 0x2b9   : > { %v13232_v35 = vadd.f32 %v4264_v22, %v3922_v51  ;;  %11385 = vmatmul.msk.f32.gmra.mxu2 %vm17428_vm3, %v4747_v26  ;;  %v4267_v32 = vpop.f32.mrf.mxu0  ;;  %v310_v22 = vshll.u32 %v307_v3, 16  ;;  %v13242_v51 = vpop.f32.mrf.mxu1 }
 0x2bb   : > { %17661 = vst [vmem:[#allocation7_spill] sm:$0xff] %v13232_v35  ;;  %11434 = vmatmul.msk.f32.gmra.mxu3 %vm17428_vm3, %v5151_v9  ;;  %v4748_v35 = vld [vmem:[#allocation2 + $0x88] sm:$0xff]  ;;  %v312_v9 = vshll.u32 %v13240_v48, 16  ;;  %vm314_vm5 = vc.u32 %v306_v31, %v310_v22  ;;  %v316_v54 = vadd.s32 %v310_v22, %v306_v31  ;;  %v333_v31 = vshrl.u32 %v13246_v28, 16 }
 0x2bc   : > { %v3459_v62 = vpop.f32.mrf.mxu2  ;;  %11483 = vmatmul.msk.f32.gmra.mxu0 %vm17428_vm3, %v5555_v15 }
 0x2bd   : > { %v3519_v19 = vadd.f32 %v3459_v62, %v17662_v21  ;;  %v5556_v62 = vld [vmem:[#allocation2 + $0x8a] sm:$0xff]  ;;  %v17357_v21 = vmov 0   ;;  %vm318_vm6 = vc.u32 %v316_v54, %v312_v9  ;;  %v311_v54 = vshrl.u32 %v307_v3, 16  ;;  %v5557_v3 = vld [vmem:[#allocation2 + $0x92] sm:$0xff] }
 0x2be   : > { %v3863_v26 = vpop.f32.mrf.mxu3  ;;  %v315_v52 = vsel %vm314_vm5, 1, %v17357_v21 }
 0x2bf   : > { %v3923_v40 = vadd.f32 %v3863_v26, %v3519_v19  ;;  %v317_v33 = vadd.s32 %v315_v52, %v309_v36  ;;  %v319_v19 = vsel %vm318_vm6, 1, %v17357_v21  ;;  %v335_v26 = vmul.u32 43691, %v332_v41  ;;  %v4749_v52 = vld [vmem:[#allocation2 + $0x90] sm:$0xff] }
 0x2c1   : > { %v13248_v15 = vadd.f32 %v4267_v32, %v3923_v40  ;;  %11386 = vmatmul.msk.f32.gmra.mxu2 %vm17428_vm3, %v4748_v35  ;;  %v4270_v39 = vpop.f32.mrf.mxu0  ;;  %v336_v40 = vmul.u32 43690, %v332_v41  ;;  %v17664_v35 = vld [vmem:[#allocation32_spill] sm:$0xff]  ;;  %v321_v36 = vadd.s32 %v319_v19, %v317_v33  ;;  %v13264_v49 = vpop.f32.mrf.mxu1  ;;  %v17666_v33 = vmov 0  }
 0x2c3   : > { %17663 = vst [vmem:[#allocation9_spill] sm:$0xff] %v13248_v15  ;;  %11435 = vmatmul.msk.f32.gmra.mxu3 %vm17428_vm3, %v5152_v13  ;;  %v13258_v15 = vmul.u32 43691, %v333_v31  ;;  %v339_v9 = vshll.u32 %v336_v40, 16  ;;  %v338_v13 = vmul.u32 43690, %v333_v31  ;;  %v313_v31 = vshrl.u32 %v13240_v48, 16 }
 0x2c4   : > { %v3462_v22 = vpop.f32.mrf.mxu2  ;;  %11484 = vmatmul.msk.f32.gmra.mxu0 %vm17428_vm3, %v5556_v62  ;;  %v5153_v62 = vld [vmem:[#allocation2 + $0x91] sm:$0xff]  ;;  %v340_v0 = vshrl.u32 %v336_v40, 16 }
 0x2c5   : > { %v3520_v32 = vadd.f32 %v3462_v22, %v17664_v35  ;;  %v341_v21 = vshll.u32 %v13258_v15, 16  ;;  %vm343_vm7 = vc.u32 %v335_v26, %v339_v9  ;;  %v345_v22 = vadd.s32 %v339_v9, %v335_v26 }
 0x2c6   : > { %v3866_v57 = vpop.f32.mrf.mxu3  ;;  %v344_v19 = vsel %vm343_vm7, 1, %v17666_v33 }
 0x2c7   : > { %v3924_v10 = vadd.f32 %v3866_v57, %v3520_v32  ;;  %v361_v57 = vand.u32 65535, %v13262_v60  ;;  %v322_v32 = vadd.s32 %v321_v36, %v311_v54  ;;  %v346_v29 = vadd.s32 %v344_v19, %v338_v13  ;;  %v4750_v54 = vld [vmem:[#allocation2 + $0x98] sm:$0xff] }
 0x2c8   : > { %vm347_vm8 = vc.u32 %v345_v22, %v341_v21  ;;  %v342_v36 = vshrl.u32 %v13258_v15, 16  ;;  %v13281_v19 = vadd.s32 24, %v13230_v27 }
 0x2c9   : > { %v13266_v41 = vadd.f32 %v4270_v39, %v3924_v10  ;;  %11387 = vmatmul.msk.f32.gmra.mxu2 %vm17428_vm3, %v4749_v52  ;;  %v4273_v35 = vpop.f32.mrf.mxu0  ;;  %v348_v26 = vsel %vm347_vm8, 1, %v17666_v33  ;;  %v362_v10 = vshrl.u32 %v13262_v60, 16  ;;  %v365_v9 = vmul.u32 43690, %v361_v57 }
 0x2ca   : > { %v350_v52 = vadd.s32 %v348_v26, %v346_v29  ;;  %v364_v30 = vmul.u32 43691, %v361_v57  ;;  %v323_v21 = vadd.s32 %v322_v32, %v313_v31  ;;  %v13285_v29 = vadd.f32 %v13139_v46, %v13094_v37 }
 0x2cb   : > { %17665 = vst [vmem:[#allocation10_spill] sm:$0xff] %v13266_v41  ;;  %11436 = vmatmul.msk.f32.gmra.mxu3 %vm17428_vm3, %v5153_v62  ;;  %v17667_v41 = vld [vmem:[#allocation33_spill] sm:$0xff]  ;;  %v13277_v50 = vmul.u32 43691, %v362_v10  ;;  %v368_v40 = vshll.u32 %v365_v9, 16  ;;  %v367_v22 = vmul.u32 43690, %v362_v10  ;;  %v390_v32 = vand.u32 65535, %v13281_v19 }
 0x2cc   : > { %v3465_v39 = vpop.f32.mrf.mxu2  ;;  %11485 = vmatmul.msk.f32.gmra.mxu0 %vm17428_vm3, %v5557_v3  ;;  %v351_v62 = vadd.s32 %v350_v52, %v340_v0  ;;  %v5154_v3 = vld [vmem:[#allocation2 + $0x99] sm:$0xff]  ;;  %v13298_v37 = vadd.f32 %v13160_v23, %v13115_v25  ;;  %v13306_v46 = vadd.f32 %v13179_v11, %v13129_v24  ;;  %v324_v25 = vshrl.u32 %v323_v21, 4 }
 0x2cd   : > { %v3521_v8 = vadd.f32 %v3465_v39, %v17667_v41  ;;  %v13289_v41 = vadd.f32 %v13149_v61, %v13105_v12  ;;  %v370_v57 = vshll.u32 %v13277_v50, 16  ;;  %v5558_v0 = vld [vmem:[#allocation2 + $0x9a] sm:$0xff]  ;;  %vm372_vm9 = vc.u32 %v364_v30, %v368_v40  ;;  %v13308_v61 = vpop.f32.mrf.mxu1 }
 0x2ce   : > { %v3869_v48 = vpop.f32.mrf.mxu3  ;;  %v374_v15 = vadd.s32 %v368_v40, %v364_v30  ;;  %v13302_v12 = vadd.f32 %v13168_v6, %v13122_v5  ;;  %v13313_v30 = vadd.f32 %v13188_v38, %v13136_v58  ;;  %v352_v23 = vadd.s32 %v351_v62, %v342_v36  ;;  %v17668_v39 = vld [vmem:[#allocation34_spill] sm:$0xff] }
 0x2cf   : > { %v3925_v13 = vadd.f32 %v3869_v48, %v3521_v8  ;;  %v369_v5 = vshrl.u32 %v365_v9, 16  ;;  %v391_v24 = vshrl.u32 %v13281_v19, 16  ;;  %v394_v6 = vmul.u32 43690, %v390_v32 }
 0x2d0   : > { %vm376_vm10 = vc.u32 %v374_v15, %v370_v57  ;;  %v13320_v11 = vadd.f32 %v13198_v42, %v13145_v44  ;;  %v393_v52 = vmul.u32 43691, %v390_v32  ;;  %v371_v21 = vshrl.u32 %v13277_v50, 16  ;;  %v5155_v57 = vld [vmem:[#allocation2 + $0xa1] sm:$0xff] }
 0x2d1   : > { %v13292_v31 = vadd.f32 %v4273_v35, %v3925_v13  ;;  %11388 = vmatmul.msk.f32.gmra.mxu2 %vm17428_vm3, %v4750_v54  ;;  %v4276_v8 = vpop.f32.mrf.mxu0  ;;  %v373_v35 = vsel %vm372_vm9, 1, %v17666_v33  ;;  %v377_v38 = vsel %vm376_vm10, 1, %v17666_v33  ;;  %v4751_v54 = vld [vmem:[#allocation2 + $0xa0] sm:$0xff]  ;;  %v13325_v40 = vmul.u32 43691, %v391_v24 }
 0x2d2   : > { %v375_v26 = vadd.s32 %v373_v35, %v367_v22  ;;  %v397_v9 = vshll.u32 %v394_v6, 16  ;;  %v353_v62 = vshrl.u32 %v352_v23, 4  ;;  %v396_v22 = vmul.u32 43690, %v391_v24  ;;  %v5559_v35 = vld [vmem:[#allocation2 + $0xa2] sm:$0xff] }
 0x2d3   : > { %11437 = vmatmul.msk.f32.gmra.mxu3 %vm17428_vm3, %v5154_v3  ;;  %v13328_v3 = vadd.s32 32, %v13230_v27  ;;  %v13332_v44 = vadd.f32 %v13206_v16, %v13154_v45  ;;  %v13336_v42 = vadd.f32 %v13217_v63, %v13162_v1  ;;  %v325_v50 = vmul.u32 24, %v324_v25 }
 0x2d4   : > { %v3468_v10 = vpop.f32.mrf.mxu2  ;;  %11486 = vmatmul.msk.f32.gmra.mxu0 %vm17428_vm3, %v5558_v0  ;;  %v379_v36 = vadd.s32 %v377_v38, %v375_v26  ;;  %v399_v23 = vshll.u32 %v13325_v40, 16  ;;  %vm401_vm11 = vc.u32 %v393_v52, %v397_v9  ;;  %v403_v26 = vadd.s32 %v397_v9, %v393_v52 }
 0x2d5   : > { %v3522_v58 = vadd.f32 %v3468_v10, %v17668_v39  ;;  %v13344_v45 = vadd.f32 %v13226_v53, %v13170_v56  ;;  %v402_v1 = vsel %vm401_vm11, 1, %v17666_v33  ;;  %v419_v63 = vand.u32 65535, %v13328_v3  ;;  %v13357_v24 = vpop.f32.mrf.mxu1 }
 0x2d6   : > { %v3872_v48 = vpop.f32.mrf.mxu3  ;;  %v380_v0 = vadd.s32 %v379_v36, %v369_v5  ;;  %v13354_v25 = vadd.f32 %v13264_v49, %v13184_v4  ;;  %v354_v10 = vmul.u32 24, %v353_v62  ;;  %v404_v5 = vadd.s32 %v402_v1, %v396_v22 }
 0x2d7   : > { %v3926_v13 = vadd.f32 %v3872_v48, %v3522_v58  ;;  %v398_v53 = vshrl.u32 %v394_v6, 16  ;;  %vm405_vm12 = vc.u32 %v403_v26, %v399_v23  ;;  %v420_v39 = vshrl.u32 %v13328_v3, 16  ;;  %v4752_v48 = vld [vmem:[#allocation2 + $0xa8] sm:$0xff] }
 0x2d8   : > { %v381_v16 = vadd.s32 %v380_v0, %v371_v21  ;;  %v423_v58 = vmul.u32 43690, %v419_v63  ;;  %v13363_v38 = vsub.s32 %v13230_v27, %v325_v50  ;;  %v406_v49 = vsel %vm405_vm12, 1, %v17666_v33 }
 0x2d9   : > { %v13338_v15 = vadd.f32 %v4276_v8, %v3926_v13  ;;  %11389 = vmatmul.msk.f32.gmra.mxu2 %vm17428_vm3, %v4751_v54  ;;  %v4279_v32 = vpop.f32.mrf.mxu0  ;;  %v13350_v8 = vadd.f32 %v13242_v51, %v13176_v2  ;;  %v17669_v2 = vld [vmem:[#allocation35_spill] sm:$0xff]  ;;  %v422_v4 = vmul.u32 43691, %v419_v63  ;;  %v408_v21 = vadd.s32 %v406_v49, %v404_v5 }
 0x2da   : > { %v382_v54 = vshrl.u32 %v381_v16, 4  ;;  %v424_v36 = vmul.u32 43691, %v420_v39  ;;  %v426_v9 = vshll.u32 %v423_v58, 16  ;;  %v400_v6 = vshrl.u32 %v13325_v40, 16  ;;  %v5560_v16 = vld [vmem:[#allocation2 + $0xaa] sm:$0xff] }
 0x2db   : > { %11438 = vmatmul.msk.f32.gmra.mxu3 %vm17428_vm3, %v5155_v57  ;;  %v425_v62 = vmul.u32 43690, %v420_v39  ;;  %v13368_v22 = vadd.s32 40, %v13230_v27  ;;  %v5156_v57 = vld [vmem:[#allocation2 + $0xa9] sm:$0xff]  ;;  %v13371_v50 = vsub.s32 %v13246_v28, %v354_v10  ;;  %v409_v0 = vadd.s32 %v408_v21, %v398_v53 }
 0x2dc   : > { %v3471_v56 = vpop.f32.mrf.mxu2  ;;  %11487 = vmatmul.msk.f32.gmra.mxu0 %vm17428_vm3, %v5559_v35  ;;  %v428_v35 = vshll.u32 %v424_v36, 16  ;;  %vm430_vm13 = vc.u32 %v422_v4, %v426_v9  ;;  %vm1692_vm14 = vcmp.ne.s32.totalorder %v13363_v38, 0  ;;  %v432_v1 = vadd.s32 %v426_v9, %v422_v4 }
 0x2dd   : > { %v3523_v51 = vadd.f32 %v3471_v56, %v17669_v2  ;;  %v431_v40 = vsel %vm430_vm13, 1, %v17666_v33  ;;  %vm1740_vm15 = vcmp.lt.s32.totalorder %v13363_v38, 0  ;;  %v13380_v63 = vadd.s32 24, %v13363_v38 }
 0x2de   : > { %v3875_v52 = vpop.f32.mrf.mxu3  ;;  %v383_v28 = vmul.u32 24, %v382_v54  ;;  %v448_v10 = vand.u32 65535, %v13368_v22  ;;  %v427_v5 = vshrl.u32 %v423_v58, 16  ;;  %v433_v56 = vadd.s32 %v431_v40, %v425_v62  ;;  %v4753_v54 = vld [vmem:[#allocation2 + $0xb0] sm:$0xff]  ;;  %vm13397_vm7 = vmand %vm1740_vm15, %vm1692_vm14 }
 0x2df   : > { %v3927_v13 = vadd.f32 %v3875_v52, %v3523_v51  ;;  %vm434_vm0 = vc.u32 %v432_v1, %v428_v35  ;;  %vm1693_vm5 = vcmp.ne.s32.totalorder %v13371_v50, 0  ;;  %vm1741_vm6 = vcmp.lt.s32.totalorder %v13371_v50, 0  ;;  %v4659_v52 = vpop.f32.mrf.mxu1  ;;  %v5157_v40 = vld [vmem:[#allocation2 + $0xb1] sm:$0xff] }
 0x2e0   : > { %v435_v39 = vsel %vm434_vm0, 1, %v17666_v33  ;;  %v449_v2 = vshrl.u32 %v13368_v22, 16  ;;  %v13391_v49 = vadd.s32 24, %v13371_v50  ;;  %v429_v4 = vshrl.u32 %v424_v36, 16  ;;  %vm13410_vm8 = vmand %vm1741_vm6, %vm1693_vm5 }
 0x2e1   : > { %v13373_v23 = vadd.f32 %v4279_v32, %v3927_v13  ;;  %11390 = vmatmul.msk.f32.gmra.mxu2 %vm17428_vm3, %v4752_v48  ;;  %v4282_v26 = vpop.f32.mrf.mxu0  ;;  %v410_v32 = vadd.s32 %v409_v0, %v400_v6  ;;  %v437_v58 = vadd.s32 %v435_v39, %v433_v56  ;;  %v13402_v9 = vsub.s32 %v13262_v60, %v383_v28 }
 0x2e2   : > { %v452_v13 = vmul.u32 43690, %v448_v10  ;;  %v13404_v6 = vmul.u32 43691, %v449_v2  ;;  %v13415_v35 = vadd.s32 48, %v13230_v27  ;;  %v13419_v60 = vadd.f32 %v13308_v61, %v13192_v47 }
 0x2e3   : > { %11439 = vmatmul.msk.f32.gmra.mxu3 %vm17428_vm3, %v5156_v57  ;;  %v411_v57 = vshrl.u32 %v410_v32, 4  ;;  %v438_v0 = vadd.s32 %v437_v58, %v427_v5  ;;  %v454_v1 = vmul.u32 43690, %v449_v2  ;;  %v1884_v47 = vsel %vm13397_vm7, %v13380_v63, %v13363_v38  ;;  %v5561_v32 = vld [vmem:[#allocation2 + $0xb2] sm:$0xff] }
 0x2e4   : > { %v3474_v53 = vpop.f32.mrf.mxu2  ;;  %11488 = vmatmul.msk.f32.gmra.mxu0 %vm17428_vm3, %v5560_v16  ;;  %v13423_v16 = vadd.f32 %v13357_v24, %v13200_v34  ;;  %v455_v28 = vshll.u32 %v452_v13, 16  ;;  %v1885_v34 = vsel %vm13410_vm8, %v13391_v49, %v13371_v50  ;;  %v477_v24 = vand.u32 65535, %v13415_v35 }
 0x2e5   : > { %v3524_v51 = vadd.f32 %v3474_v53, %v12856_v59  ;;  %v451_v59 = vmul.u32 43691, %v448_v10  ;;  %v13426_v10 = vadd.f32 %v4659_v52, %v13208_v20  ;;  %v439_v5 = vadd.s32 %v438_v0, %v429_v4  ;;  %v5158_v0 = vld [vmem:[#allocation2 + $0xb9] sm:$0xff] }
 0x2e6   : > { %v3878_v48 = vpop.f32.mrf.mxu3  ;;  %v457_v20 = vshll.u32 %v13404_v6, 16  ;;  %vm1694_vm10 = vcmp.ne.s32.totalorder %v13402_v9, 0  ;;  %vm1742_vm11 = vcmp.lt.s32.totalorder %v13402_v9, 0  ;;  %v478_v2 = vshrl.u32 %v13415_v35, 16 }
 0x2e7   : > { %v3928_v36 = vadd.f32 %v3878_v48, %v3524_v51  ;;  %vm459_vm9 = vc.u32 %v451_v59, %v455_v28  ;;  %v440_v53 = vshrl.u32 %v439_v5, 4  ;;  %v461_v39 = vadd.s32 %v455_v28, %v451_v59  ;;  %v4754_v48 = vld [vmem:[#allocation2 + $0xb8] sm:$0xff]  ;;  %vm13464_vm13 = vmand %vm1742_vm11, %vm1694_vm10 }
 0x2e8   : > { %v460_v38 = vsel %vm459_vm9, 1, %v17666_v33  ;;  %v13449_v49 = vadd.s32 24, %v13402_v9  ;;  %v456_v58 = vshrl.u32 %v452_v13, 16  ;;  %v13451_v21 = vmul.u32 43690, %v477_v24 }
 0x2e9   : > { %v13428_v56 = vadd.f32 %v4282_v26, %v3928_v36  ;;  %11391 = vmatmul.msk.f32.gmra.mxu2 %vm17428_vm3, %v4753_v54  ;;  %v5757_v61 = vpop.f32.mrf.mxu0  ;;  %v412_v26 = vmul.u32 24, %v411_v57  ;;  %v462_v50 = vadd.s32 %v460_v38, %v454_v1  ;;  %v441_v4 = vmul.u32 24, %v440_v53 }
 0x2ea   : > { %vm463_vm12 = vc.u32 %v461_v39, %v457_v20  ;;  %v480_v54 = vmul.u32 43691, %v477_v24  ;;  %v13453_v36 = vmul.u32 43691, %v478_v2  ;;  %v458_v57 = vshrl.u32 %v13404_v6, 16  ;;  %v5562_v20 = vld [vmem:[#allocation2 + $0xba] sm:$0xff] }
 0x2eb   : > { %11440 = vmatmul.msk.f32.gmra.mxu3 %vm17428_vm3, %v5157_v40  ;;  %v13456_v59 = vsub.s32 %v13281_v19, %v412_v26  ;;  %v13469_v40 = vsub.s32 %v13328_v3, %v441_v4  ;;  %v484_v19 = vshll.u32 %v13451_v21, 16  ;;  %v13473_v28 = vadd.s32 56, %v13230_v27  ;;  %v4755_v4 = vld [vmem:[#allocation2 + $0xc0] sm:$0xff] }
 0x2ec   : > { %v4949_v63 = vpop.f32.mrf.mxu2  ;;  %11489 = vmatmul.msk.f32.gmra.mxu0 %vm17428_vm3, %v5561_v32  ;;  %vm13475_vm14 = vcmp.lt.s32.totalorder %v1884_v47, 16  ;;  %v17676_v6 = vmov 0  ;;  %vm13482_vm15 = vcmp.lt.s32.totalorder %v1885_v34, 16  ;;  %v17679_v5 = vmov 0 }
 0x2ed   : > { %v5093_v51 = vadd.f32 %v4949_v63, %v12870_v7  ;;  %v464_v7 = vsel %vm463_vm12, 1, %v17666_v33  ;;  %v17677_v6 = vsel %vm13475_vm14, 4294967295, %v17676_v6  ;;  %v17680_v5 = vsel %vm13482_vm15, 4294967295, %v17679_v5 }
 0x2ee   : > { %v5353_v52 = vpop.f32.mrf.mxu3  ;;  %v466_v1 = vadd.s32 %v464_v7, %v462_v50  ;;  %17678 = vst [vmem:[#allocation11_spill] sm:$0xff] %v17677_v6  ;;  %v483_v24 = vmul.u32 43690, %v478_v2  ;;  %v486_v53 = vshll.u32 %v13453_v36, 16  ;;  %vm488_vm0 = vc.u32 %v480_v54, %v484_v19 }
 0x2ef   : > { %v5497_v62 = vadd.f32 %v5353_v52, %v5093_v51  ;;  %17681 = vst [vmem:[#allocation12_spill] sm:$0xff] %v17680_v5  ;;  %v490_v38 = vadd.s32 %v484_v19, %v480_v54  ;;  %v1886_v47 = vsel %vm13464_vm13, %v13449_v49, %v13402_v9  ;;  %vm1695_vm5 = vcmp.ne.s32.totalorder %v13456_v59, 0  ;;  %v4757_v5 = vld [vmem:[#allocation2 + $0xd0] sm:$0xff] }
 0x2f0   : > { %v467_v26 = vadd.s32 %v466_v1, %v456_v58  ;;  %vm1743_vm6 = vcmp.lt.s32.totalorder %v13456_v59, 0  ;;  %v1839_v63 = vadd.s32 24, %v13456_v59  ;;  %vm1696_vm7 = vcmp.ne.s32.totalorder %v13469_v40, 0 }
 0x2f1   : > { %v13479_v32 = vadd.f32 %v5757_v61, %v5497_v62  ;;  %11392 = vmatmul.msk.f32.gmra.mxu2 %vm17428_vm3, %v4754_v48  ;;  %v5760_v3 = vpop.f32.mrf.mxu0  ;;  %v506_v61 = vand.u32 65535, %v13473_v28  ;;  %v489_v50 = vsel %vm488_vm0, 1, %v17666_v33  ;;  %vm1744_vm8 = vcmp.lt.s32.totalorder %v13469_v40, 0  ;;  %vm13509_vm10 = vmand %vm1743_vm6, %vm1695_vm5 }
 0x2f2   : > { %v468_v39 = vadd.s32 %v467_v26, %v458_v57  ;;  %v491_v51 = vadd.s32 %v489_v50, %v483_v24  ;;  %v485_v52 = vshrl.u32 %v13451_v21, 16  ;;  %vm492_vm9 = vc.u32 %v490_v38, %v486_v53  ;;  %v5563_v26 = vld [vmem:[#allocation2 + $0xc2] sm:$0xff]  ;;  %vm13529_vm11 = vmand %vm1744_vm8, %vm1696_vm7 }
 0x2f3   : > { %11441 = vmatmul.msk.f32.gmra.mxu3 %vm17428_vm3, %v5158_v0  ;;  %v6194_v2 = vmul.f32 %v13479_v32, %v13479_v32  ;;  %v507_v48 = vshrl.u32 %v13473_v28, 16  ;;  %v509_v57 = vmul.u32 43691, %v506_v61  ;;  %v13514_v7 = vmul.u32 43690, %v506_v61  ;;  %v5159_v0 = vld [vmem:[#allocation2 + $0xc1] sm:$0xff] }
 0x2f4   : > { %v4952_v34 = vpop.f32.mrf.mxu2  ;;  %11490 = vmatmul.msk.f32.gmra.mxu0 %vm17428_vm3, %v5562_v20  ;;  %v469_v58 = vshrl.u32 %v468_v39, 4  ;;  %v6045_v21 = vsel %vm13475_vm14, %v13479_v32, 0.0  ;;  %v13520_v13 = vadd.s32 24, %v13469_v40  ;;  %v487_v38 = vshrl.u32 %v13453_v36, 16 }
 0x2f5   : > { %v5094_v9 = vadd.f32 %v4952_v34, %v12881_v43  ;;  %v493_v43 = vsel %vm492_vm9, 1, %v17666_v33  ;;  %v13534_v61 = vmul.u32 43691, %v507_v48  ;;  %v513_v34 = vshll.u32 %v13514_v7, 16 }
 0x2f6   : > { %v5356_v49 = vpop.f32.mrf.mxu3  ;;  %v470_v1 = vmul.u32 24, %v469_v58  ;;  %v495_v19 = vadd.s32 %v493_v43, %v491_v51  ;;  %vm13539_vm12 = vcmp.lt.s32.totalorder %v1886_v47, 16  ;;  %v17687_v39 = vmov 0 }
 0x2f7   : > { %v5498_v54 = vadd.f32 %v5356_v49, %v5094_v9  ;;  %v17688_v39 = vsel %vm13539_vm12, 4294967295, %v17687_v39  ;;  %v1887_v50 = vsel %vm13509_vm10, %v1839_v63, %v13456_v59  ;;  %vm13555_vm13 = vc.u32 %v509_v57, %v513_v34 }
 0x2f8   : > { %17689 = vst [vmem:[#allocation18_spill] sm:$0xff] %v17688_v39  ;;  %v496_v9 = vadd.s32 %v495_v19, %v485_v52  ;;  %v6093_v49 = vsel %vm17428_vm3, %v6045_v21, 0.0  ;;  %v13566_v58 = vadd.s32 64, %v13230_v27  ;;  %v515_v62 = vshll.u32 %v13534_v61, 16 }
 0x2f9   : > { %v13522_v20 = vadd.f32 %v5760_v3, %v5498_v54  ;;  %11393 = vmatmul.msk.f32.gmra.mxu2 %vm17428_vm3, %v4755_v4  ;;  %v5763_v24 = vpop.f32.mrf.mxu0  ;;  %v6242_v3 = vsel %vm13475_vm14, %v6194_v2, 0.0  ;;  %v13553_v2 = vsub.s32 %v13368_v22, %v470_v1  ;;  %v512_v4 = vmul.u32 43690, %v507_v48  ;;  %v4756_v1 = vld [vmem:[#allocation2 + $0xc8] sm:$0xff] }
 0x2fa   : > { %v6290_v22 = vsel %vm17428_vm3, %v6242_v3, 0.0  ;;  %v497_v54 = vadd.s32 %v496_v9, %v487_v38  ;;  %v514_v19 = vshrl.u32 %v13514_v7, 16  ;;  %v518_v48 = vsel %vm13555_vm13, 1, %v17666_v33  ;;  %v5160_v38 = vld [vmem:[#allocation2 + $0xc9] sm:$0xff] }
 0x2fb   : > { %17684 = vst [vmem:[#allocation15_spill] sm:$0xff] %v13522_v20  ;;  %v6046_v36 = vsel %vm13482_vm15, %v13522_v20, 0.0  ;;  %v6195_v51 = vmul.f32 %v13522_v20, %v13522_v20  ;;  %11442 = vmatmul.msk.f32.gmra.mxu3 %vm17428_vm3, %v5159_v0  ;;  %vm1697_vm0 = vcmp.ne.s32.totalorder %v13553_v2, 0  ;;  %vm1745_vm5 = vcmp.lt.s32.totalorder %v13553_v2, 0 }
 0x2fc   : > { %v4955_v59 = vpop.f32.mrf.mxu2  ;;  %11491 = vmatmul.msk.f32.gmra.mxu0 %vm17428_vm3, %v5563_v26  ;;  %v6094_v43 = vsel %vm17428_vm3, %v6046_v36, 0.0  ;;  %vm13580_vm6 = vcmp.lt.s32.totalorder %v1887_v50, 16  ;;  %v17692_v3 = vmov 0  ;;  %v519_v9 = vadd.s32 %v513_v34, %v509_v57  ;;  %vm13595_vm7 = vmand %vm1745_vm5, %vm1697_vm0 }
 0x2fd   : > { %v5095_v52 = vadd.f32 %v4955_v59, %v12892_v14  ;;  %v6243_v21 = vsel %vm13482_vm15, %v6195_v51, 0.0  ;;  %v498_v14 = vshrl.u32 %v497_v54, 4  ;;  %v17693_v3 = vsel %vm13580_vm6, 4294967295, %v17692_v3 }
 0x2fe   : > { %v5359_v0 = vpop.f32.mrf.mxu3  ;;  %17694 = vst [vmem:[#allocation20_spill] sm:$0xff] %v17693_v3  ;;  %v520_v36 = vadd.s32 %v518_v48, %v512_v4  ;;  %v535_v51 = vand.u32 65535, %v13566_v58  ;;  %v536_v7 = vshrl.u32 %v13566_v58, 16  ;;  %v6291_v47 = vsel %vm17428_vm3, %v6243_v21, 0.0 }
 0x2ff   : > { %v5499_v26 = vadd.f32 %v5359_v0, %v5095_v52  ;;  %v5564_v0 = vld [vmem:[#allocation2 + $0xca] sm:$0xff]  ;;  %v13589_v54 = vadd.s32 24, %v13553_v2  ;;  %v499_v50 = vmul.u32 24, %v498_v14  ;;  %v516_v34 = vshrl.u32 %v13534_v61, 16 }
 0x300   : > { %vm521_vm8 = vc.u32 %v519_v9, %v515_v62  ;;  %v13602_v4 = vmul.u32 43691, %v536_v7  ;;  %v538_v62 = vmul.u32 43691, %v535_v51  ;;  %v6095_v6 = vadd.f32 %v6094_v43, %v6093_v49 }
 0x301   : > { %v5903_v59 = vadd.f32 %v5763_v24, %v5499_v26  ;;  %11394 = vmatmul.msk.f32.gmra.mxu2 %vm17428_vm3, %v4756_v1  ;;  %v5766_v52 = vpop.f32.mrf.mxu0  ;;  %v13600_v24 = vmul.u32 43690, %v535_v51  ;;  %v13608_v48 = vsub.s32 %v13415_v35, %v499_v50  ;;  %v522_v26 = vsel %vm521_vm8, 1, %v17666_v33 }
 0x302   : > { %v524_v61 = vadd.s32 %v522_v26, %v520_v36  ;;  %v1889_v35 = vsel %vm13595_vm7, %v13589_v54, %v13553_v2  ;;  %v6292_v50 = vadd.f32 %v6291_v47, %v6290_v22  ;;  %v13622_v36 = vadd.s32 72, %v13230_v27  ;;  %v5161_v22 = vld [vmem:[#allocation2 + $0xd1] sm:$0xff] }
 0x303   : > { %v6047_v21 = vsel %vm13539_vm12, %v5903_v59, 0.0  ;;  %v6196_v1 = vmul.f32 %v5903_v59, %v5903_v59  ;;  %11443 = vmatmul.msk.f32.gmra.mxu3 %vm17428_vm3, %v5160_v38  ;;  %v542_v9 = vshll.u32 %v13600_v24, 16  ;;  %vm1698_vm9 = vcmp.ne.s32.totalorder %v13608_v48, 0 }
 0x304   : > { %v6096_v14 = vsel %vm17428_vm3, %v6047_v21, 0.0  ;;  %v4958_v63 = vpop.f32.mrf.mxu2  ;;  %11492 = vmatmul.msk.f32.gmra.mxu0 %vm17428_vm3, %v5564_v0  ;;  %v525_v20 = vadd.s32 %v524_v61, %v514_v19  ;;  %v541_v0 = vmul.u32 43690, %v536_v7  ;;  %vm1746_vm10 = vcmp.lt.s32.totalorder %v13608_v48, 0  ;;  %v5565_v7 = vld [vmem:[#allocation2 + $0xd2] sm:$0xff] }
 0x305   : > { %v6244_v59 = vsel %vm13539_vm12, %v6196_v1, 0.0  ;;  %v5096_v38 = vadd.f32 %v4958_v63, %v12903_v17  ;;  %v6097_v51 = vadd.f32 %v6096_v14, %v6095_v6  ;;  %v240_v17 = vld [vmem:[%s17352_s3] sm:$0xf]  ;;  %v544_v63 = vshll.u32 %v13602_v4, 16  ;;  %vm13659_vm5 = vmand %vm1746_vm10, %vm1698_vm9 }
 0x306   : > { %v5362_v21 = vpop.f32.mrf.mxu3  ;;  %v6293_v2 = vsel %vm17428_vm3, %v6244_v59, 0.0  ;;  %11521 = vmatpush.msk.msra.mxu1 %vm17377_vm1, %v240_v17  ;;  %v526_v43 = vadd.s32 %v525_v20, %v516_v34  ;;  %vm546_vm13 = vc.u32 %v538_v62, %v542_v9  ;;  %v13636_v47 = vadd.s32 24, %v13608_v48 }
 0x307   : > { %v5500_v49 = vadd.f32 %v5362_v21, %v5096_v38  ;;  %v547_v54 = vsel %vm546_vm13, 1, %v17666_v33  ;;  %v548_v57 = vadd.s32 %v542_v9, %v538_v62  ;;  %v564_v14 = vand.u32 65535, %v13622_v36 }
 0x308   : > { %v527_v1 = vshrl.u32 %v526_v43, 4  ;;  %v549_v26 = vadd.s32 %v547_v54, %v541_v0  ;;  %v565_v61 = vshrl.u32 %v13622_v36, 16  ;;  %v545_v59 = vshrl.u32 %v13602_v4, 16 }
 0x309   : > { %v13632_v19 = vadd.f32 %v5766_v52, %v5500_v49  ;;  %11395 = vmatmul.msk.f32.gmra.mxu2 %vm17428_vm3, %v4757_v5  ;;  %v5769_v6 = vpop.f32.mrf.mxu0  ;;  %v543_v52 = vshrl.u32 %v13600_v24, 16  ;;  %vm550_vm0 = vc.u32 %v548_v57, %v544_v63  ;;  %v567_v17 = vmul.u32 43691, %v564_v14 }
 0x30a   : > { %v528_v9 = vmul.u32 24, %v527_v1  ;;  %v551_v38 = vsel %vm550_vm0, 1, %v17666_v33  ;;  %v6294_v54 = vadd.f32 %v6293_v2, %v6292_v50  ;;  %v17699_v1 = vsel %vm13529_vm11, %v13520_v13, %v13469_v40 }
 0x30b   : > { %v6048_v20 = vsel %vm13580_vm6, %v13632_v19, 0.0  ;;  %v6197_v5 = vmul.f32 %v13632_v19, %v13632_v19  ;;  %11444 = vmatmul.msk.f32.gmra.mxu3 %vm17428_vm3, %v5161_v22  ;;  %v553_v49 = vadd.s32 %v551_v38, %v549_v26  ;;  %v4758_v22 = vld [vmem:[#allocation2 + $0xd8] sm:$0xff]  ;;  %vm13676_vm7 = vcmp.lt.s32.totalorder %v17699_v1, 16 }
 0x30c   : > { %v6098_v34 = vsel %vm17428_vm3, %v6048_v20, 0.0  ;;  %v4961_v62 = vpop.f32.mrf.mxu2  ;;  %11493 = vmatmul.msk.f32.gmra.mxu0 %vm17428_vm3, %v5565_v7  ;;  %v13665_v43 = vsub.s32 %v13473_v28, %v528_v9  ;;  %v13667_v7 = vmul.u32 43690, %v564_v14  ;;  %v17700_v26 = vmov 0 }
 0x30d   : > { %v6245_v21 = vsel %vm13580_vm6, %v6197_v5, 0.0  ;;  %v5097_v0 = vadd.f32 %v4961_v62, %v12914_v18  ;;  %v13669_v18 = vmul.u32 43691, %v565_v61  ;;  %v17701_v26 = vsel %vm13676_vm7, 4294967295, %v17700_v26  ;;  %v5162_v62 = vld [vmem:[#allocation2 + $0xd9] sm:$0xff] }
 0x30e   : > { %v6295_v63 = vsel %vm17428_vm3, %v6245_v21, 0.0  ;;  %v5365_v4 = vpop.f32.mrf.mxu3  ;;  %17702 = vst [vmem:[#allocation22_spill] sm:$0xff] %v17701_v26  ;;  %v554_v20 = vadd.s32 %v553_v49, %v543_v52  ;;  %v6099_v5 = vadd.f32 %v6098_v34, %v6097_v51  ;;  %vm13680_vm8 = vcmp.lt.s32.totalorder %v1889_v35, 16  ;;  %v5566_v35 = vld [vmem:[#allocation2 + $0xda] sm:$0xff] }
 0x30f   : > { %v5501_v57 = vadd.f32 %v5365_v4, %v5097_v0  ;;  %v17703_v28 = vmov 0  ;;  %v1890_v50 = vsel %vm13659_vm5, %v13636_v47, %v13608_v48  ;;  %v571_v53 = vshll.u32 %v13667_v7, 16 }
 0x310   : > { %v17704_v28 = vsel %vm13680_vm8, 4294967295, %v17703_v28  ;;  %v13690_v40 = vadd.s32 80, %v13230_v27  ;;  %v6296_v13 = vadd.f32 %v6295_v63, %v6294_v54  ;;  %v555_v14 = vadd.s32 %v554_v20, %v545_v59 }
 0x311   : > { %17705 = vst [vmem:[#allocation23_spill] sm:$0xff] %v17704_v28  ;;  %v13692_v2 = vadd.f32 %v5769_v6, %v5501_v57  ;;  %11396 = vmatmul.msk.f32.gmra.mxu2 %vm17428_vm3, %v4758_v22  ;;  %v5772_v51 = vpop.f32.mrf.mxu0  ;;  %v573_v52 = vshll.u32 %v13669_v18, 16  ;;  %vm1699_vm11 = vcmp.ne.s32.totalorder %v13665_v43, 0  ;;  %v570_v34 = vmul.u32 43690, %v565_v61  ;;  %v4759_v22 = vld [vmem:[#allocation2 + $0xe0] sm:$0xff] }
 0x312   : > { %vm575_vm9 = vc.u32 %v567_v17, %v571_v53  ;;  %v577_v48 = vadd.s32 %v571_v53, %v567_v17  ;;  %vm1747_vm10 = vcmp.lt.s32.totalorder %v13665_v43, 0  ;;  %v556_v9 = vshrl.u32 %v555_v14, 4 }
 0x313   : > { %v6049_v47 = vsel %vm13676_vm7, %v13692_v2, 0.0  ;;  %v6198_v6 = vmul.f32 %v13692_v2, %v13692_v2  ;;  %11445 = vmatmul.msk.f32.gmra.mxu3 %vm17428_vm3, %v5162_v62  ;;  %v13706_v38 = vadd.s32 24, %v13665_v43  ;;  %v576_v61 = vsel %vm575_vm9, 1, %v17666_v33  ;;  %vm13719_vm0 = vmand %vm1747_vm10, %vm1699_vm11 }
 0x314   : > { %v4964_v59 = vpop.f32.mrf.mxu2  ;;  %11494 = vmatmul.msk.f32.gmra.mxu0 %vm17428_vm3, %v5566_v35  ;;  %vm579_vm13 = vc.u32 %v577_v48, %v573_v52  ;;  %v593_v21 = vand.u32 65535, %v13690_v40  ;;  %v557_v49 = vmul.u32 24, %v556_v9  ;;  %v572_v17 = vshrl.u32 %v13667_v7, 16  ;;  %v5163_v35 = vld [vmem:[#allocation2 + $0xe1] sm:$0xff] }
 0x315   : > { %v6246_v0 = vsel %vm13676_vm7, %v6198_v6, 0.0  ;;  %v5098_v24 = vadd.f32 %v4964_v59, %v12923_v55  ;;  %v6100_v63 = vsel %vm17428_vm3, %v6049_v47, 0.0  ;;  %v578_v57 = vadd.s32 %v576_v61, %v570_v34 }
 0x316   : > { %v5368_v4 = vpop.f32.mrf.mxu3  ;;  %v580_v1 = vsel %vm579_vm13, 1, %v17666_v33  ;;  %v594_v55 = vshrl.u32 %v13690_v40, 16  ;;  %v6297_v20 = vsel %vm17428_vm3, %v6246_v0, 0.0  ;;  %v13727_v62 = vsub.s32 %v13566_v58, %v557_v49  ;;  %v5567_v58 = vld [vmem:[#allocation2 + $0xe2] sm:$0xff] }
 0x317   : > { %v5502_v7 = vadd.f32 %v5368_v4, %v5098_v24  ;;  %v574_v53 = vshrl.u32 %v13669_v18, 16  ;;  %vm13730_vm5 = vcmp.lt.s32.totalorder %v1890_v50, 16  ;;  %v17708_v14 = vmov 0 }
 0x318   : > { %v17709_v14 = vsel %vm13730_vm5, 4294967295, %v17708_v14  ;;  %v582_v52 = vadd.s32 %v580_v1, %v578_v57  ;;  %v596_v48 = vmul.u32 43691, %v593_v21  ;;  %v13734_v34 = vmul.u32 43690, %v593_v21 }
 0x319   : > { %17710 = vst [vmem:[#allocation24_spill] sm:$0xff] %v17709_v14  ;;  %v13736_v47 = vmul.u32 43691, %v594_v55  ;;  %v5906_v6 = vadd.f32 %v5772_v51, %v5502_v7  ;;  %v6101_v9 = vadd.f32 %v6100_v63, %v6099_v5  ;;  %11397 = vmatmul.msk.f32.gmra.mxu2 %vm17428_vm3, %v4759_v22  ;;  %v5775_v59 = vpop.f32.mrf.mxu0  ;;  %v1891_v18 = vsel %vm13719_vm0, %v13706_v38, %v13665_v43  ;;  %v17711_v22 = vld [vmem:[#allocation13_spill] sm:$0xff] }
 0x31a   : > { %v599_v50 = vmul.u32 43690, %v594_v55  ;;  %vm1700_vm11 = vcmp.ne.s32.totalorder %v13727_v62, 0  ;;  %vm1748_vm9 = vcmp.lt.s32.totalorder %v13727_v62, 0  ;;  %v583_v61 = vadd.s32 %v582_v52, %v572_v17 }
 0x31b   : > { %v600_v21 = vshll.u32 %v13734_v34, 16  ;;  %v6050_v5 = vsel %vm13680_vm8, %v5906_v6, 0.0  ;;  %v6199_v51 = vmul.f32 %v5906_v6, %v5906_v6  ;;  %v6298_v0 = vadd.f32 %v6297_v20, %v6296_v13  ;;  %11446 = vmatmul.msk.f32.gmra.mxu3 %vm17428_vm3, %v5163_v35  ;;  %vm13762_vm13 = vmand %vm1748_vm9, %vm1700_vm11  ;;  %v4760_v20 = vld [vmem:[#allocation2 + $0xe8] sm:$0xff] }
 0x31c   : > { %v13750_v24 = vadd.s32 24, %v13727_v62  ;;  %v6102_v43 = vsel %vm17428_vm3, %v6050_v5, 0.0  ;;  %v4967_v38 = vpop.f32.mrf.mxu2  ;;  %11495 = vmatmul.msk.f32.gmra.mxu0 %vm17428_vm3, %v5567_v58  ;;  %v584_v49 = vadd.s32 %v583_v61, %v574_v53  ;;  %v602_v17 = vshll.u32 %v13736_v47, 16  ;;  %v5164_v61 = vld [vmem:[#allocation2 + $0xe9] sm:$0xff] }
 0x31d   : > { %vm604_vm10 = vc.u32 %v596_v48, %v600_v21  ;;  %v6103_v63 = vadd.f32 %v6102_v43, %v6101_v9  ;;  %v6247_v4 = vsel %vm13680_vm8, %v6199_v51, 0.0  ;;  %v5099_v13 = vadd.f32 %v4967_v38, %v17711_v22  ;;  %v5568_v43 = vld [vmem:[#allocation2 + $0xea] sm:$0xff] }
 0x31e   : > { %v605_v57 = vsel %vm604_vm10, 1, %v17666_v33  ;;  %v6299_v1 = vsel %vm17428_vm3, %v6247_v4, 0.0  ;;  %v5371_v55 = vpop.f32.mrf.mxu3  ;;  %v585_v7 = vshrl.u32 %v584_v49, 4  ;;  %v606_v53 = vadd.s32 %v600_v21, %v596_v48 }
 0x31f   : > { %v607_v35 = vadd.s32 %v605_v57, %v599_v50  ;;  %v6300_v52 = vadd.f32 %v6299_v1, %v6298_v0  ;;  %v5503_v6 = vadd.f32 %v5371_v55, %v5099_v13  ;;  %v13769_v9 = vadd.s32 88, %v13230_v27  ;;  %v17717_v1 = vld [vmem:[#allocation14_spill] sm:$0xff] }
 0x320   : > { %v13772_v58 = vadd.s32 96, %v13230_v27  ;;  %vm13774_vm0 = vcmp.lt.s32.totalorder %v1891_v18, 16  ;;  %v17714_v5 = vmov 0  ;;  %v1892_v51 = vsel %vm13762_vm13, %v13750_v24, %v13727_v62 }
 0x321   : > { %v17715_v5 = vsel %vm13774_vm0, 4294967295, %v17714_v5  ;;  %v586_v48 = vmul.u32 24, %v585_v7  ;;  %v601_v50 = vshrl.u32 %v13734_v34, 16  ;;  %vm608_vm11 = vc.u32 %v606_v53, %v602_v17  ;;  %11398 = vmatmul.msk.f32.gmra.mxu2 %vm17428_vm3, %v4760_v20  ;;  %v5778_v0 = vpop.f32.mrf.mxu0 }
 0x322   : > { %17716 = vst [vmem:[#allocation25_spill] sm:$0xff] %v17715_v5  ;;  %v13783_v21 = vadd.f32 %v5775_v59, %v5503_v6  ;;  %v603_v18 = vshrl.u32 %v13736_v47, 16  ;;  %v609_v38 = vsel %vm608_vm11, 1, %v17666_v33  ;;  %v622_v49 = vand.u32 65535, %v13769_v9 }
 0x323   : > { %v13790_v4 = vsub.s32 %v13622_v36, %v586_v48  ;;  %v611_v62 = vadd.s32 %v609_v38, %v607_v35  ;;  %v623_v24 = vshrl.u32 %v13769_v9, 16  ;;  %v13794_v34 = vadd.s32 104, %v13230_v27  ;;  %11447 = vmatmul.msk.f32.gmra.mxu3 %vm17428_vm3, %v5164_v61  ;;  %v4761_v48 = vld [vmem:[#allocation2 + $0xf0] sm:$0xff] }
 0x324   : > { %v6051_v59 = vsel %vm13730_vm5, %v13783_v21, 0.0  ;;  %v6200_v47 = vmul.f32 %v13783_v21, %v13783_v21  ;;  %v13802_v17 = vmul.u32 43690, %v622_v49  ;;  %v651_v36 = vand.u32 65535, %v13772_v58  ;;  %v4970_v13 = vpop.f32.mrf.mxu2  ;;  %11496 = vmatmul.msk.f32.gmra.mxu0 %vm17428_vm3, %v5568_v43 }
 0x325   : > { %v6104_v22 = vsel %vm17428_vm3, %v6051_v59, 0.0  ;;  %vm1701_vm9 = vcmp.ne.s32.totalorder %v13790_v4, 0  ;;  %vm1749_vm10 = vcmp.lt.s32.totalorder %v13790_v4, 0  ;;  %v13810_v54 = vadd.s32 24, %v13790_v4 }
 0x326   : > { %v6248_v57 = vsel %vm13730_vm5, %v6200_v47, 0.0  ;;  %v5100_v55 = vadd.f32 %v4970_v13, %v17717_v1  ;;  %vm13815_vm13 = vmand %vm1749_vm10, %vm1701_vm9  ;;  %v612_v7 = vadd.s32 %v611_v62, %v601_v50  ;;  %v652_v53 = vshrl.u32 %v13772_v58, 16  ;;  %v5374_v61 = vpop.f32.mrf.mxu3  ;;  %v5165_v50 = vld [vmem:[#allocation2 + $0xf1] sm:$0xff]  ;;  %v17724_v47 = vld [vmem:[#allocation16_spill] sm:$0xff] }
 0x327   : > { %v6105_v35 = vadd.f32 %v6104_v22, %v6103_v63  ;;  %v6301_v6 = vsel %vm17428_vm3, %v6248_v57, 0.0  ;;  %v625_v43 = vmul.u32 43691, %v622_v49  ;;  %v13821_v38 = vmul.u32 43691, %v623_v24 }
 0x328   : > { %v5504_v59 = vadd.f32 %v5374_v61, %v5100_v55  ;;  %v613_v13 = vadd.s32 %v612_v7, %v603_v18  ;;  %v628_v1 = vmul.u32 43690, %v623_v24  ;;  %v6302_v14 = vadd.f32 %v6301_v6, %v6300_v52  ;;  %v5569_v61 = vld [vmem:[#allocation2 + $0xf2] sm:$0xff] }
 0x329   : > { %vm13827_vm11 = vcmp.lt.s32.totalorder %v1892_v51, 16  ;;  %v17720_v62 = vmov 0  ;;  %v629_v63 = vshll.u32 %v13802_v17, 16  ;;  %v630_v49 = vshrl.u32 %v13802_v17, 16  ;;  %11399 = vmatmul.msk.f32.gmra.mxu2 %vm17428_vm3, %v4761_v48  ;;  %v5781_v55 = vpop.f32.mrf.mxu0 }
 0x32a   : > { %v17721_v62 = vsel %vm13827_vm11, 4294967295, %v17720_v62  ;;  %v631_v22 = vshll.u32 %v13821_v38, 16  ;;  %v13834_v57 = vadd.f32 %v5778_v0, %v5504_v59  ;;  %v614_v18 = vshrl.u32 %v613_v13, 4 }
 0x32b   : > { %17722 = vst [vmem:[#allocation26_spill] sm:$0xff] %v17721_v62  ;;  %v632_v52 = vshrl.u32 %v13821_v38, 16  ;;  %v13838_v24 = vmul.u32 43690, %v651_v36  ;;  %vm633_vm9 = vc.u32 %v625_v43, %v629_v63  ;;  %v635_v51 = vadd.s32 %v629_v63, %v625_v43  ;;  %11448 = vmatmul.msk.f32.gmra.mxu3 %vm17428_vm3, %v5165_v50  ;;  %v4771_v62 = vld [vmem:[#allocation2 + $0x140] sm:$0xff] }
 0x32c   : > { %17723 = vst [vmem:[#allocation27_spill] sm:$0xff] %v13834_v57  ;;  %v654_v7 = vmul.u32 43691, %v651_v36  ;;  %v13840_v6 = vmul.u32 43691, %v652_v53  ;;  %v6052_v17 = vsel %vm13774_vm0, %v13834_v57, 0.0  ;;  %v6201_v0 = vmul.f32 %v13834_v57, %v13834_v57  ;;  %v4973_v13 = vpop.f32.mrf.mxu2  ;;  %11497 = vmatmul.msk.f32.gmra.mxu0 %vm17428_vm3, %v5569_v61 }
 0x32d   : > { %v615_v48 = vmul.u32 24, %v614_v18  ;;  %v634_v59 = vsel %vm633_vm9, 1, %v17666_v33  ;;  %v6106_v38 = vsel %vm17428_vm3, %v6052_v17, 0.0  ;;  %vm637_vm10 = vc.u32 %v635_v51, %v631_v22  ;;  %v4762_v17 = vld [vmem:[#allocation2 + $0xf8] sm:$0xff] }
 0x32e   : > { %v636_v36 = vadd.s32 %v634_v59, %v628_v1  ;;  %v658_v43 = vshll.u32 %v13838_v24, 16  ;;  %v6249_v63 = vsel %vm13774_vm0, %v6201_v0, 0.0  ;;  %v5101_v28 = vadd.f32 %v4973_v13, %v17724_v47  ;;  %v5377_v3 = vpop.f32.mrf.mxu3  ;;  %v5166_v0 = vld [vmem:[#allocation2 + $0xf9] sm:$0xff] }
 0x32f   : > { %v616_v26 = vsub.s32 %v13690_v40, %v615_v48  ;;  %v657_v50 = vmul.u32 43690, %v652_v53  ;;  %v6303_v18 = vsel %vm17428_vm3, %v6249_v63, 0.0  ;;  %v6107_v39 = vadd.f32 %v6106_v38, %v6105_v35  ;;  %v5570_v59 = vld [vmem:[#allocation2 + $0xfa] sm:$0xff] }
 0x330   : > { %v638_v57 = vsel %vm637_vm10, 1, %v17666_v33  ;;  %v659_v1 = vshrl.u32 %v13838_v24, 16  ;;  %v5505_v22 = vadd.f32 %v5377_v3, %v5101_v28  ;;  %v660_v61 = vshll.u32 %v13840_v6, 16 }
 0x331   : > { %vm1702_vm9 = vcmp.ne.s32.totalorder %v616_v26, 0  ;;  %vm1750_vm4 = vcmp.lt.s32.totalorder %v616_v26, 0  ;;  %v6304_v51 = vadd.f32 %v6303_v18, %v6302_v14  ;;  %v1846_v40 = vadd.s32 24, %v616_v26  ;;  %11400 = vmatmul.msk.f32.gmra.mxu2 %vm17428_vm3, %v4762_v17  ;;  %v5784_v48 = vpop.f32.mrf.mxu0 }
 0x332   : > { %vm13860_vm2 = vmand %vm1750_vm4, %vm1702_vm9  ;;  %v640_v53 = vadd.s32 %v638_v57, %v636_v36  ;;  %vm662_vm1 = vc.u32 %v654_v7, %v658_v43  ;;  %v5909_v35 = vadd.f32 %v5781_v55, %v5505_v22  ;;  %v661_v3 = vshrl.u32 %v13840_v6, 16  ;;  %v17727_v22 = vld [vmem:[#allocation17_spill] sm:$0xff] }
 0x333   : > { %v663_v28 = vsel %vm662_vm1, 1, %v17666_v33  ;;  %v664_v24 = vadd.s32 %v658_v43, %v654_v7  ;;  %v680_v13 = vand.u32 65535, %v13794_v34  ;;  %v681_v63 = vshrl.u32 %v13794_v34, 16  ;;  %11449 = vmatmul.msk.f32.gmra.mxu3 %vm17428_vm3, %v5166_v0 }
 0x334   : > { %v641_v38 = vadd.s32 %v640_v53, %v630_v49  ;;  %v665_v14 = vadd.s32 %v663_v28, %v657_v50  ;;  %v6053_v57 = vsel %vm13827_vm11, %v5909_v35, 0.0  ;;  %v6202_v36 = vmul.f32 %v5909_v35, %v5909_v35  ;;  %v4976_v18 = vpop.f32.mrf.mxu2  ;;  %11498 = vmatmul.msk.f32.gmra.mxu0 %vm17428_vm3, %v5570_v59 }
 0x335   : > { %v1894_v55 = vsel %vm13860_vm2, %v1846_v40, %v616_v26  ;;  %vm666_vm4 = vc.u32 %v664_v24, %v660_v61  ;;  %v6108_v6 = vsel %vm17428_vm3, %v6053_v57, 0.0  ;;  %v683_v43 = vmul.u32 43691, %v680_v13  ;;  %v4763_v61 = vld [vmem:[#allocation2 + $0x100] sm:$0xff] }
 0x336   : > { %v642_v49 = vadd.s32 %v641_v38, %v632_v52  ;;  %v667_v7 = vsel %vm666_vm4, 1, %v17666_v33  ;;  %v6109_v50 = vadd.f32 %v6108_v6, %v6107_v39  ;;  %v6250_v17 = vsel %vm13827_vm11, %v6202_v36, 0.0  ;;  %v5380_v26 = vpop.f32.mrf.mxu3 }
 0x337   : > { %v5102_v53 = vadd.f32 %v4976_v18, %v17727_v22  ;;  %v669_v0 = vadd.s32 %v667_v7, %v665_v14  ;;  %v6305_v47 = vsel %vm17428_vm3, %v6250_v17, 0.0  ;;  %v13881_v35 = vmul.u32 43690, %v680_v13  ;;  %v5167_v14 = vld [vmem:[#allocation2 + $0x101] sm:$0xff] }
 0x338   : > { %v643_v40 = vshrl.u32 %v642_v49, 4  ;;  %v13883_v28 = vmul.u32 43691, %v681_v63  ;;  %v6306_v52 = vadd.f32 %v6305_v47, %v6304_v51  ;;  %v17728_v39 = vsel %vm13815_vm13, %v13810_v54, %v13790_v4  ;;  %v5571_v54 = vld [vmem:[#allocation2 + $0x102] sm:$0xff] }
 0x339   : > { %v5506_v59 = vadd.f32 %v5380_v26, %v5102_v53  ;;  %vm13890_vm1 = vcmp.lt.s32.totalorder %v17728_v39, 16  ;;  %v17729_v24 = vmov 0  ;;  %v670_v38 = vadd.s32 %v669_v0, %v659_v1  ;;  %11401 = vmatmul.msk.f32.gmra.mxu2 %vm17428_vm3, %v4763_v61  ;;  %v5787_v4 = vpop.f32.mrf.mxu0  ;;  %v17735_v47 = vld [vmem:[#allocation19_spill] sm:$0xff] }
 0x33a   : > { %v17730_v24 = vsel %vm13890_vm1, 4294967295, %v17729_v24  ;;  %vm13894_vm2 = vcmp.lt.s32.totalorder %v1894_v55, 16  ;;  %v17732_v57 = vmov 0  ;;  %v644_v13 = vmul.u32 24, %v643_v40 }
 0x33b   : > { %17731 = vst [vmem:[#allocation28_spill] sm:$0xff] %v17730_v24  ;;  %v17733_v57 = vsel %vm13894_vm2, 4294967295, %v17732_v57  ;;  %v686_v36 = vmul.u32 43690, %v681_v63  ;;  %v687_v51 = vshll.u32 %v13881_v35, 16  ;;  %v688_v6 = vshrl.u32 %v13881_v35, 16  ;;  %11450 = vmatmul.msk.f32.gmra.mxu3 %vm17428_vm3, %v5167_v14 }
 0x33c   : > { %17734 = vst [vmem:[#allocation29_spill] sm:$0xff] %v17733_v57  ;;  %v13900_v20 = vadd.f32 %v5784_v48, %v5506_v59  ;;  %v671_v18 = vadd.s32 %v670_v38, %v661_v3  ;;  %v689_v1 = vshll.u32 %v13883_v28, 16  ;;  %v645_v49 = vsub.s32 %v13769_v9, %v644_v13  ;;  %v4979_v9 = vpop.f32.mrf.mxu2  ;;  %11499 = vmatmul.msk.f32.gmra.mxu0 %vm17428_vm3, %v5571_v54  ;;  %v4764_v38 = vld [vmem:[#allocation2 + $0x108] sm:$0xff] }
 0x33d   : > { %vm691_vm13 = vc.u32 %v683_v43, %v687_v51  ;;  %v693_v7 = vadd.s32 %v687_v51, %v683_v43  ;;  %v13907_v63 = vadd.s32 112, %v13230_v27  ;;  %v5103_v26 = vadd.f32 %v4979_v9, %v17735_v47 }
 0x33e   : > { %v6054_v48 = vsel %vm13890_vm1, %v13900_v20, 0.0  ;;  %v6203_v17 = vmul.f32 %v13900_v20, %v13900_v20  ;;  %v672_v3 = vshrl.u32 %v671_v18, 4  ;;  %v692_v22 = vsel %vm691_vm13, 1, %v17666_v33  ;;  %v5383_v39 = vpop.f32.mrf.mxu3 }
 0x33f   : > { %v6110_v53 = vsel %vm17428_vm3, %v6054_v48, 0.0  ;;  %vm1703_vm10 = vcmp.ne.s32.totalorder %v645_v49, 0  ;;  %vm1751_vm9 = vcmp.lt.s32.totalorder %v645_v49, 0  ;;  %v1847_v43 = vadd.s32 24, %v645_v49 }
 0x340   : > { %v6251_v0 = vsel %vm13890_vm1, %v6203_v17, 0.0  ;;  %vm1799_vm4 = vmand %vm1751_vm9, %vm1703_vm10  ;;  %v673_v61 = vmul.u32 24, %v672_v3  ;;  %v13922_v40 = vadd.s32 120, %v13230_v27  ;;  %v694_v13 = vadd.s32 %v692_v22, %v686_v36  ;;  %v5168_v17 = vld [vmem:[#allocation2 + $0x109] sm:$0xff] }
 0x341   : > { %v6307_v59 = vsel %vm17428_vm3, %v6251_v0, 0.0  ;;  %v1895_v14 = vsel %vm1799_vm4, %v1847_v43, %v645_v49  ;;  %vm695_vm13 = vc.u32 %v693_v7, %v689_v1  ;;  %v6111_v51 = vadd.f32 %v6110_v53, %v6109_v50  ;;  %11402 = vmatmul.msk.f32.gmra.mxu2 %vm17428_vm3, %v4764_v38  ;;  %v5790_v50 = vpop.f32.mrf.mxu0 }
 0x342   : > { %v6308_v54 = vadd.f32 %v6307_v59, %v6306_v52  ;;  %v5507_v18 = vadd.f32 %v5383_v39, %v5103_v26  ;;  %v674_v48 = vsub.s32 %v13772_v58, %v673_v61  ;;  %vm13926_vm1 = vcmp.lt.s32.totalorder %v1895_v14, 16  ;;  %v5572_v52 = vld [vmem:[#allocation2 + $0x10a] sm:$0xff] }
 0x343   : > { %v17736_v9 = vmov 0  ;;  %v696_v3 = vsel %vm695_vm13, 1, %v17666_v33  ;;  %v709_v47 = vand.u32 65535, %v13907_v63  ;;  %v710_v0 = vshrl.u32 %v13907_v63, 16  ;;  %11451 = vmatmul.msk.f32.gmra.mxu3 %vm17428_vm3, %v5168_v17 }
 0x344   : > { %v17737_v9 = vsel %vm13926_vm1, 4294967295, %v17736_v9  ;;  %v13933_v55 = vadd.f32 %v5787_v4, %v5507_v18  ;;  %vm1704_vm10 = vcmp.ne.s32.totalorder %v674_v48, 0  ;;  %vm1752_vm9 = vcmp.lt.s32.totalorder %v674_v48, 0  ;;  %v4982_v59 = vpop.f32.mrf.mxu2  ;;  %11500 = vmatmul.msk.f32.gmra.mxu0 %vm17428_vm3, %v5572_v52  ;;  %v17741_v18 = vld [vmem:[#allocation21_spill] sm:$0xff] }
 0x345   : > { %17738 = vst [vmem:[#allocation30_spill] sm:$0xff] %v17737_v9  ;;  %v1848_v58 = vadd.s32 24, %v674_v48  ;;  %vm13936_vm4 = vmand %vm1752_vm9, %vm1704_vm10  ;;  %v698_v1 = vadd.s32 %v696_v3, %v694_v13  ;;  %v713_v49 = vmul.u32 43690, %v709_v47  ;;  %v13940_v7 = vmul.u32 43691, %v710_v0 }
 0x346   : > { %v738_v22 = vand.u32 65535, %v13922_v40  ;;  %v6055_v4 = vsel %vm13894_vm2, %v13933_v55, 0.0  ;;  %v6204_v53 = vmul.f32 %v13933_v55, %v13933_v55  ;;  %v712_v26 = vmul.u32 43691, %v709_v47  ;;  %v5386_v47 = vpop.f32.mrf.mxu3 }
 0x347   : > { %v1896_v43 = vsel %vm13936_vm4, %v1848_v58, %v674_v48  ;;  %v6112_v61 = vsel %vm17428_vm3, %v6055_v4, 0.0  ;;  %v699_v39 = vadd.s32 %v698_v1, %v688_v6  ;;  %v715_v38 = vmul.u32 43690, %v710_v0  ;;  %v4765_v58 = vld [vmem:[#allocation2 + $0x110] sm:$0xff] }
 0x348   : > { %v716_v14 = vshll.u32 %v713_v49, 16  ;;  %v6252_v13 = vsel %vm13894_vm2, %v6204_v53, 0.0  ;;  %v5104_v3 = vadd.f32 %v4982_v59, %v17741_v18  ;;  %v6113_v17 = vadd.f32 %v6112_v61, %v6111_v51  ;;  %v5169_v53 = vld [vmem:[#allocation2 + $0x111] sm:$0xff] }
 0x349   : > { %v717_v24 = vshrl.u32 %v713_v49, 16  ;;  %v6309_v48 = vsel %vm17428_vm3, %v6252_v13, 0.0  ;;  %v17742_v36 = vshrl.u32 %v13883_v28, 16  ;;  %v718_v52 = vshll.u32 %v13940_v7, 16  ;;  %11403 = vmatmul.msk.f32.gmra.mxu2 %vm17428_vm3, %v4765_v58  ;;  %v5793_v13 = vpop.f32.mrf.mxu0 }
 0x34a   : > { %v719_v35 = vshrl.u32 %v13940_v7, 16  ;;  %v5508_v6 = vadd.f32 %v5386_v47, %v5104_v3  ;;  %v6310_v0 = vadd.f32 %v6309_v48, %v6308_v54  ;;  %vm720_vm13 = vc.u32 %v712_v26, %v716_v14  ;;  %v5573_v7 = vld [vmem:[#allocation2 + $0x112] sm:$0xff] }
 0x34b   : > { %v700_v4 = vadd.s32 %v699_v39, %v17742_v36  ;;  %v722_v1 = vadd.s32 %v716_v14, %v712_v26  ;;  %vm13963_vm10 = vcmp.lt.s32.totalorder %v1896_v43, 16  ;;  %v17743_v59 = vmov 0  ;;  %11452 = vmatmul.msk.f32.gmra.mxu3 %vm17428_vm3, %v5169_v53 }
 0x34c   : > { %v17744_v59 = vsel %vm13963_vm10, 4294967295, %v17743_v59  ;;  %v721_v49 = vsel %vm720_vm13, 1, %v17666_v33  ;;  %v739_v61 = vshrl.u32 %v13922_v40, 16  ;;  %v741_v28 = vmul.u32 43691, %v738_v22  ;;  %v4985_v36 = vpop.f32.mrf.mxu2  ;;  %11501 = vmatmul.msk.f32.gmra.mxu0 %vm17428_vm3, %v5573_v7 }
 0x34d   : > { %17745 = vst [vmem:[#allocation31_spill] sm:$0xff] %v17744_v59  ;;  %v701_v51 = vshrl.u32 %v700_v4, 4  ;;  %v5912_v39 = vadd.f32 %v5790_v50, %v5508_v6  ;;  %v723_v18 = vadd.s32 %v721_v49, %v715_v38  ;;  %vm724_vm9 = vc.u32 %v722_v1, %v718_v52 }
 0x34e   : > { %v13970_v54 = vmul.u32 43690, %v738_v22  ;;  %v725_v43 = vsel %vm724_vm9, 1, %v17666_v33  ;;  %v13973_v14 = vmul.u32 43691, %v739_v61  ;;  %v744_v3 = vmul.u32 43690, %v739_v61 }
 0x34f   : > { %v702_v26 = vmul.u32 24, %v701_v51  ;;  %v6056_v48 = vsel %vm13926_vm1, %v5912_v39, 0.0  ;;  %v6205_v47 = vmul.f32 %v5912_v39, %v5912_v39  ;;  %v727_v50 = vadd.s32 %v725_v43, %v723_v18  ;;  %v17746_v51 = vld [vmem:[#allocation38_spill] sm:$0xff]  ;;  %v5389_v39 = vpop.f32.mrf.mxu3 }
 0x350   : > { %v745_v58 = vshll.u32 %v13970_v54, 16  ;;  %v6114_v38 = vsel %vm17428_vm3, %v6056_v48, 0.0  ;;  %v746_v4 = vshrl.u32 %v13970_v54, 16  ;;  %v747_v52 = vshll.u32 %v13973_v14, 16  ;;  %v4766_v18 = vld [vmem:[#allocation2 + $0x118] sm:$0xff] }
 0x351   : > { %v703_v22 = vsub.s32 %v13794_v34, %v702_v26  ;;  %v6115_v6 = vadd.f32 %v6114_v38, %v6113_v17  ;;  %v6253_v1 = vsel %vm13926_vm1, %v6205_v47, 0.0  ;;  %v5105_v53 = vadd.f32 %v4985_v36, %v17746_v51  ;;  %v5170_v17 = vld [vmem:[#allocation2 + $0x119] sm:$0xff]  ;;  %11404 = vmatmul.msk.f32.gmra.mxu2 %vm17428_vm3, %v4766_v18 }
 0x352   : > { %v728_v49 = vadd.s32 %v727_v50, %v717_v24  ;;  %v6311_v61 = vsel %vm17428_vm3, %v6253_v1, 0.0  ;;  %v748_v26 = vshrl.u32 %v13973_v14, 16  ;;  %vm749_vm2 = vc.u32 %v741_v28, %v745_v58  ;;  %v5574_v36 = vld [vmem:[#allocation2 + $0x11a] sm:$0xff] }
 0x353   : > { %vm1705_vm4 = vcmp.ne.s32.totalorder %v703_v22, 0  ;;  %vm1753_vm13 = vcmp.lt.s32.totalorder %v703_v22, 0  ;;  %v1849_v7 = vadd.s32 24, %v703_v22  ;;  %v6312_v43 = vadd.f32 %v6311_v61, %v6310_v0  ;;  %v5796_v0 = vpop.f32.mrf.mxu0  ;;  %11453 = vmatmul.msk.f32.gmra.mxu3 %vm17428_vm3, %v5170_v17 }
 0x354   : > { %v5509_v34 = vadd.f32 %v5389_v39, %v5105_v53  ;;  %vm1801_vm9 = vmand %vm1753_vm13, %vm1705_vm4  ;;  %v729_v54 = vadd.s32 %v728_v49, %v719_v35  ;;  %v751_v47 = vadd.s32 %v745_v58, %v741_v28  ;;  %v13990_v38 = vadd.s32 128, %v13230_v27  ;;  %11502 = vmatmul.msk.f32.gmra.mxu0 %vm17428_vm3, %v5574_v36 }
 0x355   : > { %v1897_v48 = vsel %vm1801_vm9, %v1849_v7, %v703_v22  ;;  %v17747_v50 = vmov 0  ;;  %v750_v14 = vsel %vm749_vm2, 1, %v17666_v33 }
 0x356   : > { %v13992_v24 = vadd.f32 %v5793_v13, %v5509_v34  ;;  %vm13995_vm1 = vcmp.lt.s32.totalorder %v1897_v48, 16  ;;  %v730_v35 = vshrl.u32 %v729_v54, 4  ;;  %v752_v1 = vadd.s32 %v750_v14, %v744_v3  ;;  %v4988_v3 = vpop.f32.mrf.mxu2  ;;  %v17750_v34 = vld [vmem:[#allocation39_spill] sm:$0xff] }
 0x357   : > { %v17748_v50 = vsel %vm13995_vm1, 4294967295, %v17747_v50  ;;  %vm753_vm4 = vc.u32 %v751_v47, %v747_v52  ;;  %v767_v28 = vand.u32 65535, %v13990_v38  ;;  %v768_v58 = vshrl.u32 %v13990_v38, 16  ;;  %v5392_v47 = vpop.f32.mrf.mxu3 }
 0x358   : > { %17749 = vst [vmem:[#allocation32_spill] sm:$0xff] %v17748_v50  ;;  %v6057_v13 = vsel %vm13963_vm10, %v13992_v24, 0.0  ;;  %v6206_v22 = vmul.f32 %v13992_v24, %v13992_v24  ;;  %v731_v51 = vmul.u32 24, %v730_v35  ;;  %v754_v53 = vsel %vm753_vm4, 1, %v17666_v33  ;;  %v4767_v35 = vld [vmem:[#allocation2 + $0x120] sm:$0xff]  ;;  %v4769_v50 = vld [vmem:[#allocation2 + $0x130] sm:$0xff] }
 0x359   : > { %v6116_v49 = vsel %vm17428_vm3, %v6057_v13, 0.0  ;;  %v756_v52 = vadd.s32 %v754_v53, %v752_v1  ;;  %v770_v61 = vmul.u32 43691, %v767_v28  ;;  %v771_v39 = vmul.u32 43690, %v767_v28  ;;  %11405 = vmatmul.msk.f32.gmra.mxu2 %vm17428_vm3, %v4767_v35 }
 0x35a   : > { %v6117_v18 = vadd.f32 %v6116_v49, %v6115_v6  ;;  %v6254_v7 = vsel %vm13963_vm10, %v6206_v22, 0.0  ;;  %v5106_v54 = vadd.f32 %v4988_v3, %v17750_v34  ;;  %v732_v48 = vsub.s32 %v13907_v63, %v731_v51  ;;  %v5171_v6 = vld [vmem:[#allocation2 + $0x121] sm:$0xff] }
 0x35b   : > { %v6313_v17 = vsel %vm17428_vm3, %v6254_v7, 0.0  ;;  %v757_v14 = vadd.s32 %v756_v52, %v746_v4  ;;  %v14016_v13 = vmul.u32 43691, %v768_v58  ;;  %v773_v9 = vmul.u32 43690, %v768_v58  ;;  %v5799_v4 = vpop.f32.mrf.mxu0  ;;  %v5575_v3 = vld [vmem:[#allocation2 + $0x122] sm:$0xff]  ;;  %11454 = vmatmul.msk.f32.gmra.mxu3 %vm17428_vm3, %v5171_v6 }
 0x35c   : > { %v6314_v36 = vadd.f32 %v6313_v17, %v6312_v43  ;;  %v5510_v1 = vadd.f32 %v5392_v47, %v5106_v54  ;;  %vm1706_vm2 = vcmp.ne.s32.totalorder %v732_v48, 0  ;;  %vm1754_vm13 = vcmp.lt.s32.totalorder %v732_v48, 0  ;;  %11503 = vmatmul.msk.f32.gmra.mxu0 %vm17428_vm3, %v5575_v3 }
 0x35d   : > { %vm14018_vm9 = vmand %vm1754_vm13, %vm1706_vm2  ;;  %v1850_v22 = vadd.s32 24, %v732_v48  ;;  %v758_v53 = vadd.s32 %v757_v14, %v748_v26  ;;  %v774_v63 = vshll.u32 %v771_v39, 16  ;;  %v775_v51 = vshrl.u32 %v771_v39, 16 }
 0x35e   : > { %v14022_v49 = vadd.f32 %v5796_v0, %v5510_v1  ;;  %v776_v43 = vshll.u32 %v14016_v13, 16  ;;  %v777_v58 = vshrl.u32 %v14016_v13, 16  ;;  %v14028_v52 = vadd.s32 136, %v13230_v27  ;;  %v4991_v47 = vpop.f32.mrf.mxu2  ;;  %v17757_v13 = vld [vmem:[#allocation40_spill] sm:$0xff] }
 0x35f   : > { %v1898_v7 = vsel %vm14018_vm9, %v1850_v22, %v732_v48  ;;  %v759_v34 = vshrl.u32 %v758_v53, 4  ;;  %vm778_vm4 = vc.u32 %v770_v61, %v774_v63  ;;  %v780_v26 = vadd.s32 %v774_v63, %v770_v61  ;;  %v5395_v53 = vpop.f32.mrf.mxu3  ;;  %v4768_v63 = vld [vmem:[#allocation2 + $0x128] sm:$0xff] }
 0x360   : > { %17753 = vst [vmem:[#allocation33_spill] sm:$0xff] %v14022_v49  ;;  %v6058_v0 = vsel %vm13995_vm1, %v14022_v49, 0.0  ;;  %v6207_v39 = vmul.f32 %v14022_v49, %v14022_v49  ;;  %vm14038_vm2 = vcmp.lt.s32.totalorder %v1898_v7, 16  ;;  %v17754_v54 = vmov 0 }
 0x361   : > { %v17755_v54 = vsel %vm14038_vm2, 4294967295, %v17754_v54  ;;  %v779_v17 = vsel %vm778_vm4, 1, %v17666_v33  ;;  %v6118_v48 = vsel %vm17428_vm3, %v6058_v0, 0.0  ;;  %v760_v61 = vmul.u32 24, %v759_v34  ;;  %11406 = vmatmul.msk.f32.gmra.mxu2 %vm17428_vm3, %v4768_v63 }
 0x362   : > { %17756 = vst [vmem:[#allocation34_spill] sm:$0xff] %v17755_v54  ;;  %v781_v35 = vadd.s32 %v779_v17, %v773_v9  ;;  %vm782_vm13 = vc.u32 %v780_v26, %v776_v43  ;;  %v6255_v14 = vsel %vm13995_vm1, %v6207_v39, 0.0  ;;  %v5107_v1 = vadd.f32 %v4991_v47, %v17757_v13  ;;  %v5172_v39 = vld [vmem:[#allocation2 + $0x129] sm:$0xff] }
 0x363   : > { %v6119_v6 = vadd.f32 %v6118_v48, %v6117_v18  ;;  %v783_v28 = vsel %vm782_vm13, 1, %v17666_v33  ;;  %v6315_v22 = vsel %vm17428_vm3, %v6255_v14, 0.0  ;;  %v761_v7 = vsub.s32 %v13922_v40, %v760_v61  ;;  %v5802_v40 = vpop.f32.mrf.mxu0  ;;  %v5576_v47 = vld [vmem:[#allocation2 + $0x12a] sm:$0xff]  ;;  %11455 = vmatmul.msk.f32.gmra.mxu3 %vm17428_vm3, %v5172_v39 }
 0x364   : > { %v785_v0 = vadd.s32 %v783_v28, %v781_v35  ;;  %v796_v3 = vand.u32 65535, %v14028_v52  ;;  %v5511_v34 = vadd.f32 %v5395_v53, %v5107_v1  ;;  %v6316_v9 = vadd.f32 %v6315_v22, %v6314_v36  ;;  %11504 = vmatmul.msk.f32.gmra.mxu0 %vm17428_vm3, %v5576_v47 }
 0x365   : > { %v797_v43 = vshrl.u32 %v14028_v52, 16  ;;  %v14054_v26 = vadd.s32 144, %v13230_v27  ;;  %vm1707_vm9 = vcmp.ne.s32.totalorder %v761_v7, 0  ;;  %vm1755_vm4 = vcmp.lt.s32.totalorder %v761_v7, 0 }
 0x366   : > { %v1851_v18 = vadd.s32 24, %v761_v7  ;;  %v786_v17 = vadd.s32 %v785_v0, %v775_v51  ;;  %v5915_v48 = vadd.f32 %v5799_v4, %v5511_v34  ;;  %vm1803_vm13 = vmand %vm1755_vm4, %vm1707_vm9  ;;  %v799_v61 = vmul.u32 43691, %v796_v3  ;;  %v4994_v0 = vpop.f32.mrf.mxu2 }
 0x367   : > { %v800_v35 = vmul.u32 43690, %v796_v3  ;;  %v14057_v14 = vmul.u32 43691, %v797_v43  ;;  %v802_v1 = vmul.u32 43690, %v797_v43  ;;  %v825_v28 = vand.u32 65535, %v14054_v26 }
 0x368   : > { %v1899_v36 = vsel %vm1803_vm13, %v1851_v18, %v761_v7  ;;  %v787_v13 = vadd.s32 %v786_v17, %v777_v58  ;;  %v6059_v22 = vsel %vm14038_vm2, %v5915_v48, 0.0  ;;  %v6208_v53 = vmul.f32 %v5915_v48, %v5915_v48  ;;  %v17761_v18 = vld [vmem:[#allocation41_spill] sm:$0xff] }
 0x369   : > { %vm14063_vm1 = vcmp.lt.s32.totalorder %v1899_v36, 16  ;;  %v17758_v51 = vmov 0  ;;  %v803_v4 = vshll.u32 %v800_v35, 16  ;;  %v6120_v63 = vsel %vm17428_vm3, %v6059_v22, 0.0  ;;  %v5398_v36 = vpop.f32.mrf.mxu3  ;;  %11407 = vmatmul.msk.f32.gmra.mxu2 %vm17428_vm3, %v4769_v50 }
 0x36a   : > { %v17759_v51 = vsel %vm14063_vm1, 4294967295, %v17758_v51  ;;  %v788_v58 = vshrl.u32 %v787_v13, 4  ;;  %v804_v7 = vshrl.u32 %v800_v35, 16  ;;  %v805_v3 = vshll.u32 %v14057_v14, 16 }
 0x36b   : > { %17760 = vst [vmem:[#allocation35_spill] sm:$0xff] %v17759_v51  ;;  %v6121_v34 = vadd.f32 %v6120_v63, %v6119_v6  ;;  %v6256_v43 = vsel %vm14038_vm2, %v6208_v53, 0.0  ;;  %v5108_v39 = vadd.f32 %v4994_v0, %v17761_v18  ;;  %v806_v17 = vshrl.u32 %v14057_v14, 16  ;;  %v5173_v63 = vld [vmem:[#allocation2 + $0x131] sm:$0xff] }
 0x36c   : > { %v6317_v48 = vsel %vm17428_vm3, %v6256_v43, 0.0  ;;  %v789_v22 = vmul.u32 24, %v788_v58  ;;  %vm807_vm9 = vc.u32 %v799_v61, %v803_v4  ;;  %v809_v59 = vadd.s32 %v803_v4, %v799_v61  ;;  %v5805_v43 = vpop.f32.mrf.mxu0  ;;  %v5577_v58 = vld [vmem:[#allocation2 + $0x132] sm:$0xff]  ;;  %11456 = vmatmul.msk.f32.gmra.mxu3 %vm17428_vm3, %v5173_v63 }
 0x36d   : > { %v6318_v47 = vadd.f32 %v6317_v48, %v6316_v9  ;;  %v5512_v13 = vadd.f32 %v5398_v36, %v5108_v39  ;;  %v808_v35 = vsel %vm807_vm9, 1, %v17666_v33  ;;  %v826_v6 = vshrl.u32 %v14054_v26, 16  ;;  %11505 = vmatmul.msk.f32.gmra.mxu0 %vm17428_vm3, %v5577_v58 }
 0x36e   : > { %v790_v53 = vsub.s32 %v13990_v38, %v789_v22  ;;  %v810_v54 = vadd.s32 %v808_v35, %v802_v1  ;;  %vm811_vm4 = vc.u32 %v809_v59, %v805_v3  ;;  %v828_v0 = vmul.u32 43691, %v825_v28 }
 0x36f   : > { %v14078_v14 = vadd.f32 %v5802_v40, %v5512_v13  ;;  %v812_v61 = vsel %vm811_vm4, 1, %v17666_v33  ;;  %v14082_v9 = vmul.u32 43690, %v825_v28  ;;  %v14084_v4 = vmul.u32 43691, %v826_v6  ;;  %v4997_v28 = vpop.f32.mrf.mxu2  ;;  %v17763_v13 = vld [vmem:[#allocation42_spill] sm:$0xff] }
 0x370   : > { %vm1708_vm13 = vcmp.ne.s32.totalorder %v790_v53, 0  ;;  %vm1756_vm9 = vcmp.lt.s32.totalorder %v790_v53, 0  ;;  %v1852_v18 = vadd.s32 24, %v790_v53  ;;  %v814_v39 = vadd.s32 %v812_v61, %v810_v54 }
 0x371   : > { %17762 = vst [vmem:[#allocation13_spill] sm:$0xff] %v14078_v14  ;;  %v6060_v59 = vsel %vm14063_vm1, %v14078_v14, 0.0  ;;  %v6209_v38 = vmul.f32 %v14078_v14, %v14078_v14  ;;  %vm1804_vm2 = vmand %vm1756_vm9, %vm1708_vm13  ;;  %v831_v50 = vmul.u32 43690, %v826_v6  ;;  %v832_v40 = vshll.u32 %v14082_v9, 16  ;;  %v5401_v61 = vpop.f32.mrf.mxu3 }
 0x372   : > { %v6122_v1 = vsel %vm17428_vm3, %v6060_v59, 0.0  ;;  %v1900_v3 = vsel %vm1804_vm2, %v1852_v18, %v790_v53  ;;  %v815_v54 = vadd.s32 %v814_v39, %v804_v7  ;;  %v833_v48 = vshrl.u32 %v14082_v9, 16  ;;  %v4770_v59 = vld [vmem:[#allocation2 + $0x138] sm:$0xff] }
 0x373   : > { %v6123_v36 = vadd.f32 %v6122_v1, %v6121_v34  ;;  %v6257_v22 = vsel %vm14063_vm1, %v6209_v38, 0.0  ;;  %v5109_v35 = vadd.f32 %v4997_v28, %v17763_v13  ;;  %vm14099_vm4 = vcmp.lt.s32.totalorder %v1900_v3, 16  ;;  %v5174_v39 = vld [vmem:[#allocation2 + $0x139] sm:$0xff]  ;;  %11408 = vmatmul.msk.f32.gmra.mxu2 %vm17428_vm3, %v4770_v59 }
 0x374   : > { %v17764_v63 = vmov 0  ;;  %v6319_v6 = vsel %vm17428_vm3, %v6257_v22, 0.0  ;;  %v816_v53 = vadd.s32 %v815_v54, %v806_v17  ;;  %v834_v58 = vshll.u32 %v14084_v4, 16  ;;  %v5808_v17 = vpop.f32.mrf.mxu0  ;;  %11457 = vmatmul.msk.f32.gmra.mxu3 %vm17428_vm3, %v5174_v39 }
 0x375   : > { %v17765_v63 = vsel %vm14099_vm4, 4294967295, %v17764_v63  ;;  %v835_v7 = vshrl.u32 %v14084_v4, 16  ;;  %v6320_v9 = vadd.f32 %v6319_v6, %v6318_v47  ;;  %v5513_v34 = vadd.f32 %v5401_v61, %v5109_v35  ;;  %v5578_v4 = vld [vmem:[#allocation2 + $0x13a] sm:$0xff] }
 0x376   : > { %17766 = vst [vmem:[#allocation14_spill] sm:$0xff] %v17765_v63  ;;  %vm836_vm2 = vc.u32 %v828_v0, %v832_v40  ;;  %v838_v18 = vadd.s32 %v832_v40, %v828_v0  ;;  %v817_v38 = vshrl.u32 %v816_v53, 4  ;;  %v14108_v28 = vadd.s32 152, %v13230_v27  ;;  %11506 = vmatmul.msk.f32.gmra.mxu0 %vm17428_vm3, %v5578_v4  ;;  %v5175_v63 = vld [vmem:[#allocation2 + $0x141] sm:$0xff] }
 0x377   : > { %v837_v1 = vsel %vm836_vm2, 1, %v17666_v33  ;;  %v14111_v3 = vadd.s32 160, %v13230_v27  ;;  %v14113_v22 = vadd.f32 %v5805_v43, %v5513_v34  ;;  %v14117_v0 = vadd.s32 168, %v13230_v27  ;;  %v5000_v53 = vpop.f32.mrf.mxu2 }
 0x378   : > { %v839_v47 = vadd.s32 %v837_v1, %v831_v50  ;;  %vm840_vm13 = vc.u32 %v838_v18, %v834_v58  ;;  %v818_v40 = vmul.u32 24, %v817_v38  ;;  %v854_v13 = vand.u32 65535, %v14108_v28  ;;  %v17768_v1 = vld [vmem:[#allocation43_spill] sm:$0xff] }
 0x379   : > { %17767 = vst [vmem:[#allocation16_spill] sm:$0xff] %v14113_v22  ;;  %v841_v54 = vsel %vm840_vm13, 1, %v17666_v33  ;;  %v855_v35 = vshrl.u32 %v14108_v28, 16  ;;  %v6061_v43 = vsel %vm14099_vm4, %v14113_v22, 0.0  ;;  %v6210_v6 = vmul.f32 %v14113_v22, %v14113_v22 }
 0x37a   : > { %v843_v50 = vadd.s32 %v841_v54, %v839_v47  ;;  %v883_v61 = vand.u32 65535, %v14111_v3  ;;  %v6124_v59 = vsel %vm17428_vm3, %v6061_v43, 0.0  ;;  %v819_v58 = vsub.s32 %v14028_v52, %v818_v40  ;;  %v5404_v54 = vpop.f32.mrf.mxu3 }
 0x37b   : > { %v857_v34 = vmul.u32 43691, %v854_v13  ;;  %v14132_v18 = vmul.u32 43690, %v854_v13  ;;  %v6258_v38 = vsel %vm14099_vm4, %v6210_v6, 0.0  ;;  %v5110_v51 = vadd.f32 %v5000_v53, %v17768_v1  ;;  %11409 = vmatmul.msk.f32.gmra.mxu2 %vm17428_vm3, %v4771_v62 }
 0x37c   : > { %v6125_v57 = vadd.f32 %v6124_v59, %v6123_v36  ;;  %v844_v39 = vadd.s32 %v843_v50, %v833_v48  ;;  %v6321_v47 = vsel %vm17428_vm3, %v6258_v38, 0.0  ;;  %vm1709_vm9 = vcmp.ne.s32.totalorder %v819_v58, 0  ;;  %v5811_v59 = vpop.f32.mrf.mxu0  ;;  %11458 = vmatmul.msk.f32.gmra.mxu3 %vm17428_vm3, %v5175_v63  ;;  %v4662_v63 = vpop.f32.mrf.mxu1 }
 0x37d   : > { %vm1757_vm2 = vcmp.lt.s32.totalorder %v819_v58, 0  ;;  %v1853_v43 = vadd.s32 24, %v819_v58  ;;  %v5514_v52 = vadd.f32 %v5404_v54, %v5110_v51  ;;  %v6322_v4 = vadd.f32 %v6321_v47, %v6320_v9  ;;  %v5579_v9 = vld [vmem:[#allocation2 + $0x142] sm:$0xff] }
 0x37e   : > { %vm1805_vm13 = vmand %vm1757_vm2, %vm1709_vm9  ;;  %v845_v40 = vadd.s32 %v844_v39, %v835_v7  ;;  %v14138_v13 = vmul.u32 43691, %v855_v35  ;;  %v860_v6 = vmul.u32 43690, %v855_v35  ;;  %v861_v53 = vshll.u32 %v14132_v18, 16  ;;  %11507 = vmatmul.msk.f32.gmra.mxu0 %vm17428_vm3, %v5579_v9 }
 0x37f   : > { %v1901_v5 = vsel %vm1805_vm13, %v1853_v43, %v819_v58  ;;  %v862_v48 = vshrl.u32 %v14132_v18, 16  ;;  %v17769_v36 = vmov 0  ;;  %v5918_v50 = vadd.f32 %v5808_v17, %v5514_v52  ;;  %v5003_v39 = vpop.f32.mrf.mxu2  ;;  %v17772_v52 = vld [vmem:[#allocation44_spill] sm:$0xff] }
 0x380   : > { %vm14142_vm4 = vcmp.lt.s32.totalorder %v1901_v5, 16  ;;  %v846_v51 = vshrl.u32 %v845_v40, 4  ;;  %v863_v7 = vshll.u32 %v14138_v13, 16  ;;  %v864_v58 = vshrl.u32 %v14138_v13, 16 }
 0x381   : > { %v17770_v36 = vsel %vm14142_vm4, 4294967295, %v17769_v36  ;;  %vm865_vm9 = vc.u32 %v857_v34, %v861_v53  ;;  %v867_v35 = vadd.s32 %v861_v53, %v857_v34  ;;  %v884_v38 = vshrl.u32 %v14111_v3, 16 }
 0x382   : > { %17771 = vst [vmem:[#allocation17_spill] sm:$0xff] %v17770_v36  ;;  %v6062_v5 = vsel %vm14142_vm4, %v5918_v50, 0.0  ;;  %v6211_v18 = vmul.f32 %v5918_v50, %v5918_v50  ;;  %v847_v17 = vmul.u32 24, %v846_v51  ;;  %v866_v62 = vsel %vm865_vm9, 1, %v17666_v33  ;;  %v5407_v50 = vpop.f32.mrf.mxu3  ;;  %v4772_v51 = vld [vmem:[#allocation2 + $0x148] sm:$0xff] }
 0x383   : > { %v6126_v1 = vsel %vm17428_vm3, %v6062_v5, 0.0  ;;  %v868_v47 = vadd.s32 %v866_v62, %v860_v6  ;;  %vm869_vm2 = vc.u32 %v867_v35, %v863_v7  ;;  %v886_v54 = vmul.u32 43691, %v883_v61  ;;  %11410 = vmatmul.msk.f32.gmra.mxu2 %vm17428_vm3, %v4772_v51 }
 0x384   : > { %v6127_v34 = vadd.f32 %v6126_v1, %v6125_v57  ;;  %v6259_v43 = vsel %vm14142_vm4, %v6211_v18, 0.0  ;;  %v5111_v40 = vadd.f32 %v5003_v39, %v17772_v52  ;;  %v848_v13 = vsub.s32 %v14054_v26, %v847_v17  ;;  %v5176_v18 = vld [vmem:[#allocation2 + $0x149] sm:$0xff]  ;;  %v17775_v1 = vld [vmem:[#allocation6_spill] sm:$0xff] }
 0x385   : > { %v6323_v53 = vsel %vm17428_vm3, %v6259_v43, 0.0  ;;  %v870_v5 = vsel %vm869_vm2, 1, %v17666_v33  ;;  %v887_v22 = vmul.u32 43690, %v883_v61  ;;  %v888_v9 = vmul.u32 43691, %v884_v38  ;;  %v5814_v61 = vpop.f32.mrf.mxu0  ;;  %11459 = vmatmul.msk.f32.gmra.mxu3 %vm17428_vm3, %v5176_v18 }
 0x386   : > { %v6324_v6 = vadd.f32 %v6323_v53, %v6322_v4  ;;  %v5515_v7 = vadd.f32 %v5407_v50, %v5111_v40  ;;  %vm1710_vm13 = vcmp.ne.s32.totalorder %v848_v13, 0  ;;  %vm1758_vm9 = vcmp.lt.s32.totalorder %v848_v13, 0  ;;  %v5580_v4 = vld [vmem:[#allocation2 + $0x14a] sm:$0xff] }
 0x387   : > { %vm14162_vm1 = vmand %vm1758_vm9, %vm1710_vm13  ;;  %v1854_v35 = vadd.s32 24, %v848_v13  ;;  %v872_v26 = vadd.s32 %v870_v5, %v868_v47  ;;  %v889_v17 = vmul.u32 43690, %v884_v38  ;;  %v890_v62 = vshll.u32 %v887_v22, 16  ;;  %11508 = vmatmul.msk.f32.gmra.mxu0 %vm17428_vm3, %v5580_v4 }
 0x388   : > { %v14167_v39 = vadd.f32 %v4662_v63, %v17775_v1  ;;  %v14169_v43 = vadd.f32 %v5811_v59, %v5515_v7  ;;  %v891_v52 = vshrl.u32 %v887_v22, 16  ;;  %v892_v40 = vshll.u32 %v888_v9, 16  ;;  %v17780_v7 = vld [vmem:[#allocation45_spill] sm:$0xff] }
 0x389   : > { %v1902_v53 = vsel %vm14162_vm1, %v1854_v35, %v848_v13  ;;  %v873_v50 = vadd.s32 %v872_v26, %v862_v48  ;;  %vm894_vm2 = vc.u32 %v886_v54, %v890_v62  ;;  %v896_v36 = vadd.s32 %v890_v62, %v886_v54  ;;  %v5006_v48 = vpop.f32.mrf.mxu2  ;;  %v4773_v1 = vld [vmem:[#allocation2 + $0x150] sm:$0xff] }
 0x38a   : > { %17776 = vst [vmem:[#allocation19_spill] sm:$0xff] %v14169_v43  ;;  %vm14174_vm13 = vcmp.lt.s32.totalorder %v1902_v53, 16  ;;  %v17777_v38 = vmov 0  ;;  %v6212_v59 = vmul.f32 %v14169_v43, %v14169_v43  ;;  %v895_v47 = vsel %vm894_vm2, 1, %v17666_v33  ;;  %v5410_v26 = vpop.f32.mrf.mxu3 }
 0x38b   : > { %v17778_v38 = vsel %vm14174_vm13, 4294967295, %v17777_v38  ;;  %v912_v22 = vand.u32 65535, %v14117_v0  ;;  %v6063_v13 = vsel %vm14174_vm13, %v14169_v43, 0.0  ;;  %v874_v63 = vadd.s32 %v873_v50, %v864_v58  ;;  %11411 = vmatmul.msk.f32.gmra.mxu2 %vm17428_vm3, %v4773_v1  ;;  %v17782_v1 = vld [vmem:[#allocation46_spill] sm:$0xff] }
 0x38c   : > { %17779 = vst [vmem:[#allocation21_spill] sm:$0xff] %v17778_v38  ;;  %v897_v54 = vadd.s32 %v895_v47, %v889_v17  ;;  %vm898_vm1 = vc.u32 %v896_v36, %v892_v40  ;;  %v6128_v51 = vsel %vm17428_vm3, %v6063_v13, 0.0  ;;  %v6260_v5 = vsel %vm14174_vm13, %v6212_v59, 0.0  ;;  %v5177_v59 = vld [vmem:[#allocation2 + $0x151] sm:$0xff] }
 0x38d   : > { %v5112_v57 = vadd.f32 %v5006_v48, %v17780_v7  ;;  %v899_v35 = vsel %vm898_vm1, 1, %v17666_v33  ;;  %v6325_v18 = vsel %vm17428_vm3, %v6260_v5, 0.0  ;;  %v875_v62 = vshrl.u32 %v874_v63, 4  ;;  %v5817_v63 = vpop.f32.mrf.mxu0  ;;  %v5581_v5 = vld [vmem:[#allocation2 + $0x152] sm:$0xff]  ;;  %11460 = vmatmul.msk.f32.gmra.mxu3 %vm17428_vm3, %v5177_v59 }
 0x38e   : > { %v893_v53 = vshrl.u32 %v888_v9, 16  ;;  %v901_v58 = vadd.s32 %v899_v35, %v897_v54  ;;  %v14193_v50 = vadd.f32 %v6128_v51, %v6127_v34  ;;  %v14195_v17 = vadd.f32 %v6325_v18, %v6324_v6 }
 0x38f   : > { %v5516_v36 = vadd.f32 %v5410_v26, %v5112_v57  ;;  %v913_v4 = vshrl.u32 %v14117_v0, 16  ;;  %v876_v40 = vmul.u32 24, %v875_v62  ;;  %v915_v13 = vmul.u32 43691, %v912_v22  ;;  %11509 = vmatmul.msk.f32.gmra.mxu0 %vm17428_vm3, %v5581_v5 }
 0x390   : > { %v902_v47 = vadd.s32 %v901_v58, %v891_v52  ;;  %v916_v48 = vmul.u32 43690, %v912_v22  ;;  %v14204_v6 = vadd.s32 176, %v13230_v27  ;;  %v14208_v52 = vadd.s32 184, %v13230_v27 }
 0x391   : > { %v14198_v7 = vadd.f32 %v5814_v61, %v5516_v36  ;;  %v14201_v9 = vmul.u32 43691, %v913_v4  ;;  %v918_v34 = vmul.u32 43690, %v913_v4  ;;  %v877_v54 = vsub.s32 %v14108_v28, %v876_v40  ;;  %v5009_v62 = vpop.f32.mrf.mxu2 }
 0x392   : > { %v903_v51 = vadd.s32 %v902_v47, %v893_v53  ;;  %v919_v57 = vshll.u32 %v916_v48, 16  ;;  %v920_v22 = vshrl.u32 %v916_v48, 16  ;;  %v5113_v53 = vadd.f32 %v5009_v62, %v17782_v1  ;;  %v5413_v40 = vpop.f32.mrf.mxu3  ;;  %v4774_v47 = vld [vmem:[#allocation2 + $0x158] sm:$0xff] }
 0x393   : > { %17781 = vst [vmem:[#allocation38_spill] sm:$0xff] %v14198_v7  ;;  %v6213_v61 = vmul.f32 %v14198_v7, %v14198_v7  ;;  %v921_v35 = vshll.u32 %v14201_v9, 16  ;;  %v922_v18 = vshrl.u32 %v14201_v9, 16  ;;  %vm1711_vm9 = vcmp.ne.s32.totalorder %v877_v54, 0  ;;  %11412 = vmatmul.msk.f32.gmra.mxu2 %vm17428_vm3, %v4774_v47 }
 0x394   : > { %vm1759_vm2 = vcmp.lt.s32.totalorder %v877_v54, 0  ;;  %v1855_v26 = vadd.s32 24, %v877_v54  ;;  %v904_v28 = vshrl.u32 %v903_v51, 4  ;;  %vm923_vm13 = vc.u32 %v915_v13, %v919_v57 }
 0x395   : > { %vm1807_vm1 = vmand %vm1759_vm2, %vm1711_vm9  ;;  %v925_v58 = vadd.s32 %v919_v57, %v915_v13  ;;  %v941_v36 = vand.u32 65535, %v14204_v6  ;;  %v924_v48 = vsel %vm923_vm13, 1, %v17666_v33  ;;  %v942_v9 = vshrl.u32 %v14204_v6, 16 }
 0x396   : > { %v1903_v4 = vsel %vm1807_vm1, %v1855_v26, %v877_v54  ;;  %v905_v59 = vmul.u32 24, %v904_v28  ;;  %v17783_v38 = vmov 0  ;;  %v5517_v5 = vadd.f32 %v5413_v40, %v5113_v53  ;;  %v5178_v26 = vld [vmem:[#allocation2 + $0x159] sm:$0xff] }
 0x397   : > { %vm14220_vm4 = vcmp.lt.s32.totalorder %v1903_v4, 16  ;;  %v926_v51 = vadd.s32 %v924_v48, %v918_v34  ;;  %vm927_vm9 = vc.u32 %v925_v58, %v921_v35  ;;  %v5820_v35 = vpop.f32.mrf.mxu0  ;;  %v5582_v53 = vld [vmem:[#allocation2 + $0x15a] sm:$0xff]  ;;  %v944_v40 = vmul.u32 43691, %v941_v36  ;;  %11461 = vmatmul.msk.f32.gmra.mxu3 %vm17428_vm3, %v5178_v26 }
 0x398   : > { %v17784_v38 = vsel %vm14220_vm4, 4294967295, %v17783_v38  ;;  %v6064_v13 = vsel %vm14220_vm4, %v14198_v7, 0.0  ;;  %v6261_v54 = vsel %vm14220_vm4, %v6213_v61, 0.0  ;;  %v906_v57 = vsub.s32 %v14111_v3, %v905_v59  ;;  %11510 = vmatmul.msk.f32.gmra.mxu0 %vm17428_vm3, %v5582_v53  ;;  %v4775_v26 = vld [vmem:[#allocation2 + $0x160] sm:$0xff] }
 0x399   : > { %17785 = vst [vmem:[#allocation39_spill] sm:$0xff] %v17784_v38  ;;  %v928_v62 = vsel %vm927_vm9, 1, %v17666_v33  ;;  %v6130_v28 = vsel %vm17428_vm3, %v6064_v13, 0.0  ;;  %v6327_v1 = vsel %vm17428_vm3, %v6261_v54, 0.0  ;;  %v5921_v4 = vadd.f32 %v5817_v63, %v5517_v5  ;;  %v5012_v47 = vpop.f32.mrf.mxu2  ;;  %v5583_v7 = vld [vmem:[#allocation2 + $0x162] sm:$0xff] }
 0x39a   : > { %v930_v34 = vadd.s32 %v928_v62, %v926_v51  ;;  %vm1712_vm13 = vcmp.ne.s32.totalorder %v906_v57, 0  ;;  %vm1760_vm2 = vcmp.lt.s32.totalorder %v906_v57, 0  ;;  %v1856_v58 = vadd.s32 24, %v906_v57 }
 0x39b   : > { %vm1808_vm1 = vmand %vm1760_vm2, %vm1712_vm13  ;;  %v6131_v3 = vadd.f32 %v6130_v28, %v14193_v50  ;;  %v6214_v61 = vmul.f32 %v5921_v4, %v5921_v4  ;;  %v14236_v48 = vmul.u32 43690, %v941_v36  ;;  %v6328_v63 = vadd.f32 %v6327_v1, %v14195_v17  ;;  %v17789_v50 = vld [vmem:[#allocation47_spill] sm:$0xff]  ;;  %11413 = vmatmul.msk.f32.gmra.mxu2 %vm17428_vm3, %v4775_v26  ;;  %v17791_v26 = vld [vmem:[#allocation36_spill] sm:$0xff] }
 0x39c   : > { %v931_v59 = vadd.s32 %v930_v34, %v920_v22  ;;  %v1904_v13 = vsel %vm1808_vm1, %v1856_v58, %v906_v57  ;;  %v14240_v5 = vmul.u32 43691, %v942_v9  ;;  %v947_v51 = vmul.u32 43690, %v942_v9  ;;  %v5416_v57 = vpop.f32.mrf.mxu3 }
 0x39d   : > { %vm14242_vm9 = vcmp.lt.s32.totalorder %v1904_v13, 16  ;;  %v17786_v54 = vmov 0  ;;  %v5114_v62 = vadd.f32 %v5012_v47, %v17789_v50  ;;  %v948_v22 = vshll.u32 %v14236_v48, 16  ;;  %v5179_v47 = vld [vmem:[#allocation2 + $0x161] sm:$0xff] }
 0x39e   : > { %v17787_v54 = vsel %vm14242_vm9, 4294967295, %v17786_v54  ;;  %v932_v28 = vadd.s32 %v931_v59, %v922_v18  ;;  %v6065_v36 = vsel %vm14242_vm9, %v5921_v4, 0.0  ;;  %v6262_v17 = vsel %vm14242_vm9, %v6214_v61, 0.0 }
 0x39f   : > { %17788 = vst [vmem:[#allocation40_spill] sm:$0xff] %v17787_v54  ;;  %v950_v1 = vshll.u32 %v14240_v5, 16  ;;  %v970_v9 = vand.u32 65535, %v14208_v52  ;;  %v6132_v34 = vsel %vm17428_vm3, %v6065_v36, 0.0  ;;  %v6329_v53 = vsel %vm17428_vm3, %v6262_v17, 0.0  ;;  %v5823_v36 = vpop.f32.mrf.mxu0  ;;  %11462 = vmatmul.msk.f32.gmra.mxu3 %vm17428_vm3, %v5179_v47 }
 0x3a0   : > { %v5518_v58 = vadd.f32 %v5416_v57, %v5114_v62  ;;  %v933_v18 = vshrl.u32 %v932_v28, 4  ;;  %v6133_v59 = vadd.f32 %v6132_v34, %v6131_v3  ;;  %v14256_v13 = vadd.f32 %v6329_v53, %v6328_v63  ;;  %11511 = vmatmul.msk.f32.gmra.mxu0 %vm17428_vm3, %v5583_v7  ;;  %v4776_v53 = vld [vmem:[#allocation2 + $0x168] sm:$0xff] }
 0x3a1   : > { %v949_v4 = vshrl.u32 %v14236_v48, 16  ;;  %vm952_vm13 = vc.u32 %v944_v40, %v948_v22  ;;  %v954_v38 = vadd.s32 %v948_v22, %v944_v40  ;;  %v971_v62 = vshrl.u32 %v14208_v52, 16  ;;  %v5015_v40 = vpop.f32.mrf.mxu2 }
 0x3a2   : > { %v934_v61 = vmul.u32 24, %v933_v18  ;;  %v14259_v50 = vadd.f32 %v5820_v35, %v5518_v58  ;;  %v953_v54 = vsel %vm952_vm13, 1, %v17666_v33  ;;  %v973_v3 = vmul.u32 43691, %v970_v9 }
 0x3a3   : > { %v955_v17 = vadd.s32 %v953_v54, %v947_v51  ;;  %v14264_v63 = vmul.u32 43690, %v970_v9  ;;  %vm956_vm2 = vc.u32 %v954_v38, %v950_v1  ;;  %v14271_v35 = vadd.s32 192, %v13230_v27 }
 0x3a4   : > { %17790 = vst [vmem:[#allocation41_spill] sm:$0xff] %v14259_v50  ;;  %v935_v28 = vsub.s32 %v14117_v0, %v934_v61  ;;  %v6215_v48 = vmul.f32 %v14259_v50, %v14259_v50  ;;  %v957_v22 = vsel %vm956_vm2, 1, %v17666_v33  ;;  %v975_v51 = vmul.u32 43691, %v971_v62  ;;  %v5419_v34 = vpop.f32.mrf.mxu3 }
 0x3a5   : > { %v976_v54 = vmul.u32 43690, %v971_v62  ;;  %v977_v57 = vshll.u32 %v14264_v63, 16  ;;  %v5115_v9 = vadd.f32 %v5015_v40, %v17791_v26  ;;  %v951_v38 = vshrl.u32 %v14240_v5, 16  ;;  %v4665_v62 = vpop.f32.mrf.mxu1  ;;  %v5180_v40 = vld [vmem:[#allocation2 + $0x169] sm:$0xff] }
 0x3a6   : > { %vm1713_vm1 = vcmp.ne.s32.totalorder %v935_v28, 0  ;;  %vm1761_vm13 = vcmp.lt.s32.totalorder %v935_v28, 0  ;;  %v1857_v0 = vadd.s32 24, %v935_v28  ;;  %v959_v1 = vadd.s32 %v957_v22, %v955_v17 }
 0x3a7   : > { %vm1809_vm9 = vmand %vm1761_vm13, %vm1713_vm1  ;;  %v978_v58 = vshrl.u32 %v14264_v63, 16  ;;  %v979_v18 = vshll.u32 %v975_v51, 16  ;;  %v5519_v7 = vadd.f32 %v5419_v34, %v5115_v9  ;;  %vm981_vm2 = vc.u32 %v973_v3, %v977_v57  ;;  %v5826_v22 = vpop.f32.mrf.mxu0  ;;  %v17799_v34 = vld [vmem:[#allocation8_spill] sm:$0xff] }
 0x3a8   : > { %v1905_v47 = vsel %vm1809_vm9, %v1857_v0, %v935_v28  ;;  %v983_v61 = vadd.s32 %v977_v57, %v973_v3  ;;  %v17792_v43 = vmov 0  ;;  %v960_v14 = vadd.s32 %v959_v1, %v949_v4  ;;  %v5584_v57 = vld [vmem:[#allocation2 + $0x16a] sm:$0xff] }
 0x3a9   : > { %vm14279_vm3 = vcmp.lt.s32.totalorder %v1905_v47, 16  ;;  %v982_v26 = vsel %vm981_vm2, 1, %v17666_v33  ;;  %v999_v5 = vand.u32 65535, %v14271_v35  ;;  %v14290_v28 = vadd.f32 %v5823_v36, %v5519_v7  ;;  %v5018_v7 = vpop.f32.mrf.mxu2 }
 0x3aa   : > { %v17793_v43 = vsel %vm14279_vm3, 4294967295, %v17792_v43  ;;  %v6066_v17 = vsel %vm14279_vm3, %v14259_v50, 0.0  ;;  %v6263_v63 = vsel %vm14279_vm3, %v6215_v48, 0.0  ;;  %vm17796_vm9 = vcmask 31744  }
 0x3ab   : > { %17794 = vst [vmem:[#allocation42_spill] sm:$0xff] %v17793_v43  ;;  %11414 = vmatmul.msk.f32.gmra.mxu2 %vm17796_vm9, %v4776_v53  ;;  %v984_v3 = vadd.s32 %v982_v26, %v976_v54  ;;  %vm17797_vm1 = vmmov %vm17796_vm9  ;;  %v961_v9 = vadd.s32 %v960_v14, %v951_v38  ;;  %vm985_vm2 = vc.u32 %v983_v61, %v979_v18  ;;  %v980_v36 = vshrl.u32 %v975_v51, 16  ;;  %v17802_v38 = vld [vmem:[#allocation37_spill] sm:$0xff] }
 0x3ac   : > { %17795 = vst [vmem:[#allocation43_spill] sm:$0xff] %v14290_v28  ;;  %v6134_v4 = vsel %vm17797_vm1, %v6066_v17, 0.0  ;;  %vm17798_vm13 = vmmov %vm17797_vm1  ;;  %v14296_v1 = vadd.f32 %v4665_v62, %v17799_v34  ;;  %v986_v48 = vsel %vm985_vm2, 1, %v17666_v33  ;;  %v1000_v14 = vshrl.u32 %v14271_v35, 16 }
 0x3ad   : > { %v6331_v0 = vsel %vm17798_vm13, %v6263_v63, 0.0  ;;  %v14298_v47 = vadd.f32 %v6134_v4, %v6133_v59  ;;  %vm17800_vm4 = vmmov %vm17797_vm1  ;;  %v962_v53 = vshrl.u32 %v961_v9, 4  ;;  %v988_v26 = vadd.s32 %v986_v48, %v984_v3  ;;  %v4777_v63 = vld [vmem:[#allocation2 + $0x170] sm:$0xff] }
 0x3ae   : > { %11463 = vmatmul.msk.f32.gmra.mxu3 %vm17800_vm4, %v5180_v40  ;;  %v14303_v54 = vadd.f32 %v6331_v0, %v14256_v13  ;;  %vm17801_vm9 = vmmov %vm17797_vm1  ;;  %v5116_v18 = vadd.f32 %v5018_v7, %v17802_v38  ;;  %v1002_v61 = vmul.u32 43691, %v999_v5  ;;  %v1003_v59 = vmul.u32 43690, %v999_v5  ;;  %v5422_v13 = vpop.f32.mrf.mxu3  ;;  %v5181_v48 = vld [vmem:[#allocation2 + $0x171] sm:$0xff] }
 0x3af   : > { %11512 = vmatmul.msk.f32.gmra.mxu0 %vm17801_vm9, %v5584_v57  ;;  %v14309_v62 = vadd.s32 200, %v13230_v27  ;;  %v963_v51 = vmul.u32 24, %v962_v53  ;;  %v6216_v40 = vmul.f32 %v14290_v28, %v14290_v28  ;;  %v989_v17 = vadd.s32 %v988_v26, %v978_v58  ;;  %vm17803_vm4 = vmmov %vm17797_vm1  ;;  %v5829_v26 = vpop.f32.mrf.mxu0 }
 0x3b0   : > { %v14313_v4 = vmul.u32 43691, %v1000_v14  ;;  %v5520_v3 = vadd.f32 %v5422_v13, %v5116_v18  ;;  %v1005_v57 = vmul.u32 43690, %v1000_v14  ;;  %v1006_v0 = vshll.u32 %v1003_v59, 16  ;;  %v5585_v14 = vld [vmem:[#allocation2 + $0x172] sm:$0xff]  ;;  %vm17804_vm3 = vmmov %vm17803_vm4 }
 0x3b1   : > { %v14316_v9 = vadd.s32 208, %v13230_v27  ;;  %v964_v5 = vsub.s32 %v14204_v6, %v963_v51  ;;  %v990_v34 = vadd.s32 %v989_v17, %v980_v36  ;;  %v1028_v7 = vand.u32 65535, %v14309_v62 }
 0x3b2   : > { %v1008_v53 = vshll.u32 %v14313_v4, 16  ;;  %v14321_v38 = vadd.f32 %v5826_v22, %v5520_v3  ;;  %vm1010_vm1 = vc.u32 %v1002_v61, %v1006_v0  ;;  %v1012_v58 = vadd.s32 %v1006_v0, %v1002_v61  ;;  %v5021_v61 = vpop.f32.mrf.mxu2 }
 0x3b3   : > { %11415 = vmatmul.msk.f32.gmra.mxu2 %vm17803_vm4, %v4777_v63  ;;  %v1029_v18 = vshrl.u32 %v14309_v62, 16  ;;  %vm1714_vm13 = vcmp.ne.s32.totalorder %v964_v5, 0  ;;  %vm1762_vm2 = vcmp.lt.s32.totalorder %v964_v5, 0  ;;  %v1858_v13 = vadd.s32 24, %v964_v5  ;;  %vm17805_vm4 = vmmov %vm17804_vm3 }
 0x3b4   : > { %v991_v6 = vshrl.u32 %v990_v34, 4  ;;  %vm1810_vm9 = vmand %vm1762_vm2, %vm1714_vm13  ;;  %v1007_v36 = vshrl.u32 %v1003_v59, 16  ;;  %v1009_v51 = vshrl.u32 %v14313_v4, 16  ;;  %v1011_v22 = vsel %vm1010_vm1, 1, %v17666_v33 }
 0x3b5   : > { %vm1014_vm10 = vc.u32 %v1012_v58, %v1008_v53  ;;  %v1906_v17 = vsel %vm1810_vm9, %v1858_v13, %v964_v5  ;;  %v1013_v3 = vadd.s32 %v1011_v22, %v1005_v57  ;;  %v17806_v43 = vmov 0  ;;  %vm17810_vm9 = vmmov %vm17804_vm3 }
 0x3b6   : > { %11464 = vmatmul.msk.f32.gmra.mxu3 %vm17804_vm3, %v5181_v48  ;;  %v992_v63 = vmul.u32 24, %v991_v6  ;;  %v1015_v0 = vsel %vm1014_vm10, 1, %v17666_v33  ;;  %vm14330_vm11 = vcmp.lt.s32.totalorder %v1906_v17, 16  ;;  %v5117_v34 = vadd.f32 %v5021_v61, %v13285_v29  ;;  %v5425_v53 = vpop.f32.mrf.mxu3  ;;  %vm17809_vm10 = vmmov %vm17804_vm3 }
 0x3b7   : > { %11513 = vmatmul.msk.f32.gmra.mxu0 %vm17805_vm4, %v5585_v14  ;;  %v17807_v43 = vsel %vm14330_vm11, 4294967295, %v17806_v43  ;;  %v14335_v59 = vmul.u32 43690, %v1028_v7  ;;  %v14337_v4 = vmul.u32 43691, %v1029_v18  ;;  %v6067_v5 = vsel %vm14330_vm11, %v14290_v28, 0.0  ;;  %v4778_v14 = vld [vmem:[#allocation2 + $0x178] sm:$0xff] }
 0x3b8   : > { %17808 = vst [vmem:[#allocation44_spill] sm:$0xff] %v17807_v43  ;;  %v6264_v57 = vsel %vm14330_vm11, %v6216_v40, 0.0  ;;  %v993_v48 = vsub.s32 %v14208_v52, %v992_v63  ;;  %v1017_v58 = vadd.s32 %v1015_v0, %v1013_v3  ;;  %v6136_v13 = vsel %vm17804_vm3, %v6067_v5, 0.0  ;;  %v5182_v28 = vld [vmem:[#allocation2 + $0x179] sm:$0xff]  ;;  %v5832_v0 = vpop.f32.mrf.mxu0 }
 0x3b9   : > { %v6333_v29 = vsel %vm17809_vm10, %v6264_v57, 0.0  ;;  %v5521_v6 = vadd.f32 %v5425_v53, %v5117_v34  ;;  %v1031_v22 = vmul.u32 43691, %v1028_v7  ;;  %v6217_v61 = vmul.f32 %v14321_v38, %v14321_v38  ;;  %v5586_v5 = vld [vmem:[#allocation2 + $0x17a] sm:$0xff] }
 0x3ba   : > { %vm1715_vm1 = vcmp.ne.s32.totalorder %v993_v48, 0  ;;  %vm1763_vm13 = vcmp.lt.s32.totalorder %v993_v48, 0  ;;  %v1859_v17 = vadd.s32 24, %v993_v48  ;;  %v6137_v40 = vadd.f32 %v6136_v13, %v14298_v47  ;;  %v4668_v13 = vpop.f32.mrf.mxu1 }
 0x3bb   : > { %vm1811_vm2 = vmand %vm1763_vm13, %vm1715_vm1  ;;  %v1018_v52 = vadd.s32 %v1017_v58, %v1007_v36  ;;  %11416 = vmatmul.msk.f32.gmra.mxu2 %vm17810_vm9, %v4778_v14  ;;  %v1034_v63 = vmul.u32 43690, %v1029_v18  ;;  %v1035_v3 = vshll.u32 %v14335_v59, 16  ;;  %v6334_v7 = vadd.f32 %v6333_v29, %v14303_v54 }
 0x3bc   : > { %v1907_v34 = vsel %vm1811_vm2, %v1859_v17, %v993_v48  ;;  %v14353_v57 = vadd.f32 %v5829_v26, %v5521_v6  ;;  %v1037_v53 = vshll.u32 %v14337_v4, 16  ;;  %v17812_v43 = vmov 0  ;;  %v5024_v26 = vpop.f32.mrf.mxu2  ;;  %vm17815_vm1 = vmmov %vm17804_vm3 }
 0x3bd   : > { %vm14356_vm4 = vcmp.lt.s32.totalorder %v1907_v34, 16  ;;  %v1019_v47 = vadd.s32 %v1018_v52, %v1009_v51  ;;  %v1036_v18 = vshrl.u32 %v14335_v59, 16  ;;  %vm1039_vm10 = vc.u32 %v1031_v22, %v1035_v3  ;;  %vm17816_vm13 = vmmov %vm17815_vm1 }
 0x3be   : > { %17811 = vst [vmem:[#allocation6_spill] sm:$0xff] %v14353_v57  ;;  %v17813_v43 = vsel %vm14356_vm4, 4294967295, %v17812_v43  ;;  %11465 = vmatmul.msk.f32.gmra.mxu3 %vm17804_vm3, %v5182_v28  ;;  %v6068_v36 = vsel %vm14356_vm4, %v14321_v38, 0.0  ;;  %v6265_v54 = vsel %vm14356_vm4, %v6217_v61, 0.0  ;;  %v1040_v48 = vsel %vm1039_vm10, 1, %v17666_v33  ;;  %vm17817_vm2 = vmmov %vm17815_vm1  ;;  %v5428_v6 = vpop.f32.mrf.mxu3  ;;  %v4779_v61 = vld [vmem:[#allocation2 + $0x180] sm:$0xff] }
 0x3bf   : > { %17814 = vst [vmem:[#allocation45_spill] sm:$0xff] %v17813_v43  ;;  %v1041_v58 = vadd.s32 %v1035_v3, %v1031_v22  ;;  %11514 = vmatmul.msk.f32.gmra.mxu0 %vm17815_vm1, %v5586_v5  ;;  %v6138_v51 = vsel %vm17816_vm13, %v6068_v36, 0.0  ;;  %v6335_v28 = vsel %vm17817_vm2, %v6265_v54, 0.0  ;;  %v1020_v14 = vshrl.u32 %v1019_v47, 4  ;;  %v5183_v36 = vld [vmem:[#allocation2 + $0x181] sm:$0xff]  ;;  %vm17819_vm3 = vmmov %vm17815_vm1 }
 0x3c0   : > { %v5118_v59 = vadd.f32 %v5024_v26, %v13289_v41  ;;  %v14372_v29 = vadd.f32 %v6138_v51, %v6137_v40  ;;  %v14374_v38 = vadd.f32 %v6335_v28, %v6334_v7  ;;  %v1042_v17 = vadd.s32 %v1040_v48, %v1034_v63  ;;  %v17818_v7 = vld [vmem:[#allocation7_spill] sm:$0xff]  ;;  %v5835_v48 = vpop.f32.mrf.mxu0  ;;  %vm17820_vm13 = vmmov %vm17817_vm2 }
 0x3c1   : > { %vm1043_vm9 = vc.u32 %v1041_v58, %v1037_v53  ;;  %v1021_v52 = vmul.u32 24, %v1020_v14  ;;  %v1057_v5 = vand.u32 65535, %v14316_v9  ;;  %v1038_v34 = vshrl.u32 %v14337_v4, 16  ;;  %v5587_v58 = vld [vmem:[#allocation2 + $0x182] sm:$0xff] }
 0x3c2   : > { %v5522_v22 = vadd.f32 %v5428_v6, %v5118_v59  ;;  %v1044_v3 = vsel %vm1043_vm9, 1, %v17666_v33  ;;  %v1058_v41 = vshrl.u32 %v14316_v9, 16  ;;  %v14381_v40 = vadd.s32 216, %v13230_v27  ;;  %vm17821_vm9 = vmmov %vm17819_vm3 }
 0x3c3   : > { %v1046_v47 = vadd.s32 %v1044_v3, %v1042_v17  ;;  %v14384_v54 = vadd.f32 %v4668_v13, %v17818_v7  ;;  %v1022_v63 = vsub.s32 %v14271_v35, %v1021_v52  ;;  %11417 = vmatmul.msk.f32.gmra.mxu2 %vm17819_vm3, %v4779_v61  ;;  %v1061_v26 = vmul.u32 43690, %v1057_v5 }
 0x3c4   : > { %v14387_v53 = vadd.f32 %v5832_v0, %v5522_v22  ;;  %v6218_v4 = vmul.f32 %v14353_v57, %v14353_v57  ;;  %v1060_v28 = vmul.u32 43691, %v1057_v5  ;;  %v14392_v14 = vmul.u32 43691, %v1058_v41  ;;  %v5027_v13 = vpop.f32.mrf.mxu2 }
 0x3c5   : > { %v1047_v51 = vadd.s32 %v1046_v47, %v1036_v18  ;;  %vm1716_vm10 = vcmp.ne.s32.totalorder %v1022_v63, 0  ;;  %vm1764_vm1 = vcmp.lt.s32.totalorder %v1022_v63, 0  ;;  %v1860_v59 = vadd.s32 24, %v1022_v63 }
 0x3c6   : > { %11466 = vmatmul.msk.f32.gmra.mxu3 %vm17820_vm13, %v5183_v36  ;;  %v14396_v35 = vadd.s32 224, %v13230_v27  ;;  %vm1812_vm2 = vmand %vm1764_vm1, %vm1716_vm10  ;;  %v1063_v6 = vmul.u32 43690, %v1058_v41  ;;  %v1064_v17 = vshll.u32 %v1061_v26, 16  ;;  %v1086_v18 = vand.u32 65535, %v14381_v40  ;;  %v5431_v47 = vpop.f32.mrf.mxu3  ;;  %v4780_v41 = vld [vmem:[#allocation2 + $0x188] sm:$0xff] }
 0x3c7   : > { %v1048_v0 = vadd.s32 %v1047_v51, %v1038_v34  ;;  %11515 = vmatmul.msk.f32.gmra.mxu0 %vm17821_vm9, %v5587_v58  ;;  %v1908_v61 = vsel %vm1812_vm2, %v1860_v59, %v1022_v63  ;;  %v6219_v52 = vmul.f32 %v14387_v53, %v14387_v53  ;;  %v5119_v22 = vadd.f32 %v5027_v13, %v13298_v37  ;;  %vm17825_vm1 = vmmov %vm17821_vm9 }
 0x3c8   : > { %v1066_v3 = vshll.u32 %v14392_v14, 16  ;;  %vm14404_vm3 = vcmp.lt.s32.totalorder %v1908_v61, 16  ;;  %v17822_v5 = vmov 0  ;;  %vm1068_vm10 = vc.u32 %v1060_v28, %v1064_v17  ;;  %v5184_v61 = vld [vmem:[#allocation2 + $0x189] sm:$0xff]  ;;  %vm17826_vm13 = vmmov %vm17825_vm1 }
 0x3c9   : > { %v17823_v5 = vsel %vm14404_vm3, 4294967295, %v17822_v5  ;;  %v1049_v34 = vshrl.u32 %v1048_v0, 4  ;;  %v1070_v36 = vadd.s32 %v1064_v17, %v1060_v28  ;;  %v6069_v7 = vsel %vm14404_vm3, %v14353_v57, 0.0  ;;  %vm17827_vm9 = vmmov %vm17825_vm1 }
 0x3ca   : > { %17824 = vst [vmem:[#allocation46_spill] sm:$0xff] %v17823_v5  ;;  %v6266_v63 = vsel %vm14404_vm3, %v6218_v4, 0.0  ;;  %v1069_v37 = vsel %vm1068_vm10, 1, %v17666_v33  ;;  %v1087_v58 = vshrl.u32 %v14381_v40, 16  ;;  %v6140_v51 = vsel %vm17825_vm1, %v6069_v7, 0.0  ;;  %v5838_v5 = vpop.f32.mrf.mxu0  ;;  %v5588_v4 = vld [vmem:[#allocation2 + $0x18a] sm:$0xff]  ;;  %vm17828_vm10 = vmmov %vm17825_vm1 }
 0x3cb   : > { %v1050_v59 = vmul.u32 24, %v1049_v34  ;;  %v1065_v13 = vshrl.u32 %v1061_v26, 16  ;;  %v1071_v0 = vadd.s32 %v1069_v37, %v1063_v6  ;;  %v6337_v28 = vsel %vm17826_vm13, %v6266_v63, 0.0  ;;  %11418 = vmatmul.msk.f32.gmra.mxu2 %vm17827_vm9, %v4780_v41 }
 0x3cc   : > { %v5523_v17 = vadd.f32 %v5431_v47, %v5119_v22  ;;  %v1067_v43 = vshrl.u32 %v14392_v14, 16  ;;  %vm1072_vm2 = vc.u32 %v1070_v36, %v1066_v3  ;;  %v1089_v49 = vmul.u32 43691, %v1086_v18  ;;  %v5030_v3 = vpop.f32.mrf.mxu2 }
 0x3cd   : > { %v1051_v57 = vsub.s32 %v14309_v62, %v1050_v59  ;;  %v1073_v50 = vsel %vm1072_vm2, 1, %v17666_v33  ;;  %v1090_v7 = vmul.u32 43690, %v1086_v18  ;;  %v6141_v26 = vadd.f32 %v6140_v51, %v14372_v29 }
 0x3ce   : > { %v1075_v6 = vadd.s32 %v1073_v50, %v1071_v0  ;;  %11467 = vmatmul.msk.f32.gmra.mxu3 %vm17828_vm10, %v5184_v61  ;;  %v1091_v34 = vmul.u32 43691, %v1087_v58  ;;  %v1092_v22 = vmul.u32 43690, %v1087_v58  ;;  %v14424_v36 = vadd.f32 %v5835_v48, %v5523_v17  ;;  %v5434_v50 = vpop.f32.mrf.mxu3  ;;  %v4781_v58 = vld [vmem:[#allocation2 + $0x190] sm:$0xff] }
 0x3cf   : > { %vm1717_vm1 = vcmp.ne.s32.totalorder %v1051_v57, 0  ;;  %vm1765_vm13 = vcmp.lt.s32.totalorder %v1051_v57, 0  ;;  %v1861_v14 = vadd.s32 24, %v1051_v57  ;;  %v1093_v47 = vshll.u32 %v1090_v7, 16  ;;  %11516 = vmatmul.msk.f32.gmra.mxu0 %vm17827_vm9, %v5588_v4 }
 0x3d0   : > { %vm1813_vm3 = vmand %vm1765_vm13, %vm1717_vm1  ;;  %v1076_v62 = vadd.s32 %v1075_v6, %v1065_v13  ;;  %v5120_v18 = vadd.f32 %v5030_v3, %v13302_v12  ;;  %v1095_v41 = vshll.u32 %v1091_v34, 16  ;;  %v1094_v63 = vshrl.u32 %v1090_v7, 16  ;;  %v5185_v13 = vld [vmem:[#allocation2 + $0x191] sm:$0xff] }
 0x3d1   : > { %v1909_v29 = vsel %vm1813_vm3, %v1861_v14, %v1051_v57  ;;  %vm1097_vm2 = vc.u32 %v1089_v49, %v1093_v47  ;;  %v1099_v37 = vadd.s32 %v1093_v47, %v1089_v49  ;;  %v17829_v51 = vmov 0  ;;  %vm17832_vm1 = vmmov %vm17827_vm9  ;;  %v5589_v6 = vld [vmem:[#allocation2 + $0x192] sm:$0xff] }
 0x3d2   : > { %vm14427_vm10 = vcmp.lt.s32.totalorder %v1909_v29, 16  ;;  %v1077_v59 = vadd.s32 %v1076_v62, %v1067_v43  ;;  %v5524_v0 = vadd.f32 %v5434_v50, %v5120_v18  ;;  %v1098_v61 = vsel %vm1097_vm2, 1, %v17666_v33  ;;  %vm17833_vm13 = vmmov %vm17832_vm1  ;;  %v14441_v7 = vpop.f32.mrf.mxu0 }
 0x3d3   : > { %v17830_v51 = vsel %vm14427_vm10, 4294967295, %v17829_v51  ;;  %v6070_v48 = vsel %vm14427_vm10, %v14387_v53, 0.0  ;;  %v6267_v12 = vsel %vm14427_vm10, %v6219_v52, 0.0  ;;  %v1100_v57 = vadd.s32 %v1098_v61, %v1092_v22  ;;  %vm17834_vm9 = vmmov %vm17832_vm1 }
 0x3d4   : > { %17831 = vst [vmem:[#allocation47_spill] sm:$0xff] %v17830_v51  ;;  %vm1101_vm3 = vc.u32 %v1099_v37, %v1095_v41  ;;  %v6142_v49 = vsel %vm17832_vm1, %v6070_v48, 0.0  ;;  %v6339_v17 = vsel %vm17833_vm13, %v6267_v12, 0.0  ;;  %v1078_v4 = vshrl.u32 %v1077_v59, 4  ;;  %11419 = vmatmul.msk.f32.gmra.mxu2 %vm17834_vm9, %v4781_v58  ;;  %vm17835_vm2 = vmmov %vm17832_vm1  ;;  %v5033_v58 = vpop.f32.mrf.mxu2 }
 0x3d5   : > { %v1102_v43 = vsel %vm1101_vm3, 1, %v17666_v33  ;;  %v6338_v14 = vadd.f32 %v6337_v28, %v14374_v38  ;;  %v1096_v3 = vshrl.u32 %v1091_v34, 16  ;;  %v14444_v52 = vadd.f32 %v5838_v5, %v5524_v0  ;;  %vm17836_vm3 = vmmov %vm17832_vm1 }
 0x3d6   : > { %v1104_v47 = vadd.s32 %v1102_v43, %v1100_v57  ;;  %v1079_v22 = vmul.u32 24, %v1078_v4  ;;  %v6220_v62 = vmul.f32 %v14424_v36, %v14424_v36  ;;  %11468 = vmatmul.msk.f32.gmra.mxu3 %vm17835_vm2, %v5185_v13  ;;  %v1115_v18 = vand.u32 65535, %v14396_v35  ;;  %v5437_v61 = vpop.f32.mrf.mxu3  ;;  %v5186_v4 = vld [vmem:[#allocation2 + $0x199] sm:$0xff]  ;;  %vm17842_vm10 = vmmov %vm17835_vm2 }
 0x3d7   : > { %v1116_v41 = vshrl.u32 %v14396_v35, 16  ;;  %v6143_v29 = vadd.f32 %v6142_v49, %v6141_v26  ;;  %v6340_v50 = vadd.f32 %v6339_v17, %v6338_v14  ;;  %11517 = vmatmul.msk.f32.gmra.mxu0 %vm17836_vm3, %v5589_v6  ;;  %v14453_v38 = vadd.s32 232, %v13230_v27 }
 0x3d8   : > { %v1105_v37 = vadd.s32 %v1104_v47, %v1094_v63  ;;  %v1080_v5 = vsub.s32 %v14316_v9, %v1079_v22  ;;  %v14458_v28 = vmul.f32 %v14444_v52, %v14444_v52  ;;  %v5121_v34 = vadd.f32 %v5033_v58, %v13306_v46  ;;  %v4782_v63 = vld [vmem:[#allocation2 + $0x198] sm:$0xff] }
 0x3d9   : > { %v1119_v59 = vmul.u32 43690, %v1115_v18  ;;  %v1118_v26 = vmul.u32 43691, %v1115_v18  ;;  %v14461_v48 = vmul.u32 43691, %v1116_v41  ;;  %v14464_v12 = vadd.s32 240, %v13230_v27  ;;  %v5590_v22 = vld [vmem:[#allocation2 + $0x19a] sm:$0xff] }
 0x3da   : > { %v1106_v0 = vadd.s32 %v1105_v37, %v1096_v3  ;;  %vm1718_vm1 = vcmp.ne.s32.totalorder %v1080_v5, 0  ;;  %vm1766_vm13 = vcmp.lt.s32.totalorder %v1080_v5, 0  ;;  %v1862_v57 = vadd.s32 24, %v1080_v5  ;;  %v5844_v47 = vpop.f32.mrf.mxu0 }
 0x3db   : > { %v1121_v9 = vmul.u32 43690, %v1116_v41  ;;  %vm1814_vm9 = vmand %vm1766_vm13, %vm1718_vm1  ;;  %v5525_v49 = vadd.f32 %v5437_v61, %v5121_v34  ;;  %v1122_v17 = vshll.u32 %v1119_v59, 16  ;;  %v1144_v46 = vand.u32 65535, %v14453_v38 }
 0x3dc   : > { %v1107_v13 = vshrl.u32 %v1106_v0, 4  ;;  %v1910_v43 = vsel %vm1814_vm9, %v1862_v57, %v1080_v5  ;;  %v1123_v6 = vshrl.u32 %v1119_v59, 16  ;;  %v1124_v14 = vshll.u32 %v14461_v48, 16  ;;  %11420 = vmatmul.msk.f32.gmra.mxu2 %vm17835_vm2, %v4782_v63  ;;  %vm17840_vm13 = vmmov %vm17835_vm2  ;;  %v5036_v63 = vpop.f32.mrf.mxu2 }
 0x3dd   : > { %v1125_v3 = vshrl.u32 %v14461_v48, 16  ;;  %vm14470_vm3 = vcmp.lt.s32.totalorder %v1910_v43, 16  ;;  %v17837_v18 = vmov 0  ;;  %vm1126_vm1 = vc.u32 %v1118_v26, %v1122_v17  ;;  %vm17841_vm9 = vmmov %vm17835_vm2  ;;  %v4783_v43 = vld [vmem:[#allocation2 + $0x1a0] sm:$0xff] }
 0x3de   : > { %v17838_v18 = vsel %vm14470_vm3, 4294967295, %v17837_v18  ;;  %v1108_v41 = vmul.u32 24, %v1107_v13  ;;  %v1128_v37 = vadd.s32 %v1122_v17, %v1118_v26  ;;  %v6071_v58 = vsel %vm14470_vm3, %v14424_v36, 0.0  ;;  %11469 = vmatmul.msk.f32.gmra.mxu3 %vm17840_vm13, %v5186_v4  ;;  %v5440_v4 = vpop.f32.mrf.mxu3 }
 0x3df   : > { %17839 = vst [vmem:[#allocation36_spill] sm:$0xff] %v17838_v18  ;;  %v6268_v5 = vsel %vm14470_vm3, %v6220_v62, 0.0  ;;  %v1127_v34 = vsel %vm1126_vm1, 1, %v17666_v33  ;;  %v1145_v59 = vshrl.u32 %v14453_v38, 16  ;;  %v6144_v0 = vsel %vm17841_vm9, %v6071_v58, 0.0  ;;  %11518 = vmatmul.msk.f32.gmra.mxu0 %vm17842_vm10, %v5590_v22  ;;  %vm17847_vm9 = vmmov %vm17835_vm2 }
 0x3e0   : > { %v6341_v61 = vsel %vm17835_vm2, %v6268_v5, 0.0  ;;  %v1109_v48 = vsub.s32 %v14381_v40, %v1108_v41  ;;  %v1129_v26 = vadd.s32 %v1127_v34, %v1121_v9  ;;  %v6145_v36 = vadd.f32 %v6144_v0, %v6143_v29 }
 0x3e1   : > { %v6342_v57 = vadd.f32 %v6341_v61, %v6340_v50  ;;  %vm1130_vm4 = vc.u32 %v1128_v37, %v1124_v14  ;;  %v5122_v62 = vadd.f32 %v5036_v63, %v13313_v30  ;;  %v14489_v40 = vadd.f32 %v14441_v7, %v5525_v49  ;;  %v5187_v14 = vld [vmem:[#allocation2 + $0x1a1] sm:$0xff] }
 0x3e2   : > { %vm1719_vm1 = vcmp.ne.s32.totalorder %v1109_v48, 0  ;;  %vm1767_vm3 = vcmp.lt.s32.totalorder %v1109_v48, 0  ;;  %v1863_v13 = vadd.s32 24, %v1109_v48  ;;  %v1131_v17 = vsel %vm1130_vm4, 1, %v17666_v33  ;;  %vm17846_vm4 = vmmov %vm17835_vm2  ;;  %v5847_v7 = vpop.f32.mrf.mxu0  ;;  %v5591_v49 = vld [vmem:[#allocation2 + $0x1a2] sm:$0xff] }
 0x3e3   : > { %vm1815_vm13 = vmand %vm1767_vm3, %vm1719_vm1  ;;  %v1133_v58 = vadd.s32 %v1131_v17, %v1129_v26  ;;  %v1147_v9 = vmul.u32 43691, %v1144_v46  ;;  %v1148_v41 = vmul.u32 43690, %v1144_v46  ;;  %v5526_v29 = vadd.f32 %v5440_v4, %v5122_v62 }
 0x3e4   : > { %v1911_v22 = vsel %vm1815_vm13, %v1863_v13, %v1109_v48  ;;  %v1149_v50 = vmul.u32 43691, %v1145_v59  ;;  %v14492_v30 = vadd.s32 248, %v13230_v27  ;;  %v17843_v37 = vmov 0  ;;  %11421 = vmatmul.msk.f32.gmra.mxu2 %vm17846_vm4, %v4783_v43  ;;  %vm17848_vm1 = vmmov %vm17835_vm2 }
 0x3e5   : > { %vm14494_vm10 = vcmp.lt.s32.totalorder %v1911_v22, 16  ;;  %v1134_v5 = vadd.s32 %v1133_v58, %v1123_v6  ;;  %v1150_v34 = vmul.u32 43690, %v1145_v59  ;;  %v1151_v0 = vshll.u32 %v1148_v41, 16  ;;  %vm17849_vm13 = vmmov %vm17848_vm1 }
 0x3e6   : > { %v17844_v37 = vsel %vm14494_vm10, 4294967295, %v17843_v37  ;;  %v6072_v46 = vsel %vm14494_vm10, %v14444_v52, 0.0  ;;  %v6269_v61 = vsel %vm14494_vm10, %v14458_v28, 0.0  ;;  %v1153_v48 = vshll.u32 %v1149_v50, 16  ;;  %11470 = vmatmul.msk.f32.gmra.mxu3 %vm17847_vm9, %v5187_v14  ;;  %v5039_v28 = vpop.f32.mrf.mxu2 }
 0x3e7   : > { %17845 = vst [vmem:[#allocation8_spill] sm:$0xff] %v17844_v37  ;;  %v1173_v26 = vand.u32 65535, %v14464_v12  ;;  %v1135_v63 = vadd.s32 %v1134_v5, %v1125_v3  ;;  %v14508_v6 = vmul.f32 %v14489_v40, %v14489_v40  ;;  %v1152_v59 = vshrl.u32 %v1148_v41, 16  ;;  %11519 = vmatmul.msk.f32.gmra.mxu0 %vm17849_vm13, %v5591_v49  ;;  %v5443_v41 = vpop.f32.mrf.mxu3  ;;  %v4784_v37 = vld [vmem:[#allocation2 + $0x1a8] sm:$0xff] }
 0x3e8   : > { %vm1155_vm3 = vc.u32 %v1147_v9, %v1151_v0  ;;  %v6146_v62 = vsel %vm17835_vm2, %v6072_v46, 0.0  ;;  %v6343_v13 = vsel %vm17848_vm1, %v6269_v61, 0.0  ;;  %v1157_v4 = vadd.s32 %v1151_v0, %v1147_v9 }
 0x3e9   : > { %v1156_v17 = vsel %vm1155_vm3, 1, %v17666_v33  ;;  %v1136_v43 = vshrl.u32 %v1135_v63, 4  ;;  %v14515_v58 = vadd.f32 %v5844_v47, %v5526_v29  ;;  %v5123_v22 = vadd.f32 %v5039_v28, %v13320_v11  ;;  %v5188_v47 = vld [vmem:[#allocation2 + $0x1a9] sm:$0xff]  ;;  %vm17850_vm3 = vmmov %vm17848_vm1 }
 0x3ea   : > { %v1158_v3 = vadd.s32 %v1156_v17, %v1150_v34  ;;  %vm1159_vm4 = vc.u32 %v1157_v4, %v1153_v48  ;;  %v1174_v14 = vshrl.u32 %v14464_v12, 16  ;;  %v1176_v5 = vmul.u32 43691, %v1173_v26  ;;  %vm17851_vm13 = vmmov %vm17850_vm3 }
 0x3eb   : > { %v1177_v46 = vmul.u32 43690, %v1173_v26  ;;  %v6147_v61 = vadd.f32 %v6146_v62, %v6145_v36  ;;  %v1137_v18 = vmul.u32 24, %v1136_v43  ;;  %v1154_v51 = vshrl.u32 %v1149_v50, 16  ;;  %v5592_v36 = vld [vmem:[#allocation2 + $0x1aa] sm:$0xff] }
 0x3ec   : > { %v1160_v9 = vsel %vm1159_vm4, 1, %v17666_v33  ;;  %v1178_v49 = vmul.u32 43691, %v1174_v14  ;;  %v1179_v63 = vmul.u32 43690, %v1174_v14  ;;  %v6344_v29 = vadd.f32 %v6343_v13, %v6342_v57  ;;  %11422 = vmatmul.msk.f32.gmra.mxu2 %vm17850_vm3, %v4784_v37 }
 0x3ed   : > { %v1162_v0 = vadd.s32 %v1160_v9, %v1158_v3  ;;  %v1180_v34 = vshll.u32 %v1177_v46, 16  ;;  %v1138_v11 = vsub.s32 %v14396_v35, %v1137_v18  ;;  %v14523_v48 = vmul.f32 %v14515_v58, %v14515_v58  ;;  %v5850_v35 = vpop.f32.mrf.mxu0 }
 0x3ee   : > { %v5527_v17 = vadd.f32 %v5443_v41, %v5123_v22  ;;  %v1182_v50 = vshll.u32 %v1178_v49, 16  ;;  %v1202_v62 = vand.u32 65535, %v14492_v30  ;;  %11471 = vmatmul.msk.f32.gmra.mxu3 %vm17851_vm13, %v5188_v47  ;;  %v1181_v13 = vshrl.u32 %v1177_v46, 16  ;;  %v5042_v37 = vpop.f32.mrf.mxu2 }
 0x3ef   : > { %v1163_v26 = vadd.s32 %v1162_v0, %v1152_v59  ;;  %vm1184_vm9 = vc.u32 %v1176_v5, %v1180_v34  ;;  %vm1720_vm2 = vcmp.ne.s32.totalorder %v1138_v11, 0  ;;  %vm1768_vm1 = vcmp.lt.s32.totalorder %v1138_v11, 0  ;;  %11520 = vmatmul.msk.f32.gmra.mxu0 %vm17850_vm3, %v5592_v36 }
 0x3f0   : > { %v1864_v4 = vadd.s32 24, %v1138_v11  ;;  %v1185_v57 = vsel %vm1184_vm9, 1, %v17666_v33  ;;  %vm1816_vm4 = vmand %vm1768_vm1, %vm1720_vm2  ;;  %v1186_v28 = vadd.s32 %v1180_v34, %v1176_v5  ;;  %v14530_v3 = vadd.f32 %v5847_v7, %v5527_v17 }
 0x3f1   : > { %v1164_v18 = vadd.s32 %v1163_v26, %v1154_v51  ;;  %v1187_v43 = vadd.s32 %v1185_v57, %v1179_v63  ;;  %v5124_v22 = vadd.f32 %v5042_v37, %v13332_v44  ;;  %v1203_v41 = vshrl.u32 %v14492_v30, 16  ;;  %v5446_v51 = vpop.f32.mrf.mxu3  ;;  %vm17855_vm2 = vmmov %vm17850_vm3 }
 0x3f2   : > { %v1912_v59 = vsel %vm1816_vm4, %v1864_v4, %v1138_v11  ;;  %v17852_v14 = vmov 0  ;;  %vm1188_vm9 = vc.u32 %v1186_v28, %v1182_v50  ;;  %v1206_v46 = vmul.u32 43690, %v1202_v62  ;;  %vm17856_vm1 = vmmov %vm17855_vm2 }
 0x3f3   : > { %vm14534_vm10 = vcmp.lt.s32.totalorder %v1912_v59, 16  ;;  %v1165_v9 = vshrl.u32 %v1164_v18, 4  ;;  %v1183_v0 = vshrl.u32 %v1178_v49, 16  ;;  %v1189_v44 = vsel %vm1188_vm9, 1, %v17666_v33 }
 0x3f4   : > { %v17853_v14 = vsel %vm14534_vm10, 4294967295, %v17852_v14  ;;  %v6073_v5 = vsel %vm14534_vm10, %v14489_v40, 0.0  ;;  %v6270_v7 = vsel %vm14534_vm10, %v14508_v6, 0.0  ;;  %v1191_v11 = vadd.s32 %v1189_v44, %v1187_v43 }
 0x3f5   : > { %17854 = vst [vmem:[#allocation37_spill] sm:$0xff] %v17853_v14  ;;  %v6148_v63 = vsel %vm17855_vm2, %v6073_v5, 0.0  ;;  %v6345_v34 = vsel %vm17856_vm1, %v6270_v7, 0.0  ;;  %v1166_v47 = vmul.u32 24, %v1165_v9  ;;  %v5528_v36 = vadd.f32 %v5446_v51, %v5124_v22 }
 0x3f6   : > { %v6149_v17 = vadd.f32 %v6148_v63, %v6147_v61  ;;  %v1205_v26 = vmul.u32 43691, %v1202_v62  ;;  %v1207_v50 = vmul.u32 43691, %v1203_v41  ;;  %v6346_v57 = vadd.f32 %v6345_v34, %v6344_v29  ;;  %v5045_v43 = vpop.f32.mrf.mxu2 }
 0x3f7   : > { %v1167_v4 = vsub.s32 %v14453_v38, %v1166_v47  ;;  %v1192_v18 = vadd.s32 %v1191_v11, %v1181_v13  ;;  %v1209_v28 = vshll.u32 %v1206_v46, 16  ;;  %v1208_v37 = vmul.u32 43690, %v1203_v41  ;;  %v5853_v38 = vpop.f32.mrf.mxu0 }
 0x3f8   : > { %v1210_v6 = vshrl.u32 %v1206_v46, 16  ;;  %v1211_v49 = vshll.u32 %v1207_v50, 16  ;;  %v14549_v59 = vadd.s32 256, %v13230_v27  ;;  %v1212_v61 = vshrl.u32 %v1207_v50, 16 }
 0x3f9   : > { %vm1721_vm13 = vcmp.ne.s32.totalorder %v1167_v4, 0  ;;  %vm1769_vm4 = vcmp.lt.s32.totalorder %v1167_v4, 0  ;;  %v1865_v5 = vadd.s32 24, %v1167_v4  ;;  %v1193_v9 = vadd.s32 %v1192_v18, %v1183_v0  ;;  %v5449_v46 = vpop.f32.mrf.mxu3 }
 0x3fa   : > { %vm1817_vm3 = vmand %vm1769_vm4, %vm1721_vm13  ;;  %vm1213_vm9 = vc.u32 %v1205_v26, %v1209_v28  ;;  %v1215_v62 = vadd.s32 %v1209_v28, %v1205_v26  ;;  %v14551_v22 = vadd.f32 %v5850_v35, %v5528_v36  ;;  %v5125_v51 = vadd.f32 %v5045_v43, %v13336_v42 }
 0x3fb   : > { %v1913_v29 = vsel %vm1817_vm3, %v1865_v5, %v1167_v4  ;;  %v1194_v13 = vshrl.u32 %v1193_v9, 4  ;;  %v1214_v41 = vsel %vm1213_vm9, 1, %v17666_v33  ;;  %v17857_v7 = vmov 0 }
 0x3fc   : > { %vm14555_vm2 = vcmp.lt.s32.totalorder %v1913_v29, 16  ;;  %v1216_v0 = vadd.s32 %v1214_v41, %v1208_v37  ;;  %vm1217_vm1 = vc.u32 %v1215_v62, %v1211_v49  ;;  %v1231_v44 = vand.u32 65535, %v14549_v59 }
 0x3fd   : > { %v17858_v7 = vsel %vm14555_vm2, 4294967295, %v17857_v7  ;;  %v6074_v35 = vsel %vm14555_vm2, %v14515_v58, 0.0  ;;  %v6271_v63 = vsel %vm14555_vm2, %v14523_v48, 0.0  ;;  %v1195_v34 = vmul.u32 24, %v1194_v13 }
 0x3fe   : > { %17859 = vst [vmem:[#allocation7_spill] sm:$0xff] %v17858_v7  ;;  %v1218_v42 = vsel %vm1217_vm1, 1, %v17666_v33  ;;  %vm17860_vm13 = vcmask 31744   ;;  %v1232_v26 = vshrl.u32 %v14549_v59, 16  ;;  %v5529_v28 = vadd.f32 %v5449_v46, %v5125_v51  ;;  %v5048_v43 = vpop.f32.mrf.mxu2 }
 0x3ff   : > { %v6150_v47 = vsel %vm17860_vm13, %v6074_v35, 0.0  ;;  %vm17861_vm4 = vmmov %vm17860_vm13  ;;  %v1220_v36 = vadd.s32 %v1218_v42, %v1216_v0  ;;  %v1196_v18 = vsub.s32 %v14464_v12, %v1195_v34  ;;  %v1234_v37 = vmul.u32 43691, %v1231_v44 }
 0x400   : > { %v6347_v11 = vsel %vm17861_vm4, %v6271_v63, 0.0  ;;  %v6151_v50 = vadd.f32 %v6150_v47, %v6149_v17  ;;  %v1235_v49 = vmul.u32 43690, %v1231_v44  ;;  %v1236_v5 = vmul.u32 43691, %v1232_v26 }
 0x401   : > { %v6348_v4 = vadd.f32 %v6347_v11, %v6346_v57  ;;  %v1221_v58 = vadd.s32 %v1220_v36, %v1210_v6  ;;  %vm1722_vm3 = vcmp.ne.s32.totalorder %v1196_v18, 0  ;;  %vm1770_vm9 = vcmp.lt.s32.totalorder %v1196_v18, 0  ;;  %v5452_v51 = vpop.f32.mrf.mxu3 }
 0x402   : > { %v1866_v48 = vadd.s32 24, %v1196_v18  ;;  %v6224_v9 = vmul.f32 %v14530_v3, %v14530_v3  ;;  %vm1818_vm1 = vmand %vm1770_vm9, %vm1722_vm3  ;;  %v6225_v17 = vmul.f32 %v14551_v22, %v14551_v22  ;;  %v1237_v57 = vmul.u32 43690, %v1232_v26 }
 0x403   : > { %v1222_v62 = vadd.s32 %v1221_v58, %v1212_v61  ;;  %v1238_v29 = vshll.u32 %v1235_v49, 16  ;;  %v1240_v13 = vshll.u32 %v1236_v5, 16  ;;  %v14575_v6 = vadd.f32 %v5853_v38, %v5529_v28  ;;  %v5856_v61 = vpop.f32.mrf.mxu0 }
 0x404   : > { %v1914_v12 = vsel %vm1818_vm1, %v1866_v48, %v1196_v18  ;;  %v5126_v41 = vadd.f32 %v5048_v43, %v13344_v45  ;;  %v17862_v46 = vmov 0  ;;  %v1239_v38 = vshrl.u32 %v1235_v49, 16 }
 0x405   : > { %vm14578_vm13 = vcmp.lt.s32.totalorder %v1914_v12, 16  ;;  %v1223_v0 = vshrl.u32 %v1222_v62, 4  ;;  %vm1242_vm4 = vc.u32 %v1234_v37, %v1238_v29  ;;  %v1244_v44 = vadd.s32 %v1238_v29, %v1234_v37 }
 0x406   : > { %v17863_v46 = vsel %vm14578_vm13, 4294967295, %v17862_v46  ;;  %v6075_v35 = vsel %vm14578_vm13, %v14530_v3, 0.0  ;;  %v6272_v63 = vsel %vm14578_vm13, %v6224_v9, 0.0  ;;  %v1243_v34 = vsel %vm1242_vm4, 1, %v17666_v33  ;;  %v5051_v62 = vpop.f32.mrf.mxu2 }
 0x407   : > { %17864 = vst [vmem:[#allocation48_spill] sm:$0xff] %v17863_v46  ;;  %vm17865_vm3 = vcmask 31744   ;;  %v1224_v47 = vmul.u32 24, %v1223_v0  ;;  %v1245_v11 = vadd.s32 %v1243_v34, %v1237_v57  ;;  %v1241_v36 = vshrl.u32 %v1236_v5, 16 }
 0x408   : > { %v6152_v45 = vsel %vm17865_vm3, %v6075_v35, 0.0  ;;  %vm17866_vm9 = vmmov %vm17865_vm3  ;;  %vm1246_vm1 = vc.u32 %v1244_v44, %v1240_v13  ;;  %v14592_v26 = vmul.f32 %v14575_v6, %v14575_v6  ;;  %v14595_v18 = vadd.s32 264, %v13230_v27 }
 0x409   : > { %v6349_v42 = vsel %vm17866_vm9, %v6272_v63, 0.0  ;;  %v6153_v28 = vadd.f32 %v6152_v45, %v6151_v50  ;;  %v1225_v58 = vsub.s32 %v14492_v30, %v1224_v47  ;;  %v1247_v37 = vsel %vm1246_vm1, 1, %v17666_v33  ;;  %v5455_v0 = vpop.f32.mrf.mxu3 }
 0x40a   : > { %v5530_v49 = vadd.f32 %v5452_v51, %v5126_v41  ;;  %v6350_v48 = vadd.f32 %v6349_v42, %v6348_v4  ;;  %v1249_v9 = vadd.s32 %v1247_v37, %v1245_v11  ;;  %v1260_v43 = vand.u32 65535, %v14595_v18 }
 0x40b   : > { %v1261_v5 = vshrl.u32 %v14595_v18, 16  ;;  %vm1723_vm4 = vcmp.ne.s32.totalorder %v1225_v58, 0  ;;  %vm1771_vm3 = vcmp.lt.s32.totalorder %v1225_v58, 0  ;;  %v1867_v57 = vadd.s32 24, %v1225_v58  ;;  %v5859_v11 = vpop.f32.mrf.mxu0 }
 0x40c   : > { %v14602_v29 = vadd.s32 272, %v13230_v27  ;;  %vm1819_vm9 = vmand %vm1771_vm3, %vm1723_vm4  ;;  %v1250_v50 = vadd.s32 %v1249_v9, %v1239_v38  ;;  %v1263_v12 = vmul.u32 43691, %v1260_v43  ;;  %v1264_v30 = vmul.u32 43690, %v1260_v43 }
 0x40d   : > { %v1265_v13 = vmul.u32 43691, %v1261_v5  ;;  %v1915_v41 = vsel %vm1819_vm9, %v1867_v57, %v1225_v58  ;;  %v1266_v4 = vmul.u32 43690, %v1261_v5  ;;  %v14604_v51 = vadd.f32 %v5856_v61, %v5530_v49 }
 0x40e   : > { %v14607_v44 = vadd.s32 280, %v13230_v27  ;;  %vm14609_vm1 = vcmp.lt.s32.totalorder %v1915_v41, 16  ;;  %v17867_v35 = vmov 0  ;;  %v1251_v63 = vadd.s32 %v1250_v50, %v1241_v36  ;;  %v5054_v50 = vpop.f32.mrf.mxu2 }
 0x40f   : > { %v17868_v35 = vsel %vm14609_vm1, 4294967295, %v17867_v35  ;;  %v1267_v34 = vshll.u32 %v1264_v30, 16  ;;  %v5127_v45 = vadd.f32 %v5051_v62, %v13350_v8  ;;  %v6076_v38 = vsel %vm14609_vm1, %v14551_v22, 0.0 }
 0x410   : > { %17869 = vst [vmem:[#allocation49_spill] sm:$0xff] %v17868_v35  ;;  %v6273_v42 = vsel %vm14609_vm1, %v6225_v17, 0.0  ;;  %v1269_v61 = vshll.u32 %v1265_v13, 16  ;;  %v1289_v47 = vand.u32 65535, %v14602_v29  ;;  %vm17870_vm4 = vcmask 31744  }
 0x411   : > { %v6154_v58 = vsel %vm17870_vm4, %v6076_v38, 0.0  ;;  %vm17871_vm3 = vmmov %vm17870_vm4  ;;  %v1252_v49 = vshrl.u32 %v1251_v63, 4  ;;  %vm1271_vm9 = vc.u32 %v1263_v12, %v1267_v34  ;;  %v1268_v36 = vshrl.u32 %v1264_v30, 16 }
 0x412   : > { %v6351_v37 = vsel %vm17871_vm3, %v6273_v42, 0.0  ;;  %v1270_v9 = vshrl.u32 %v1265_v13, 16  ;;  %v1272_v8 = vsel %vm1271_vm9, 1, %v17666_v33  ;;  %v1273_v43 = vadd.s32 %v1267_v34, %v1263_v12  ;;  %v5458_v13 = vpop.f32.mrf.mxu3 }
 0x413   : > { %v1253_v5 = vmul.u32 24, %v1252_v49  ;;  %v6155_v62 = vadd.f32 %v6154_v58, %v6153_v28  ;;  %v1274_v57 = vadd.s32 %v1272_v8, %v1266_v4  ;;  %v1290_v17 = vshrl.u32 %v14602_v29, 16  ;;  %v5862_v8 = vpop.f32.mrf.mxu0 }
 0x414   : > { %v6352_v41 = vadd.f32 %v6351_v37, %v6350_v48  ;;  %vm1275_vm1 = vc.u32 %v1273_v43, %v1269_v61  ;;  %v1292_v35 = vmul.u32 43691, %v1289_v47  ;;  %v1293_v46 = vmul.u32 43690, %v1289_v47  ;;  %v4671_v43 = vpop.f32.mrf.mxu1 }
 0x415   : > { %v1254_v38 = vsub.s32 %v14549_v59, %v1253_v5  ;;  %v1276_v63 = vsel %vm1275_vm1, 1, %v17666_v33  ;;  %v5531_v42 = vadd.f32 %v5455_v0, %v5127_v45  ;;  %v1294_v30 = vmul.u32 43691, %v1290_v17 }
 0x416   : > { %v1278_v7 = vadd.s32 %v1276_v63, %v1274_v57  ;;  %v1295_v14 = vmul.u32 43690, %v1290_v17  ;;  %v1296_v12 = vshll.u32 %v1293_v46, 16  ;;  %v5128_v28 = vadd.f32 %v5054_v50, %v13354_v25  ;;  %v17877_v63 = vld [vmem:[#allocation9_spill] sm:$0xff] }
 0x417   : > { %vm1724_vm4 = vcmp.ne.s32.totalorder %v1254_v38, 0  ;;  %vm1772_vm3 = vcmp.lt.s32.totalorder %v1254_v38, 0  ;;  %v1868_v4 = vadd.s32 24, %v1254_v38  ;;  %v1298_v34 = vshll.u32 %v1294_v30, 16 }
 0x418   : > { %vm1820_vm9 = vmand %vm1772_vm3, %vm1724_vm4  ;;  %v1279_v48 = vadd.s32 %v1278_v7, %v1268_v36  ;;  %v1297_v61 = vshrl.u32 %v1293_v46, 16  ;;  %vm1300_vm13 = vc.u32 %v1292_v35, %v1296_v12  ;;  %v1302_v47 = vadd.s32 %v1296_v12, %v1292_v35  ;;  %v5057_v36 = vpop.f32.mrf.mxu2 }
 0x419   : > { %v1916_v59 = vsel %vm1820_vm9, %v1868_v4, %v1254_v38  ;;  %v1299_v58 = vshrl.u32 %v1294_v30, 16  ;;  %v1301_v0 = vsel %vm1300_vm13, 1, %v17666_v33  ;;  %v14628_v45 = vadd.f32 %v5859_v11, %v5531_v42 }
 0x41a   : > { %vm14630_vm1 = vcmp.lt.s32.totalorder %v1916_v59, 16  ;;  %v17872_v37 = vmov 0  ;;  %v1280_v25 = vadd.s32 %v1279_v48, %v1270_v9  ;;  %v1303_v49 = vadd.s32 %v1301_v0, %v1295_v14 }
 0x41b   : > { %v17873_v37 = vsel %vm14630_vm1, 4294967295, %v17872_v37  ;;  %vm1304_vm2 = vc.u32 %v1302_v47, %v1298_v34  ;;  %v6077_v7 = vsel %vm14630_vm1, %v14575_v6, 0.0  ;;  %v6274_v46 = vsel %vm14630_vm1, %v14592_v26, 0.0  ;;  %v5461_v47 = vpop.f32.mrf.mxu3 }
 0x41c   : > { %17874 = vst [vmem:[#allocation50_spill] sm:$0xff] %v17873_v37  ;;  %v1305_v35 = vsel %vm1304_vm2, 1, %v17666_v33  ;;  %v1318_v11 = vand.u32 65535, %v14607_v44  ;;  %vm17875_vm13 = vcmask 31744   ;;  %v1281_v9 = vshrl.u32 %v1280_v25, 4 }
 0x41d   : > { %v6156_v5 = vsel %vm17875_vm13, %v6077_v7, 0.0  ;;  %vm17876_vm4 = vmmov %vm17875_vm13  ;;  %v1307_v57 = vadd.s32 %v1305_v35, %v1303_v49  ;;  %v5532_v6 = vadd.f32 %v5458_v13, %v5128_v28  ;;  %v1319_v38 = vshrl.u32 %v14607_v44, 16 }
 0x41e   : > { %v6353_v14 = vsel %vm17876_vm4, %v6274_v46, 0.0  ;;  %v14644_v17 = vadd.f32 %v6156_v5, %v6155_v62  ;;  %v14650_v26 = vadd.f32 %v4671_v43, %v17877_v63  ;;  %v1282_v42 = vmul.u32 24, %v1281_v9  ;;  %v5865_v5 = vpop.f32.mrf.mxu0 }
 0x41f   : > { %v14646_v50 = vadd.f32 %v6353_v14, %v6352_v41  ;;  %v1308_v30 = vadd.s32 %v1307_v57, %v1297_v61  ;;  %v1322_v12 = vmul.u32 43690, %v1318_v11  ;;  %v6227_v4 = vmul.f32 %v14604_v51, %v14604_v51 }
 0x420   : > { %v1321_v34 = vmul.u32 43691, %v1318_v11  ;;  %v1323_v48 = vmul.u32 43691, %v1319_v38  ;;  %v14655_v62 = vadd.s32 288, %v13230_v27  ;;  %v1283_v41 = vsub.s32 %v14595_v18, %v1282_v42  ;;  %v5060_v57 = vpop.f32.mrf.mxu2 }
 0x421   : > { %v1309_v13 = vadd.s32 %v1308_v30, %v1299_v58  ;;  %v1325_v28 = vshll.u32 %v1322_v12, 16  ;;  %v5129_v59 = vadd.f32 %v5057_v36, %v13419_v60  ;;  %v6228_v0 = vmul.f32 %v14628_v45, %v14628_v45 }
 0x422   : > { %v1324_v61 = vmul.u32 43690, %v1319_v38  ;;  %v1327_v25 = vshll.u32 %v1323_v48, 16  ;;  %v14661_v49 = vadd.f32 %v5862_v8, %v5532_v6  ;;  %vm1725_vm2 = vcmp.ne.s32.totalorder %v1283_v41, 0 }
 0x423   : > { %vm1773_vm3 = vcmp.lt.s32.totalorder %v1283_v41, 0  ;;  %v1869_v43 = vadd.s32 24, %v1283_v41  ;;  %v1310_v7 = vshrl.u32 %v1309_v13, 4  ;;  %v1326_v46 = vshrl.u32 %v1322_v12, 16 }
 0x424   : > { %vm1821_vm9 = vmand %vm1773_vm3, %vm1725_vm2  ;;  %vm1329_vm13 = vc.u32 %v1321_v34, %v1325_v28  ;;  %v1331_v35 = vadd.s32 %v1325_v28, %v1321_v34  ;;  %v1347_v18 = vand.u32 65535, %v14655_v62  ;;  %v5533_v36 = vadd.f32 %v5461_v47, %v5129_v59 }
 0x425   : > { %v1917_v58 = vsel %vm1821_vm9, %v1869_v43, %v1283_v41  ;;  %v1311_v11 = vmul.u32 24, %v1310_v7  ;;  %v1330_v60 = vsel %vm1329_vm13, 1, %v17666_v33  ;;  %v17878_v14 = vmov 0 }
 0x426   : > { %vm14665_vm4 = vcmp.lt.s32.totalorder %v1917_v58, 16  ;;  %v1332_v8 = vadd.s32 %v1330_v60, %v1324_v61  ;;  %vm1333_vm1 = vc.u32 %v1331_v35, %v1327_v25  ;;  %v1348_v9 = vshrl.u32 %v14655_v62, 16  ;;  %v5464_v61 = vpop.f32.mrf.mxu3 }
 0x427   : > { %v17879_v14 = vsel %vm14665_vm4, 4294967295, %v17878_v14  ;;  %v6078_v6 = vsel %vm14665_vm4, %v14604_v51, 0.0  ;;  %v1312_v38 = vsub.s32 %v14602_v29, %v1311_v11  ;;  %v1328_v63 = vshrl.u32 %v1323_v48, 16 }
 0x428   : > { %17880 = vst [vmem:[#allocation9_spill] sm:$0xff] %v17879_v14  ;;  %v1334_v42 = vsel %vm1333_vm1, 1, %v17666_v33  ;;  %v6275_v30 = vsel %vm14665_vm4, %v6227_v4, 0.0  ;;  %v14679_v34 = vmul.f32 %v14661_v49, %v14661_v49  ;;  %v1351_v47 = vmul.u32 43690, %v1347_v18 }
 0x429   : > { %v1336_v12 = vadd.s32 %v1334_v42, %v1332_v8  ;;  %vm1726_vm2 = vcmp.ne.s32.totalorder %v1312_v38, 0  ;;  %vm1774_vm3 = vcmp.lt.s32.totalorder %v1312_v38, 0  ;;  %v1350_v41 = vmul.u32 43691, %v1347_v18 }
 0x42a   : > { %v14681_v13 = vadd.f32 %v5865_v5, %v5533_v36  ;;  %vm17881_vm9 = vcmask 31744   ;;  %vm1822_vm13 = vmand %vm1774_vm3, %vm1726_vm2  ;;  %v1870_v29 = vadd.s32 24, %v1312_v38  ;;  %v1352_v59 = vmul.u32 43691, %v1348_v9 }
 0x42b   : > { %v6158_v28 = vsel %vm17881_vm9, %v6078_v6, 0.0  ;;  %v1337_v48 = vadd.s32 %v1336_v12, %v1326_v46  ;;  %vm17882_vm1 = vmmov %vm17881_vm9  ;;  %v1353_v25 = vmul.u32 43690, %v1348_v9  ;;  %v1354_v43 = vshll.u32 %v1351_v47, 16 }
 0x42c   : > { %v6355_v4 = vsel %vm17882_vm1, %v6275_v30, 0.0  ;;  %v5130_v7 = vadd.f32 %v5060_v57, %v13423_v16  ;;  %v1918_v35 = vsel %vm1822_vm13, %v1870_v29, %v1312_v38  ;;  %v1355_v11 = vshrl.u32 %v1351_v47, 16  ;;  %vm17886_vm2 = vmmov %vm17882_vm1 }
 0x42d   : > { %v1338_v58 = vadd.s32 %v1337_v48, %v1328_v63  ;;  %v1356_v60 = vshll.u32 %v1352_v59, 16  ;;  %vm14686_vm4 = vcmp.lt.s32.totalorder %v1918_v35, 16  ;;  %v17883_v18 = vmov 0  ;;  %vm17887_vm3 = vmmov %vm17882_vm1  ;;  %v5868_v63 = vpop.f32.mrf.mxu0 }
 0x42e   : > { %v17884_v18 = vsel %vm14686_vm4, 4294967295, %v17883_v18  ;;  %vm1358_vm9 = vc.u32 %v1350_v41, %v1354_v43  ;;  %v1360_v36 = vadd.s32 %v1354_v43, %v1350_v41  ;;  %v5534_v5 = vadd.f32 %v5464_v61, %v5130_v7  ;;  %v5063_v41 = vpop.f32.mrf.mxu2 }
 0x42f   : > { %17885 = vst [vmem:[#allocation51_spill] sm:$0xff] %v17884_v18  ;;  %v6079_v46 = vsel %vm14686_vm4, %v14628_v45, 0.0  ;;  %v6276_v8 = vsel %vm14686_vm4, %v6228_v0, 0.0  ;;  %v1339_v9 = vshrl.u32 %v1338_v58, 4  ;;  %v1359_v16 = vsel %vm1358_vm9, 1, %v17666_v33 }
 0x430   : > { %v6160_v57 = vsel %vm17886_vm2, %v6079_v46, 0.0  ;;  %v6357_v6 = vsel %vm17887_vm3, %v6276_v8, 0.0  ;;  %v1361_v38 = vadd.s32 %v1359_v16, %v1353_v25  ;;  %vm1362_vm13 = vc.u32 %v1360_v36, %v1356_v60  ;;  %v5467_v60 = vpop.f32.mrf.mxu3 }
 0x431   : > { %v6159_v42 = vadd.f32 %v6158_v28, %v14644_v17  ;;  %v6356_v30 = vadd.f32 %v6355_v4, %v14646_v50  ;;  %v1340_v12 = vmul.u32 24, %v1339_v9  ;;  %v1363_v47 = vsel %vm1362_vm13, 1, %v17666_v33 }
 0x432   : > { %v1357_v29 = vshrl.u32 %v1352_v59, 16  ;;  %v1365_v0 = vadd.s32 %v1363_v47, %v1361_v38  ;;  %v14703_v48 = vmul.f32 %v14681_v13, %v14681_v13  ;;  %v14706_v61 = vadd.s32 296, %v13230_v27 }
 0x433   : > { %v1341_v25 = vsub.s32 %v14607_v44, %v1340_v12  ;;  %v6161_v43 = vadd.f32 %v6160_v57, %v6159_v42  ;;  %v6358_v7 = vadd.f32 %v6357_v6, %v6356_v30  ;;  %v14709_v17 = vadd.f32 %v5868_v63, %v5534_v5 }
 0x434   : > { %v1366_v50 = vadd.s32 %v1365_v0, %v1355_v11  ;;  %v1376_v28 = vand.u32 65535, %v14706_v61  ;;  %v1377_v4 = vshrl.u32 %v14706_v61, 16  ;;  %v14714_v59 = vadd.s32 304, %v13230_v27 }
 0x435   : > { %vm1727_vm1 = vcmp.ne.s32.totalorder %v1341_v25, 0  ;;  %vm1775_vm9 = vcmp.lt.s32.totalorder %v1341_v25, 0  ;;  %v1871_v35 = vadd.s32 24, %v1341_v25  ;;  %v5131_v58 = vadd.f32 %v5063_v41, %v13426_v10 }
 0x436   : > { %vm1823_vm2 = vmand %vm1775_vm9, %vm1727_vm1  ;;  %v1367_v44 = vadd.s32 %v1366_v50, %v1357_v29  ;;  %v1379_v36 = vmul.u32 43691, %v1376_v28  ;;  %v1380_v46 = vmul.u32 43690, %v1376_v28  ;;  %v1381_v5 = vmul.u32 43691, %v1377_v4 }
 0x437   : > { %v1919_v8 = vsel %vm1823_vm2, %v1871_v35, %v1341_v25  ;;  %v1382_v11 = vmul.u32 43690, %v1377_v4  ;;  %v14718_v9 = vadd.s32 312, %v13230_v27  ;;  %v14721_v16 = vadd.s32 320, %v13230_v27  ;;  %v5871_v4 = vpop.f32.mrf.mxu0 }
 0x438   : > { %vm14723_vm3 = vcmp.lt.s32.totalorder %v1919_v8, 16  ;;  %v17888_v57 = vmov 0  ;;  %v1368_v6 = vshrl.u32 %v1367_v44, 4  ;;  %v1383_v10 = vshll.u32 %v1380_v46, 16 }
 0x439   : > { %v17889_v57 = vsel %vm14723_vm3, 4294967295, %v17888_v57  ;;  %v1405_v38 = vand.u32 65535, %v14714_v59  ;;  %v6080_v63 = vsel %vm14723_vm3, %v14661_v49, 0.0  ;;  %v6277_v42 = vsel %vm14723_vm3, %v14679_v34, 0.0  ;;  %v5066_v49 = vpop.f32.mrf.mxu2 }
 0x43a   : > { %17890 = vst [vmem:[#allocation52_spill] sm:$0xff] %v17889_v57  ;;  %v1385_v30 = vshll.u32 %v1381_v5, 16  ;;  %v1406_v12 = vshrl.u32 %v14714_v59, 16  ;;  %vm17891_vm13 = vcmask 31744   ;;  %v1369_v29 = vmul.u32 24, %v1368_v6 }
 0x43b   : > { %v6162_v47 = vsel %vm17891_vm13, %v6080_v63, 0.0  ;;  %vm17892_vm1 = vmmov %vm17891_vm13  ;;  %vm1387_vm9 = vc.u32 %v1379_v36, %v1383_v10  ;;  %v1389_v28 = vadd.s32 %v1383_v10, %v1379_v36  ;;  %v5535_v34 = vadd.f32 %v5467_v60, %v5131_v58 }
 0x43c   : > { %v6359_v41 = vsel %vm17892_vm1, %v6277_v42, 0.0  ;;  %v6163_v0 = vadd.f32 %v6162_v47, %v6161_v43  ;;  %v1388_v50 = vsel %vm1387_vm9, 1, %v17666_v33  ;;  %v1370_v35 = vsub.s32 %v14655_v62, %v1369_v29  ;;  %v5470_v47 = vpop.f32.mrf.mxu3 }
 0x43d   : > { %v6360_v25 = vadd.f32 %v6359_v41, %v6358_v7  ;;  %v1390_v44 = vadd.s32 %v1388_v50, %v1382_v11  ;;  %v1409_v8 = vmul.u32 43690, %v1405_v38  ;;  %v1384_v57 = vshrl.u32 %v1380_v46, 16 }
 0x43e   : > { %vm1391_vm2 = vc.u32 %v1389_v28, %v1385_v30  ;;  %v1408_v18 = vmul.u32 43691, %v1405_v38  ;;  %v1410_v63 = vmul.u32 43691, %v1406_v12  ;;  %vm1728_vm13 = vcmp.ne.s32.totalorder %v1370_v35, 0 }
 0x43f   : > { %vm1776_vm1 = vcmp.lt.s32.totalorder %v1370_v35, 0  ;;  %v1872_v6 = vadd.s32 24, %v1370_v35  ;;  %v1392_v43 = vsel %vm1391_vm2, 1, %v17666_v33  ;;  %v1386_v7 = vshrl.u32 %v1381_v5, 16 }
 0x440   : > { %vm1824_vm3 = vmand %vm1776_vm1, %vm1728_vm13  ;;  %v1394_v42 = vadd.s32 %v1392_v43, %v1390_v44  ;;  %v1411_v36 = vmul.u32 43690, %v1406_v12  ;;  %v1412_v10 = vshll.u32 %v1409_v8, 16  ;;  %v14742_v62 = vmul.f32 %v14709_v17, %v14709_v17 }
 0x441   : > { %v1920_v41 = vsel %vm1824_vm3, %v1872_v6, %v1370_v35  ;;  %v1414_v58 = vshll.u32 %v1410_v63, 16  ;;  %v5132_v60 = vadd.f32 %v5066_v49, %v14167_v39  ;;  %v17893_v46 = vmov 0 }
 0x442   : > { %vm14745_vm9 = vcmp.lt.s32.totalorder %v1920_v41, 16  ;;  %v1395_v11 = vadd.s32 %v1394_v42, %v1384_v57  ;;  %vm1416_vm2 = vc.u32 %v1408_v18, %v1412_v10  ;;  %v1418_v38 = vadd.s32 %v1412_v10, %v1408_v18  ;;  %v5874_v42 = vpop.f32.mrf.mxu0 }
 0x443   : > { %v17894_v46 = vsel %vm14745_vm9, 4294967295, %v17893_v46  ;;  %v6081_v5 = vsel %vm14745_vm9, %v14681_v13, 0.0  ;;  %v6278_v30 = vsel %vm14745_vm9, %v14703_v48, 0.0  ;;  %v1417_v12 = vsel %vm1416_vm2, 1, %v17666_v33 }
 0x444   : > { %17895 = vst [vmem:[#allocation53_spill] sm:$0xff] %v17894_v46  ;;  %v14756_v29 = vadd.f32 %v5871_v4, %v5535_v34  ;;  %v1396_v39 = vadd.s32 %v1395_v11, %v1386_v7  ;;  %v1413_v50 = vshrl.u32 %v1409_v8, 16  ;;  %v1419_v28 = vadd.s32 %v1417_v12, %v1411_v36  ;;  %v5069_v4 = vpop.f32.mrf.mxu2 }
 0x445   : > { %v5536_v49 = vadd.f32 %v5470_v47, %v5132_v60  ;;  %vm17896_vm3 = vcmask 31744   ;;  %vm1420_vm1 = vc.u32 %v1418_v38, %v1414_v58  ;;  %v1434_v35 = vand.u32 65535, %v14718_v9 }
 0x446   : > { %v6164_v57 = vsel %vm17896_vm3, %v6081_v5, 0.0  ;;  %vm17897_vm13 = vmmov %vm17896_vm3  ;;  %v1397_v44 = vshrl.u32 %v1396_v39, 4  ;;  %v1415_v6 = vshrl.u32 %v1410_v63, 16  ;;  %v1421_v43 = vsel %vm1420_vm1, 1, %v17666_v33  ;;  %v5473_v39 = vpop.f32.mrf.mxu3 }
 0x447   : > { %v6361_v18 = vsel %vm17897_vm13, %v6278_v30, 0.0  ;;  %v1435_v48 = vshrl.u32 %v14718_v9, 16  ;;  %v1423_v34 = vadd.s32 %v1421_v43, %v1419_v28  ;;  %v14765_v8 = vmul.f32 %v14756_v29, %v14756_v29 }
 0x448   : > { %v1437_v7 = vmul.u32 43691, %v1434_v35  ;;  %v1438_v36 = vmul.u32 43690, %v1434_v35  ;;  %v6165_v10 = vadd.f32 %v6164_v57, %v6163_v0  ;;  %v6362_v47 = vadd.f32 %v6361_v18, %v6360_v25 }
 0x449   : > { %v1398_v41 = vmul.u32 24, %v1397_v44  ;;  %v1439_v58 = vmul.u32 43691, %v1435_v48  ;;  %v1424_v60 = vadd.s32 %v1423_v34, %v1413_v50  ;;  %v1440_v11 = vmul.u32 43690, %v1435_v48 }
 0x44a   : > { %v1441_v63 = vshll.u32 %v1438_v36, 16  ;;  %v14767_v38 = vadd.f32 %v5874_v42, %v5536_v49  ;;  %v5133_v12 = vadd.f32 %v5069_v4, %v14296_v1  ;;  %v1463_v28 = vand.u32 65535, %v14721_v16 }
 0x44b   : > { %v1399_v5 = vsub.s32 %v14706_v61, %v1398_v41  ;;  %v1443_v30 = vshll.u32 %v1439_v58, 16  ;;  %v1425_v43 = vadd.s32 %v1424_v60, %v1415_v6  ;;  %v1464_v0 = vshrl.u32 %v14721_v16, 16 }
 0x44c   : > { %vm1445_vm2 = vc.u32 %v1437_v7, %v1441_v63  ;;  %v1447_v35 = vadd.s32 %v1441_v63, %v1437_v7  ;;  %v1442_v57 = vshrl.u32 %v1438_v36, 16  ;;  %v1467_v44 = vmul.u32 43690, %v1463_v28 }
 0x44d   : > { %vm1729_vm3 = vcmp.ne.s32.totalorder %v1399_v5, 0  ;;  %vm1777_vm13 = vcmp.lt.s32.totalorder %v1399_v5, 0  ;;  %v1873_v25 = vadd.s32 24, %v1399_v5  ;;  %v1446_v50 = vsel %vm1445_vm2, 1, %v17666_v33 }
 0x44e   : > { %vm1825_vm1 = vmand %vm1777_vm13, %vm1729_vm3  ;;  %v1426_v49 = vshrl.u32 %v1425_v43, 4  ;;  %v1448_v61 = vadd.s32 %v1446_v50, %v1440_v11  ;;  %vm1449_vm9 = vc.u32 %v1447_v35, %v1443_v30  ;;  %v1468_v48 = vmul.u32 43691, %v1464_v0  ;;  %v5072_v11 = vpop.f32.mrf.mxu2 }
 0x44f   : > { %v1921_v18 = vsel %vm1825_vm1, %v1873_v25, %v1399_v5  ;;  %v1450_v1 = vsel %vm1449_vm9, 1, %v17666_v33  ;;  %v17898_v6 = vmov 0  ;;  %v1444_v4 = vshrl.u32 %v1439_v58, 16 }
 0x450   : > { %vm14775_vm4 = vcmp.lt.s32.totalorder %v1921_v18, 16  ;;  %v1427_v42 = vmul.u32 24, %v1426_v49  ;;  %v1452_v34 = vadd.s32 %v1450_v1, %v1448_v61  ;;  %v1466_v41 = vmul.u32 43691, %v1463_v28  ;;  %v5877_v49 = vpop.f32.mrf.mxu0 }
 0x451   : > { %v17899_v6 = vsel %vm14775_vm4, 4294967295, %v17898_v6  ;;  %v6082_v7 = vsel %vm14775_vm4, %v14709_v17, 0.0  ;;  %v6279_v36 = vsel %vm14775_vm4, %v14742_v62, 0.0  ;;  %v1470_v60 = vshll.u32 %v1467_v44, 16 }
 0x452   : > { %17900 = vst [vmem:[#allocation54_spill] sm:$0xff] %v17899_v6  ;;  %vm17901_vm9 = vcmask 31744   ;;  %v1428_v30 = vsub.s32 %v14714_v59, %v1427_v42  ;;  %v1453_v43 = vadd.s32 %v1452_v34, %v1442_v57  ;;  %v5537_v58 = vadd.f32 %v5473_v39, %v5133_v12 }
 0x453   : > { %v6166_v63 = vsel %vm17901_vm9, %v6082_v7, 0.0  ;;  %vm17902_vm2 = vmmov %vm17901_vm9  ;;  %v1469_v35 = vmul.u32 43690, %v1464_v0  ;;  %v1471_v25 = vshrl.u32 %v1467_v44, 16  ;;  %v1472_v50 = vshll.u32 %v1468_v48, 16  ;;  %v5476_v7 = vpop.f32.mrf.mxu3 }
 0x454   : > { %v6363_v5 = vsel %vm17902_vm2, %v6279_v36, 0.0  ;;  %vm1730_vm3 = vcmp.ne.s32.totalorder %v1428_v30, 0  ;;  %vm1778_vm13 = vcmp.lt.s32.totalorder %v1428_v30, 0  ;;  %v1874_v61 = vadd.s32 24, %v1428_v30 }
 0x455   : > { %v1454_v18 = vadd.s32 %v1453_v43, %v1444_v4  ;;  %vm1826_vm1 = vmand %vm1778_vm13, %vm1730_vm3  ;;  %v6167_v62 = vadd.f32 %v6166_v63, %v6165_v10  ;;  %v6364_v28 = vadd.f32 %v6363_v5, %v6362_v47  ;;  %vm1474_vm4 = vc.u32 %v1466_v41, %v1470_v60 }
 0x456   : > { %v1476_v1 = vadd.s32 %v1470_v60, %v1466_v41  ;;  %v1922_v6 = vsel %vm1826_vm1, %v1874_v61, %v1428_v30  ;;  %v1475_v59 = vsel %vm1474_vm4, 1, %v17666_v33  ;;  %v14790_v12 = vadd.s32 328, %v13230_v27  ;;  %v4674_v60 = vpop.f32.mrf.mxu1 }
 0x457   : > { %v1455_v36 = vshrl.u32 %v1454_v18, 4  ;;  %vm14792_vm9 = vcmp.lt.s32.totalorder %v1922_v6, 16  ;;  %v17903_v39 = vmov 0  ;;  %v1477_v0 = vadd.s32 %v1475_v59, %v1469_v35  ;;  %v5075_v35 = vpop.f32.mrf.mxu2 }
 0x458   : > { %v17904_v39 = vsel %vm14792_vm9, 4294967295, %v17903_v39  ;;  %vm1478_vm2 = vc.u32 %v1476_v1, %v1472_v50  ;;  %v5134_v57 = vadd.f32 %v5072_v11, %v14384_v54  ;;  %v6083_v10 = vsel %vm14792_vm9, %v14756_v29, 0.0 }
 0x459   : > { %17905 = vst [vmem:[#allocation55_spill] sm:$0xff] %v17904_v39  ;;  %v6280_v47 = vsel %vm14792_vm9, %v14765_v8, 0.0  ;;  %v1456_v44 = vmul.u32 24, %v1455_v36  ;;  %v1479_v42 = vsel %vm1478_vm2, 1, %v17666_v33  ;;  %vm17906_vm4 = vcmask 31744  }
 0x45a   : > { %v6168_v6 = vsel %vm17906_vm4, %v6083_v10, 0.0  ;;  %vm17907_vm3 = vmmov %vm17906_vm4  ;;  %v1473_v34 = vshrl.u32 %v1468_v48, 16  ;;  %v1481_v41 = vadd.s32 %v1479_v42, %v1477_v0  ;;  %v1492_v11 = vand.u32 65535, %v14790_v12 }
 0x45b   : > { %v6365_v4 = vsel %vm17907_vm3, %v6280_v47, 0.0  ;;  %v14806_v63 = vadd.f32 %v6168_v6, %v6167_v62  ;;  %v1457_v29 = vsub.s32 %v14718_v9, %v1456_v44  ;;  %v6233_v8 = vmul.f32 %v14767_v38, %v14767_v38  ;;  %v5479_v0 = vpop.f32.mrf.mxu3 }
 0x45c   : > { %v14808_v54 = vadd.f32 %v6365_v4, %v6364_v28  ;;  %v1482_v5 = vadd.s32 %v1481_v41, %v1471_v25  ;;  %v14814_v30 = vadd.f32 %v5877_v49, %v5537_v58  ;;  %v1493_v43 = vshrl.u32 %v14790_v12, 16  ;;  %v5880_v28 = vpop.f32.mrf.mxu0 }
 0x45d   : > { %vm1731_vm13 = vcmp.ne.s32.totalorder %v1457_v29, 0  ;;  %vm1779_vm1 = vcmp.lt.s32.totalorder %v1457_v29, 0  ;;  %v1875_v48 = vadd.s32 24, %v1457_v29  ;;  %v5538_v50 = vadd.f32 %v5476_v7, %v5134_v57  ;;  %v17911_v7 = vld [vmem:[#allocation10_spill] sm:$0xff] }
 0x45e   : > { %vm1827_vm2 = vmand %vm1779_vm1, %vm1731_vm13  ;;  %v1483_v61 = vadd.s32 %v1482_v5, %v1473_v34  ;;  %v1495_v18 = vmul.u32 43691, %v1492_v11  ;;  %v1496_v62 = vmul.u32 43690, %v1492_v11  ;;  %v1497_v9 = vmul.u32 43691, %v1493_v43 }
 0x45f   : > { %v1923_v1 = vsel %vm1827_vm2, %v1875_v48, %v1457_v29  ;;  %v1498_v36 = vmul.u32 43690, %v1493_v43  ;;  %v5135_v59 = vadd.f32 %v5075_v35, %v14650_v26  ;;  %v17908_v58 = vmov 0  ;;  %v4677_v48 = vpop.f32.mrf.mxu1 }
 0x460   : > { %vm14818_vm4 = vcmp.lt.s32.totalorder %v1923_v1, 16  ;;  %v1484_v25 = vshrl.u32 %v1483_v61, 4  ;;  %v1499_v49 = vshll.u32 %v1496_v62, 16  ;;  %v14823_v10 = vadd.s32 336, %v13230_v27 }
 0x461   : > { %v17909_v58 = vsel %vm14818_vm4, 4294967295, %v17908_v58  ;;  %v4732_v57 = vadd.f32 %v4674_v60, %v17911_v7  ;;  %v6234_v47 = vmul.f32 %v14814_v30, %v14814_v30  ;;  %v1501_v44 = vshll.u32 %v1497_v9, 16 }
 0x462   : > { %17910 = vst [vmem:[#allocation56_spill] sm:$0xff] %v17909_v58  ;;  %v14828_v42 = vadd.f32 %v5880_v28, %v5538_v50  ;;  %v6084_v26 = vsel %vm14818_vm4, %v14767_v38, 0.0  ;;  %v6281_v6 = vsel %vm14818_vm4, %v6233_v8, 0.0  ;;  %v1485_v4 = vmul.u32 24, %v1484_v25 }
 0x463   : > { %vm1503_vm3 = vc.u32 %v1495_v18, %v1499_v49  ;;  %v1500_v34 = vshrl.u32 %v1496_v62, 16  ;;  %v1505_v29 = vadd.s32 %v1499_v49, %v1495_v18  ;;  %v5539_v60 = vadd.f32 %v5479_v0, %v5135_v59 }
 0x464   : > { %v1504_v41 = vsel %vm1503_vm3, 1, %v17666_v33  ;;  %v1486_v11 = vsub.s32 %v14721_v16, %v1485_v4  ;;  %v1521_v43 = vand.u32 65535, %v14823_v10  ;;  %v1522_v35 = vshrl.u32 %v14823_v10, 16  ;;  %v5078_v4 = vpop.f32.mrf.mxu2 }
 0x465   : > { %v1506_v5 = vadd.s32 %v1504_v41, %v1498_v36  ;;  %vm17912_vm13 = vcmask 31744   ;;  %v1502_v8 = vshrl.u32 %v1497_v9, 16  ;;  %vm1507_vm2 = vc.u32 %v1505_v29, %v1501_v44  ;;  %v5883_v9 = vpop.f32.mrf.mxu0 }
 0x466   : > { %v6170_v50 = vsel %vm17912_vm13, %v6084_v26, 0.0  ;;  %vm17913_vm1 = vmmov %vm17912_vm13  ;;  %vm1732_vm4 = vcmp.ne.s32.totalorder %v1486_v11, 0  ;;  %vm1780_vm9 = vcmp.lt.s32.totalorder %v1486_v11, 0  ;;  %v1876_v62 = vadd.s32 24, %v1486_v11 }
 0x467   : > { %v6367_v61 = vsel %vm17913_vm1, %v6281_v6, 0.0  ;;  %v1508_v18 = vsel %vm1507_vm2, 1, %v17666_v33  ;;  %vm1828_vm3 = vmand %vm1780_vm9, %vm1732_vm4  ;;  %v1524_v16 = vmul.u32 43691, %v1521_v43  ;;  %v1525_v1 = vmul.u32 43690, %v1521_v43 }
 0x468   : > { %v1510_v28 = vadd.s32 %v1508_v18, %v1506_v5  ;;  %v1526_v36 = vmul.u32 43691, %v1522_v35  ;;  %v14843_v59 = vadd.f32 %v4677_v48, %v13292_v31  ;;  %v1924_v25 = vsel %vm1828_vm3, %v1876_v62, %v1486_v11  ;;  %vm17917_vm4 = vmmov %vm17913_vm1 }
 0x469   : > { %v14847_v49 = vmul.f32 %v14828_v42, %v14828_v42  ;;  %v14850_v0 = vadd.s32 344, %v13230_v27  ;;  %vm14852_vm13 = vcmp.lt.s32.totalorder %v1924_v25, 16  ;;  %v17914_v7 = vmov 0 }
 0x46a   : > { %v17915_v7 = vsel %vm14852_vm13, 4294967295, %v17914_v7  ;;  %v1511_v44 = vadd.s32 %v1510_v28, %v1500_v34  ;;  %v1527_v26 = vmul.u32 43690, %v1522_v35  ;;  %v1528_v6 = vshll.u32 %v1525_v1, 16 }
 0x46b   : > { %17916 = vst [vmem:[#allocation10_spill] sm:$0xff] %v17915_v7  ;;  %v6171_v31 = vadd.f32 %v6170_v50, %v14806_v63  ;;  %v6368_v41 = vadd.f32 %v6367_v61, %v14808_v54  ;;  %v6085_v29 = vsel %vm14852_vm13, %v14814_v30, 0.0  ;;  %v1530_v11 = vshll.u32 %v1526_v36, 16 }
 0x46c   : > { %v6282_v5 = vsel %vm14852_vm13, %v6234_v47, 0.0  ;;  %v1512_v43 = vadd.s32 %v1511_v44, %v1502_v8  ;;  %vm1532_vm9 = vc.u32 %v1524_v16, %v1528_v6  ;;  %v14863_v48 = vadd.f32 %v5883_v9, %v5539_v60 }
 0x46d   : > { %v6172_v34 = vsel %vm17917_vm4, %v6085_v29, 0.0  ;;  %v1533_v35 = vsel %vm1532_vm9, 1, %v17666_v33  ;;  %v1534_v62 = vadd.s32 %v1528_v6, %v1524_v16  ;;  %v5136_v63 = vadd.f32 %v5078_v4, %v4732_v57 }
 0x46e   : > { %v1513_v50 = vshrl.u32 %v1512_v43, 4  ;;  %v1535_v54 = vadd.s32 %v1533_v35, %v1527_v26  ;;  %v1550_v61 = vand.u32 65535, %v14850_v0  ;;  %v1551_v18 = vshrl.u32 %v14850_v0, 16 }
 0x46f   : > { %v6369_v28 = vsel %vm17913_vm1, %v6282_v5, 0.0  ;;  %v1529_v25 = vshrl.u32 %v1525_v1, 16  ;;  %vm1536_vm2 = vc.u32 %v1534_v62, %v1530_v11  ;;  %v14871_v47 = vadd.s32 352, %v13230_v27  ;;  %v5482_v1 = vpop.f32.mrf.mxu3 }
 0x470   : > { %v1514_v60 = vmul.u32 24, %v1513_v50  ;;  %v1537_v8 = vsel %vm1536_vm2, 1, %v17666_v33  ;;  %v1553_v9 = vmul.u32 43691, %v1550_v61  ;;  %v1554_v44 = vmul.u32 43690, %v1550_v61 }
 0x471   : > { %v6173_v16 = vadd.f32 %v6172_v34, %v6171_v31  ;;  %v1531_v57 = vshrl.u32 %v1526_v36, 16  ;;  %v1539_v6 = vadd.s32 %v1537_v8, %v1535_v54  ;;  %v1555_v26 = vmul.u32 43691, %v1551_v18 }
 0x472   : > { %v1515_v4 = vsub.s32 %v14790_v12, %v1514_v60  ;;  %v6370_v29 = vadd.f32 %v6369_v28, %v6368_v41  ;;  %v1556_v43 = vmul.u32 43690, %v1551_v18  ;;  %v1557_v35 = vshll.u32 %v1554_v44, 16 }
 0x473   : > { %v1540_v5 = vadd.s32 %v1539_v6, %v1529_v25  ;;  %v1558_v11 = vshrl.u32 %v1554_v44, 16  ;;  %v1559_v62 = vshll.u32 %v1555_v26, 16  ;;  %v1579_v7 = vand.u32 65535, %v14871_v47 }
 0x474   : > { %vm1733_vm3 = vcmp.ne.s32.totalorder %v1515_v4, 0  ;;  %vm1781_vm9 = vcmp.lt.s32.totalorder %v1515_v4, 0  ;;  %v1877_v50 = vadd.s32 24, %v1515_v4  ;;  %vm1561_vm4 = vc.u32 %v1553_v9, %v1557_v35 }
 0x475   : > { %vm1829_vm1 = vmand %vm1781_vm9, %vm1733_vm3  ;;  %v1541_v31 = vadd.s32 %v1540_v5, %v1531_v57  ;;  %v1562_v36 = vsel %vm1561_vm4, 1, %v17666_v33  ;;  %v1563_v34 = vadd.s32 %v1557_v35, %v1553_v9  ;;  %v1580_v12 = vshrl.u32 %v14871_v47, 16  ;;  %v5081_v35 = vpop.f32.mrf.mxu2 }
 0x476   : > { %v1925_v41 = vsel %vm1829_vm1, %v1877_v50, %v1515_v4  ;;  %v1560_v54 = vshrl.u32 %v1555_v26, 16  ;;  %v1564_v61 = vadd.s32 %v1562_v36, %v1556_v43  ;;  %v1583_v18 = vmul.u32 43690, %v1579_v7 }
 0x477   : > { %vm14878_vm2 = vcmp.lt.s32.totalorder %v1925_v41, 16  ;;  %v17918_v28 = vmov 0  ;;  %v1542_v25 = vshrl.u32 %v1541_v31, 4  ;;  %vm1565_vm13 = vc.u32 %v1563_v34, %v1559_v62  ;;  %v5886_v31 = vpop.f32.mrf.mxu0 }
 0x478   : > { %v17919_v28 = vsel %vm14878_vm2, 4294967295, %v17918_v28  ;;  %v14882_v60 = vmul.u32 43691, %v1580_v12  ;;  %v6086_v8 = vsel %vm14878_vm2, %v14828_v42, 0.0  ;;  %v6283_v9 = vsel %vm14878_vm2, %v14847_v49, 0.0 }
 0x479   : > { %17920 = vst [vmem:[#allocation57_spill] sm:$0xff] %v17919_v28  ;;  %v1566_v44 = vsel %vm1565_vm13, 1, %v17666_v33  ;;  %v1582_v57 = vmul.u32 43691, %v1579_v7  ;;  %vm17921_vm3 = vcmask 31744   ;;  %v1543_v4 = vmul.u32 24, %v1542_v25 }
 0x47a   : > { %v6174_v6 = vsel %vm17921_vm3, %v6086_v8, 0.0  ;;  %vm17922_vm9 = vmmov %vm17921_vm3  ;;  %v1568_v43 = vadd.s32 %v1566_v44, %v1564_v61  ;;  %v5540_v50 = vadd.f32 %v5482_v1, %v5136_v63  ;;  %v1586_v36 = vshll.u32 %v1583_v18, 16  ;;  %v5485_v63 = vpop.f32.mrf.mxu3 }
 0x47b   : > { %v6371_v26 = vsel %vm17922_vm9, %v6283_v9, 0.0  ;;  %v6175_v5 = vadd.f32 %v6174_v6, %v6173_v16  ;;  %v1544_v42 = vsub.s32 %v14823_v10, %v1543_v4  ;;  %v1585_v41 = vmul.u32 43690, %v1580_v12 }
 0x47c   : > { %v6372_v62 = vadd.f32 %v6371_v26, %v6370_v29  ;;  %v1569_v34 = vadd.s32 %v1568_v43, %v1558_v11  ;;  %v1588_v49 = vshll.u32 %v14882_v60, 16  ;;  %v6236_v7 = vmul.f32 %v14863_v48, %v14863_v48 }
 0x47d   : > { %v5137_v8 = vadd.f32 %v5081_v35, %v14843_v59  ;;  %vm1590_vm13 = vc.u32 %v1582_v57, %v1586_v36  ;;  %v1592_v25 = vadd.s32 %v1586_v36, %v1582_v57  ;;  %vm1734_vm4 = vcmp.ne.s32.totalorder %v1544_v42, 0  ;;  %v4680_v36 = vpop.f32.mrf.mxu1 }
 0x47e   : > { %vm1782_vm1 = vcmp.lt.s32.totalorder %v1544_v42, 0  ;;  %v1878_v16 = vadd.s32 24, %v1544_v42  ;;  %v1570_v29 = vadd.s32 %v1569_v34, %v1560_v54  ;;  %v14898_v1 = vadd.f32 %v5886_v31, %v5540_v50 }
 0x47f   : > { %vm1830_vm3 = vmand %vm1782_vm1, %vm1734_vm4  ;;  %v1587_v10 = vshrl.u32 %v1583_v18, 16  ;;  %v1591_v11 = vsel %vm1590_vm13, 1, %v17666_v33  ;;  %vm1594_vm9 = vc.u32 %v1592_v25, %v1588_v49  ;;  %v17923_v59 = vmov 0 }
 0x480   : > { %v1926_v12 = vsel %vm1830_vm3, %v1878_v16, %v1544_v42  ;;  %v1571_v61 = vshrl.u32 %v1570_v29, 4  ;;  %v1593_v9 = vadd.s32 %v1591_v11, %v1585_v41  ;;  %v1595_v44 = vsel %vm1594_vm9, 1, %v17666_v33 }
 0x481   : > { %vm14902_vm2 = vcmp.lt.s32.totalorder %v1926_v12, 16  ;;  %v5541_v57 = vadd.f32 %v5485_v63, %v5137_v8  ;;  %v1589_v54 = vshrl.u32 %v14882_v60, 16  ;;  %v14908_v6 = vadd.s32 360, %v13230_v27 }
 0x482   : > { %v17924_v59 = vsel %vm14902_vm2, 4294967295, %v17923_v59  ;;  %v6087_v18 = vsel %vm14902_vm2, %v14863_v48, 0.0  ;;  %v6284_v26 = vsel %vm14902_vm2, %v6236_v7, 0.0  ;;  %v1572_v4 = vmul.u32 24, %v1571_v61  ;;  %v5889_v7 = vpop.f32.mrf.mxu0 }
 0x483   : > { %17925 = vst [vmem:[#allocation58_spill] sm:$0xff] %v17924_v59  ;;  %v1597_v43 = vadd.s32 %v1595_v44, %v1593_v9  ;;  %vm17926_vm13 = vcmask 31744   ;;  %v1608_v31 = vand.u32 65535, %v14908_v6  ;;  %v1609_v60 = vshrl.u32 %v14908_v6, 16 }
 0x484   : > { %v6176_v35 = vsel %vm17926_vm13, %v6087_v18, 0.0  ;;  %vm17927_vm4 = vmmov %vm17926_vm13  ;;  %v1573_v41 = vsub.s32 %v14850_v0, %v1572_v4  ;;  %v6237_v8 = vmul.f32 %v14898_v1, %v14898_v1  ;;  %v4734_v12 = vadd.f32 %v4680_v36, %v13338_v15 }
 0x485   : > { %v6373_v50 = vsel %vm17927_vm4, %v6284_v26, 0.0  ;;  %v6177_v42 = vadd.f32 %v6176_v35, %v6175_v5  ;;  %v1598_v49 = vadd.s32 %v1597_v43, %v1587_v10  ;;  %v1611_v25 = vmul.u32 43691, %v1608_v31  ;;  %v5084_v26 = vpop.f32.mrf.mxu2 }
 0x486   : > { %v6374_v34 = vadd.f32 %v6373_v50, %v6372_v62  ;;  %v1612_v16 = vmul.u32 43690, %v1608_v31  ;;  %v1613_v29 = vmul.u32 43691, %v1609_v60  ;;  %vm1735_vm1 = vcmp.ne.s32.totalorder %v1573_v41, 0 }
 0x487   : > { %vm1783_vm3 = vcmp.lt.s32.totalorder %v1573_v41, 0  ;;  %v1879_v63 = vadd.s32 24, %v1573_v41  ;;  %v1599_v11 = vadd.s32 %v1598_v49, %v1589_v54  ;;  %v1614_v61 = vmul.u32 43690, %v1609_v60 }
 0x488   : > { %vm1831_vm9 = vmand %vm1783_vm3, %vm1735_vm1  ;;  %v1615_v5 = vshll.u32 %v1612_v16, 16  ;;  %v1617_v62 = vshll.u32 %v1613_v29, 16  ;;  %v5945_v10 = vadd.f32 %v5889_v7, %v5541_v57  ;;  %v1616_v44 = vshrl.u32 %v1612_v16, 16 }
 0x489   : > { %v1927_v9 = vsel %vm1831_vm9, %v1879_v63, %v1573_v41  ;;  %v1600_v0 = vshrl.u32 %v1599_v11, 4  ;;  %v17928_v18 = vmov 0  ;;  %v14928_v43 = vadd.s32 368, %v13230_v27 }
 0x48a   : > { %vm14923_vm13 = vcmp.lt.s32.totalorder %v1927_v9, 16  ;;  %vm1619_vm4 = vc.u32 %v1611_v25, %v1615_v5  ;;  %v1621_v4 = vadd.s32 %v1615_v5, %v1611_v25  ;;  %vm17931_vm1 = vcmask 31744   ;;  %v5488_v9 = vpop.f32.mrf.mxu3 }
 0x48b   : > { %v17929_v18 = vsel %vm14923_vm13, 4294967295, %v17928_v18  ;;  %v6088_v15 = vsel %vm14923_vm13, %v14898_v1, 0.0  ;;  %v6285_v54 = vsel %vm14923_vm13, %v6237_v8, 0.0  ;;  %v1601_v35 = vmul.u32 24, %v1600_v0  ;;  %vm17932_vm3 = vmmov %vm17931_vm1  ;;  %v4683_v0 = vpop.f32.mrf.mxu1 }
 0x48c   : > { %17930 = vst [vmem:[#allocation59_spill] sm:$0xff] %v17929_v18  ;;  %v1620_v57 = vsel %vm1619_vm4, 1, %v17666_v33  ;;  %v6178_v50 = vsel %vm17931_vm1, %v6088_v15, 0.0  ;;  %v6375_v31 = vsel %vm17932_vm3, %v6285_v54, 0.0  ;;  %vm1623_vm9 = vc.u32 %v1621_v4, %v1617_v62 }
 0x48d   : > { %v1622_v60 = vadd.s32 %v1620_v57, %v1614_v61  ;;  %v1602_v36 = vsub.s32 %v14871_v47, %v1601_v35  ;;  %v6179_v41 = vadd.f32 %v6178_v50, %v6177_v42  ;;  %v6376_v49 = vadd.f32 %v6375_v31, %v6374_v34 }
 0x48e   : > { %v1624_v7 = vsel %vm1623_vm9, 1, %v17666_v33  ;;  %v1618_v25 = vshrl.u32 %v1613_v29, 16  ;;  %v1637_v63 = vand.u32 65535, %v14928_v43  ;;  %v1638_v8 = vshrl.u32 %v14928_v43, 16 }
 0x48f   : > { %v1626_v16 = vadd.s32 %v1624_v7, %v1622_v60  ;;  %vm1736_vm13 = vcmp.ne.s32.totalorder %v1602_v36, 0  ;;  %vm1784_vm4 = vcmp.lt.s32.totalorder %v1602_v36, 0  ;;  %v1880_v11 = vadd.s32 24, %v1602_v36  ;;  %v5087_v7 = vpop.f32.mrf.mxu2 }
 0x490   : > { %v6238_v5 = vmul.f32 %v5945_v10, %v5945_v10  ;;  %vm1832_vm1 = vmand %vm1784_vm4, %vm1736_vm13  ;;  %v1640_v62 = vmul.u32 43691, %v1637_v63  ;;  %v1641_v47 = vmul.u32 43690, %v1637_v63  ;;  %v1642_v42 = vmul.u32 43691, %v1638_v8 }
 0x491   : > { %v1627_v61 = vadd.s32 %v1626_v16, %v1616_v44  ;;  %v1928_v34 = vsel %vm1832_vm1, %v1880_v11, %v1602_v36  ;;  %v5138_v4 = vadd.f32 %v5084_v26, %v4734_v12  ;;  %v17933_v29 = vmov 0  ;;  %v5892_v36 = vpop.f32.mrf.mxu0 }
 0x492   : > { %vm14942_vm3 = vcmp.lt.s32.totalorder %v1928_v34, 16  ;;  %v1643_v54 = vmul.u32 43690, %v1638_v8  ;;  %v1644_v35 = vshll.u32 %v1641_v47, 16  ;;  %v4735_v57 = vadd.f32 %v4683_v0, %v13373_v23 }
 0x493   : > { %v17934_v29 = vsel %vm14942_vm3, 4294967295, %v17933_v29  ;;  %v1628_v15 = vadd.s32 %v1627_v61, %v1618_v25  ;;  %v6089_v50 = vsel %vm14942_vm3, %v5945_v10, 0.0  ;;  %v6286_v44 = vsel %vm14942_vm3, %v6238_v5, 0.0 }
 0x494   : > { %17935 = vst [vmem:[#allocation60_spill] sm:$0xff] %v17934_v29  ;;  %v1646_v31 = vshll.u32 %v1642_v42, 16  ;;  %vm17936_vm13 = vcmask 31744   ;;  %vm1648_vm4 = vc.u32 %v1640_v62, %v1644_v35  ;;  %v1650_v63 = vadd.s32 %v1644_v35, %v1640_v62 }
 0x495   : > { %v6180_v60 = vsel %vm17936_vm13, %v6089_v50, 0.0  ;;  %vm17937_vm9 = vmmov %vm17936_vm13  ;;  %v1629_v26 = vshrl.u32 %v1628_v15, 4  ;;  %v1649_v23 = vsel %vm1648_vm4, 1, %v17666_v33  ;;  %v5542_v10 = vadd.f32 %v5488_v9, %v5138_v4  ;;  %v5491_v50 = vpop.f32.mrf.mxu3 }
 0x496   : > { %v6377_v12 = vsel %vm17937_vm9, %v6286_v44, 0.0  ;;  %v14953_v25 = vadd.f32 %v6180_v60, %v6179_v41  ;;  %v1651_v11 = vadd.s32 %v1649_v23, %v1643_v54  ;;  %v14959_v5 = vadd.s32 376, %v13230_v27  ;;  %v4686_v23 = vpop.f32.mrf.mxu1 }
 0x497   : > { %v14955_v16 = vadd.f32 %v6377_v12, %v6376_v49  ;;  %v1630_v8 = vmul.u32 24, %v1629_v26  ;;  %v5139_v0 = vadd.f32 %v5087_v7, %v4735_v57  ;;  %v1645_v61 = vshrl.u32 %v1641_v47, 16 }
 0x498   : > { %vm1652_vm1 = vc.u32 %v1650_v63, %v1646_v31  ;;  %v1666_v41 = vand.u32 65535, %v14959_v5  ;;  %v1667_v49 = vshrl.u32 %v14959_v5, 16  ;;  %v1647_v44 = vshrl.u32 %v1642_v42, 16 }
 0x499   : > { %v1631_v34 = vsub.s32 %v14908_v6, %v1630_v8  ;;  %v1653_v15 = vsel %vm1652_vm1, 1, %v17666_v33  ;;  %v14965_v4 = vadd.f32 %v5892_v36, %v5542_v10  ;;  %v5543_v57 = vadd.f32 %v5491_v50, %v5139_v0  ;;  %v5895_v26 = vpop.f32.mrf.mxu0 }
 0x49a   : > { %v1655_v62 = vadd.s32 %v1653_v15, %v1651_v11  ;;  %v1669_v6 = vmul.u32 43691, %v1666_v41  ;;  %v1670_v54 = vmul.u32 43690, %v1666_v41  ;;  %v1671_v35 = vmul.u32 43691, %v1667_v49 }
 0x49b   : > { %vm1737_vm13 = vcmp.ne.s32.totalorder %v1631_v34, 0  ;;  %vm1785_vm9 = vcmp.lt.s32.totalorder %v1631_v34, 0  ;;  %v1881_v9 = vadd.s32 24, %v1631_v34  ;;  %v1672_v42 = vmul.u32 43690, %v1667_v49 }
 0x49c   : > { %vm14967_vm4 = vmand %vm1785_vm9, %vm1737_vm13  ;;  %v1656_v47 = vadd.s32 %v1655_v62, %v1645_v61  ;;  %v1673_v12 = vshll.u32 %v1670_v54, 16  ;;  %v1675_v7 = vshll.u32 %v1671_v35, 16  ;;  %v6239_v36 = vmul.f32 %v14965_v4, %v14965_v4 }
 0x49d   : > { %v1929_v31 = vsel %vm14967_vm4, %v1881_v9, %v1631_v34  ;;  %v17940_v10 = vmov 0  ;;  %v14980_v61 = vadd.f32 %v5895_v26, %v5543_v57  ;;  %v5090_v34 = vpop.f32.mrf.mxu2  ;;  %v4736_v41 = vadd.f32 %v4686_v23, %v13428_v56 }
 0x49e   : > { %v1657_v60 = vadd.s32 %v1656_v47, %v1647_v44  ;;  %vm1677_vm1 = vc.u32 %v1669_v6, %v1673_v12  ;;  %vm14975_vm13 = vcmp.lt.s32.totalorder %v1929_v31, 16  ;;  %v1679_v11 = vadd.s32 %v1673_v12, %v1669_v6 }
 0x49f   : > { %v17941_v10 = vsel %vm14975_vm13, 4294967295, %v17940_v10  ;;  %v1678_v8 = vsel %vm1677_vm1, 1, %v17666_v33  ;;  %v1674_v49 = vshrl.u32 %v1670_v54, 16  ;;  %v6090_v50 = vsel %vm14975_vm13, %v14965_v4, 0.0  ;;  %v5494_v54 = vpop.f32.mrf.mxu3 }
 0x4a0   : > { %v1658_v63 = vshrl.u32 %v1657_v60, 4  ;;  %17942 = vst [vmem:[#allocation61_spill] sm:$0xff] %v17941_v10  ;;  %v1680_v15 = vadd.s32 %v1678_v8, %v1672_v42  ;;  %vm1681_vm9 = vc.u32 %v1679_v11, %v1675_v7  ;;  %v6287_v44 = vsel %vm14975_vm13, %v6239_v36, 0.0 }
 0x4a1   : > { %v1682_v9 = vsel %vm1681_vm9, 1, %v17666_v33  ;;  %v5140_v27 = vadd.f32 %v5090_v34, %v4736_v41  ;;  %v1676_v47 = vshrl.u32 %v1671_v35, 16  ;;  %v6240_v56 = vmul.f32 %v14980_v61, %v14980_v61 }
 0x4a2   : > { %v1659_v0 = vmul.u32 24, %v1658_v63  ;;  %v1684_v6 = vadd.s32 %v1682_v9, %v1680_v15  ;;  %vm17943_vm3 = vcmask 31744   ;;  %v5898_v63 = vpop.f32.mrf.mxu0 }
 0x4a3   : > { %v6182_v31 = vsel %vm17943_vm3, %v6090_v50, 0.0  ;;  %vm17944_vm2 = vmmov %vm17943_vm3  ;;  %v5544_v33 = vadd.f32 %v5494_v54, %v5140_v27 }
 0x4a4   : > { %v1660_v62 = vsub.s32 %v14928_v43, %v1659_v0  ;;  %v6379_v60 = vsel %vm17944_vm2, %v6287_v44, 0.0  ;;  %v1685_v42 = vadd.s32 %v1684_v6, %v1674_v49  ;;  %v17945_v43 = vmov 0 }
 0x4a5   : > { %v6183_v26 = vadd.f32 %v6182_v31, %v14953_v25  ;;  %v6380_v7 = vadd.f32 %v6379_v60, %v14955_v16  ;;  %v5948_v49 = vadd.f32 %v5898_v63, %v5544_v33 }
 0x4a6   : > { %vm1738_vm4 = vcmp.ne.s32.totalorder %v1660_v62, 0  ;;  %vm1786_vm1 = vcmp.lt.s32.totalorder %v1660_v62, 0  ;;  %v1882_v57 = vadd.s32 24, %v1660_v62  ;;  %v1686_v35 = vadd.s32 %v1685_v42, %v1676_v47 }
 0x4a7   : > { %vm1834_vm10 = vmand %vm1786_vm1, %vm1738_vm4  ;;  %v6241_v50 = vmul.f32 %v5948_v49, %v5948_v49 }
 0x4a8   : > { %v1930_v12 = vsel %vm1834_vm10, %v1882_v57, %v1660_v62  ;;  %vm17948_vm10 = vmmov %vm17944_vm2  ;;  %v1687_v0 = vshrl.u32 %v1686_v35, 4  ;;  %v17949_v62 = vmov 0 }
 0x4a9   : > { %vm14994_vm13 = vcmp.lt.s32.totalorder %v1930_v12, 16 }
 0x4aa   : > { %v17946_v43 = vsel %vm14994_vm13, 4294967295, %v17945_v43  ;;  %v6091_v23 = vsel %vm14994_vm13, %v14980_v61, 0.0  ;;  %v6288_v36 = vsel %vm14994_vm13, %v6240_v56, 0.0  ;;  %v1688_v41 = vmul.u32 24, %v1687_v0 }
 0x4ab   : > { %17947 = vst [vmem:[#allocation62_spill] sm:$0xff] %v17946_v43  ;;  %v6184_v8 = vsel %vm17944_vm2, %v6091_v23, 0.0  ;;  %v6381_v11 = vsel %vm17948_vm10, %v6288_v36, 0.0  ;;  %vm17952_vm10 = vmmov %vm17944_vm2 }
 0x4ac   : > { %v6185_v34 = vadd.f32 %v6184_v8, %v6183_v26  ;;  %v6382_v15 = vadd.f32 %v6381_v11, %v6380_v7  ;;  %v1689_v25 = vsub.s32 %v14959_v5, %v1688_v41  ;;  %v241_v26 = vld [vmem:[%s17352_s3 + $0x4] sm:$0xf] }
 0x4ae   : > { %vm1739_vm3 = vcmp.ne.s32.totalorder %v1689_v25, 0  ;;  %vm1787_vm9 = vcmp.lt.s32.totalorder %v1689_v25, 0  ;;  %v1883_v16 = vadd.s32 24, %v1689_v25 }
 0x4af   : > { %vm1835_vm4 = vmand %vm1787_vm9, %vm1739_vm3  ;;  %vm17953_vm3 = vcmask 1043456  }
 0x4b0   : > { %v1931_v44 = vsel %vm1835_vm4, %v1883_v16, %v1689_v25  ;;  %11570 = vmatpush.msk.msrb.mxu2 %vm17953_vm3, %v241_v26  ;;  %vm17954_vm9 = vmmov %vm17953_vm3 }
 0x4b1   : > { %vm15008_vm1 = vcmp.lt.s32.totalorder %v1931_v44, 16  ;;  %v243_v44 = vld [vmem:[%s17352_s3 + $0xc] sm:$0xf]  ;;  %vm17955_vm4 = vmmov %vm17953_vm3 }
 0x4b2   : > { %v17950_v62 = vsel %vm15008_vm1, 4294967295, %v17949_v62  ;;  %v6092_v9 = vsel %vm15008_vm1, %v5948_v49, 0.0  ;;  %v6289_v27 = vsel %vm15008_vm1, %v6241_v50, 0.0  ;;  %11668 = vmatpush.msk.msrb.mxu0 %vm17955_vm4, %v243_v44 }
 0x4b3   : > { %17951 = vst [vmem:[#allocation63_spill] sm:$0xff] %v17950_v62  ;;  %v6186_v47 = vsel %vm17944_vm2, %v6092_v9, 0.0  ;;  %v6383_v5 = vsel %vm17952_vm10, %v6289_v27, 0.0 }
 0x4b4   : > { %v6187_v6 = vadd.f32 %v6186_v47, %v6185_v34  ;;  %v6384_v57 = vadd.f32 %v6383_v5, %v6382_v15  ;;  %v242_v34 = vld [vmem:[%s17352_s3 + $0x8] sm:$0xf] }
 0x4b5   : > { %11619 = vmatpush.msk.msrb.mxu3 %vm17954_vm9, %v242_v34  ;;  %v17964_v34 = vld [vmem:[#allocation43_spill] sm:$0xff]  ;;  %vm18002_vm9 = vcmask 1040384  }
 0x4b6   : > { %v6188_v56 = vrot.slane %v6187_v6, 4  ;;  %v6385_v54 = vrot.slane %v6384_v57, 4  ;;  %vm18003_vm4 = vmmov %vm18002_vm9 }
 0x4b8   : > { %v6189_v31 = vadd.f32 %v6188_v56, %v6187_v6  ;;  %v6386_v60 = vadd.f32 %v6385_v54, %v6384_v57  ;;  %v17956_v6 = vld [vmem:[#allocation15_spill] sm:$0xff] }
 0x4ba   : > { %v6190_v42 = vrot.slane %v6189_v31, 2  ;;  %v6387_v12 = vrot.slane %v6386_v60, 2 }
 0x4bc   : > { %v6191_v33 = vadd.f32 %v6190_v42, %v6189_v31  ;;  %v6388_v35 = vadd.f32 %v6387_v12, %v6386_v60  ;;  %v17957_v60 = vld [vmem:[#allocation27_spill] sm:$0xff] }
 0x4be   : > { %v6192_v7 = vrot.slane %v6191_v33, 1  ;;  %v6389_v23 = vrot.slane %v6388_v35, 1 }
 0x4c0   : > { %v6193_v36 = vadd.f32 %v6192_v7, %v6191_v33  ;;  %v6390_v63 = vadd.f32 %v6389_v23, %v6388_v35 }
 0x4c2   : > { %v15022_v8 = vmul.f32 0.00390625, %v6193_v36  ;;  %v6392_v11 = vmul.f32 0.00390625, %v6390_v63  ;;  %v17961_v36 = vld [vmem:[#allocation19_spill] sm:$0xff] }
 0x4c4   : > { %v6393_v0 = vmul.f32 %v15022_v8, %v15022_v8  ;;  %v6424_v25 = vsub.f32 %v14863_v48, %v15022_v8  ;;  %v6425_v16 = vsub.f32 %v14898_v1, %v15022_v8  ;;  %v6427_v50 = vsub.f32 %v14980_v61, %v15022_v8 }
 0x4c5   : > { %v6396_v5 = vsub.f32 %v13479_v32, %v15022_v8  ;;  %v6397_v57 = vsub.f32 %v17956_v6, %v15022_v8  ;;  %v6398_v56 = vsub.f32 %v13632_v19, %v15022_v8  ;;  %v6399_v54 = vsub.f32 %v13692_v2, %v15022_v8  ;;  %v17958_v19 = vld [vmem:[#allocation33_spill] sm:$0xff] }
 0x4c6   : > { %v6394_v15 = vsub.f32 %v6392_v11, %v6393_v0  ;;  %v6400_v31 = vsub.f32 %v13783_v21, %v15022_v8  ;;  %v6401_v42 = vsub.f32 %v17957_v60, %v15022_v8  ;;  %v6402_v12 = vsub.f32 %v13900_v20, %v15022_v8  ;;  %v17959_v2 = vld [vmem:[#allocation13_spill] sm:$0xff]  ;;  %v17960_v21 = vld [vmem:[#allocation16_spill] sm:$0xff]  ;;  %v17962_v20 = vld [vmem:[#allocation38_spill] sm:$0xff] }
 0x4c7   : > { %v6403_v32 = vsub.f32 %v13933_v55, %v15022_v8  ;;  %v6404_v35 = vsub.f32 %v13992_v24, %v15022_v8  ;;  %v6405_v26 = vsub.f32 %v17958_v19, %v15022_v8  ;;  %v6406_v7 = vsub.f32 %v17959_v2, %v15022_v8  ;;  %v17963_v55 = vld [vmem:[#allocation41_spill] sm:$0xff] }
 0x4c8   : > { %v6395_v41 = vmax.f32 %v6394_v15, 0.0  ;;  %v6407_v23 = vsub.f32 %v17960_v21, %v15022_v8  ;;  %v6408_v63 = vsub.f32 %v17961_v36, %v15022_v8  ;;  %v6409_v11 = vsub.f32 %v17962_v20, %v15022_v8 }
 0x4c9   : > { %v6410_v24 = vsub.f32 %v17963_v55, %v15022_v8  ;;  %v6411_v15 = vsub.f32 %v17964_v34, %v15022_v8  ;;  %v6415_v6 = vsub.f32 %v14489_v40, %v15022_v8  ;;  %v6417_v19 = vsub.f32 %v14551_v22, %v15022_v8 }
 0x4ca   : > { %v6428_v49 = vadd.f32 1e-05, %v6395_v41  ;;  %v17965_v41 = vld [vmem:[#allocation6_spill] sm:$0xff]  ;;  %v6418_v2 = vsub.f32 %v14604_v51, %v15022_v8  ;;  %v6421_v40 = vsub.f32 %v14709_v17, %v15022_v8  ;;  %v6423_v22 = vsub.f32 %v14814_v30, %v15022_v8 }
 0x4cb   : > { %v6412_v44 = vsub.f32 %v17965_v41, %v15022_v8  ;;  %v6426_v21 = vsub.f32 %v14965_v4, %v15022_v8 }
 0x4cc   : > { %12014 = vrsqrt.f32 %v6428_v49  ;;  %vm6435_vm10 = vweird.f32 %v6428_v49 }
 0x4d2   : > { %v12015_v9 = vpop.eup %12014 }
 0x4d3   : > { %v6430_v27 = vmul.f32 %v12015_v9, %v6428_v49  ;;  %vm6436_vm2 = vweird.f32 %v12015_v9 }
 0x4d4   : > { %vm6437_vm3 = vmor %vm6435_vm10, %vm6436_vm2 }
 0x4d5   : > { %v6431_v47 = vmul.f32 %v12015_v9, %v6430_v27  ;;  %v6413_v27 = vsub.f32 %v14387_v53, %v15022_v8  ;;  %v6419_v53 = vsub.f32 %v14628_v45, %v15022_v8  ;;  %vm18004_vm2 = vmmov %vm18003_vm4 }
 0x4d6   : > { %vm18005_vm10 = vmmov %vm18004_vm2 }
 0x4d7   : > { %v6432_v33 = vmul.f32 0.5, %v6431_v47  ;;  %v6414_v47 = vsub.f32 %v14444_v52, %v15022_v8  ;;  %v6420_v52 = vsub.f32 %v14681_v13, %v15022_v8  ;;  %vm18007_vm1 = vmmov %vm18004_vm2 }
 0x4d9   : > { %v6433_v0 = vsub.f32 1.5, %v6432_v33  ;;  %v6416_v33 = vsub.f32 %v14530_v3, %v15022_v8  ;;  %v6422_v3 = vsub.f32 %v14767_v38, %v15022_v8 }
 0x4db   : > { %v6434_v60 = vmul.f32 %v12015_v9, %v6433_v0 }
 0x4dd   : > { %v6438_v49 = vsel %vm6437_vm3, %v12015_v9, %v6434_v60  ;;  %vm18006_vm3 = vmmov %vm18004_vm2 }
 0x4de   : > { %v15098_v51 = vmul.f32 %v6438_v49, %v6396_v5  ;;  %v15100_v36 = vmul.f32 %v6438_v49, %v6397_v57  ;;  %v15102_v45 = vmul.f32 %v6438_v49, %v6398_v56  ;;  %v15104_v13 = vmul.f32 %v6438_v49, %v6399_v54 }
 0x4df   : > { %v15106_v20 = vmul.f32 %v6438_v49, %v6400_v31  ;;  %v15108_v17 = vmul.f32 %v6438_v49, %v6401_v42  ;;  %v15110_v9 = vmul.f32 %v6438_v49, %v6402_v12  ;;  %v15112_v38 = vmul.f32 %v6438_v49, %v6403_v32 }
 0x4e0   : > { %v15114_v30 = vmul.f32 %v6438_v49, %v6404_v35  ;;  %v15116_v0 = vmul.f32 %v6438_v49, %v6405_v26  ;;  %v15118_v4 = vmul.f32 %v6438_v49, %v6406_v7  ;;  %v15120_v5 = vmul.f32 %v6438_v49, %v6407_v23 }
 0x4e1   : > { %v15122_v57 = vmul.f32 %v6438_v49, %v6408_v63  ;;  %v15124_v56 = vmul.f32 %v6438_v49, %v6409_v11  ;;  %v15126_v54 = vmul.f32 %v6438_v49, %v6410_v24  ;;  %v15128_v31 = vmul.f32 %v6438_v49, %v6411_v15 }
 0x4e2   : > { %v15130_v42 = vmul.f32 %v6438_v49, %v6412_v44  ;;  %v15132_v12 = vmul.f32 %v6438_v49, %v6413_v27  ;;  %v15134_v32 = vmul.f32 %v6438_v49, %v6414_v47  ;;  %v15136_v35 = vmul.f32 %v6438_v49, %v6415_v6 }
 0x4e3   : > { %v15138_v26 = vmul.f32 %v6438_v49, %v6416_v33  ;;  %v15140_v7 = vmul.f32 %v6438_v49, %v6417_v19  ;;  %v15142_v23 = vmul.f32 %v6438_v49, %v6418_v2  ;;  %v15144_v63 = vmul.f32 %v6438_v49, %v6419_v53 }
 0x4e4   : > { %v15146_v11 = vmul.f32 %v6438_v49, %v6420_v52  ;;  %v15148_v55 = vmul.f32 %v6438_v49, %v6421_v40  ;;  %v15150_v24 = vmul.f32 %v6438_v49, %v6422_v3  ;;  %v15152_v34 = vmul.f32 %v6438_v49, %v6423_v22 }
 0x4e5   : > { %17966 = vst [vmem:[#allocation15_spill] sm:$0xff] %v15138_v26  ;;  %v15157_v15 = vmul.f32 %v6438_v49, %v6424_v25  ;;  %v15162_v41 = vmul.f32 %v6438_v49, %v6425_v16  ;;  %v15164_v44 = vmul.f32 %v6438_v49, %v6426_v21  ;;  %v15169_v27 = vmul.f32 %v6438_v49, %v6427_v50 }
 0x4e6   : > { %17967 = vst [vmem:[#allocation27_spill] sm:$0xff] %v15140_v7  ;;  %v6471_v47 = vmax.f32 %v15098_v51, 0.0  ;;  %v17522_v6 = vmax.f32 %v15100_v36, 0.0  ;;  %v6473_v48 = vmax.f32 %v15102_v45, 0.0  ;;  %v17519_v25 = vmax.f32 %v15104_v13, 0.0 }
 0x4e7   : > { %17968 = vst [vmem:[#allocation33_spill] sm:$0xff] %v15142_v23  ;;  %v6475_v60 = vmax.f32 %v15106_v20, 0.0  ;;  %v17520_v1 = vmax.f32 %v15108_v17, 0.0  ;;  %v6477_v16 = vmax.f32 %v15110_v9, 0.0  ;;  %v17521_v33 = vmax.f32 %v15112_v38, 0.0 }
 0x4e8   : > { %17969 = vst [vmem:[#allocation13_spill] sm:$0xff] %v15144_v63  ;;  %v17523_v61 = vmax.f32 %v15114_v30, 0.0  ;;  %v17524_v8 = vmax.f32 %v15116_v0, 0.0  ;;  %v17527_v50 = vmax.f32 %v15118_v4, 0.0  ;;  %v17530_v19 = vmax.f32 %v15120_v5, 0.0 }
 0x4e9   : > { %17970 = vst [vmem:[#allocation16_spill] sm:$0xff] %v15146_v11  ;;  %v6519_v53 = vrot.slane %v6471_v47, 1  ;;  %v6520_v20 = vrot.slane %v6473_v48, 1  ;;  %v6521_v2 = vrot.slane %v6475_v60, 1  ;;  %v15203_v9 = vrot.slane %v6477_v16, 1 }
 0x4ea   : > { %17971 = vst [vmem:[#allocation19_spill] sm:$0xff] %v15148_v55  ;;  %v6567_v52 = vrot.slane %v6471_v47, 7  ;;  %v15207_v40 = vrot.slane %v17522_v6, 7  ;;  %v6570_v49 = vrot.slane %v6473_v48, 7  ;;  %v15211_v22 = vrot.slane %v17519_v25, 7 }
 0x4eb   : > { %17972 = vst [vmem:[#allocation38_spill] sm:$0xff] %v15150_v24  ;;  %v6573_v21 = vrot.slane %v6475_v60, 7  ;;  %v15215_v51 = vrot.slane %v17520_v1, 7  ;;  %v6576_v45 = vrot.slane %v6477_v16, 7  ;;  %v15219_v3 = vrot.slane %v17521_v33, 7 }
 0x4ec   : > { %17973 = vst [vmem:[#allocation41_spill] sm:$0xff] %v15152_v34  ;;  %v6579_v47 = vrot.slane %v17523_v61, 7  ;;  %v15225_v48 = vrot.slane %v17524_v8, 7  ;;  %v15229_v25 = vrot.slane %v17527_v50, 7  ;;  %v15233_v60 = vrot.slane %v17530_v19, 7 }
 0x4ed   : > { %17974 = vst [vmem:[#allocation43_spill] sm:$0xff] %v15157_v15  ;;  %v17977_v16 = vmax.f32 %v15122_v57, 0.0  ;;  %v17978_v33 = vmax.f32 %v15124_v56, 0.0  ;;  %v17979_v61 = vmax.f32 %v15126_v54, 0.0  ;;  %v17980_v62 = vmax.f32 %v15128_v31, 0.0 }
 0x4ee   : > { %17975 = vst [vmem:[#allocation6_spill] sm:$0xff] %v15164_v44  ;;  %v17981_v43 = vmax.f32 %v15130_v42, 0.0  ;;  %v17982_v10 = vmax.f32 %v15132_v12, 0.0  ;;  %v17983_v29 = vmax.f32 %v15134_v32, 0.0  ;;  %v17984_v18 = vmax.f32 %v15136_v35, 0.0 }
 0x4ef   : > { %17976 = vst [vmem:[#allocation64_spill] sm:$0xff] %v15169_v27  ;;  %v15237_v1 = vrot.slane %v17977_v16, 7  ;;  %v15241_v6 = vrot.slane %v17978_v33, 7  ;;  %v15245_v8 = vrot.slane %v17979_v61, 7  ;;  %v15249_v50 = vrot.slane %v17980_v62, 7 }
 0x4f0   : > { %v15253_v19 = vrot.slane %v17981_v43, 7  ;;  %v15257_v16 = vrot.slane %v17982_v10, 7  ;;  %v15261_v33 = vrot.slane %v17983_v29, 7  ;;  %v15265_v61 = vrot.slane %v17984_v18, 7 }
 0x4f1   : > { %v17985_v59 = vmax.f32 %v15138_v26, 0.0  ;;  %v17986_v28 = vmax.f32 %v15140_v7, 0.0  ;;  %v17987_v58 = vmax.f32 %v15142_v23, 0.0  ;;  %v17988_v39 = vmax.f32 %v15144_v63, 0.0 }
 0x4f2   : > { %v17989_v46 = vmax.f32 %v15146_v11, 0.0  ;;  %v17991_v14 = vmax.f32 %v15148_v55, 0.0  ;;  %v17993_v37 = vmax.f32 %v15150_v24, 0.0  ;;  %v17995_v23 = vmax.f32 %v15152_v34, 0.0 }
 0x4f3   : > { %v15269_v62 = vrot.slane %v17985_v59, 7  ;;  %v15273_v43 = vrot.slane %v17986_v28, 7  ;;  %v15277_v10 = vrot.slane %v17987_v58, 7  ;;  %v15281_v29 = vrot.slane %v17988_v39, 7 }
 0x4f4   : > { %v15285_v18 = vrot.slane %v17989_v46, 7  ;;  %v15289_v59 = vrot.slane %v17991_v14, 7  ;;  %v15293_v28 = vrot.slane %v17993_v37, 7  ;;  %v15297_v58 = vrot.slane %v17995_v23, 7 }
 0x4f5   : > { %v17997_v63 = vmax.f32 %v15157_v15, 0.0  ;;  %v17999_v11 = vmax.f32 %v15162_v41, 0.0  ;;  %v18000_v26 = vmax.f32 %v15164_v44, 0.0  ;;  %v18001_v14 = vmax.f32 %v15169_v27, 0.0 }
 0x4f6   : > { %17990 = vst [vmem:[#allocation65_spill] sm:$0xff] %v15285_v18  ;;  %v6569_v37 = vsel %vm18002_vm9, %v6567_v52, %v15207_v40  ;;  %v6572_v23 = vsel %vm18003_vm4, %v6570_v49, %v15211_v22  ;;  %vm18008_vm9 = vmmov %vm18007_vm1  ;;  %v15349_v34 = vsel %vm18007_vm1, %v15261_v33, %v15265_v61 }
 0x4f7   : > { %17992 = vst [vmem:[#allocation66_spill] sm:$0xff] %v15289_v59  ;;  %v15301_v39 = vrot.slane %v17997_v63, 7  ;;  %v6610_v46 = vrot.slane %v17999_v11, 7  ;;  %v15307_v55 = vrot.slane %v18000_v26, 7  ;;  %v15311_v24 = vrot.slane %v18001_v14, 7  ;;  %vm18009_vm4 = vmmov %vm18007_vm1 }
 0x4f8   : > { %17994 = vst [vmem:[#allocation67_spill] sm:$0xff] %v15293_v28  ;;  %v6575_v63 = vsel %vm18004_vm2, %v6573_v21, %v15215_v51  ;;  %v6578_v11 = vsel %vm18005_vm10, %v6576_v45, %v15219_v3  ;;  %v15323_v26 = vsel %vm18006_vm3, %v6579_v47, %v15225_v48  ;;  %v15328_v14 = vsel %vm18007_vm1, %v15229_v25, %v15233_v60  ;;  %vm18012_vm10 = vmmov %vm18007_vm1 }
 0x4f9   : > { %17996 = vst [vmem:[#allocation68_spill] sm:$0xff] %v15297_v58  ;;  %v15333_v44 = vsel %vm18008_vm9, %v15237_v1, %v15241_v6  ;;  %v15338_v27 = vsel %vm18009_vm4, %v15245_v8, %v15249_v50  ;;  %vm18011_vm2 = vcmask 31744   ;;  %v15344_v15 = vsel %vm18012_vm10, %v15253_v19, %v15257_v16  ;;  %vm18015_vm3 = vmmov %vm18007_vm1 }
 0x4fa   : > { %17998 = vst [vmem:[#allocation69_spill] sm:$0xff] %v15301_v39  ;;  %v15354_v7 = vsel %vm18015_vm3, %v15269_v62, %v15273_v43  ;;  %vm18017_vm9 = vmmov %vm18007_vm1 }
 0x4fb   : > { %18010 = vst [vmem:[#allocation70_spill] sm:$0xff] %v15338_v27  ;;  %v15359_v27 = vsel %vm18017_vm9, %v15277_v10, %v15281_v29  ;;  %vm18019_vm4 = vmmov %vm18011_vm2 }
 0x4fc   : > { %6792 = vst.msk [vmem:[#allocation2 + $0x8] sm:$0xff] %vm18011_vm2, %v6572_v23  ;;  %vm18020_vm2 = vmmov %vm18007_vm1 }
 0x4fd   : > { %18013 = vst [vmem:[#allocation71_spill] sm:$0xff] %v15344_v15  ;;  %v15365_v15 = vsel %vm18020_vm2, %v15285_v18, %v15289_v59  ;;  %vm18022_vm10 = vmmov %vm18007_vm1  ;;  %v18032_v18 = vmax.f32 %v15104_v13, 0.0  ;;  %v18040_v13 = vmax.f32 %v15162_v41, 0.0 }
 0x4fe   : > { %18014 = vst [vmem:[#allocation72_spill] sm:$0xff] %v15349_v34  ;;  %v15370_v34 = vsel %vm18022_vm10, %v15293_v28, %v15297_v58  ;;  %vm18024_vm3 = vmmov %vm18007_vm1 }
 0x4ff   : > { %18016 = vst [vmem:[#allocation73_spill] sm:$0xff] %v15354_v7  ;;  %v15374_v7 = vsel %vm18007_vm1, %v15301_v39, %v6610_v46  ;;  %vm18026_vm9 = vmmov %vm18019_vm4  ;;  %v18031_v39 = vmax.f32 %v15100_v36, 0.0  ;;  %v6664_v59 = vrot.slane %v18032_v18, 5  ;;  %v18039_v36 = vmax.f32 %v15112_v38, 0.0 }
 0x500   : > { %18018 = vst [vmem:[#allocation74_spill] sm:$0xff] %v15359_v27  ;;  %v15379_v27 = vsel %vm18024_vm3, %v15307_v55, %v15311_v24  ;;  %vm18028_vm2 = vmmov %vm18007_vm1 }
 0x501   : > { %6744 = vst.msk [vmem:[#allocation2 + $0x20] sm:$0xff] %vm18019_vm4, %v6569_v37  ;;  %vm18027_vm4 = vmmov %vm18007_vm1  ;;  %v6663_v58 = vrot.slane %v18031_v39, 5 }
 0x502   : > { %18021 = vst [vmem:[#allocation75_spill] sm:$0xff] %v15365_v15  ;;  %v6695_v37 = vsel %vm18027_vm4, %v6519_v53, %v6567_v52  ;;  %v6696_v15 = vsel %vm18028_vm2, %v6520_v20, %v6570_v49  ;;  %vm18029_vm13 = vmmov %vm18026_vm9  ;;  %v18036_v53 = vmax.f32 %v15108_v17, 0.0 }
 0x503   : > { %18023 = vst [vmem:[#allocation76_spill] sm:$0xff] %v15370_v34  ;;  %v18030_v34 = vmax.f32 %v15114_v30, 0.0  ;;  %vm18033_vm10 = vmmov %vm18007_vm1  ;;  %v6666_v30 = vrot.slane %v18039_v36, 5 }
 0x504   : > { %18025 = vst [vmem:[#allocation77_spill] sm:$0xff] %v15379_v27  ;;  %v6697_v27 = vsel %vm18033_vm10, %v6521_v2, %v6573_v21  ;;  %vm18034_vm1 = vmmov %vm18026_vm9  ;;  %v6665_v52 = vrot.slane %v18036_v53, 5 }
 0x505   : > { %6747 = vst.msk [vmem:[#allocation2 + $0x38] sm:$0xff] %vm18026_vm9, %v6572_v23  ;;  %v6523_v28 = vrot.slane %v18030_v34, 1  ;;  %vm18035_vm3 = vmmov %vm18034_vm1  ;;  %v6677_v34 = vrot.slane %v18040_v13, 5  ;;  %v18091_v13 = vmax.f32 %v15134_v32, 0.0  ;;  %v18101_v32 = vld [vmem:[#allocation15_spill] sm:$0xff] }
 0x506   : > { %6795 = vst.msk [vmem:[#allocation2 + $0x1a0] sm:$0xff] %vm18029_vm13, %v15374_v7  ;;  %vm18037_vm13 = vmmov %vm18028_vm2 }
 0x507   : > { %6791 = vst.msk [vmem:[#allocation2] sm:$0xff] %vm18034_vm1, %v6696_v15  ;;  %v6698_v49 = vsel %vm18037_vm13, %v15203_v9, %v6576_v45  ;;  %vm18038_vm9 = vmmov %vm18034_vm1  ;;  %v6699_v2 = vsel %vm18028_vm2, %v6523_v28, %v6579_v47 }
 0x508   : > { %6743 = vst.msk [vmem:[#allocation2 + $0x18] sm:$0xff] %vm18035_vm3, %v6695_v37  ;;  %vm18041_vm4 = vmmov %vm18034_vm1 }
 0x509   : > { %6746 = vst.msk [vmem:[#allocation2 + $0x30] sm:$0xff] %vm18038_vm9, %v6696_v15  ;;  %vm18042_vm10 = vmmov %vm18028_vm2  ;;  %v18044_v15 = vmax.f32 %v15116_v0, 0.0  ;;  %v18052_v0 = vmax.f32 %v15120_v5, 0.0  ;;  %v18061_v5 = vmax.f32 %v15124_v56, 0.0  ;;  %v18069_v56 = vmax.f32 %v15128_v31, 0.0 }
 0x50a   : > { %6749 = vst.msk [vmem:[#allocation2 + $0x48] sm:$0xff] %vm18041_vm4, %v6697_v27  ;;  %v6711_v21 = vsel %vm18042_vm10, %v15207_v40, %v6663_v58  ;;  %vm18043_vm1 = vmmov %vm18028_vm2  ;;  %vm18050_vm10 = vcmask 1041408   ;;  %v18077_v31 = vmax.f32 %v15132_v12, 0.0  ;;  %v244_v12 = vld [vmem:[%s17352_s3 + $0x10] sm:$0xf] }
 0x50b   : > { %v6712_v17 = vsel %vm18043_vm1, %v15211_v22, %v6664_v59  ;;  %6750 = vst.msk [vmem:[#allocation2 + $0x50] sm:$0xff] %vm18035_vm3, %v6575_v63  ;;  %v6667_v45 = vrot.slane %v18044_v15, 5  ;;  %vm18045_vm13 = vmmov %vm18035_vm3  ;;  %v6727_v40 = vsel %vm18050_vm10, %v6711_v21, 0.0  ;;  %v6668_v9 = vrot.slane %v18052_v0, 5  ;;  %v18099_v15 = vld [vmem:[#allocation70_spill] sm:$0xff] }
 0x50c   : > { %6752 = vst.msk [vmem:[#allocation2 + $0x60] sm:$0xff] %vm18045_vm13, %v6698_v49  ;;  %vm18046_vm9 = vmmov %vm18043_vm1  ;;  %v6669_v58 = vrot.slane %v18061_v5, 5  ;;  %v6670_v63 = vrot.slane %v18069_v56, 5  ;;  %v6671_v53 = vrot.slane %v18077_v31, 5 }
 0x50d   : > { %v6713_v38 = vsel %vm18046_vm9, %v15215_v51, %v6665_v52  ;;  %vm18047_vm11 = vmmov %vm18035_vm3  ;;  %6755 = vst.msk [vmem:[#allocation2 + $0x78] sm:$0xff] %vm18035_vm3, %v6699_v2  ;;  %v18055_v51 = vmax.f32 %v15118_v4, 0.0  ;;  %v18063_v4 = vmax.f32 %v15122_v57, 0.0  ;;  %v18071_v57 = vmax.f32 %v15126_v54, 0.0 }
 0x50e   : > { %6753 = vst.msk [vmem:[#allocation2 + $0x68] sm:$0xff] %vm18047_vm11, %v6578_v11  ;;  %vm18048_vm4 = vmmov %vm18043_vm1  ;;  %v6800_v20 = vld [vmem:[#allocation2] sm:$0xff] }
 0x50f   : > { %v6714_v41 = vsel %vm18048_vm4, %v15219_v3, %v6666_v30  ;;  %vm18049_vm2 = vmmov %vm18043_vm1  ;;  %v6524_v47 = vrot.slane %v18055_v51, 1  ;;  %v6526_v11 = vrot.slane %v18071_v57, 1  ;;  %v7204_v54 = vld [vmem:[#allocation2 + $0x1] sm:$0xff]  ;;  %v15468_v52 = vld [vmem:[#allocation2 + $0x18] sm:$0xff] }
 0x510   : > { %v6725_v27 = vsel %vm18049_vm2, %v6610_v46, %v6677_v34  ;;  %vm18051_vm1 = vmmov %vm18050_vm10  ;;  %v6528_v34 = vrot.slane %v18091_v13, 1  ;;  %v18113_v51 = vld [vmem:[#allocation33_spill] sm:$0xff] }
 0x511   : > { %v6728_v22 = vsel %vm18051_vm1, %v6712_v17, 0.0  ;;  %vm18053_vm13 = vmmov %vm18035_vm3  ;;  %v15435_v28 = vsel %vm18051_vm1, %v6725_v27, 0.0  ;;  %v18128_v57 = vld [vmem:[#allocation41_spill] sm:$0xff] }
 0x512   : > { %6793 = vst.msk [vmem:[#allocation2 + $0x10] sm:$0xff] %vm18053_vm13, %v6728_v22  ;;  %vm18054_vm9 = vmmov %vm18035_vm3 }
 0x513   : > { %11522 = vmatmul.msk.f32.vlgmr.msra.gmra.mxu1 %vm18054_vm9, %v6800_v20  ;;  %vm18056_vm11 = vmmov %vm18049_vm2 }
 0x514   : > { %v6715_v3 = vsel %vm18056_vm11, %v15225_v48, %v6667_v45  ;;  %vm18057_vm4 = vmmov %vm18051_vm1  ;;  %v6525_v48 = vrot.slane %v18063_v4, 1  ;;  %v18102_v45 = vmax.f32 %v18101_v32, 0.0 }
 0x515   : > { %v6729_v18 = vsel %vm18057_vm4, %v6713_v38, 0.0  ;;  %vm18058_vm2 = vmmov %vm18035_vm3 }
 0x516   : > { %6745 = vst.msk [vmem:[#allocation2 + $0x28] sm:$0xff] %vm18058_vm2, %v6727_v40  ;;  %vm18059_vm10 = vmmov %vm18051_vm1  ;;  %v6529_v38 = vrot.slane %v18102_v45, 1 }
 0x517   : > { %v6730_v59 = vsel %vm18059_vm10, %v6714_v41, 0.0  ;;  %vm18060_vm3 = vmmov %vm18058_vm2 }
 0x518   : > { %6748 = vst.msk [vmem:[#allocation2 + $0x40] sm:$0xff] %vm18060_vm3, %v6728_v22  ;;  %vm18062_vm13 = vmmov %vm18058_vm2  ;;  %v18108_v22 = vld [vmem:[#allocation13_spill] sm:$0xff] }
 0x519   : > { %6796 = vst.msk [vmem:[#allocation2 + $0x1a8] sm:$0xff] %vm18062_vm13, %v15435_v28  ;;  %vm18064_vm9 = vmmov %vm18056_vm11  ;;  %v7205_v27 = vld [vmem:[#allocation2 + $0x9] sm:$0xff]  ;;  %v18109_v20 = vmax.f32 %v18108_v22, 0.0 }
 0x51a   : > { %v6716_v39 = vsel %vm18064_vm9, %v15233_v60, %v6668_v9  ;;  %vm18065_vm11 = vmmov %vm18051_vm1  ;;  %v7609_v40 = vld [vmem:[#allocation2 + $0xa] sm:$0xff]  ;;  %v18110_v9 = vld [vmem:[#allocation71_spill] sm:$0xff] }
 0x51b   : > { %v6731_v46 = vsel %vm18065_vm11, %v6715_v3, 0.0  ;;  %vm18066_vm4 = vmmov %vm18058_vm2  ;;  %v6674_v0 = vrot.slane %v18109_v20, 5  ;;  %v8015_v22 = vld [vmem:[#allocation2 + $0x30] sm:$0xff] }
 0x51c   : > { %6751 = vst.msk [vmem:[#allocation2 + $0x58] sm:$0xff] %vm18066_vm4, %v6729_v18  ;;  %vm18067_vm2 = vmmov %vm18064_vm9 }
 0x51d   : > { %v6700_v23 = vsel %vm18067_vm2, %v6524_v47, %v15229_v25  ;;  %vm18068_vm10 = vmmov %vm18060_vm3  ;;  %v18114_v47 = vmax.f32 %v18113_v51, 0.0 }
 0x51e   : > { %6754 = vst.msk [vmem:[#allocation2 + $0x70] sm:$0xff] %vm18068_vm10, %v6730_v59  ;;  %vm18070_vm1 = vmmov %vm18060_vm3  ;;  %v6802_v59 = vld [vmem:[#allocation2 + $0x10] sm:$0xff] }
 0x51f   : > { %6756 = vst.msk [vmem:[#allocation2 + $0x80] sm:$0xff] %vm18070_vm1, %v15323_v26  ;;  %vm18072_vm3 = vmmov %vm18067_vm2  ;;  %v7608_v26 = vld [vmem:[#allocation2 + $0x2] sm:$0xff]  ;;  %v6530_v3 = vrot.slane %v18114_v47, 1  ;;  %v7210_v47 = vld [vmem:[#allocation2 + $0x31] sm:$0xff] }
 0x520   : > { %v6717_v60 = vsel %vm18072_vm3, %v15241_v6, %v6669_v58  ;;  %vm18073_vm13 = vmmov %vm18065_vm11  ;;  %v18079_v6 = vmax.f32 %v15130_v42, 0.0  ;;  %v6801_v42 = vld [vmem:[#allocation2 + $0x8] sm:$0xff]  ;;  %v18119_v58 = vld [vmem:[#allocation19_spill] sm:$0xff] }
 0x521   : > { %v6732_v37 = vsel %vm18073_vm13, %v6716_v39, 0.0  ;;  %vm18074_vm9 = vmmov %vm18070_vm1  ;;  %v18120_v4 = vmax.f32 %v18119_v58, 0.0  ;;  %v18121_v39 = vld [vmem:[#allocation72_spill] sm:$0xff]  ;;  %v8017_v51 = vld [vmem:[#allocation2 + $0x40] sm:$0xff] }
 0x522   : > { %6757 = vst.msk [vmem:[#allocation2 + $0x88] sm:$0xff] %vm18074_vm9, %v6731_v46  ;;  %vm18075_vm11 = vmmov %vm18067_vm2  ;;  %v6527_v49 = vrot.slane %v18079_v6, 1  ;;  %v7206_v6 = vld [vmem:[#allocation2 + $0x11] sm:$0xff]  ;;  %v7212_v58 = vld [vmem:[#allocation2 + $0x41] sm:$0xff] }
 0x523   : > { %v6701_v25 = vsel %vm18075_vm11, %v6525_v48, %v15237_v1  ;;  %vm18076_vm4 = vmmov %vm18070_vm1  ;;  %v6675_v48 = vrot.slane %v18120_v4, 5  ;;  %v7616_v4 = vld [vmem:[#allocation2 + $0x42] sm:$0xff] }
 0x524   : > { %6758 = vst.msk [vmem:[#allocation2 + $0x90] sm:$0xff] %vm18076_vm4, %v6700_v23  ;;  %vm18078_vm2 = vmmov %vm18070_vm1 }
 0x525   : > { %6759 = vst.msk [vmem:[#allocation2 + $0x98] sm:$0xff] %vm18078_vm2, %v15328_v14  ;;  %vm18080_vm10 = vmmov %vm18072_vm3  ;;  %11669 = vmatmul.msk.f32.vlgmr.msrb.gmra.mxu0 %vm18078_vm2, %v15468_v52 }
 0x526   : > { %v6718_v36 = vsel %vm18080_vm10, %v15249_v50, %v6670_v63  ;;  %vm18081_vm1 = vmmov %vm18073_vm13  ;;  %v18088_v50 = vmax.f32 %v15136_v35, 0.0  ;;  %v18097_v35 = vld [vmem:[#allocation27_spill] sm:$0xff] }
 0x527   : > { %v6733_v1 = vsel %vm18081_vm1, %v6717_v60, 0.0  ;;  %vm18082_vm3 = vmmov %vm18078_vm2  ;;  %v18098_v17 = vmax.f32 %v18097_v35, 0.0 }
 0x528   : > { %6760 = vst.msk [vmem:[#allocation2 + $0xa0] sm:$0xff] %vm18082_vm3, %v6732_v37  ;;  %vm18083_vm13 = vmmov %vm18078_vm2  ;;  %v6672_v30 = vrot.slane %v18088_v50, 5  ;;  %v18130_v37 = vld [vmem:[#allocation73_spill] sm:$0xff] }
 0x529   : > { %11571 = vmatmul.msk.f32.vlgmr.msrb.gmra.mxu2 %vm18083_vm13, %v7204_v54  ;;  %vm18084_vm9 = vmmov %vm18078_vm2  ;;  %v18134_v54 = vld [vmem:[#allocation66_spill] sm:$0xff] }
 0x52a   : > { %11620 = vmatmul.msk.f32.vlgmr.msrb.gmra.mxu3 %vm18084_vm9, %v7608_v26  ;;  %vm18085_vm11 = vmmov %vm18080_vm10  ;;  %vm18087_vm10 = vcmask 1043456   ;;  %vm18093_vm9 = vcmask 1041408  }
 0x52b   : > { %v6702_v14 = vsel %vm18085_vm11, %v6526_v11, %v15245_v8  ;;  %vm18086_vm4 = vmmov %vm18078_vm2  ;;  %11717 = vmatpush.msk.msrb.mxu1 %vm18087_vm10, %v244_v12  ;;  %v6734_v2 = vsel %vm18093_vm9, %v6718_v36, 0.0  ;;  %v18129_v11 = vmax.f32 %v18128_v57, 0.0  ;;  %v18143_v12 = vld [vmem:[#allocation74_spill] sm:$0xff] }
 0x52c   : > { %6761 = vst.msk [vmem:[#allocation2 + $0xa8] sm:$0xff] %vm18086_vm4, %v6701_v25  ;;  %vm18089_vm1 = vmmov %vm18078_vm2  ;;  %v18132_v25 = vld [vmem:[#allocation38_spill] sm:$0xff] }
 0x52d   : > { %6762 = vst.msk [vmem:[#allocation2 + $0xb0] sm:$0xff] %vm18089_vm1, %v15333_v44  ;;  %vm18090_vm3 = vmmov %vm18089_vm1  ;;  %v6673_v44 = vrot.slane %v18098_v17, 5  ;;  %v6676_v60 = vrot.slane %v18129_v11, 5  ;;  %v18133_v31 = vmax.f32 %v18132_v25, 0.0  ;;  %v7619_v57 = vld [vmem:[#allocation2 + $0x5a] sm:$0xff]  ;;  %v8023_v11 = vld [vmem:[#allocation2 + $0x70] sm:$0xff] }
 0x52e   : > { %11523 = vmatmul.msk.f32.gmra.mxu1 %vm18090_vm3, %v6801_v42  ;;  %vm18092_vm13 = vmmov %vm18085_vm11  ;;  %v8024_v25 = vld [vmem:[#allocation2 + $0x78] sm:$0xff] }
 0x52f   : > { %v6719_v8 = vsel %vm18092_vm13, %v15257_v16, %v6671_v53  ;;  %vm18094_vm11 = vmmov %vm18089_vm1  ;;  %v6532_v53 = vrot.slane %v18133_v31, 1  ;;  %v7217_v31 = vld [vmem:[#allocation2 + $0x69] sm:$0xff] }
 0x530   : > { %6763 = vst.msk [vmem:[#allocation2 + $0xb8] sm:$0xff] %vm18094_vm11, %v6733_v1  ;;  %vm18095_vm4 = vmmov %vm18092_vm13  ;;  %v8014_v1 = vld [vmem:[#allocation2 + $0x28] sm:$0xff] }
 0x531   : > { %v6703_v21 = vsel %vm18095_vm4, %v6527_v49, %v15253_v19  ;;  %vm18096_vm2 = vmmov %vm18089_vm1  ;;  %v18138_v49 = vld [vmem:[#allocation65_spill] sm:$0xff] }
 0x532   : > { %6764 = vst.msk [vmem:[#allocation2 + $0xc0] sm:$0xff] %vm18096_vm2, %v6702_v14  ;;  %vm18100_vm10 = vmmov %vm18089_vm1  ;;  %11572 = vmatmul.msk.f32.gmra.mxu2 %vm18096_vm2, %v7205_v27  ;;  %v18146_v14 = vld [vmem:[#allocation43_spill] sm:$0xff] }
 0x533   : > { %6765 = vst.msk [vmem:[#allocation2 + $0xc8] sm:$0xff] %vm18100_vm10, %v18099_v15  ;;  %vm18103_vm1 = vmmov %vm18095_vm4  ;;  %v18147_v42 = vmax.f32 %v18146_v14, 0.0  ;;  %v18160_v15 = vld [vmem:[#allocation6_spill] sm:$0xff] }
 0x534   : > { %v6720_v16 = vsel %vm18103_vm1, %v15265_v61, %v6672_v30  ;;  %vm18104_vm3 = vmmov %vm18093_vm9  ;;  %v8013_v61 = vld [vmem:[#allocation2 + $0x20] sm:$0xff]  ;;  %v6722_v56 = vsel %vm18103_vm1, %v15281_v29, %v6674_v0  ;;  %v18148_v30 = vld [vmem:[#allocation68_spill] sm:$0xff]  ;;  %v18161_v32 = vmax.f32 %v18160_v15, 0.0 }
 0x535   : > { %v6735_v41 = vsel %vm18104_vm3, %v6719_v8, 0.0  ;;  %vm18105_vm13 = vmmov %vm18096_vm2  ;;  %v6736_v18 = vsel %vm18104_vm3, %v6720_v16, 0.0  ;;  %v6533_v50 = vrot.slane %v18147_v42, 1  ;;  %v18153_v8 = vld [vmem:[#allocation67_spill] sm:$0xff]  ;;  %v18164_v16 = vld [vmem:[#allocation69_spill] sm:$0xff] }
 0x536   : > { %6766 = vst.msk [vmem:[#allocation2 + $0xd0] sm:$0xff] %vm18105_vm13, %v6734_v2  ;;  %vm18106_vm9 = vmmov %vm18103_vm1  ;;  %11524 = vmatmul.msk.f32.gmra.mxu1 %vm18096_vm2, %v6802_v59  ;;  %v6534_v45 = vrot.slane %v18161_v32, 1  ;;  %v7611_v27 = vld [vmem:[#allocation2 + $0x1a] sm:$0xff]  ;;  %v18180_v0 = vld [vmem:[#allocation77_spill] sm:$0xff] }
 0x537   : > { %v6704_v19 = vsel %vm18106_vm9, %v6528_v34, %v15261_v33  ;;  %vm18107_vm11 = vmmov %vm18096_vm2  ;;  %v6721_v33 = vsel %vm18103_vm1, %v15273_v43, %v6673_v44  ;;  %v18123_v43 = vld [vmem:[#allocation16_spill] sm:$0xff]  ;;  %v18158_v44 = vld [vmem:[#allocation75_spill] sm:$0xff] }
 0x538   : > { %6767 = vst.msk [vmem:[#allocation2 + $0xd8] sm:$0xff] %vm18107_vm11, %v6703_v21  ;;  %vm18111_vm4 = vmmov %vm18096_vm2  ;;  %v18124_v46 = vmax.f32 %v18123_v43, 0.0  ;;  %v6737_v63 = vsel %vm18104_vm3, %v6721_v33, 0.0  ;;  %v18156_v21 = vld [vmem:[#allocation64_spill] sm:$0xff]  ;;  %v7615_v59 = vld [vmem:[#allocation2 + $0x3a] sm:$0xff] }
 0x539   : > { %6768 = vst.msk [vmem:[#allocation2 + $0xe0] sm:$0xff] %vm18111_vm4, %v18110_v9  ;;  %vm18112_vm10 = vmmov %vm18096_vm2  ;;  %v18157_v35 = vmax.f32 %v18156_v21, 0.0  ;;  %v7612_v9 = vld [vmem:[#allocation2 + $0x22] sm:$0xff]  ;;  %v7617_v43 = vld [vmem:[#allocation2 + $0x4a] sm:$0xff] }
 0x53a   : > { %11621 = vmatmul.msk.f32.gmra.mxu3 %vm18112_vm10, %v7609_v40  ;;  %vm18115_vm13 = vmmov %vm18096_vm2  ;;  %v6531_v23 = vrot.slane %v18124_v46, 1  ;;  %v8018_v33 = vld [vmem:[#allocation2 + $0x48] sm:$0xff]  ;;  %v8021_v46 = vld [vmem:[#allocation2 + $0x60] sm:$0xff] }
 0x53b   : > { %6769 = vst.msk [vmem:[#allocation2 + $0xe8] sm:$0xff] %vm18115_vm13, %v6735_v41  ;;  %vm18116_vm9 = vmmov %vm18096_vm2  ;;  %v6678_v17 = vrot.slane %v18157_v35, 5  ;;  %v18166_v41 = vld [vmem:[#allocation76_spill] sm:$0xff] }
 0x53c   : > { %11670 = vmatmul.msk.f32.gmra.mxu0 %vm18116_vm9, %v8013_v61  ;;  %vm18117_vm11 = vmmov %vm18103_vm1  ;;  %v7220_v42 = vld [vmem:[#allocation2 + $0x81] sm:$0xff]  ;;  %v7625_v15 = vld [vmem:[#allocation2 + $0x8a] sm:$0xff] }
 0x53d   : > { %v6705_v5 = vsel %vm18117_vm11, %v6529_v38, %v15269_v62  ;;  %vm18118_vm4 = vmmov %vm18096_vm2 }
 0x53e   : > { %6770 = vst.msk [vmem:[#allocation2 + $0xf0] sm:$0xff] %vm18118_vm4, %v6704_v19  ;;  %vm18122_vm10 = vmmov %vm18096_vm2  ;;  %v7207_v19 = vld [vmem:[#allocation2 + $0x19] sm:$0xff] }
 0x53f   : > { %6771 = vst.msk [vmem:[#allocation2 + $0xf8] sm:$0xff] %vm18122_vm10, %v18121_v39  ;;  %vm18125_vm13 = vmmov %vm18096_vm2  ;;  %v7213_v39 = vld [vmem:[#allocation2 + $0x49] sm:$0xff] }
 0x540   : > { %6772 = vst.msk [vmem:[#allocation2 + $0x100] sm:$0xff] %vm18125_vm13, %v6736_v18  ;;  %vm18126_vm9 = vmmov %vm18103_vm1  ;;  %v7211_v18 = vld [vmem:[#allocation2 + $0x39] sm:$0xff] }
 0x541   : > { %v6706_v62 = vsel %vm18126_vm9, %v6530_v3, %v15277_v10  ;;  %vm18127_vm11 = vmmov %vm18096_vm2  ;;  %v7610_v10 = vld [vmem:[#allocation2 + $0x12] sm:$0xff] }
 0x542   : > { %6773 = vst.msk [vmem:[#allocation2 + $0x108] sm:$0xff] %vm18127_vm11, %v6705_v5  ;;  %vm18131_vm4 = vmmov %vm18096_vm2  ;;  %v7614_v3 = vld [vmem:[#allocation2 + $0x32] sm:$0xff] }
 0x543   : > { %6774 = vst.msk [vmem:[#allocation2 + $0x110] sm:$0xff] %vm18131_vm4, %v18130_v37  ;;  %vm18135_vm2 = vmmov %vm18103_vm1  ;;  %v8019_v5 = vld [vmem:[#allocation2 + $0x50] sm:$0xff]  ;;  %v7620_v37 = vld [vmem:[#allocation2 + $0x62] sm:$0xff] }
 0x544   : > { %v6723_v29 = vsel %vm18135_vm2, %v18134_v54, %v6675_v48  ;;  %vm18136_vm10 = vmmov %vm18104_vm3  ;;  %v8020_v48 = vld [vmem:[#allocation2 + $0x58] sm:$0xff]  ;;  %v8025_v54 = vld [vmem:[#allocation2 + $0x80] sm:$0xff] }
 0x545   : > { %v6738_v26 = vsel %vm18136_vm10, %v6722_v56, 0.0  ;;  %vm18137_vm1 = vmmov %vm18131_vm4  ;;  %v7618_v56 = vld [vmem:[#allocation2 + $0x52] sm:$0xff] }
 0x546   : > { %6775 = vst.msk [vmem:[#allocation2 + $0x118] sm:$0xff] %vm18137_vm1, %v6737_v63  ;;  %vm18139_vm3 = vmmov %vm18135_vm2  ;;  %v8022_v63 = vld [vmem:[#allocation2 + $0x68] sm:$0xff] }
 0x547   : > { %v6707_v36 = vsel %vm18139_vm3, %v6531_v23, %v18138_v49  ;;  %vm18140_vm13 = vmmov %vm18137_vm1  ;;  %v7214_v23 = vld [vmem:[#allocation2 + $0x51] sm:$0xff]  ;;  %v7219_v49 = vld [vmem:[#allocation2 + $0x79] sm:$0xff] }
 0x548   : > { %6776 = vst.msk [vmem:[#allocation2 + $0x120] sm:$0xff] %vm18140_vm13, %v6706_v62  ;;  %vm18141_vm9 = vmmov %vm18137_vm1  ;;  %v7215_v62 = vld [vmem:[#allocation2 + $0x59] sm:$0xff] }
 0x549   : > { %11573 = vmatmul.msk.f32.gmra.mxu2 %vm18141_vm9, %v7206_v6  ;;  %vm18142_vm11 = vmmov %vm18137_vm1  ;;  %v8026_v6 = vld [vmem:[#allocation2 + $0x88] sm:$0xff] }
 0x54a   : > { %11622 = vmatmul.msk.f32.gmra.mxu3 %vm18142_vm11, %v7610_v10  ;;  %vm18144_vm4 = vmmov %vm18137_vm1 }
 0x54b   : > { %6777 = vst.msk [vmem:[#allocation2 + $0x128] sm:$0xff] %vm18144_vm4, %v18143_v12  ;;  %vm18145_vm2 = vmmov %vm18137_vm1  ;;  %vm18150_vm1 = vcmask 1041408   ;;  %v15657_v12 = vld [vmem:[%s17353_s4] ss:$0 sm:$0xff] }
 0x54c   : > { %11671 = vmatmul.msk.f32.gmra.mxu0 %vm18145_vm2, %v8014_v1  ;;  %vm18149_vm10 = vmmov %vm18139_vm3  ;;  %v6739_v34 = vsel %vm18150_vm1, %v6723_v29, 0.0  ;;  %v7218_v29 = vld [vmem:[#allocation2 + $0x71] sm:$0xff] }
 0x54d   : > { %v6724_v13 = vsel %vm18149_vm10, %v18148_v30, %v6676_v60  ;;  %vm18151_vm3 = vmmov %vm18145_vm2  ;;  %v7216_v60 = vld [vmem:[#allocation2 + $0x61] sm:$0xff] }
 0x54e   : > { %6778 = vst.msk [vmem:[#allocation2 + $0x130] sm:$0xff] %vm18151_vm3, %v6738_v26  ;;  %vm18152_vm13 = vmmov %vm18145_vm2  ;;  %v7622_v26 = vld [vmem:[#allocation2 + $0x72] sm:$0xff] }
 0x54f   : > { %11525 = vmatmul.msk.f32.gmra.mxu1 %vm18152_vm13, %v15468_v52  ;;  %vm18154_vm9 = vmmov %vm18149_vm10 }
 0x550   : > { %v6708_v2 = vsel %vm18154_vm9, %v6532_v53, %v18153_v8  ;;  %vm18155_vm11 = vmmov %vm18145_vm2  ;;  %v7621_v53 = vld [vmem:[#allocation2 + $0x6a] sm:$0xff] }
 0x551   : > { %6779 = vst.msk [vmem:[#allocation2 + $0x138] sm:$0xff] %vm18155_vm11, %v6707_v36  ;;  %vm18159_vm4 = vmmov %vm18145_vm2  ;;  %v7623_v36 = vld [vmem:[#allocation2 + $0x7a] sm:$0xff] }
 0x552   : > { %6780 = vst.msk [vmem:[#allocation2 + $0x140] sm:$0xff] %vm18159_vm4, %v18158_v44  ;;  %vm18162_vm2 = vmmov %vm18150_vm1  ;;  %v7221_v44 = vld [vmem:[#allocation2 + $0x89] sm:$0xff] }
 0x553   : > { %v6740_v38 = vsel %vm18162_vm2, %v6724_v13, 0.0  ;;  %vm18163_vm10 = vmmov %vm18151_vm3  ;;  %6782 = vst.msk [vmem:[#allocation2 + $0x150] sm:$0xff] %vm18151_vm3, %v6708_v2  ;;  %v8028_v13 = vld [vmem:[#allocation2 + $0x98] sm:$0xff] }
 0x554   : > { %6781 = vst.msk [vmem:[#allocation2 + $0x148] sm:$0xff] %vm18163_vm10, %v6739_v34  ;;  %vm18165_vm1 = vmmov %vm18154_vm9 }
 0x555   : > { %v6709_v52 = vsel %vm18165_vm1, %v6533_v50, %v18164_v16  ;;  %vm18167_vm13 = vmmov %vm18151_vm3  ;;  %v7624_v50 = vld [vmem:[#allocation2 + $0x82] sm:$0xff] }
 0x556   : > { %6783 = vst.msk [vmem:[#allocation2 + $0x158] sm:$0xff] %vm18167_vm13, %v18166_v41  ;;  %vm18168_vm9 = vmmov %vm18165_vm1 }
 0x557   : > { %v6726_v40 = vsel %vm18168_vm9, %v15311_v24, %v6678_v17  ;;  %vm18169_vm11 = vmmov %vm18151_vm3  ;;  %vm18177_vm9 = vcmask 1041408  }
 0x558   : > { %6784 = vst.msk [vmem:[#allocation2 + $0x160] sm:$0xff] %vm18169_vm11, %v6740_v38  ;;  %vm18170_vm4 = vmmov %vm18151_vm3  ;;  %v6742_v24 = vsel %vm18177_vm9, %v6726_v40, 0.0  ;;  %v7222_v40 = vld [vmem:[#allocation2 + $0x91] sm:$0xff] }
 0x559   : > { %11574 = vmatmul.msk.f32.gmra.mxu2 %vm18170_vm4, %v7207_v19  ;;  %vm18171_vm2 = vmmov %vm18151_vm3 }
 0x55a   : > { %11623 = vmatmul.msk.f32.gmra.mxu3 %vm18171_vm2, %v7611_v27  ;;  %vm18172_vm10 = vmmov %vm18165_vm1 }
 0x55b   : > { %v6710_v20 = vsel %vm18172_vm10, %v6534_v45, %v15307_v55  ;;  %vm18173_vm1 = vmmov %vm18171_vm2  ;;  %v7208_v55 = vld [vmem:[#allocation2 + $0x21] sm:$0xff] }
 0x55c   : > { %6785 = vst.msk [vmem:[#allocation2 + $0x168] sm:$0xff] %vm18173_vm1, %v6709_v52  ;;  %vm18174_vm3 = vmmov %vm18173_vm1  ;;  %v8029_v45 = vld [vmem:[#allocation2 + $0xa0] sm:$0xff] }
 0x55d   : > { %11672 = vmatmul.msk.f32.gmra.mxu0 %vm18174_vm3, %v8015_v22  ;;  %vm18175_vm13 = vmmov %vm18173_vm1 }
 0x55e   : > { %6786 = vst.msk [vmem:[#allocation2 + $0x170] sm:$0xff] %vm18175_vm13, %v15374_v7  ;;  %vm18176_vm0 = vmmov %vm18173_vm1  ;;  %v8016_v7 = vld [vmem:[#allocation2 + $0x38] sm:$0xff] }
 0x55f   : > { %11526 = vmatmul.msk.f32.gmra.mxu1 %vm18176_vm0, %v8013_v61  ;;  %vm18178_vm11 = vmmov %vm18176_vm0  ;;  %v7613_v61 = vld [vmem:[#allocation2 + $0x2a] sm:$0xff] }
 0x560   : > { %6787 = vst.msk [vmem:[#allocation2 + $0x178] sm:$0xff] %vm18178_vm11, %v15435_v28  ;;  %vm18179_vm4 = vmmov %vm18176_vm0  ;;  %v7209_v28 = vld [vmem:[#allocation2 + $0x29] sm:$0xff] }
 0x561   : > { %6788 = vst.msk [vmem:[#allocation2 + $0x180] sm:$0xff] %vm18179_vm4, %v6710_v20  ;;  %vm18181_vm2 = vmmov %vm18176_vm0 }
 0x562   : > { %6789 = vst.msk [vmem:[#allocation2 + $0x188] sm:$0xff] %vm18181_vm2, %v18180_v0  ;;  %vm18182_vm10 = vmmov %vm18176_vm0 }
 0x563   : > { %6790 = vst.msk [vmem:[#allocation2 + $0x190] sm:$0xff] %vm18182_vm10, %v6742_v24  ;;  %vm18183_vm1 = vmmov %vm18176_vm0  ;;  %v8030_v24 = vld [vmem:[#allocation2 + $0xa8] sm:$0xff] }
 0x564   : > { %6794 = vst.msk [vmem:[#allocation2 + $0x198] sm:$0xff] %vm18183_vm1, %v6709_v52  ;;  %vm18184_vm3 = vmmov %vm18176_vm0 }
 0x565   : > { %11575 = vmatmul.msk.f32.gmra.mxu2 %vm18184_vm3, %v7208_v55  ;;  %vm18185_vm13 = vmmov %vm18176_vm0  ;;  %11673 = vmatmul.msk.f32.gmra.mxu0 %vm18176_vm0, %v8016_v7 }
 0x566   : > { %11624 = vmatmul.msk.f32.gmra.mxu3 %vm18185_vm13, %v7612_v9  ;;  %vm18186_vm9 = vmmov %vm18176_vm0 }
 0x567   : > { %11527 = vmatmul.msk.f32.gmra.mxu1 %vm18186_vm9, %v8014_v1  ;;  %vm18187_vm11 = vmmov %vm18176_vm0  ;;  %v8027_v1 = vld [vmem:[#allocation2 + $0x90] sm:$0xff] }
 0x568   : > { %vm18188_vm4 = vmmov %vm18176_vm0 }
 0x569   : > { %vm18189_vm2 = vmmov %vm18176_vm0 }
 0x56a   : > { %vm18190_vm10 = vmmov %vm18176_vm0 }
 0x56b   : > { %vm18191_vm1 = vmmov %vm18176_vm0 }
 0x56c   : > { %vm18192_vm3 = vmmov %vm18176_vm0 }
 0x56d   : > { %11576 = vmatmul.msk.f32.gmra.mxu2 %vm18187_vm11, %v7209_v28  ;;  %11674 = vmatmul.msk.f32.gmra.mxu0 %vm18189_vm2, %v8017_v51  ;;  %vm18193_vm13 = vmmov %vm18176_vm0 }
 0x56e   : > { %11625 = vmatmul.msk.f32.gmra.mxu3 %vm18188_vm4, %v7613_v61  ;;  %vm18194_vm9 = vmmov %vm18176_vm0 }
 0x56f   : > { %11528 = vmatmul.msk.f32.gmra.mxu1 %vm18190_vm10, %v8015_v22  ;;  %vm18195_vm11 = vmmov %vm18176_vm0  ;;  %v7626_v22 = vld [vmem:[#allocation2 + $0x92] sm:$0xff] }
 0x570   : > { %vm18196_vm4 = vmmov %vm18176_vm0 }
 0x571   : > { %vm18197_vm2 = vmmov %vm18176_vm0 }
 0x572   : > { %vm18198_vm10 = vmmov %vm18176_vm0 }
 0x575   : > { %11577 = vmatmul.msk.f32.gmra.mxu2 %vm18191_vm1, %v7210_v47  ;;  %11675 = vmatmul.msk.f32.gmra.mxu0 %vm18193_vm13, %v8018_v33  ;;  %vm18199_vm1 = vmmov %vm18176_vm0  ;;  %v7627_v47 = vld [vmem:[#allocation2 + $0x9a] sm:$0xff] }
 0x576   : > { %11626 = vmatmul.msk.f32.gmra.mxu3 %vm18192_vm3, %v7614_v3  ;;  %vm18200_vm3 = vmmov %vm18176_vm0 }
 0x577   : > { %11529 = vmatmul.msk.f32.gmra.mxu1 %vm18176_vm0, %v8016_v7  ;;  %vm18201_vm13 = vmmov %vm18176_vm0 }
 0x57d   : > { %11578 = vmatmul.msk.f32.gmra.mxu2 %vm18194_vm9, %v7211_v18  ;;  %11676 = vmatmul.msk.f32.gmra.mxu0 %vm18196_vm4, %v8019_v5  ;;  %vm18202_vm9 = vmmov %vm18176_vm0 }
 0x57e   : > { %11627 = vmatmul.msk.f32.gmra.mxu3 %vm18195_vm11, %v7615_v59  ;;  %vm18203_vm11 = vmmov %vm18176_vm0 }
 0x57f   : > { %11530 = vmatmul.msk.f32.gmra.mxu1 %vm18197_vm2, %v8017_v51  ;;  %vm18204_vm4 = vmmov %vm18176_vm0  ;;  %v7223_v51 = vld [vmem:[#allocation2 + $0x99] sm:$0xff] }
 0x580   : > { %vm18205_vm2 = vmmov %vm18176_vm0 }
 0x585   : > { %11579 = vmatmul.msk.f32.gmra.mxu2 %vm18198_vm10, %v7212_v58  ;;  %11677 = vmatmul.msk.f32.gmra.mxu0 %vm18200_vm3, %v8020_v48  ;;  %vm18206_vm10 = vmmov %vm18176_vm0 }
 0x586   : > { %11628 = vmatmul.msk.f32.gmra.mxu3 %vm18199_vm1, %v7616_v4  ;;  %vm18207_vm1 = vmmov %vm18176_vm0 }
 0x587   : > { %11531 = vmatmul.msk.f32.gmra.mxu1 %vm18201_vm13, %v8018_v33  ;;  %vm18208_vm3 = vmmov %vm18176_vm0  ;;  %v8031_v33 = vld [vmem:[#allocation2 + $0xb0] sm:$0xff] }
 0x588   : > { %vm18209_vm13 = vmmov %vm18176_vm0 }
 0x58d   : > { %11580 = vmatmul.msk.f32.gmra.mxu2 %vm18176_vm0, %v7213_v39  ;;  %11678 = vmatmul.msk.f32.gmra.mxu0 %vm18203_vm11, %v8021_v46  ;;  %vm18211_vm11 = vmmov %vm18176_vm0  ;;  %v7224_v39 = vld [vmem:[#allocation2 + $0xa1] sm:$0xff] }
 0x58e   : > { %11629 = vmatmul.msk.f32.gmra.mxu3 %vm18202_vm9, %v7617_v43  ;;  %vm18210_vm9 = vmmov %vm18176_vm0  ;;  %v7628_v43 = vld [vmem:[#allocation2 + $0xa2] sm:$0xff] }
 0x58f   : > { %11532 = vmatmul.msk.f32.gmra.mxu1 %vm18204_vm4, %v8019_v5  ;;  %vm18212_vm4 = vmmov %vm18176_vm0 }
 0x590   : > { %v7012_v10 = vpop.f32.mrf.mxu1 }
 0x591   : > { %v7156_v34 = vadd.f32 %v15657_v12, %v7012_v10 }
 0x595   : > { %11581 = vmatmul.msk.f32.gmra.mxu2 %vm18205_vm2, %v7214_v23  ;;  %11679 = vmatmul.msk.f32.gmra.mxu0 %vm18207_vm1, %v8022_v63  ;;  %vm18213_vm2 = vmmov %vm18176_vm0  ;;  %v8032_v23 = vld [vmem:[#allocation2 + $0xb8] sm:$0xff] }
 0x596   : > { %11630 = vmatmul.msk.f32.gmra.mxu3 %vm18206_vm10, %v7618_v56  ;;  %vm18214_vm10 = vmmov %vm18176_vm0 }
 0x597   : > { %11533 = vmatmul.msk.f32.gmra.mxu1 %vm18208_vm3, %v8020_v48  ;;  %vm18215_vm1 = vmmov %vm18176_vm0 }
 0x598   : > { %vm18216_vm3 = vmmov %vm18176_vm0 }
 0x59d   : > { %11582 = vmatmul.msk.f32.gmra.mxu2 %vm18209_vm13, %v7215_v62  ;;  %11680 = vmatmul.msk.f32.gmra.mxu0 %vm18210_vm9, %v8023_v11  ;;  %vm18217_vm13 = vmmov %vm18176_vm0 }
 0x59e   : > { %11631 = vmatmul.msk.f32.gmra.mxu3 %vm18176_vm0, %v7619_v57  ;;  %vm18218_vm9 = vmmov %vm18176_vm0 }
 0x59f   : > { %11534 = vmatmul.msk.f32.gmra.mxu1 %vm18211_vm11, %v8021_v46  ;;  %vm18219_vm11 = vmmov %vm18176_vm0 }
 0x5a2   : > { %v15659_v14 = vpop.f32.mrf.mxu0 }
 0x5a5   : > { %11583 = vmatmul.msk.f32.gmra.mxu2 %vm18212_vm4, %v7216_v60  ;;  %11681 = vmatmul.msk.f32.gmra.mxu0 %vm18214_vm10, %v8024_v25  ;;  %vm18220_vm4 = vmmov %vm18176_vm0 }
 0x5a6   : > { %11632 = vmatmul.msk.f32.gmra.mxu3 %vm18213_vm2, %v7620_v37  ;;  %vm18221_vm2 = vmmov %vm18176_vm0  ;;  %v7225_v37 = vld [vmem:[#allocation2 + $0xa9] sm:$0xff] }
 0x5a7   : > { %11535 = vmatmul.msk.f32.gmra.mxu1 %vm18215_vm1, %v8022_v63  ;;  %vm18222_vm10 = vmmov %vm18176_vm0 }
 0x5a8   : > { %vm18223_vm1 = vmmov %vm18176_vm0 }
 0x5ab   : > { %v7015_v30 = vpop.f32.mrf.mxu1 }
 0x5ac   : > { %v7416_v8 = vpop.f32.mrf.mxu2  ;;  %v7157_v38 = vadd.f32 %v15657_v12, %v7015_v30  ;;  %v8034_v30 = vld [vmem:[#allocation2 + $0xc8] sm:$0xff] }
 0x5ad   : > { %11584 = vmatmul.msk.f32.gmra.mxu2 %vm18216_vm3, %v7217_v31  ;;  %11682 = vmatmul.msk.f32.gmra.mxu0 %vm18176_vm0, %v8025_v54  ;;  %vm18224_vm3 = vmmov %vm18176_vm0  ;;  %v7820_v2 = vpop.f32.mrf.mxu3  ;;  %v7560_v21 = vadd.f32 %v7416_v8, %v7156_v34 }
 0x5ae   : > { %11633 = vmatmul.msk.f32.gmra.mxu3 %vm18217_vm13, %v7621_v53  ;;  %vm18225_vm13 = vmmov %vm18176_vm0  ;;  %v8033_v53 = vld [vmem:[#allocation2 + $0xc0] sm:$0xff] }
 0x5af   : > { %11536 = vmatmul.msk.f32.gmra.mxu1 %vm18218_vm9, %v8023_v11  ;;  %vm18226_vm9 = vmmov %vm18176_vm0  ;;  %v15666_v35 = vadd.f32 %v7820_v2, %v7560_v21 }
 0x5b3   : > { %v7018_v32 = vpop.f32.mrf.mxu1 }
 0x5b4   : > { %v7158_v0 = vadd.f32 %v15657_v12, %v7018_v32 }
 0x5b5   : > { %11585 = vmatmul.msk.f32.gmra.mxu2 %vm18219_vm11, %v7218_v29  ;;  %11683 = vmatmul.msk.f32.gmra.mxu0 %vm18221_vm2, %v8026_v6  ;;  %vm18227_vm11 = vmmov %vm18176_vm0  ;;  %v7419_v16 = vpop.f32.mrf.mxu2  ;;  %v15713_v29 = vadd.f32 %v15659_v14, %v15666_v35 }
 0x5b6   : > { %11634 = vmatmul.msk.f32.gmra.mxu3 %vm18220_vm4, %v7622_v26  ;;  %vm18228_vm4 = vmmov %vm18176_vm0  ;;  %v7561_v41 = vadd.f32 %v7419_v16, %v7157_v38 }
 0x5b7   : > { %11537 = vmatmul.msk.f32.gmra.mxu1 %vm18222_vm10, %v8024_v25  ;;  %vm18229_vm2 = vmmov %vm18176_vm0  ;;  %v7629_v25 = vld [vmem:[#allocation2 + $0xaa] sm:$0xff] }
 0x5b8   : > { %vm18230_vm10 = vmmov %vm18176_vm0 }
 0x5b9   : > { %v15668_v17 = vpop.f32.mrf.mxu0 }
 0x5bd   : > { %11586 = vmatmul.msk.f32.gmra.mxu2 %vm18223_vm1, %v7219_v49  ;;  %11684 = vmatmul.msk.f32.gmra.mxu0 %vm18225_vm13, %v8027_v1  ;;  %vm18231_vm1 = vmmov %vm18176_vm0  ;;  %v7823_v52 = vpop.f32.mrf.mxu3 }
 0x5be   : > { %11635 = vmatmul.msk.f32.gmra.mxu3 %vm18224_vm3, %v7623_v36  ;;  %vm18232_vm3 = vmmov %vm18176_vm0  ;;  %v15675_v19 = vadd.f32 %v7823_v52, %v7561_v41 }
 0x5bf   : > { %11538 = vmatmul.msk.f32.gmra.mxu1 %vm18176_vm0, %v8025_v54  ;;  %vm18233_vm13 = vmmov %vm18176_vm0 }
 0x5c0   : > { %v15726_v8 = vadd.f32 %v15668_v17, %v15675_v19 }
 0x5c5   : > { %11587 = vmatmul.msk.f32.gmra.mxu2 %vm18226_vm9, %v7220_v42  ;;  %11685 = vmatmul.msk.f32.gmra.mxu0 %vm18228_vm4, %v8028_v13  ;;  %vm18234_vm9 = vmmov %vm18176_vm0  ;;  %v7630_v42 = vld [vmem:[#allocation2 + $0xb2] sm:$0xff] }
 0x5c6   : > { %11636 = vmatmul.msk.f32.gmra.mxu3 %vm18227_vm11, %v7624_v50  ;;  %vm18235_vm11 = vmmov %vm18176_vm0 }
 0x5c7   : > { %11539 = vmatmul.msk.f32.gmra.mxu1 %vm18229_vm2, %v8026_v6  ;;  %vm18236_vm4 = vmmov %vm18176_vm0 }
 0x5c8   : > { %vm18237_vm2 = vmmov %vm18176_vm0 }
 0x5c9   : > { %v15677_v27 = vpop.f32.mrf.mxu0 }
 0x5cc   : > { %v7021_v20 = vpop.f32.mrf.mxu1  ;;  %v7422_v55 = vpop.f32.mrf.mxu2 }
 0x5cd   : > { %11588 = vmatmul.msk.f32.gmra.mxu2 %vm18230_vm10, %v7221_v44  ;;  %11686 = vmatmul.msk.f32.gmra.mxu0 %vm18232_vm3, %v8029_v45  ;;  %v7826_v9 = vpop.f32.mrf.mxu3  ;;  %v7562_v7 = vadd.f32 %v7422_v55, %v7158_v0  ;;  %vm18238_vm10 = vmmov %vm18176_vm0  ;;  %v7159_v18 = vadd.f32 %v15657_v12, %v7021_v20  ;;  %v7227_v44 = vld [vmem:[#allocation2 + $0xb9] sm:$0xff]  ;;  %v7632_v20 = vld [vmem:[#allocation2 + $0xc2] sm:$0xff] }
 0x5ce   : > { %11637 = vmatmul.msk.f32.gmra.mxu3 %vm18231_vm1, %v7625_v15  ;;  %vm18239_vm1 = vmmov %vm18176_vm0  ;;  %v7631_v15 = vld [vmem:[#allocation2 + $0xba] sm:$0xff] }
 0x5cf   : > { %11540 = vmatmul.msk.f32.gmra.mxu1 %vm18233_vm13, %v8027_v1  ;;  %v15684_v28 = vadd.f32 %v7826_v9, %v7562_v7  ;;  %vm18240_vm3 = vmmov %vm18176_vm0  ;;  %v7226_v1 = vld [vmem:[#allocation2 + $0xb1] sm:$0xff] }
 0x5d0   : > { %vm18241_vm13 = vmmov %vm18176_vm0  ;;  %v8036_v0 = vld [vmem:[#allocation2 + $0xd8] sm:$0xff] }
 0x5d1   : > { %v15739_v52 = vadd.f32 %v15677_v27, %v15684_v28 }
 0x5d5   : > { %11589 = vmatmul.msk.f32.gmra.mxu2 %vm18176_vm0, %v7222_v40  ;;  %11687 = vmatmul.msk.f32.gmra.mxu0 %vm18235_vm11, %v8030_v24  ;;  %vm18243_vm11 = vmmov %vm18176_vm0 }
 0x5d6   : > { %11638 = vmatmul.msk.f32.gmra.mxu3 %vm18234_vm9, %v7626_v22  ;;  %vm18242_vm9 = vmmov %vm18176_vm0  ;;  %v7228_v22 = vld [vmem:[#allocation2 + $0xc1] sm:$0xff] }
 0x5d7   : > { %11541 = vmatmul.msk.f32.gmra.mxu1 %vm18236_vm4, %v8028_v13  ;;  %vm18244_vm4 = vmmov %vm18176_vm0 }
 0x5da   : > { %v15686_v61 = vpop.f32.mrf.mxu0 }
 0x5dc   : > { %v7024_v3 = vpop.f32.mrf.mxu1  ;;  %v7425_v59 = vpop.f32.mrf.mxu2 }
 0x5dd   : > { %11590 = vmatmul.msk.f32.gmra.mxu2 %vm18237_vm2, %v7223_v51  ;;  %11688 = vmatmul.msk.f32.gmra.mxu0 %vm18239_vm1, %v8031_v33  ;;  %v7829_v5 = vpop.f32.mrf.mxu3  ;;  %v7563_v58 = vadd.f32 %v7425_v59, %v7159_v18  ;;  %v7160_v56 = vadd.f32 %v15657_v12, %v7024_v3  ;;  %vm18245_vm2 = vmmov %vm18176_vm0  ;;  %v7229_v3 = vld [vmem:[#allocation2 + $0xc9] sm:$0xff]  ;;  %v8037_v59 = vld [vmem:[#allocation2 + $0xe0] sm:$0xff] }
 0x5de   : > { %11639 = vmatmul.msk.f32.gmra.mxu3 %vm18238_vm10, %v7627_v47  ;;  %vm18246_vm10 = vmmov %vm18176_vm0 }
 0x5df   : > { %11542 = vmatmul.msk.f32.gmra.mxu1 %vm18240_vm3, %v8029_v45  ;;  %v15693_v4 = vadd.f32 %v7829_v5, %v7563_v58  ;;  %vm18247_vm1 = vmmov %vm18176_vm0  ;;  %v8035_v45 = vld [vmem:[#allocation2 + $0xd0] sm:$0xff] }
 0x5e0   : > { %vm18248_vm3 = vmmov %vm18176_vm0 }
 0x5e1   : > { %v15752_v28 = vadd.f32 %v15686_v61, %v15693_v4 }
 0x5e2   : > { %v15695_v48 = vpop.f32.mrf.mxu0 }
 0x5e4   : > { %v7027_v46 = vpop.f32.mrf.mxu1 }
 0x5e5   : > { %11591 = vmatmul.msk.f32.gmra.mxu2 %vm18241_vm13, %v7224_v39  ;;  %11689 = vmatmul.msk.f32.gmra.mxu0 %vm18242_vm9, %v8032_v23  ;;  %v7161_v54 = vadd.f32 %v15657_v12, %v7027_v46  ;;  %vm18249_vm13 = vmmov %vm18176_vm0 }
 0x5e6   : > { %11640 = vmatmul.msk.f32.gmra.mxu3 %vm18176_vm0, %v7628_v43  ;;  %vm18250_vm9 = vmmov %vm18176_vm0 }
 0x5e7   : > { %11543 = vmatmul.msk.f32.gmra.mxu1 %vm18243_vm11, %v8030_v24  ;;  %vm18251_vm11 = vmmov %vm18176_vm0 }
 0x5e8   : > { %v7428_v63 = vpop.f32.mrf.mxu2 }
 0x5e9   : > { %v7832_v62 = vpop.f32.mrf.mxu3  ;;  %v7564_v57 = vadd.f32 %v7428_v63, %v7160_v56  ;;  %v7634_v56 = vld [vmem:[#allocation2 + $0xd2] sm:$0xff] }
 0x5ea   : > { %v15704_v60 = vpop.f32.mrf.mxu0 }
 0x5eb   : > { %v15702_v11 = vadd.f32 %v7832_v62, %v7564_v57  ;;  %v8038_v62 = vld [vmem:[#allocation2 + $0xe8] sm:$0xff] }
 0x5ec   : > { %v7030_v31 = vpop.f32.mrf.mxu1 }
 0x5ed   : > { %11592 = vmatmul.msk.f32.gmra.mxu2 %vm18244_vm4, %v7225_v37  ;;  %11690 = vmatmul.msk.f32.gmra.mxu0 %vm18246_vm10, %v8033_v53  ;;  %v7162_v14 = vadd.f32 %v15657_v12, %v7030_v31  ;;  %vm18252_vm4 = vmmov %vm18176_vm0  ;;  %v15769_v46 = vadd.f32 %v15695_v48, %v15702_v11 }
 0x5ee   : > { %11641 = vmatmul.msk.f32.gmra.mxu3 %vm18245_vm2, %v7629_v25  ;;  %vm18253_vm2 = vmmov %vm18176_vm0 }
 0x5ef   : > { %11544 = vmatmul.msk.f32.gmra.mxu1 %vm18247_vm1, %v8031_v33  ;;  %vm18254_vm10 = vmmov %vm18176_vm0  ;;  %v7633_v33 = vld [vmem:[#allocation2 + $0xca] sm:$0xff] }
 0x5f0   : > { %v7431_v26 = vpop.f32.mrf.mxu2  ;;  %vm18255_vm1 = vmmov %vm18176_vm0 }
 0x5f1   : > { %v7835_v6 = vpop.f32.mrf.mxu3  ;;  %v7565_v10 = vadd.f32 %v7431_v26, %v7161_v54  ;;  %v7231_v54 = vld [vmem:[#allocation2 + $0xd9] sm:$0xff] }
 0x5f2   : > { %v15717_v36 = vpop.f32.mrf.mxu0  ;;  %v7635_v26 = vld [vmem:[#allocation2 + $0xda] sm:$0xff] }
 0x5f3   : > { %v15715_v49 = vadd.f32 %v7835_v6, %v7565_v10  ;;  %v8039_v10 = vld [vmem:[#allocation2 + $0xf0] sm:$0xff] }
 0x5f4   : > { %v7033_v50 = vpop.f32.mrf.mxu1 }
 0x5f5   : > { %11593 = vmatmul.msk.f32.gmra.mxu2 %vm18248_vm3, %v7226_v1  ;;  %11691 = vmatmul.msk.f32.gmra.mxu0 %vm18176_vm0, %v8034_v30  ;;  %v7163_v38 = vadd.f32 %v15657_v12, %v7033_v50  ;;  %vm18256_vm3 = vmmov %vm18176_vm0  ;;  %v15782_v11 = vadd.f32 %v15704_v60, %v15715_v49  ;;  %v7232_v49 = vld [vmem:[#allocation2 + $0xe1] sm:$0xff] }
 0x5f6   : > { %11642 = vmatmul.msk.f32.gmra.mxu3 %vm18249_vm13, %v7630_v42  ;;  %vm18257_vm13 = vmmov %vm18176_vm0 }
 0x5f7   : > { %11545 = vmatmul.msk.f32.gmra.mxu1 %vm18250_vm9, %v8032_v23  ;;  %vm18258_vm9 = vmmov %vm18176_vm0  ;;  %v7230_v23 = vld [vmem:[#allocation2 + $0xd1] sm:$0xff] }
 0x5f8   : > { %v7434_v13 = vpop.f32.mrf.mxu2 }
 0x5f9   : > { %v7838_v34 = vpop.f32.mrf.mxu3  ;;  %v7566_v2 = vadd.f32 %v7434_v13, %v7162_v14  ;;  %v7636_v13 = vld [vmem:[#allocation2 + $0xe2] sm:$0xff] }
 0x5fa   : > { %v15730_v35 = vpop.f32.mrf.mxu0 }
 0x5fb   : > { %v15728_v21 = vadd.f32 %v7838_v34, %v7566_v2  ;;  %v8040_v2 = vld [vmem:[#allocation2 + $0xf8] sm:$0xff] }
 0x5fc   : > { %v7036_v32 = vpop.f32.mrf.mxu1 }
 0x5fd   : > { %11594 = vmatmul.msk.f32.gmra.mxu2 %vm18251_vm11, %v7227_v44  ;;  %11692 = vmatmul.msk.f32.gmra.mxu0 %vm18253_vm2, %v8035_v45  ;;  %v7164_v55 = vadd.f32 %v15657_v12, %v7036_v32  ;;  %vm18259_vm11 = vmmov %vm18176_vm0  ;;  %v15797_v44 = vadd.f32 %v15717_v36, %v15728_v21  ;;  %v8041_v36 = vld [vmem:[#allocation2 + $0x100] sm:$0xff] }
 0x5fe   : > { %11643 = vmatmul.msk.f32.gmra.mxu3 %vm18252_vm4, %v7631_v15  ;;  %vm18260_vm4 = vmmov %vm18176_vm0 }
 0x5ff   : > { %11546 = vmatmul.msk.f32.gmra.mxu1 %vm18254_vm10, %v8033_v53  ;;  %vm18261_vm2 = vmmov %vm18176_vm0 }
 0x600   : > { %v7437_v17 = vpop.f32.mrf.mxu2  ;;  %vm18262_vm10 = vmmov %vm18176_vm0 }
 0x601   : > { %v7841_v16 = vpop.f32.mrf.mxu3  ;;  %v7567_v41 = vadd.f32 %v7437_v17, %v7163_v38 }
 0x602   : > { %v15743_v40 = vpop.f32.mrf.mxu0 }
 0x603   : > { %v15741_v19 = vadd.f32 %v7841_v16, %v7567_v41  ;;  %v7233_v41 = vld [vmem:[#allocation2 + $0xe9] sm:$0xff] }
 0x604   : > { %v7039_v24 = vpop.f32.mrf.mxu1 }
 0x605   : > { %11595 = vmatmul.msk.f32.gmra.mxu2 %vm18255_vm1, %v7228_v22  ;;  %11693 = vmatmul.msk.f32.gmra.mxu0 %vm18257_vm13, %v8036_v0  ;;  %v7165_v5 = vadd.f32 %v15657_v12, %v7039_v24  ;;  %vm18263_vm1 = vmmov %vm18176_vm0  ;;  %v7637_v22 = vld [vmem:[#allocation2 + $0xea] sm:$0xff]  ;;  %v15811_v21 = vadd.f32 %v15730_v35, %v15741_v19 }
 0x606   : > { %11644 = vmatmul.msk.f32.gmra.mxu3 %vm18256_vm3, %v7632_v20  ;;  %vm18264_vm3 = vmmov %vm18176_vm0  ;;  %v8042_v35 = vld [vmem:[#allocation2 + $0x108] sm:$0xff] }
 0x607   : > { %11547 = vmatmul.msk.f32.gmra.mxu1 %vm18176_vm0, %v8034_v30  ;;  %vm18265_vm13 = vmmov %vm18176_vm0 }
 0x608   : > { %v7440_v27 = vpop.f32.mrf.mxu2 }
 0x609   : > { %v7844_v9 = vpop.f32.mrf.mxu3  ;;  %v7568_v7 = vadd.f32 %v7440_v27, %v7164_v55 }
 0x60a   : > { %v15756_v47 = vpop.f32.mrf.mxu0 }
 0x60b   : > { %v15754_v51 = vadd.f32 %v7844_v9, %v7568_v7 }
 0x60c   : > { %v7042_v18 = vpop.f32.mrf.mxu1 }
 0x60d   : > { %11596 = vmatmul.msk.f32.gmra.mxu2 %vm18258_vm9, %v7229_v3  ;;  %11694 = vmatmul.msk.f32.gmra.mxu0 %vm18260_vm4, %v8037_v59  ;;  %v7166_v57 = vadd.f32 %v15657_v12, %v7042_v18  ;;  %vm18266_vm9 = vmmov %vm18176_vm0  ;;  %v7234_v3 = vld [vmem:[#allocation2 + $0xf1] sm:$0xff]  ;;  %v15824_v19 = vadd.f32 %v15743_v40, %v15754_v51 }
 0x60e   : > { %11645 = vmatmul.msk.f32.gmra.mxu3 %vm18259_vm11, %v7633_v33  ;;  %vm18267_vm11 = vmmov %vm18176_vm0  ;;  %v7638_v33 = vld [vmem:[#allocation2 + $0xf2] sm:$0xff] }
 0x60f   : > { %11548 = vmatmul.msk.f32.gmra.mxu1 %vm18261_vm2, %v8035_v45  ;;  %vm18268_vm4 = vmmov %vm18176_vm0  ;;  %v8043_v40 = vld [vmem:[#allocation2 + $0x110] sm:$0xff] }
 0x610   : > { %v7443_v61 = vpop.f32.mrf.mxu2  ;;  %vm18269_vm2 = vmmov %vm18176_vm0 }
 0x611   : > { %v7847_v58 = vpop.f32.mrf.mxu3  ;;  %v7569_v4 = vadd.f32 %v7443_v61, %v7165_v5 }
 0x612   : > { %v15765_v43 = vpop.f32.mrf.mxu0 }
 0x613   : > { %v15763_v39 = vadd.f32 %v7847_v58, %v7569_v4 }
 0x614   : > { %v7045_v63 = vpop.f32.mrf.mxu1 }
 0x615   : > { %11597 = vmatmul.msk.f32.gmra.mxu2 %vm18262_vm10, %v7230_v23  ;;  %11695 = vmatmul.msk.f32.gmra.mxu0 %vm18264_vm3, %v8038_v62  ;;  %v7167_v1 = vadd.f32 %v15657_v12, %v7045_v63  ;;  %vm18270_vm10 = vmmov %vm18176_vm0  ;;  %v7639_v63 = vld [vmem:[#allocation2 + $0xfa] sm:$0xff] }
 0x616   : > { %11646 = vmatmul.msk.f32.gmra.mxu3 %vm18263_vm1, %v7634_v56  ;;  %vm18271_vm1 = vmmov %vm18176_vm0  ;;  %v7235_v56 = vld [vmem:[#allocation2 + $0xf9] sm:$0xff] }
 0x617   : > { %11549 = vmatmul.msk.f32.gmra.mxu1 %vm18265_vm13, %v8036_v0  ;;  %vm18272_vm3 = vmmov %vm18176_vm0 }
 0x618   : > { %v7446_v37 = vpop.f32.mrf.mxu2  ;;  %vm18273_vm13 = vmmov %vm18176_vm0 }
 0x619   : > { %v7850_v25 = vpop.f32.mrf.mxu3  ;;  %v7570_v31 = vadd.f32 %v7446_v37, %v7166_v57 }
 0x61a   : > { %v15778_v48 = vpop.f32.mrf.mxu0 }
 0x61b   : > { %v15776_v53 = vadd.f32 %v7850_v25, %v7570_v31  ;;  %v15839_v25 = vadd.f32 %v15756_v47, %v15763_v39 }
 0x61c   : > { %v7048_v6 = vpop.f32.mrf.mxu1 }
 0x61d   : > { %11598 = vmatmul.msk.f32.gmra.mxu2 %vm18176_vm0, %v7231_v54  ;;  %11696 = vmatmul.msk.f32.gmra.mxu0 %vm18267_vm11, %v8039_v10  ;;  %v7168_v15 = vadd.f32 %v15657_v12, %v7048_v6  ;;  %vm18275_vm11 = vmmov %vm18176_vm0  ;;  %v7236_v6 = vld [vmem:[#allocation2 + $0x101] sm:$0xff] }
 0x61e   : > { %11647 = vmatmul.msk.f32.gmra.mxu3 %vm18266_vm9, %v7635_v26  ;;  %vm18274_vm9 = vmmov %vm18176_vm0 }
 0x61f   : > { %11550 = vmatmul.msk.f32.gmra.mxu1 %vm18268_vm4, %v8037_v59  ;;  %vm18276_vm4 = vmmov %vm18176_vm0 }
 0x620   : > { %v7449_v42 = vpop.f32.mrf.mxu2 }
 0x621   : > { %v7853_v50 = vpop.f32.mrf.mxu3  ;;  %v7571_v30 = vadd.f32 %v7449_v42, %v7167_v1  ;;  %v8044_v42 = vld [vmem:[#allocation2 + $0x118] sm:$0xff] }
 0x622   : > { %v15791_v60 = vpop.f32.mrf.mxu0 }
 0x623   : > { %v15789_v14 = vadd.f32 %v7853_v50, %v7571_v30 }
 0x624   : > { %v7051_v34 = vpop.f32.mrf.mxu1 }
 0x625   : > { %11599 = vmatmul.msk.f32.gmra.mxu2 %vm18269_vm2, %v7232_v49  ;;  %11697 = vmatmul.msk.f32.gmra.mxu0 %vm18271_vm1, %v8040_v2  ;;  %v7169_v24 = vadd.f32 %v15657_v12, %v7051_v34  ;;  %vm18277_vm2 = vmmov %vm18176_vm0  ;;  %v15852_v49 = vadd.f32 %v15765_v43, %v15776_v53 }
 0x626   : > { %11648 = vmatmul.msk.f32.gmra.mxu3 %vm18270_vm10, %v7636_v13  ;;  %vm18278_vm10 = vmmov %vm18176_vm0 }
 0x627   : > { %11551 = vmatmul.msk.f32.gmra.mxu1 %vm18272_vm3, %v8038_v62  ;;  %vm18279_vm1 = vmmov %vm18176_vm0 }
 0x628   : > { %v7452_v32 = vpop.f32.mrf.mxu2  ;;  %vm18280_vm3 = vmmov %vm18176_vm0 }
 0x629   : > { %v7856_v45 = vpop.f32.mrf.mxu3  ;;  %v7572_v38 = vadd.f32 %v7452_v32, %v7168_v15  ;;  %v7641_v15 = vld [vmem:[#allocation2 + $0x10a] sm:$0xff] }
 0x62a   : > { %v15804_v16 = vpop.f32.mrf.mxu0 }
 0x62b   : > { %v15802_v17 = vadd.f32 %v7856_v45, %v7572_v38  ;;  %v8045_v45 = vld [vmem:[#allocation2 + $0x120] sm:$0xff] }
 0x62c   : > { %v7054_v20 = vpop.f32.mrf.mxu1 }
 0x62d   : > { %11600 = vmatmul.msk.f32.gmra.mxu2 %vm18273_vm13, %v7233_v41  ;;  %11698 = vmatmul.msk.f32.gmra.mxu0 %vm18274_vm9, %v8041_v36  ;;  %v7170_v59 = vadd.f32 %v15657_v12, %v7054_v20  ;;  %vm18281_vm13 = vmmov %vm18176_vm0 }
 0x62e   : > { %11649 = vmatmul.msk.f32.gmra.mxu3 %vm18176_vm0, %v7637_v22  ;;  %vm18282_vm9 = vmmov %vm18176_vm0  ;;  %v15865_v22 = vadd.f32 %v15778_v48, %v15789_v14 }
 0x62f   : > { %11552 = vmatmul.msk.f32.gmra.mxu1 %vm18275_vm11, %v8039_v10  ;;  %v7640_v10 = vld [vmem:[#allocation2 + $0x102] sm:$0xff]  ;;  %vm18283_vm11 = vmmov %vm18176_vm0 }
 0x630   : > { %v7455_v0 = vpop.f32.mrf.mxu2 }
 0x631   : > { %v7859_v55 = vpop.f32.mrf.mxu3  ;;  %v7573_v27 = vadd.f32 %v7455_v0, %v7169_v24  ;;  %v7238_v24 = vld [vmem:[#allocation2 + $0x111] sm:$0xff] }
 0x632   : > { %v15817_v7 = vpop.f32.mrf.mxu0  ;;  %v7642_v0 = vld [vmem:[#allocation2 + $0x112] sm:$0xff] }
 0x633   : > { %v15815_v9 = vadd.f32 %v7859_v55, %v7573_v27  ;;  %v8046_v27 = vld [vmem:[#allocation2 + $0x128] sm:$0xff] }
 0x634   : > { %v7057_v18 = vpop.f32.mrf.mxu1 }
 0x635   : > { %11601 = vmatmul.msk.f32.gmra.mxu2 %vm18276_vm4, %v7234_v3  ;;  %11699 = vmatmul.msk.f32.gmra.mxu0 %vm18278_vm10, %v8042_v35  ;;  %v7171_v51 = vadd.f32 %v15657_v12, %v7057_v18  ;;  %vm18284_vm4 = vmmov %vm18176_vm0 }
 0x636   : > { %11650 = vmatmul.msk.f32.gmra.mxu3 %vm18277_vm2, %v7638_v33  ;;  %vm18285_vm2 = vmmov %vm18176_vm0 }
 0x637   : > { %11553 = vmatmul.msk.f32.gmra.mxu1 %vm18279_vm1, %v8040_v2  ;;  %vm18286_vm10 = vmmov %vm18176_vm0  ;;  %v7237_v2 = vld [vmem:[#allocation2 + $0x109] sm:$0xff] }
 0x638   : > { %v7458_v5 = vpop.f32.mrf.mxu2  ;;  %vm18287_vm1 = vmmov %vm18176_vm0 }
 0x639   : > { %v7862_v61 = vpop.f32.mrf.mxu3  ;;  %v7574_v58 = vadd.f32 %v7458_v5, %v7170_v59  ;;  %v15882_v59 = vadd.f32 %v15791_v60, %v15802_v17  ;;  %v7239_v5 = vld [vmem:[#allocation2 + $0x119] sm:$0xff]  ;;  %v7240_v17 = vld [vmem:[#allocation2 + $0x121] sm:$0xff] }
 0x63a   : > { %v15830_v23 = vpop.f32.mrf.mxu0 }
 0x63b   : > { %v15828_v4 = vadd.f32 %v7862_v61, %v7574_v58  ;;  %v7643_v61 = vld [vmem:[#allocation2 + $0x11a] sm:$0xff] }
 0x63c   : > { %v7060_v62 = vpop.f32.mrf.mxu1 }
 0x63d   : > { %11602 = vmatmul.msk.f32.gmra.mxu2 %vm18280_vm3, %v7235_v56  ;;  %11700 = vmatmul.msk.f32.gmra.mxu0 %vm18176_vm0, %v8043_v40  ;;  %v7172_v50 = vadd.f32 %v15657_v12, %v7060_v62  ;;  %vm18288_vm3 = vmmov %vm18176_vm0  ;;  %v8047_v56 = vld [vmem:[#allocation2 + $0x130] sm:$0xff] }
 0x63e   : > { %11651 = vmatmul.msk.f32.gmra.mxu3 %vm18281_vm13, %v7639_v63  ;;  %vm18289_vm13 = vmmov %vm18176_vm0 }
 0x63f   : > { %11554 = vmatmul.msk.f32.gmra.mxu1 %vm18282_vm9, %v8041_v36  ;;  %vm18290_vm9 = vmmov %vm18176_vm0 }
 0x640   : > { %v7461_v57 = vpop.f32.mrf.mxu2 }
 0x641   : > { %v7865_v37 = vpop.f32.mrf.mxu3  ;;  %v7575_v31 = vadd.f32 %v7461_v57, %v7171_v51 }
 0x642   : > { %v15843_v26 = vpop.f32.mrf.mxu0 }
 0x643   : > { %v15841_v54 = vadd.f32 %v7865_v37, %v7575_v31  ;;  %v7644_v37 = vld [vmem:[#allocation2 + $0x122] sm:$0xff] }
 0x644   : > { %v7063_v1 = vpop.f32.mrf.mxu1 }
 0x645   : > { %11603 = vmatmul.msk.f32.gmra.mxu2 %vm18283_vm11, %v7236_v6  ;;  %11701 = vmatmul.msk.f32.gmra.mxu0 %vm18285_vm2, %v8044_v42  ;;  %v7173_v38 = vadd.f32 %v15657_v12, %v7063_v1  ;;  %vm18291_vm11 = vmmov %vm18176_vm0  ;;  %v15895_v6 = vadd.f32 %v15804_v16, %v15815_v9  ;;  %v7241_v16 = vld [vmem:[#allocation2 + $0x129] sm:$0xff] }
 0x646   : > { %11652 = vmatmul.msk.f32.gmra.mxu3 %vm18284_vm4, %v7640_v10  ;;  %vm18292_vm4 = vmmov %vm18176_vm0  ;;  %v8048_v10 = vld [vmem:[#allocation2 + $0x138] sm:$0xff]  ;;  %v7645_v9 = vld [vmem:[#allocation2 + $0x12a] sm:$0xff] }
 0x647   : > { %11555 = vmatmul.msk.f32.gmra.mxu1 %vm18286_vm10, %v8042_v35  ;;  %vm18293_vm2 = vmmov %vm18176_vm0 }
 0x648   : > { %v7464_v47 = vpop.f32.mrf.mxu2  ;;  %vm18294_vm10 = vmmov %vm18176_vm0 }
 0x649   : > { %v7868_v39 = vpop.f32.mrf.mxu3  ;;  %v7576_v30 = vadd.f32 %v7464_v47, %v7172_v50 }
 0x64a   : > { %v15856_v34 = vpop.f32.mrf.mxu0 }
 0x64b   : > { %v15854_v13 = vadd.f32 %v7868_v39, %v7576_v30 }
 0x64c   : > { %v7066_v32 = vpop.f32.mrf.mxu1 }
 0x64d   : > { %11604 = vmatmul.msk.f32.gmra.mxu2 %vm18287_vm1, %v7237_v2  ;;  %11702 = vmatmul.msk.f32.gmra.mxu0 %vm18289_vm13, %v8045_v45  ;;  %v7174_v3 = vadd.f32 %v15657_v12, %v7066_v32  ;;  %vm18295_vm1 = vmmov %vm18176_vm0  ;;  %v8049_v32 = vld [vmem:[#allocation2 + $0x140] sm:$0xff] }
 0x64e   : > { %11653 = vmatmul.msk.f32.gmra.mxu3 %vm18288_vm3, %v7641_v15  ;;  %vm18296_vm3 = vmmov %vm18176_vm0  ;;  %v15908_v15 = vadd.f32 %v15817_v7, %v15828_v4  ;;  %v7242_v7 = vld [vmem:[#allocation2 + $0x131] sm:$0xff] }
 0x64f   : > { %11556 = vmatmul.msk.f32.gmra.mxu1 %vm18176_vm0, %v8043_v40  ;;  %vm18297_vm13 = vmmov %vm18176_vm0  ;;  %v7646_v4 = vld [vmem:[#allocation2 + $0x132] sm:$0xff] }
 0x650   : > { %v7467_v43 = vpop.f32.mrf.mxu2 }
 0x651   : > { %v7871_v53 = vpop.f32.mrf.mxu3  ;;  %v7577_v41 = vadd.f32 %v7467_v43, %v7173_v38 }
 0x652   : > { %v15869_v36 = vpop.f32.mrf.mxu0 }
 0x653   : > { %v15867_v20 = vadd.f32 %v7871_v53, %v7577_v41 }
 0x654   : > { %v7069_v55 = vpop.f32.mrf.mxu1 }
 0x655   : > { %11605 = vmatmul.msk.f32.gmra.mxu2 %vm18290_vm9, %v7238_v24  ;;  %11703 = vmatmul.msk.f32.gmra.mxu0 %vm18292_vm4, %v8046_v27  ;;  %v7175_v63 = vadd.f32 %v15657_v12, %v7069_v55  ;;  %vm18298_vm9 = vmmov %vm18176_vm0  ;;  %v8050_v55 = vld [vmem:[#allocation2 + $0x148] sm:$0xff] }
 0x656   : > { %11654 = vmatmul.msk.f32.gmra.mxu3 %vm18291_vm11, %v7642_v0  ;;  %vm18299_vm11 = vmmov %vm18176_vm0 }
 0x657   : > { %11557 = vmatmul.msk.f32.gmra.mxu1 %vm18293_vm2, %v8044_v42  ;;  %vm18300_vm4 = vmmov %vm18176_vm0 }
 0x658   : > { %v7470_v48 = vpop.f32.mrf.mxu2  ;;  %vm18301_vm2 = vmmov %vm18176_vm0 }
 0x659   : > { %v7874_v14 = vpop.f32.mrf.mxu3  ;;  %v7578_v33 = vadd.f32 %v7470_v48, %v7174_v3 }
 0x65a   : > { %v15878_v35 = vpop.f32.mrf.mxu0 }
 0x65b   : > { %v15876_v18 = vadd.f32 %v7874_v14, %v7578_v33 }
 0x65c   : > { %v7072_v58 = vpop.f32.mrf.mxu1 }
 0x65d   : > { %11606 = vmatmul.msk.f32.gmra.mxu2 %vm18294_vm10, %v7239_v5  ;;  %11704 = vmatmul.msk.f32.gmra.mxu0 %vm18296_vm3, %v8047_v56  ;;  %v7176_v1 = vadd.f32 %v15657_v12, %v7072_v58  ;;  %vm18302_vm10 = vmmov %vm18176_vm0  ;;  %v7243_v58 = vld [vmem:[#allocation2 + $0x139] sm:$0xff] }
 0x65e   : > { %11655 = vmatmul.msk.f32.gmra.mxu3 %vm18295_vm1, %v7643_v61  ;;  %vm18303_vm1 = vmmov %vm18176_vm0 }
 0x65f   : > { %11558 = vmatmul.msk.f32.gmra.mxu1 %vm18297_vm13, %v8045_v45  ;;  %vm18304_vm3 = vmmov %vm18176_vm0 }
 0x660   : > { %v7473_v62 = vpop.f32.mrf.mxu2  ;;  %vm18305_vm13 = vmmov %vm18176_vm0 }
 0x661   : > { %v7877_v40 = vpop.f32.mrf.mxu3  ;;  %v7579_v51 = vadd.f32 %v7473_v62, %v7175_v63  ;;  %v15939_v62 = vadd.f32 %v15843_v26, %v15854_v13  ;;  %v15952_v13 = vadd.f32 %v15856_v34, %v15867_v20 }
 0x662   : > { %v15891_v60 = vpop.f32.mrf.mxu0 }
 0x663   : > { %v15889_v57 = vadd.f32 %v7877_v40, %v7579_v51 }
 0x664   : > { %v7075_v31 = vpop.f32.mrf.mxu1 }
 0x665   : > { %11607 = vmatmul.msk.f32.gmra.mxu2 %vm18176_vm0, %v7240_v17  ;;  %11705 = vmatmul.msk.f32.gmra.mxu0 %vm18299_vm11, %v8048_v10  ;;  %v7177_v45 = vadd.f32 %v15657_v12, %v7075_v31  ;;  %vm18307_vm11 = vmmov %vm18176_vm0 }
 0x666   : > { %11656 = vmatmul.msk.f32.gmra.mxu3 %vm18298_vm9, %v7644_v37  ;;  %vm18306_vm9 = vmmov %vm18176_vm0 }
 0x667   : > { %11559 = vmatmul.msk.f32.gmra.mxu1 %vm18300_vm4, %v8046_v27  ;;  %v15924_v27 = vadd.f32 %v15830_v23, %v15841_v54  ;;  %vm18308_vm4 = vmmov %vm18176_vm0  ;;  %v8051_v23 = vld [vmem:[#allocation2 + $0x150] sm:$0xff] }
 0x668   : > { %v7476_v42 = vpop.f32.mrf.mxu2 }
 0x669   : > { %v7880_v50 = vpop.f32.mrf.mxu3  ;;  %v7580_v47 = vadd.f32 %v7476_v42, %v7176_v1  ;;  %v7648_v1 = vld [vmem:[#allocation2 + $0x142] sm:$0xff] }
 0x66a   : > { %v15904_v30 = vpop.f32.mrf.mxu0 }
 0x66b   : > { %v15902_v39 = vadd.f32 %v7880_v50, %v7580_v47  ;;  %v8052_v50 = vld [vmem:[#allocation2 + $0x158] sm:$0xff] }
 0x66c   : > { %v7078_v2 = vpop.f32.mrf.mxu1 }
 0x66d   : > { %11608 = vmatmul.msk.f32.gmra.mxu2 %vm18301_vm2, %v7241_v16  ;;  %11706 = vmatmul.msk.f32.gmra.mxu0 %vm18303_vm1, %v8049_v32  ;;  %v7178_v3 = vadd.f32 %v15657_v12, %v7078_v2  ;;  %vm18309_vm2 = vmmov %vm18176_vm0 }
 0x66e   : > { %11657 = vmatmul.msk.f32.gmra.mxu3 %vm18302_vm10, %v7645_v9  ;;  %vm18310_vm10 = vmmov %vm18176_vm0 }
 0x66f   : > { %11560 = vmatmul.msk.f32.gmra.mxu1 %vm18304_vm3, %v8047_v56  ;;  %v7647_v56 = vld [vmem:[#allocation2 + $0x13a] sm:$0xff]  ;;  %vm18311_vm1 = vmmov %vm18176_vm0 }
 0x670   : > { %v7479_v38 = vpop.f32.mrf.mxu2  ;;  %vm18312_vm3 = vmmov %vm18176_vm0 }
 0x671   : > { %v7883_v43 = vpop.f32.mrf.mxu3  ;;  %v7581_v53 = vadd.f32 %v7479_v38, %v7177_v45  ;;  %v7245_v45 = vld [vmem:[#allocation2 + $0x149] sm:$0xff] }
 0x672   : > { %v15917_v24 = vpop.f32.mrf.mxu0  ;;  %v7649_v38 = vld [vmem:[#allocation2 + $0x14a] sm:$0xff] }
 0x673   : > { %v15915_v41 = vadd.f32 %v7883_v43, %v7581_v53  ;;  %v8053_v53 = vld [vmem:[#allocation2 + $0x160] sm:$0xff] }
 0x674   : > { %v7081_v0 = vpop.f32.mrf.mxu1 }
 0x675   : > { %11609 = vmatmul.msk.f32.gmra.mxu2 %vm18305_vm13, %v7242_v7  ;;  %11707 = vmatmul.msk.f32.gmra.mxu0 %vm18306_vm9, %v8050_v55  ;;  %v7179_v54 = vadd.f32 %v15657_v12, %v7081_v0  ;;  %vm18313_vm13 = vmmov %vm18176_vm0  ;;  %v15965_v0 = vadd.f32 %v15869_v36, %v15876_v18 }
 0x676   : > { %11658 = vmatmul.msk.f32.gmra.mxu3 %vm18176_vm0, %v7646_v4  ;;  %vm18314_vm9 = vmmov %vm18176_vm0 }
 0x677   : > { %11561 = vmatmul.msk.f32.gmra.mxu1 %vm18307_vm11, %v8048_v10  ;;  %v7244_v10 = vld [vmem:[#allocation2 + $0x141] sm:$0xff]  ;;  %vm18315_vm11 = vmmov %vm18176_vm0 }
 0x678   : > { %v7482_v48 = vpop.f32.mrf.mxu2 }
 0x679   : > { %v7886_v14 = vpop.f32.mrf.mxu3  ;;  %v7582_v33 = vadd.f32 %v7482_v48, %v7178_v3  ;;  %v7246_v48 = vld [vmem:[#allocation2 + $0x151] sm:$0xff] }
 0x67a   : > { %v15930_v61 = vpop.f32.mrf.mxu0 }
 0x67b   : > { %v15928_v5 = vadd.f32 %v7886_v14, %v7582_v33  ;;  %v7650_v14 = vld [vmem:[#allocation2 + $0x152] sm:$0xff] }
 0x67c   : > { %v7084_v63 = vpop.f32.mrf.mxu1 }
 0x67d   : > { %11610 = vmatmul.msk.f32.gmra.mxu2 %vm18308_vm4, %v7243_v58  ;;  %11708 = vmatmul.msk.f32.gmra.mxu0 %vm18310_vm10, %v8051_v23  ;;  %v7180_v26 = vadd.f32 %v15657_v12, %v7084_v63  ;;  %vm18316_vm4 = vmmov %vm18176_vm0  ;;  %v8054_v58 = vld [vmem:[#allocation2 + $0x168] sm:$0xff] }
 0x67e   : > { %11659 = vmatmul.msk.f32.gmra.mxu3 %vm18309_vm2, %v7647_v56  ;;  %vm18317_vm2 = vmmov %vm18176_vm0 }
 0x67f   : > { %11562 = vmatmul.msk.f32.gmra.mxu1 %vm18311_vm1, %v8049_v32  ;;  %vm18318_vm10 = vmmov %vm18176_vm0 }
 0x680   : > { %v7485_v40 = vpop.f32.mrf.mxu2  ;;  %vm18319_vm1 = vmmov %vm18176_vm0 }
 0x681   : > { %v7889_v51 = vpop.f32.mrf.mxu3  ;;  %v7583_v17 = vadd.f32 %v7485_v40, %v7179_v54 }
 0x682   : > { %v15943_v31 = vpop.f32.mrf.mxu0 }
 0x683   : > { %v15941_v37 = vadd.f32 %v7889_v51, %v7583_v17  ;;  %v245_v51 = vld [vmem:[%s17352_s3 + $0x14] sm:$0xf]  ;;  %v246_v17 = vld [vmem:[%s17352_s3 + $0x18] sm:$0xf] }
 0x684   : > { %v7087_v42 = vpop.f32.mrf.mxu1 }
 0x685   : > { %11611 = vmatmul.msk.f32.gmra.mxu2 %vm18312_vm3, %v7244_v10  ;;  %11709 = vmatmul.msk.f32.gmra.mxu0 %vm18176_vm0, %v8052_v50  ;;  %v7181_v34 = vadd.f32 %v15657_v12, %v7087_v42  ;;  %vm18320_vm3 = vmmov %vm18176_vm0  ;;  %v7247_v10 = vld [vmem:[#allocation2 + $0x159] sm:$0xff] }
 0x686   : > { %11660 = vmatmul.msk.f32.gmra.mxu3 %vm18313_vm13, %v7648_v1  ;;  %vm18321_vm13 = vmmov %vm18176_vm0  ;;  %v7651_v1 = vld [vmem:[#allocation2 + $0x15a] sm:$0xff] }
 0x687   : > { %11563 = vmatmul.msk.f32.gmra.mxu1 %vm18314_vm9, %v8050_v55  ;;  %vm18322_vm9 = vcmask 1043456  }
 0x688   : > { %v7488_v47 = vpop.f32.mrf.mxu2  ;;  %11766 = vmatpush.msk.msra.mxu2 %vm18322_vm9, %v245_v51 }
 0x689   : > { %v7892_v16 = vpop.f32.mrf.mxu3  ;;  %v7584_v9 = vadd.f32 %v7488_v47, %v7180_v26 }
 0x68a   : > { %v15956_v32 = vpop.f32.mrf.mxu0 }
 0x68b   : > { %v15954_v2 = vadd.f32 %v7892_v16, %v7584_v9  ;;  %v15999_v16 = vadd.f32 %v15891_v60, %v15902_v39  ;;  %v248_v60 = vld [vmem:[%s17352_s3 + $0x20] sm:$0xf] }
 0x68c   : > { %v7090_v43 = vpop.f32.mrf.mxu1 }
 0x68d   : > { %11612 = vmatmul.msk.f32.gmra.mxu2 %vm18315_vm11, %v7245_v45  ;;  %11710 = vmatmul.msk.f32.gmra.mxu0 %vm18317_vm2, %v8053_v53  ;;  %v7182_v56 = vadd.f32 %v15657_v12, %v7090_v43  ;;  %vm18323_vm11 = vmmov %vm18322_vm9  ;;  %v7248_v43 = vld [vmem:[#allocation2 + $0x161] sm:$0xff] }
 0x68e   : > { %11661 = vmatmul.msk.f32.gmra.mxu3 %vm18316_vm4, %v7649_v38  ;;  %vm18324_vm4 = vmmov %vm18176_vm0  ;;  %v247_v38 = vld [vmem:[%s17352_s3 + $0x1c] sm:$0xf] }
 0x68f   : > { %11564 = vmatmul.msk.f32.gmra.mxu1 %vm18318_vm10, %v8051_v23  ;;  %v15978_v23 = vadd.f32 %v15878_v35, %v15889_v57  ;;  %11815 = vmatpush.msk.msra.mxu3 %vm18323_vm11, %v246_v17  ;;  %vm18325_vm2 = vmmov %vm18176_vm0  ;;  %v8055_v35 = vld [vmem:[#allocation2 + $0x170] sm:$0xff] }
 0x690   : > { %v7491_v20 = vpop.f32.mrf.mxu2  ;;  %vm18326_vm10 = vmmov %vm18176_vm0 }
 0x691   : > { %v7895_v7 = vpop.f32.mrf.mxu3  ;;  %v7585_v4 = vadd.f32 %v7491_v20, %v7181_v34  ;;  %v7652_v34 = vld [vmem:[#allocation2 + $0x162] sm:$0xff]  ;;  %vm18331_vm11 = vmmov %vm18176_vm0 }
 0x692   : > { %v15969_v3 = vpop.f32.mrf.mxu0 }
 0x693   : > { %v15967_v55 = vadd.f32 %v7895_v7, %v7585_v4 }
 0x694   : > { %v7093_v33 = vpop.f32.mrf.mxu1 }
 0x695   : > { %11613 = vmatmul.msk.f32.gmra.mxu2 %vm18319_vm1, %v7246_v48  ;;  %11711 = vmatmul.msk.f32.gmra.mxu0 %vm18321_vm13, %v8054_v58  ;;  %v7183_v57 = vadd.f32 %v15657_v12, %v7093_v33  ;;  %vm18327_vm1 = vmmov %vm18176_vm0 }
 0x696   : > { %11662 = vmatmul.msk.f32.gmra.mxu3 %vm18320_vm3, %v7650_v14  ;;  %vm18328_vm3 = vmmov %vm18322_vm9 }
 0x697   : > { %11565 = vmatmul.msk.f32.gmra.mxu1 %vm18176_vm0, %v8052_v50  ;;  %11864 = vmatpush.msk.msra.mxu0 %vm18328_vm3, %v247_v38  ;;  %vm18329_vm13 = vmmov %vm18176_vm0 }
 0x698   : > { %v7494_v36 = vpop.f32.mrf.mxu2  ;;  %vm18330_vm9 = vmmov %vm18176_vm0 }
 0x699   : > { %v7898_v18 = vpop.f32.mrf.mxu3  ;;  %v7586_v63 = vadd.f32 %v7494_v36, %v7182_v56  ;;  %v7249_v56 = vld [vmem:[#allocation2 + $0x169] sm:$0xff] }
 0x69a   : > { %v15982_v40 = vpop.f32.mrf.mxu0  ;;  %v7653_v36 = vld [vmem:[#allocation2 + $0x16a] sm:$0xff] }
 0x69b   : > { %v15980_v54 = vadd.f32 %v7898_v18, %v7586_v63  ;;  %v16024_v63 = vadd.f32 %v15904_v30, %v15915_v41  ;;  %v7250_v30 = vld [vmem:[#allocation2 + $0x171] sm:$0xff] }
 0x69c   : > { %v7096_v42 = vpop.f32.mrf.mxu1  ;;  %v7654_v41 = vld [vmem:[#allocation2 + $0x172] sm:$0xff] }
 0x69d   : > { %11614 = vmatmul.msk.f32.gmra.mxu2 %vm18324_vm4, %v7247_v10  ;;  %11712 = vmatmul.msk.f32.gmra.mxu0 %vm18326_vm10, %v8055_v35  ;;  %v7184_v39 = vadd.f32 %v15657_v12, %v7096_v42  ;;  %vm18332_vm4 = vmmov %vm18328_vm3 }
 0x69e   : > { %11663 = vmatmul.msk.f32.gmra.mxu3 %vm18325_vm2, %v7651_v1  ;;  %11913 = vmatpush.msk.msra.mxu1 %vm18332_vm4, %v248_v60  ;;  %vm18333_vm2 = vmmov %vm18176_vm0 }
 0x69f   : > { %11566 = vmatmul.msk.f32.gmra.mxu1 %vm18327_vm1, %v8053_v53  ;;  %v8056_v53 = vld [vmem:[#allocation2 + $0x178] sm:$0xff]  ;;  %vm18334_vm10 = vmmov %vm18176_vm0 }
 0x6a0   : > { %v7497_v50 = vpop.f32.mrf.mxu2  ;;  %vm18335_vm1 = vmmov %vm18176_vm0 }
 0x6a1   : > { %v7901_v26 = vpop.f32.mrf.mxu3  ;;  %v7587_v47 = vadd.f32 %v7497_v50, %v7183_v57  ;;  %vm18336_vm3 = vmmov %vm18176_vm0 }
 0x6a2   : > { %v16003_v45 = vpop.f32.mrf.mxu0  ;;  %vm18340_vm4 = vmmov %vm18176_vm0 }
 0x6a3   : > { %v16001_v9 = vadd.f32 %v7901_v26, %v7587_v47  ;;  %v8058_v26 = vld [vmem:[#allocation2 + $0x188] sm:$0xff]  ;;  %v16039_v47 = vadd.f32 %v15917_v24, %v15928_v5  ;;  %v8059_v24 = vld [vmem:[#allocation2 + $0x190] sm:$0xff]  ;;  %v16052_v5 = vadd.f32 %v15930_v61, %v15941_v37 }
 0x6a4   : > { %v7099_v20 = vpop.f32.mrf.mxu1  ;;  %v9628_v61 = vld [vmem:[#allocation2 + $0x31] sm:$0xff]  ;;  %v8417_v37 = vld [vmem:[#allocation2 + $0x21] sm:$0xff] }
 0x6a5   : > { %11615 = vmatmul.msk.f32.gmra.mxu2 %vm18329_vm13, %v7248_v43  ;;  %11713 = vmatmul.msk.f32.gmra.mxu0 %vm18330_vm9, %v8056_v53  ;;  %v7185_v51 = vadd.f32 %v15657_v12, %v7099_v20  ;;  %vm18337_vm13 = vmmov %vm18176_vm0 }
 0x6a6   : > { %11664 = vmatmul.msk.f32.gmra.mxu3 %vm18176_vm0, %v7652_v34  ;;  %vm18338_vm9 = vmmov %vm18176_vm0 }
 0x6a7   : > { %11567 = vmatmul.msk.f32.gmra.mxu1 %vm18331_vm11, %v8054_v58  ;;  %v8057_v58 = vld [vmem:[#allocation2 + $0x180] sm:$0xff]  ;;  %vm18339_vm11 = vmmov %vm18176_vm0 }
 0x6a8   : > { %v7500_v7 = vpop.f32.mrf.mxu2 }
 0x6a9   : > { %v7904_v4 = vpop.f32.mrf.mxu3  ;;  %v7588_v48 = vadd.f32 %v7500_v7, %v7184_v39  ;;  %v7251_v39 = vld [vmem:[#allocation2 + $0x179] sm:$0xff] }
 0x6aa   : > { %v16020_v33 = vpop.f32.mrf.mxu0  ;;  %v7655_v7 = vld [vmem:[#allocation2 + $0x17a] sm:$0xff] }
 0x6ab   : > { %v16018_v14 = vadd.f32 %v7904_v4, %v7588_v48 }
 0x6ac   : > { %v7102_v18 = vpop.f32.mrf.mxu1 }
 0x6ad   : > { %11616 = vmatmul.msk.f32.gmra.mxu2 %vm18333_vm2, %v7249_v56  ;;  %11714 = vmatmul.msk.f32.gmra.mxu0 %vm18335_vm1, %v8057_v58  ;;  %vm18341_vm2 = vmmov %vm18176_vm0 }
 0x6ae   : > { %11665 = vmatmul.msk.f32.gmra.mxu3 %vm18334_vm10, %v7653_v36  ;;  %vm18342_vm10 = vmmov %vm18176_vm0 }
 0x6af   : > { %11568 = vmatmul.msk.f32.gmra.mxu1 %vm18336_vm3, %v8055_v35  ;;  %v7186_v35 = vadd.f32 %v15657_v12, %v7102_v18  ;;  %vm18343_vm1 = vmmov %vm18176_vm0 }
 0x6b0   : > { %v7503_v17 = vpop.f32.mrf.mxu2  ;;  %vm18344_vm3 = vmmov %vm18176_vm0 }
 0x6b1   : > { %v7907_v10 = vpop.f32.mrf.mxu3  ;;  %v7589_v1 = vadd.f32 %v7503_v17, %v7185_v51  ;;  %v8820_v17 = vld [vmem:[#allocation2 + $0x1a] sm:$0xff] }
 0x6b2   : > { %v16033_v57 = vpop.f32.mrf.mxu0 }
 0x6b3   : > { %v16031_v42 = vadd.f32 %v7907_v10, %v7589_v1  ;;  %v9224_v10 = vld [vmem:[#allocation2 + $0x30] sm:$0xff] }
 0x6b4   : > { %v7105_v50 = vpop.f32.mrf.mxu1 }
 0x6b5   : > { %11617 = vmatmul.msk.f32.gmra.mxu2 %vm18337_vm13, %v7250_v30  ;;  %11715 = vmatmul.msk.f32.gmra.mxu0 %vm18338_vm9, %v8058_v26  ;;  %v7187_v48 = vadd.f32 %v15657_v12, %v7105_v50  ;;  %vm18345_vm13 = vmmov %vm18176_vm0 }
 0x6b6   : > { %11666 = vmatmul.msk.f32.gmra.mxu3 %vm18176_vm0, %v7654_v41  ;;  %vm18346_vm9 = vmmov %vm18176_vm0  ;;  %v16068_v41 = vadd.f32 %v15943_v31, %v15954_v2 }
 0x6b7   : > { %11569 = vmatmul.msk.f32.gmra.mxu1 %vm18339_vm11, %v8056_v53  ;;  %v8416_v53 = vld [vmem:[#allocation2 + $0x19] sm:$0xff]  ;;  %vm18347_vm11 = vmmov %vm18176_vm0 }
 0x6b8   : > { %v7506_v38 = vpop.f32.mrf.mxu2 }
 0x6b9   : > { %v7910_v43 = vpop.f32.mrf.mxu3  ;;  %v7590_v34 = vadd.f32 %v7506_v38, %v7186_v35 }
 0x6ba   : > { %v16046_v60 = vpop.f32.mrf.mxu0 }
 0x6bb   : > { %v16044_v20 = vadd.f32 %v7910_v43, %v7590_v34  ;;  %v8821_v34 = vld [vmem:[#allocation2 + $0x22] sm:$0xff] }
 0x6bc   : > { %v7108_v4 = vpop.f32.mrf.mxu1 }
 0x6bd   : > { %11618 = vmatmul.msk.f32.gmra.mxu2 %vm18340_vm4, %v7251_v39  ;;  %11716 = vmatmul.msk.f32.gmra.mxu0 %vm18342_vm10, %v8059_v24  ;;  %v7188_v30 = vadd.f32 %v15657_v12, %v7108_v4  ;;  %v9225_v39 = vld [vmem:[#allocation2 + $0x38] sm:$0xff]  ;;  %vm18348_vm4 = vmmov %vm18176_vm0  ;;  %v8418_v24 = vld [vmem:[#allocation2 + $0x29] sm:$0xff] }
 0x6be   : > { %11667 = vmatmul.msk.f32.gmra.mxu3 %vm18341_vm2, %v7655_v7  ;;  %v9629_v4 = vld [vmem:[#allocation2 + $0x39] sm:$0xff]  ;;  %vm18349_vm2 = vmmov %vm18176_vm0 }
 0x6bf   : > { %11718 = vmatmul.msk.f32.vlgmr.msrb.gmra.mxu1 %vm18343_vm1, %v8416_v53  ;;  %vm18350_vm10 = vmmov %vm18176_vm0 }
 0x6c0   : > { %v7509_v56 = vpop.f32.mrf.mxu2  ;;  %vm18351_vm1 = vmmov %vm18176_vm0 }
 0x6c1   : > { %v7913_v36 = vpop.f32.mrf.mxu3  ;;  %v7591_v18 = vadd.f32 %v7509_v56, %v7187_v48  ;;  %v16081_v48 = vadd.f32 %v15956_v32, %v15967_v55  ;;  %v16093_v32 = vld [vmem:[%s17353_s4] ss:$0 sm:$0xff] }
 0x6c2   : > { %v16059_v51 = vpop.f32.mrf.mxu0 }
 0x6c3   : > { %v16057_v58 = vadd.f32 %v7913_v36, %v7591_v18 }
 0x6c4   : > { %v7111_v1 = vpop.f32.mrf.mxu1 }
 0x6c5   : > { %11767 = vmatmul.msk.f32.vlgmr.msra.gmra.mxu2 %vm18344_vm3, %v8820_v17  ;;  %11865 = vmatmul.msk.f32.vlgmr.msra.gmra.mxu0 %vm18176_vm0, %v9628_v61  ;;  %v7189_v31 = vadd.f32 %v15657_v12, %v7111_v1  ;;  %v8822_v17 = vld [vmem:[#allocation2 + $0x2a] sm:$0xff]  ;;  %vm18352_vm3 = vmmov %vm18176_vm0  ;;  %v9630_v12 = vld [vmem:[#allocation2 + $0x41] sm:$0xff] }
 0x6c6   : > { %11816 = vmatmul.msk.f32.vlgmr.msra.gmra.mxu3 %vm18345_vm13, %v9224_v10  ;;  %v9226_v10 = vld [vmem:[#allocation2 + $0x40] sm:$0xff]  ;;  %vm18353_vm13 = vmmov %vm18176_vm0 }
 0x6c7   : > { %11719 = vmatmul.msk.f32.gmra.mxu1 %vm18346_vm9, %v8417_v37  ;;  %vm18354_vm9 = vmmov %vm18176_vm0 }
 0x6c8   : > { %v7512_v50 = vpop.f32.mrf.mxu2 }
 0x6c9   : > { %v7916_v26 = vpop.f32.mrf.mxu3  ;;  %v7592_v35 = vadd.f32 %v7512_v50, %v7188_v30  ;;  %v16099_v50 = vadd.f32 %v15969_v3, %v15980_v54 }
 0x6ca   : > { %v16072_v43 = vpop.f32.mrf.mxu0 }
 0x6cb   : > { %v16070_v38 = vadd.f32 %v7916_v26, %v7592_v35 }
 0x6cc   : > { %v7114_v7 = vpop.f32.mrf.mxu1 }
 0x6cd   : > { %11768 = vmatmul.msk.f32.gmra.mxu2 %vm18347_vm11, %v8821_v34  ;;  %11866 = vmatmul.msk.f32.gmra.mxu0 %vm18349_vm2, %v9629_v4  ;;  %v7190_v55 = vadd.f32 %v16093_v32, %v7114_v7  ;;  %vm18355_vm11 = vmmov %vm18176_vm0  ;;  %v9631_v7 = vld [vmem:[#allocation2 + $0x49] sm:$0xff] }
 0x6ce   : > { %11817 = vmatmul.msk.f32.gmra.mxu3 %vm18348_vm4, %v9225_v39  ;;  %v8823_v39 = vld [vmem:[#allocation2 + $0x32] sm:$0xff]  ;;  %vm18356_vm4 = vmmov %vm18176_vm0 }
 0x6cf   : > { %11720 = vmatmul.msk.f32.gmra.mxu1 %vm18350_vm10, %v8418_v24  ;;  %v9227_v24 = vld [vmem:[#allocation2 + $0x48] sm:$0xff]  ;;  %vm18357_vm2 = vmmov %vm18176_vm0 }
 0x6d0   : > { %v7515_v2 = vpop.f32.mrf.mxu2  ;;  %vm18358_vm10 = vmmov %vm18176_vm0 }
 0x6d1   : > { %v7919_v53 = vpop.f32.mrf.mxu3  ;;  %v7593_v56 = vadd.f32 %v7515_v2, %v7189_v31 }
 0x6d2   : > { %v16085_v18 = vpop.f32.mrf.mxu0 }
 0x6d3   : > { %v16083_v36 = vadd.f32 %v7919_v53, %v7593_v56  ;;  %v16112_v53 = vadd.f32 %v15982_v40, %v16001_v9 }
 0x6d4   : > { %v7117_v37 = vpop.f32.mrf.mxu1 }
 0x6d5   : > { %11769 = vmatmul.msk.f32.gmra.mxu2 %vm18351_vm1, %v8822_v17  ;;  %11867 = vmatmul.msk.f32.gmra.mxu0 %vm18353_vm13, %v9630_v12  ;;  %vm18359_vm1 = vmmov %vm18176_vm0 }
 0x6d6   : > { %11818 = vmatmul.msk.f32.gmra.mxu3 %vm18352_vm3, %v9226_v10  ;;  %v8824_v10 = vld [vmem:[#allocation2 + $0x3a] sm:$0xff]  ;;  %vm18360_vm3 = vmmov %vm18176_vm0 }
 0x6d7   : > { %11721 = vmatmul.msk.f32.gmra.mxu1 %vm18176_vm0, %v9628_v61  ;;  %v7191_v61 = vadd.f32 %v16093_v32, %v7117_v37  ;;  %v9632_v37 = vld [vmem:[#allocation2 + $0x51] sm:$0xff]  ;;  %vm18361_vm13 = vmmov %vm18176_vm0 }
 0x6d8   : > { %v7518_v1 = vpop.f32.mrf.mxu2 }
 0x6d9   : > { %v7922_v30 = vpop.f32.mrf.mxu3  ;;  %v7594_v26 = vadd.f32 %v7518_v1, %v7190_v55  ;;  %v9228_v55 = vld [vmem:[#allocation2 + $0x50] sm:$0xff] }
 0x6da   : > { %v16103_v34 = vpop.f32.mrf.mxu0 }
 0x6db   : > { %v16101_v35 = vadd.f32 %v7922_v30, %v7594_v26 }
 0x6dc   : > { %v7120_v31 = vpop.f32.mrf.mxu1 }
 0x6dd   : > { %11770 = vmatmul.msk.f32.gmra.mxu2 %vm18354_vm9, %v8823_v39  ;;  %11868 = vmatmul.msk.f32.gmra.mxu0 %vm18356_vm4, %v9631_v7  ;;  %vm18363_vm9 = vmmov %vm18176_vm0 }
 0x6de   : > { %11819 = vmatmul.msk.f32.gmra.mxu3 %vm18355_vm11, %v9227_v24  ;;  %v16129_v24 = vadd.f32 %v16003_v45, %v16018_v14  ;;  %vm18364_vm11 = vmmov %vm18176_vm0  ;;  %v16142_v14 = vadd.f32 %v16020_v33, %v16031_v42  ;;  %v8827_v42 = vld [vmem:[#allocation2 + $0x52] sm:$0xff] }
 0x6df   : > { %11722 = vmatmul.msk.f32.gmra.mxu1 %vm18357_vm2, %v9629_v4  ;;  %v7192_v4 = vadd.f32 %v16093_v32, %v7120_v31  ;;  %v9633_v31 = vld [vmem:[#allocation2 + $0x59] sm:$0xff]  ;;  %vm18365_vm4 = vmmov %vm18176_vm0 }
 0x6e0   : > { %v7521_v3 = vpop.f32.mrf.mxu2  ;;  %vm18368_vm2 = vmmov %vm18176_vm0 }
 0x6e1   : > { %v7925_v54 = vpop.f32.mrf.mxu3  ;;  %v7595_v2 = vadd.f32 %v7521_v3, %v7191_v61  ;;  %v8825_v61 = vld [vmem:[#allocation2 + $0x42] sm:$0xff]  ;;  %v9229_v3 = vld [vmem:[#allocation2 + $0x58] sm:$0xff] }
 0x6e2   : > { %v16116_v17 = vpop.f32.mrf.mxu0 }
 0x6e3   : > { %v16114_v56 = vadd.f32 %v7925_v54, %v7595_v2 }
 0x6e4   : > { %v7123_v1 = vpop.f32.mrf.mxu1 }
 0x6e5   : > { %11771 = vmatmul.msk.f32.gmra.mxu2 %vm18358_vm10, %v8824_v10  ;;  %11869 = vmatmul.msk.f32.gmra.mxu0 %vm18360_vm3, %v9632_v37  ;;  %vm18369_vm10 = vmmov %vm18176_vm0 }
 0x6e6   : > { %11820 = vmatmul.msk.f32.gmra.mxu3 %vm18359_vm1, %v9228_v55  ;;  %vm18370_vm1 = vmmov %vm18176_vm0 }
 0x6e7   : > { %11723 = vmatmul.msk.f32.gmra.mxu1 %vm18361_vm13, %v9630_v12  ;;  %v7193_v12 = vadd.f32 %v16093_v32, %v7123_v1  ;;  %v9634_v1 = vld [vmem:[#allocation2 + $0x61] sm:$0xff]  ;;  %vm18371_vm3 = vmmov %vm18176_vm0 }
 0x6e8   : > { %v7524_v40 = vpop.f32.mrf.mxu2  ;;  %vm18374_vm13 = vmmov %vm18176_vm0 }
 0x6e9   : > { %v7928_v9 = vpop.f32.mrf.mxu3  ;;  %v7596_v30 = vadd.f32 %v7524_v40, %v7192_v4  ;;  %v8826_v40 = vld [vmem:[#allocation2 + $0x4a] sm:$0xff] }
 0x6ea   : > { %v16125_v39 = vpop.f32.mrf.mxu0 }
 0x6eb   : > { %v16123_v26 = vadd.f32 %v7928_v9, %v7596_v30  ;;  %18362 = vst [vmem:[#allocation27_spill] sm:$0xff] %v16125_v39  ;;  %v9230_v9 = vld [vmem:[#allocation2 + $0x60] sm:$0xff] }
 0x6ec   : > { %v7126_v54 = vpop.f32.mrf.mxu1 }
 0x6ed   : > { %11772 = vmatmul.msk.f32.gmra.mxu2 %vm18176_vm0, %v8825_v61  ;;  %11870 = vmatmul.msk.f32.gmra.mxu0 %vm18364_vm11, %v9633_v31  ;;  %vm18376_vm11 = vmmov %vm18176_vm0 }
 0x6ee   : > { %11821 = vmatmul.msk.f32.gmra.mxu3 %vm18363_vm9, %v9229_v3  ;;  %vm18375_vm9 = vmmov %vm18176_vm0 }
 0x6ef   : > { %11724 = vmatmul.msk.f32.gmra.mxu1 %vm18365_vm4, %v9631_v7  ;;  %v7194_v7 = vadd.f32 %v16093_v32, %v7126_v54  ;;  %vm18379_vm4 = vmmov %vm18176_vm0 }
 0x6f0   : > { %v7527_v2 = vpop.f32.mrf.mxu2 }
 0x6f1   : > { %v7931_v10 = vpop.f32.mrf.mxu3  ;;  %v7597_v55 = vadd.f32 %v7527_v2, %v7193_v12 }
 0x6f2   : > { %v16138_v45 = vpop.f32.mrf.mxu0 }
 0x6f3   : > { %v16136_v4 = vadd.f32 %v7931_v10, %v7597_v55  ;;  %18367 = vst [vmem:[#allocation15_spill] sm:$0xff] %v16138_v45  ;;  %v9231_v10 = vld [vmem:[#allocation2 + $0x68] sm:$0xff] }
 0x6f4   : > { %v7129_v30 = vpop.f32.mrf.mxu1 }
 0x6f5   : > { %18366 = vst [vmem:[#allocation70_spill] sm:$0xff] %v16136_v4  ;;  %11773 = vmatmul.msk.f32.gmra.mxu2 %vm18368_vm2, %v8826_v40  ;;  %11871 = vmatmul.msk.f32.gmra.mxu0 %vm18370_vm1, %v9634_v1  ;;  %v9635_v40 = vld [vmem:[#allocation2 + $0x69] sm:$0xff]  ;;  %v7195_v54 = vadd.f32 %v16093_v32, %v7129_v30  ;;  %vm18380_vm2 = vmmov %vm18176_vm0 }
 0x6f6   : > { %11822 = vmatmul.msk.f32.gmra.mxu3 %vm18369_vm10, %v9230_v9  ;;  %vm18381_vm10 = vmmov %vm18176_vm0 }
 0x6f7   : > { %11725 = vmatmul.msk.f32.gmra.mxu1 %vm18371_vm3, %v9632_v37  ;;  %vm18382_vm1 = vmmov %vm18176_vm0 }
 0x6f8   : > { %v7530_v61 = vpop.f32.mrf.mxu2  ;;  %vm18384_vm3 = vmmov %vm18176_vm0 }
 0x6f9   : > { %v7934_v3 = vpop.f32.mrf.mxu3  ;;  %v7598_v12 = vadd.f32 %v7530_v61, %v7194_v7 }
 0x6fa   : > { %v16151_v33 = vpop.f32.mrf.mxu0 }
 0x6fb   : > { %v16149_v2 = vadd.f32 %v7934_v3, %v7598_v12  ;;  %18373 = vst [vmem:[#allocation71_spill] sm:$0xff] %v16151_v33  ;;  %v8828_v3 = vld [vmem:[#allocation2 + $0x5a] sm:$0xff]  ;;  %v9232_v12 = vld [vmem:[#allocation2 + $0x70] sm:$0xff] }
 0x6fc   : > { %v7132_v55 = vpop.f32.mrf.mxu1 }
 0x6fd   : > { %18372 = vst [vmem:[#allocation13_spill] sm:$0xff] %v16149_v2  ;;  %11774 = vmatmul.msk.f32.gmra.mxu2 %vm18374_vm13, %v8827_v42  ;;  %11872 = vmatmul.msk.f32.gmra.mxu0 %vm18375_vm9, %v9635_v40  ;;  %v9636_v42 = vld [vmem:[#allocation2 + $0x71] sm:$0xff]  ;;  %v7196_v30 = vadd.f32 %v16093_v32, %v7132_v55  ;;  %vm18385_vm13 = vmmov %vm18176_vm0 }
 0x6fe   : > { %11823 = vmatmul.msk.f32.gmra.mxu3 %vm18176_vm0, %v9231_v10  ;;  %vm18387_vm9 = vmmov %vm18176_vm0 }
 0x6ff   : > { %11726 = vmatmul.msk.f32.gmra.mxu1 %vm18376_vm11, %v9633_v31  ;;  %vm18389_vm11 = vmmov %vm18176_vm0 }
 0x700   : > { %v7533_v37 = vpop.f32.mrf.mxu2 }
 0x701   : > { %v7937_v9 = vpop.f32.mrf.mxu3  ;;  %v7599_v7 = vadd.f32 %v7533_v37, %v7195_v54 }
 0x702   : > { %v16160_v45 = vpop.f32.mrf.mxu0 }
 0x703   : > { %v16158_v61 = vadd.f32 %v7937_v9, %v7599_v7  ;;  %18378 = vst [vmem:[#allocation19_spill] sm:$0xff] %v16160_v45  ;;  %v8829_v9 = vld [vmem:[#allocation2 + $0x62] sm:$0xff]  ;;  %v9233_v7 = vld [vmem:[#allocation2 + $0x78] sm:$0xff] }
 0x704   : > { %v7135_v33 = vpop.f32.mrf.mxu1  ;;  %v9234_v45 = vld [vmem:[#allocation2 + $0x80] sm:$0xff] }
 0x705   : > { %18377 = vst [vmem:[#allocation33_spill] sm:$0xff] %v16158_v61  ;;  %11775 = vmatmul.msk.f32.gmra.mxu2 %vm18379_vm4, %v8828_v3  ;;  %11873 = vmatmul.msk.f32.gmra.mxu0 %vm18381_vm10, %v9636_v42  ;;  %v9637_v3 = vld [vmem:[#allocation2 + $0x79] sm:$0xff]  ;;  %vm18390_vm4 = vmmov %vm18176_vm0 }
 0x706   : > { %11824 = vmatmul.msk.f32.gmra.mxu3 %vm18380_vm2, %v9232_v12  ;;  %v7197_v12 = vadd.f32 %v16093_v32, %v7135_v33  ;;  %vm18391_vm2 = vmmov %vm18176_vm0 }
 0x707   : > { %11727 = vmatmul.msk.f32.gmra.mxu1 %vm18382_vm1, %v9634_v1  ;;  %vm18392_vm10 = vmmov %vm18176_vm0 }
 0x708   : > { %v7536_v31 = vpop.f32.mrf.mxu2  ;;  %vm18395_vm1 = vmmov %vm18176_vm0 }
 0x709   : > { %v7940_v10 = vpop.f32.mrf.mxu3  ;;  %v7600_v54 = vadd.f32 %v7536_v31, %v7196_v30 }
 0x70a   : > { %v16173_v55 = vpop.f32.mrf.mxu0 }
 0x70b   : > { %v16167_v37 = vadd.f32 %v7940_v10, %v7600_v54  ;;  %18386 = vst [vmem:[#allocation16_spill] sm:$0xff] %v16173_v55  ;;  %v8830_v54 = vld [vmem:[#allocation2 + $0x6a] sm:$0xff] }
 0x70c   : > { %v7138_v61 = vpop.f32.mrf.mxu1 }
 0x70d   : > { %18383 = vst [vmem:[#allocation72_spill] sm:$0xff] %v16167_v37  ;;  %11776 = vmatmul.msk.f32.gmra.mxu2 %vm18384_vm3, %v8829_v9  ;;  %11874 = vmatmul.msk.f32.gmra.mxu0 %vm18176_vm0, %v9637_v3  ;;  %v9638_v9 = vld [vmem:[#allocation2 + $0x81] sm:$0xff]  ;;  %v7198_v33 = vadd.f32 %v16093_v32, %v7138_v61  ;;  %vm18396_vm3 = vmmov %vm18176_vm0 }
 0x70e   : > { %11825 = vmatmul.msk.f32.gmra.mxu3 %vm18385_vm13, %v9233_v7  ;;  %vm18397_vm13 = vmmov %vm18176_vm0 }
 0x70f   : > { %11728 = vmatmul.msk.f32.gmra.mxu1 %vm18387_vm9, %v9635_v40  ;;  %vm18400_vm9 = vmmov %vm18176_vm0 }
 0x710   : > { %v7539_v1 = vpop.f32.mrf.mxu2 }
 0x711   : > { %v7943_v30 = vpop.f32.mrf.mxu3  ;;  %v7601_v31 = vadd.f32 %v7539_v1, %v7197_v12 }
 0x712   : > { %v16183_v55 = vpop.f32.mrf.mxu0 }
 0x713   : > { %v16176_v10 = vadd.f32 %v7943_v30, %v7601_v31  ;;  %18393 = vst [vmem:[#allocation73_spill] sm:$0xff] %v16183_v55  ;;  %v8831_v30 = vld [vmem:[#allocation2 + $0x72] sm:$0xff]  ;;  %v9235_v31 = vld [vmem:[#allocation2 + $0x88] sm:$0xff] }
 0x714   : > { %v7141_v37 = vpop.f32.mrf.mxu1 }
 0x715   : > { %18388 = vst [vmem:[#allocation41_spill] sm:$0xff] %v16176_v10  ;;  %11777 = vmatmul.msk.f32.gmra.mxu2 %vm18389_vm11, %v8830_v54  ;;  %11875 = vmatmul.msk.f32.gmra.mxu0 %vm18391_vm2, %v9638_v9  ;;  %v7199_v61 = vadd.f32 %v16093_v32, %v7141_v37  ;;  %vm18401_vm11 = vmmov %vm18176_vm0 }
 0x716   : > { %11826 = vmatmul.msk.f32.gmra.mxu3 %vm18390_vm4, %v9234_v45  ;;  %v9639_v45 = vld [vmem:[#allocation2 + $0x89] sm:$0xff]  ;;  %vm18402_vm4 = vmmov %vm18176_vm0 }
 0x717   : > { %11729 = vmatmul.msk.f32.gmra.mxu1 %vm18392_vm10, %v9636_v42  ;;  %vm18403_vm2 = vmmov %vm18176_vm0 }
 0x718   : > { %v7542_v40 = vpop.f32.mrf.mxu2  ;;  %vm18406_vm10 = vmmov %vm18176_vm0 }
 0x719   : > { %v7946_v7 = vpop.f32.mrf.mxu3  ;;  %v7602_v12 = vadd.f32 %v7542_v40, %v7198_v33 }
 0x71a   : > { %v16192_v33 = vpop.f32.mrf.mxu0 }
 0x71b   : > { %v16185_v1 = vadd.f32 %v7946_v7, %v7602_v12  ;;  %18398 = vst [vmem:[#allocation66_spill] sm:$0xff] %v16192_v33  ;;  %v8832_v7 = vld [vmem:[#allocation2 + $0x7a] sm:$0xff]  ;;  %v9236_v12 = vld [vmem:[#allocation2 + $0x90] sm:$0xff] }
 0x71c   : > { %v7144_v10 = vpop.f32.mrf.mxu1 }
 0x71d   : > { %18394 = vst [vmem:[#allocation38_spill] sm:$0xff] %v16185_v1  ;;  %11778 = vmatmul.msk.f32.gmra.mxu2 %vm18395_vm1, %v8831_v30  ;;  %11876 = vmatmul.msk.f32.gmra.mxu0 %vm18397_vm13, %v9639_v45  ;;  %v9640_v30 = vld [vmem:[#allocation2 + $0x91] sm:$0xff]  ;;  %v7200_v37 = vadd.f32 %v16093_v32, %v7144_v10  ;;  %vm18407_vm1 = vmmov %vm18176_vm0 }
 0x71e   : > { %11827 = vmatmul.msk.f32.gmra.mxu3 %vm18396_vm3, %v9235_v31  ;;  %vm18408_vm3 = vmmov %vm18176_vm0 }
 0x71f   : > { %11730 = vmatmul.msk.f32.gmra.mxu1 %vm18176_vm0, %v9637_v3  ;;  %vm18409_vm13 = vmmov %vm18176_vm0 }
 0x720   : > { %v7545_v42 = vpop.f32.mrf.mxu2 }
 0x721   : > { %v7949_v54 = vpop.f32.mrf.mxu3  ;;  %v7603_v55 = vadd.f32 %v7545_v42, %v7199_v61 }
 0x723   : > { %v16194_v40 = vadd.f32 %v7949_v54, %v7603_v55  ;;  %v8833_v55 = vld [vmem:[#allocation2 + $0x82] sm:$0xff]  ;;  %v9237_v54 = vld [vmem:[#allocation2 + $0x98] sm:$0xff] }
 0x724   : > { %v7147_v1 = vpop.f32.mrf.mxu1 }
 0x725   : > { %18399 = vst [vmem:[#allocation65_spill] sm:$0xff] %v16194_v40  ;;  %11779 = vmatmul.msk.f32.gmra.mxu2 %vm18400_vm9, %v8832_v7  ;;  %11877 = vmatmul.msk.f32.gmra.mxu0 %vm18402_vm4, %v9640_v30  ;;  %v16203_v40 = vpop.f32.mrf.mxu0  ;;  %v9641_v7 = vld [vmem:[#allocation2 + $0x99] sm:$0xff]  ;;  %v7201_v10 = vadd.f32 %v16093_v32, %v7147_v1  ;;  %vm18411_vm9 = vmmov %vm18176_vm0 }
 0x726   : > { %11828 = vmatmul.msk.f32.gmra.mxu3 %vm18401_vm11, %v9236_v12  ;;  %18405 = vst [vmem:[#allocation43_spill] sm:$0xff] %v16203_v40  ;;  %vm18412_vm11 = vmmov %vm18176_vm0 }
 0x727   : > { %11731 = vmatmul.msk.f32.gmra.mxu1 %vm18403_vm2, %v9638_v9  ;;  %vm18414_vm4 = vmmov %vm18176_vm0 }
 0x728   : > { %v7548_v3 = vpop.f32.mrf.mxu2  ;;  %vm18416_vm2 = vmmov %vm18176_vm0 }
 0x729   : > { %v7952_v31 = vpop.f32.mrf.mxu3  ;;  %v7604_v61 = vadd.f32 %v7548_v3, %v7200_v37 }
 0x72b   : > { %v16201_v42 = vadd.f32 %v7952_v31, %v7604_v61  ;;  %v8834_v31 = vld [vmem:[#allocation2 + $0x8a] sm:$0xff]  ;;  %v9238_v61 = vld [vmem:[#allocation2 + $0xa0] sm:$0xff] }
 0x72c   : > { %v7150_v33 = vpop.f32.mrf.mxu1 }
 0x72d   : > { %18404 = vst [vmem:[#allocation74_spill] sm:$0xff] %v16201_v42  ;;  %11780 = vmatmul.msk.f32.gmra.mxu2 %vm18406_vm10, %v8833_v55  ;;  %11878 = vmatmul.msk.f32.gmra.mxu0 %vm18408_vm3, %v9641_v7  ;;  %v9642_v55 = vld [vmem:[#allocation2 + $0xa1] sm:$0xff]  ;;  %v7202_v1 = vadd.f32 %v16093_v32, %v7150_v33  ;;  %vm18417_vm10 = vmmov %vm18176_vm0 }
 0x72e   : > { %11829 = vmatmul.msk.f32.gmra.mxu3 %vm18407_vm1, %v9237_v54  ;;  %v16215_v54 = vpop.f32.mrf.mxu0  ;;  %vm18418_vm1 = vmmov %vm18176_vm0 }
 0x72f   : > { %11732 = vmatmul.msk.f32.gmra.mxu1 %vm18409_vm13, %v9639_v45  ;;  %18413 = vst [vmem:[#allocation67_spill] sm:$0xff] %v16215_v54  ;;  %vm18419_vm3 = vmmov %vm18176_vm0 }
 0x730   : > { %v7551_v9 = vpop.f32.mrf.mxu2  ;;  %vm18422_vm13 = vmmov %vm18176_vm0 }
 0x731   : > { %v7955_v12 = vpop.f32.mrf.mxu3  ;;  %v7605_v37 = vadd.f32 %v7551_v9, %v7201_v10 }
 0x733   : > { %v16210_v3 = vadd.f32 %v7955_v12, %v7605_v37  ;;  %v8835_v37 = vld [vmem:[#allocation2 + $0x92] sm:$0xff] }
 0x734   : > { %v7153_v42 = vpop.f32.mrf.mxu1 }
 0x735   : > { %18410 = vst [vmem:[#allocation68_spill] sm:$0xff] %v16210_v3  ;;  %11781 = vmatmul.msk.f32.gmra.mxu2 %vm18176_vm0, %v8834_v31  ;;  %11879 = vmatmul.msk.f32.gmra.mxu0 %vm18412_vm11, %v9642_v55  ;;  %v9239_v3 = vld [vmem:[#allocation2 + $0xa8] sm:$0xff]  ;;  %vm18424_vm11 = vmmov %vm18176_vm0 }
 0x736   : > { %11830 = vmatmul.msk.f32.gmra.mxu3 %vm18411_vm9, %v9238_v61  ;;  %v9643_v31 = vld [vmem:[#allocation2 + $0xa9] sm:$0xff]  ;;  %v7203_v61 = vadd.f32 %v16093_v32, %v7153_v42  ;;  %v16226_v54 = vpop.f32.mrf.mxu0  ;;  %vm18423_vm9 = vmmov %vm18176_vm0 }
 0x737   : > { %11733 = vmatmul.msk.f32.gmra.mxu1 %vm18414_vm4, %v9640_v30  ;;  %18420 = vst [vmem:[#allocation75_spill] sm:$0xff] %v16226_v54  ;;  %vm18426_vm4 = vmmov %vm18176_vm0 }
 0x738   : > { %v7554_v45 = vpop.f32.mrf.mxu2 }
 0x739   : > { %v7958_v10 = vpop.f32.mrf.mxu3  ;;  %v7606_v9 = vadd.f32 %v7554_v45, %v7202_v1 }
 0x73b   : > { %v16219_v12 = vadd.f32 %v7958_v10, %v7606_v9  ;;  %v8836_v10 = vld [vmem:[#allocation2 + $0x9a] sm:$0xff]  ;;  %v9240_v9 = vld [vmem:[#allocation2 + $0xb0] sm:$0xff] }
 0x73c   : > { %v8628_v40 = vpop.f32.mrf.mxu1 }
 0x73d   : > { %18415 = vst [vmem:[#allocation64_spill] sm:$0xff] %v16219_v12  ;;  %11782 = vmatmul.msk.f32.gmra.mxu2 %vm18416_vm2, %v8835_v37  ;;  %11880 = vmatmul.msk.f32.gmra.mxu0 %vm18418_vm1, %v9643_v31  ;;  %v8772_v32 = vadd.f32 %v8628_v40, %v15713_v29  ;;  %vm18427_vm2 = vmmov %vm18176_vm0 }
 0x73e   : > { %11831 = vmatmul.msk.f32.gmra.mxu3 %vm18417_vm10, %v9239_v3  ;;  %v9644_v3 = vld [vmem:[#allocation2 + $0xb1] sm:$0xff]  ;;  %vm18428_vm10 = vmmov %vm18176_vm0 }
 0x73f   : > { %11734 = vmatmul.msk.f32.gmra.mxu1 %vm18419_vm3, %v9641_v7  ;;  %vm18429_vm1 = vmmov %vm18176_vm0 }
 0x740   : > { %v7557_v33 = vpop.f32.mrf.mxu2  ;;  %vm18430_vm3 = vmmov %vm18176_vm0 }
 0x741   : > { %v7961_v30 = vpop.f32.mrf.mxu3  ;;  %v7607_v1 = vadd.f32 %v7557_v33, %v7203_v61  ;;  %v16235_v61 = vpop.f32.mrf.mxu0 }
 0x742   : > { %18425 = vst [vmem:[#allocation69_spill] sm:$0xff] %v16235_v61 }
 0x743   : > { %v16228_v45 = vadd.f32 %v7961_v30, %v7607_v1  ;;  %v8837_v30 = vld [vmem:[#allocation2 + $0xa2] sm:$0xff]  ;;  %v9241_v1 = vld [vmem:[#allocation2 + $0xb8] sm:$0xff] }
 0x744   : > { %v8631_v12 = vpop.f32.mrf.mxu1 }
 0x745   : > { %18421 = vst [vmem:[#allocation6_spill] sm:$0xff] %v16228_v45  ;;  %11783 = vmatmul.msk.f32.gmra.mxu2 %vm18422_vm13, %v8836_v10  ;;  %11881 = vmatmul.msk.f32.gmra.mxu0 %vm18423_vm9, %v9644_v3  ;;  %v9645_v10 = vld [vmem:[#allocation2 + $0xb9] sm:$0xff]  ;;  %v8773_v29 = vadd.f32 %v8631_v12, %v15726_v8  ;;  %vm18431_vm13 = vmmov %vm18176_vm0 }
 0x746   : > { %11832 = vmatmul.msk.f32.gmra.mxu3 %vm18176_vm0, %v9240_v9  ;;  %vm18432_vm9 = vmmov %vm18176_vm0 }
 0x747   : > { %11735 = vmatmul.msk.f32.gmra.mxu1 %vm18424_vm11, %v9642_v55  ;;  %vm18433_vm11 = vmmov %vm18176_vm0 }
 0x748   : > { %v9032_v42 = vpop.f32.mrf.mxu2 }
 0x749   : > { %v9436_v7 = vpop.f32.mrf.mxu3  ;;  %v9176_v37 = vadd.f32 %v9032_v42, %v8772_v32  ;;  %v8838_v42 = vld [vmem:[#allocation2 + $0xaa] sm:$0xff]  ;;  %v16246_v61 = vpop.f32.mrf.mxu0 }
 0x74b   : > { %v16237_v33 = vadd.f32 %v9436_v7, %v9176_v37  ;;  %v9242_v7 = vld [vmem:[#allocation2 + $0xc0] sm:$0xff] }
 0x74c   : > { %v8634_v45 = vpop.f32.mrf.mxu1 }
 0x74d   : > { %11784 = vmatmul.msk.f32.gmra.mxu2 %vm18426_vm4, %v8837_v30  ;;  %11882 = vmatmul.msk.f32.gmra.mxu0 %vm18428_vm10, %v9645_v10  ;;  %v9646_v30 = vld [vmem:[#allocation2 + $0xc1] sm:$0xff]  ;;  %v8774_v8 = vadd.f32 %v8634_v45, %v15739_v52  ;;  %vm18434_vm4 = vmmov %vm18176_vm0 }
 0x74e   : > { %11833 = vmatmul.msk.f32.gmra.mxu3 %vm18427_vm2, %v9241_v1  ;;  %vm18435_vm2 = vmmov %vm18176_vm0 }
 0x74f   : > { %11736 = vmatmul.msk.f32.gmra.mxu1 %vm18429_vm1, %v9643_v31  ;;  %vm18436_vm10 = vmmov %vm18176_vm0 }
 0x750   : > { %v9035_v40 = vpop.f32.mrf.mxu2  ;;  %vm18437_vm1 = vmmov %vm18176_vm0 }
 0x751   : > { %v9439_v55 = vpop.f32.mrf.mxu3  ;;  %v9177_v9 = vadd.f32 %v9035_v40, %v8773_v29  ;;  %v8839_v40 = vld [vmem:[#allocation2 + $0xb2] sm:$0xff] }
 0x753   : > { %v16244_v32 = vadd.f32 %v9439_v55, %v9177_v9  ;;  %v9243_v55 = vld [vmem:[#allocation2 + $0xc8] sm:$0xff] }
 0x754   : > { %v8637_v37 = vpop.f32.mrf.mxu1 }
 0x755   : > { %11785 = vmatmul.msk.f32.gmra.mxu2 %vm18430_vm3, %v8838_v42  ;;  %11883 = vmatmul.msk.f32.gmra.mxu0 %vm18176_vm0, %v9646_v30  ;;  %v9647_v42 = vld [vmem:[#allocation2 + $0xc9] sm:$0xff]  ;;  %v8775_v52 = vadd.f32 %v8637_v37, %v15752_v28  ;;  %vm18438_vm3 = vmmov %vm18176_vm0 }
 0x756   : > { %11834 = vmatmul.msk.f32.gmra.mxu3 %vm18431_vm13, %v9242_v7  ;;  %v16258_v7 = vpop.f32.mrf.mxu0  ;;  %vm18439_vm13 = vmmov %vm18176_vm0 }
 0x757   : > { %11737 = vmatmul.msk.f32.gmra.mxu1 %vm18432_vm9, %v9644_v3  ;;  %vm18440_vm9 = vmmov %vm18176_vm0 }
 0x758   : > { %v9038_v12 = vpop.f32.mrf.mxu2 }
 0x759   : > { %v9442_v31 = vpop.f32.mrf.mxu3  ;;  %v9178_v1 = vadd.f32 %v9038_v12, %v8774_v8 }
 0x75b   : > { %v16253_v29 = vadd.f32 %v9442_v31, %v9178_v1  ;;  %v8840_v31 = vld [vmem:[#allocation2 + $0xba] sm:$0xff]  ;;  %v9244_v1 = vld [vmem:[#allocation2 + $0xd0] sm:$0xff] }
 0x75c   : > { %v8640_v9 = vpop.f32.mrf.mxu1 }
 0x75d   : > { %11786 = vmatmul.msk.f32.gmra.mxu2 %vm18433_vm11, %v8839_v40  ;;  %11884 = vmatmul.msk.f32.gmra.mxu0 %vm18435_vm2, %v9647_v42  ;;  %v9648_v40 = vld [vmem:[#allocation2 + $0xd1] sm:$0xff]  ;;  %vm18441_vm11 = vmmov %vm18176_vm0 }
 0x75e   : > { %11835 = vmatmul.msk.f32.gmra.mxu3 %vm18434_vm4, %v9243_v55  ;;  %v8776_v55 = vadd.f32 %v8640_v9, %v15769_v46  ;;  %v16269_v37 = vpop.f32.mrf.mxu0  ;;  %vm18442_vm4 = vmmov %vm18176_vm0 }
 0x75f   : > { %11738 = vmatmul.msk.f32.gmra.mxu1 %vm18436_vm10, %v9645_v10  ;;  %vm18443_vm2 = vmmov %vm18176_vm0 }
 0x760   : > { %v9041_v45 = vpop.f32.mrf.mxu2  ;;  %vm18444_vm10 = vmmov %vm18176_vm0 }
 0x761   : > { %v9445_v3 = vpop.f32.mrf.mxu3  ;;  %v9179_v8 = vadd.f32 %v9041_v45, %v8775_v52 }
 0x763   : > { %v16262_v12 = vadd.f32 %v9445_v3, %v9179_v8  ;;  %v8841_v3 = vld [vmem:[#allocation2 + $0xc2] sm:$0xff]  ;;  %v9245_v8 = vld [vmem:[#allocation2 + $0xd8] sm:$0xff] }
 0x764   : > { %v8643_v54 = vpop.f32.mrf.mxu1 }
 0x765   : > { %11787 = vmatmul.msk.f32.gmra.mxu2 %vm18437_vm1, %v8840_v31  ;;  %11885 = vmatmul.msk.f32.gmra.mxu0 %vm18439_vm13, %v9648_v40  ;;  %v9649_v31 = vld [vmem:[#allocation2 + $0xd9] sm:$0xff]  ;;  %v8777_v46 = vadd.f32 %v8643_v54, %v15782_v11  ;;  %vm18445_vm1 = vmmov %vm18176_vm0 }
 0x766   : > { %11836 = vmatmul.msk.f32.gmra.mxu3 %vm18438_vm3, %v9244_v1  ;;  %vm18446_vm3 = vmmov %vm18176_vm0 }
 0x767   : > { %11739 = vmatmul.msk.f32.gmra.mxu1 %vm18176_vm0, %v9646_v30  ;;  %vm18447_vm13 = vmmov %vm18176_vm0 }
 0x768   : > { %v9044_v28 = vpop.f32.mrf.mxu2 }
 0x769   : > { %v9448_v10 = vpop.f32.mrf.mxu3  ;;  %v9180_v52 = vadd.f32 %v9044_v28, %v8776_v55  ;;  %v16278_v55 = vpop.f32.mrf.mxu0 }
 0x76b   : > { %v16271_v45 = vadd.f32 %v9448_v10, %v9180_v52  ;;  %v8842_v10 = vld [vmem:[#allocation2 + $0xca] sm:$0xff]  ;;  %v9246_v52 = vld [vmem:[#allocation2 + $0xe0] sm:$0xff] }
 0x76c   : > { %v8646_v2 = vpop.f32.mrf.mxu1 }
 0x76d   : > { %11788 = vmatmul.msk.f32.gmra.mxu2 %vm18440_vm9, %v8841_v3  ;;  %11886 = vmatmul.msk.f32.gmra.mxu0 %vm18442_vm4, %v9649_v31  ;;  %v9650_v3 = vld [vmem:[#allocation2 + $0xe1] sm:$0xff]  ;;  %v8778_v11 = vadd.f32 %v8646_v2, %v15797_v44  ;;  %vm18448_vm9 = vmmov %vm18176_vm0 }
 0x76e   : > { %11837 = vmatmul.msk.f32.gmra.mxu3 %vm18441_vm11, %v9245_v8  ;;  %vm18449_vm11 = vmmov %vm18176_vm0 }
 0x76f   : > { %11740 = vmatmul.msk.f32.gmra.mxu1 %vm18443_vm2, %v9647_v42  ;;  %vm18450_vm4 = vmmov %vm18176_vm0 }
 0x770   : > { %v9047_v30 = vpop.f32.mrf.mxu2  ;;  %vm18452_vm2 = vmmov %vm18176_vm0 }
 0x771   : > { %v9451_v9 = vpop.f32.mrf.mxu3  ;;  %v9181_v1 = vadd.f32 %v9047_v30, %v8777_v46  ;;  %v8843_v30 = vld [vmem:[#allocation2 + $0xd2] sm:$0xff]  ;;  %v16289_v4 = vpop.f32.mrf.mxu0 }
 0x773   : > { %v16280_v28 = vadd.f32 %v9451_v9, %v9181_v1  ;;  %v9247_v9 = vld [vmem:[#allocation2 + $0xe8] sm:$0xff] }
 0x774   : > { %v8649_v39 = vpop.f32.mrf.mxu1 }
 0x775   : > { %11789 = vmatmul.msk.f32.gmra.mxu2 %vm18444_vm10, %v8842_v10  ;;  %11887 = vmatmul.msk.f32.gmra.mxu0 %vm18446_vm3, %v9650_v3  ;;  %v9651_v10 = vld [vmem:[#allocation2 + $0xe9] sm:$0xff]  ;;  %v8779_v44 = vadd.f32 %v8649_v39, %v15811_v21  ;;  %vm18453_vm10 = vmmov %vm18176_vm0 }
 0x776   : > { %11838 = vmatmul.msk.f32.gmra.mxu3 %vm18445_vm1, %v9246_v52  ;;  %vm18454_vm1 = vmmov %vm18176_vm0 }
 0x777   : > { %11741 = vmatmul.msk.f32.gmra.mxu1 %vm18447_vm13, %v9648_v40  ;;  %vm18455_vm3 = vmmov %vm18176_vm0 }
 0x778   : > { %v9050_v54 = vpop.f32.mrf.mxu2  ;;  %vm18457_vm13 = vmmov %vm18176_vm0 }
 0x779   : > { %v9454_v42 = vpop.f32.mrf.mxu3  ;;  %v9182_v8 = vadd.f32 %v9050_v54, %v8778_v11  ;;  %v8844_v54 = vld [vmem:[#allocation2 + $0xda] sm:$0xff] }
 0x77b   : > { %v16287_v46 = vadd.f32 %v9454_v42, %v9182_v8  ;;  %v9248_v42 = vld [vmem:[#allocation2 + $0xf0] sm:$0xff] }
 0x77c   : > { %v8652_v1 = vpop.f32.mrf.mxu1 }
 0x77d   : > { %11790 = vmatmul.msk.f32.gmra.mxu2 %vm18176_vm0, %v8843_v30  ;;  %11888 = vmatmul.msk.f32.gmra.mxu0 %vm18449_vm11, %v9651_v10  ;;  %v9652_v30 = vld [vmem:[#allocation2 + $0xf1] sm:$0xff]  ;;  %v8780_v21 = vadd.f32 %v8652_v1, %v15824_v19  ;;  %vm18459_vm11 = vmmov %vm18176_vm0 }
 0x77e   : > { %11839 = vmatmul.msk.f32.gmra.mxu3 %vm18448_vm9, %v9247_v9  ;;  %v16301_v9 = vpop.f32.mrf.mxu0  ;;  %vm18458_vm9 = vmmov %vm18176_vm0 }
 0x77f   : > { %11742 = vmatmul.msk.f32.gmra.mxu1 %vm18450_vm4, %v9649_v31  ;;  %vm18461_vm4 = vmmov %vm18176_vm0 }
 0x780   : > { %v9053_v2 = vpop.f32.mrf.mxu2 }
 0x781   : > { %v9457_v40 = vpop.f32.mrf.mxu3  ;;  %v9183_v52 = vadd.f32 %v9053_v2, %v8779_v44 }
 0x783   : > { %v16296_v11 = vadd.f32 %v9457_v40, %v9183_v52  ;;  %v8845_v40 = vld [vmem:[#allocation2 + $0xe2] sm:$0xff]  ;;  %v9249_v52 = vld [vmem:[#allocation2 + $0xf8] sm:$0xff] }
 0x784   : > { %v8655_v8 = vpop.f32.mrf.mxu1 }
 0x785   : > { %18451 = vst [vmem:[#allocation76_spill] sm:$0xff] %v16296_v11  ;;  %11791 = vmatmul.msk.f32.gmra.mxu2 %vm18452_vm2, %v8844_v54  ;;  %11889 = vmatmul.msk.f32.gmra.mxu0 %vm18454_vm1, %v9652_v30  ;;  %v9653_v54 = vld [vmem:[#allocation2 + $0xf9] sm:$0xff]  ;;  %vm18462_vm2 = vmmov %vm18176_vm0 }
 0x786   : > { %11840 = vmatmul.msk.f32.gmra.mxu3 %vm18453_vm10, %v9248_v42  ;;  %v8781_v42 = vadd.f32 %v8655_v8, %v15839_v25  ;;  %v16312_v1 = vpop.f32.mrf.mxu0  ;;  %vm18463_vm10 = vmmov %vm18176_vm0 }
 0x787   : > { %11743 = vmatmul.msk.f32.gmra.mxu1 %vm18455_vm3, %v9650_v3  ;;  %vm18464_vm1 = vmmov %vm18176_vm0 }
 0x788   : > { %v9056_v39 = vpop.f32.mrf.mxu2  ;;  %vm18466_vm3 = vmmov %vm18176_vm0 }
 0x789   : > { %v9460_v31 = vpop.f32.mrf.mxu3  ;;  %v9184_v44 = vadd.f32 %v9056_v39, %v8780_v21 }
 0x78b   : > { %v16305_v2 = vadd.f32 %v9460_v31, %v9184_v44  ;;  %v8846_v31 = vld [vmem:[#allocation2 + $0xea] sm:$0xff]  ;;  %v9250_v44 = vld [vmem:[#allocation2 + $0x100] sm:$0xff] }
 0x78c   : > { %v8658_v11 = vpop.f32.mrf.mxu1 }
 0x78d   : > { %18456 = vst [vmem:[#allocation77_spill] sm:$0xff] %v16305_v2  ;;  %11792 = vmatmul.msk.f32.gmra.mxu2 %vm18457_vm13, %v8845_v40  ;;  %11890 = vmatmul.msk.f32.gmra.mxu0 %vm18458_vm9, %v9653_v54  ;;  %v9654_v40 = vld [vmem:[#allocation2 + $0x101] sm:$0xff]  ;;  %v8782_v25 = vadd.f32 %v8658_v11, %v15852_v49  ;;  %vm18467_vm13 = vmmov %vm18176_vm0 }
 0x78e   : > { %11841 = vmatmul.msk.f32.gmra.mxu3 %vm18176_vm0, %v9249_v52  ;;  %vm18468_vm9 = vmmov %vm18176_vm0 }
 0x78f   : > { %11744 = vmatmul.msk.f32.gmra.mxu1 %vm18459_vm11, %v9651_v10  ;;  %vm18469_vm11 = vmmov %vm18176_vm0 }
 0x790   : > { %v9059_v19 = vpop.f32.mrf.mxu2 }
 0x791   : > { %v9463_v3 = vpop.f32.mrf.mxu3  ;;  %v9185_v21 = vadd.f32 %v9059_v19, %v8781_v42  ;;  %v16321_v42 = vpop.f32.mrf.mxu0 }
 0x793   : > { %v16314_v39 = vadd.f32 %v9463_v3, %v9185_v21  ;;  %v8847_v3 = vld [vmem:[#allocation2 + $0xf2] sm:$0xff]  ;;  %v9251_v21 = vld [vmem:[#allocation2 + $0x108] sm:$0xff] }
 0x794   : > { %v8661_v2 = vpop.f32.mrf.mxu1 }
 0x795   : > { %18460 = vst [vmem:[#allocation78_spill] sm:$0xff] %v16314_v39  ;;  %11793 = vmatmul.msk.f32.gmra.mxu2 %vm18461_vm4, %v8846_v31  ;;  %11891 = vmatmul.msk.f32.gmra.mxu0 %vm18463_vm10, %v9654_v40  ;;  %v9655_v31 = vld [vmem:[#allocation2 + $0x109] sm:$0xff]  ;;  %v8783_v49 = vadd.f32 %v8661_v2, %v15865_v22  ;;  %vm18470_vm4 = vmmov %vm18176_vm0 }
 0x796   : > { %11842 = vmatmul.msk.f32.gmra.mxu3 %vm18462_vm2, %v9250_v44  ;;  %vm18471_vm2 = vmmov %vm18176_vm0 }
 0x797   : > { %11745 = vmatmul.msk.f32.gmra.mxu1 %vm18464_vm1, %v9652_v30  ;;  %vm18472_vm10 = vmmov %vm18176_vm0 }
 0x798   : > { %v9062_v10 = vpop.f32.mrf.mxu2  ;;  %vm18474_vm1 = vmmov %vm18176_vm0 }
 0x799   : > { %v9466_v8 = vpop.f32.mrf.mxu3  ;;  %v9186_v52 = vadd.f32 %v9062_v10, %v8782_v25  ;;  %v8848_v10 = vld [vmem:[#allocation2 + $0xfa] sm:$0xff] }
 0x79b   : > { %v16323_v19 = vadd.f32 %v9466_v8, %v9186_v52  ;;  %v9252_v8 = vld [vmem:[#allocation2 + $0x110] sm:$0xff] }
 0x79c   : > { %v8664_v39 = vpop.f32.mrf.mxu1 }
 0x79d   : > { %18465 = vst [vmem:[#allocation79_spill] sm:$0xff] %v16323_v19  ;;  %11794 = vmatmul.msk.f32.gmra.mxu2 %vm18466_vm3, %v8847_v3  ;;  %11892 = vmatmul.msk.f32.gmra.mxu0 %vm18176_vm0, %v9655_v31  ;;  %v16332_v19 = vpop.f32.mrf.mxu0  ;;  %v9656_v3 = vld [vmem:[#allocation2 + $0x111] sm:$0xff]  ;;  %v8784_v22 = vadd.f32 %v8664_v39, %v15882_v59  ;;  %vm18475_vm3 = vmmov %vm18176_vm0 }
 0x79e   : > { %11843 = vmatmul.msk.f32.gmra.mxu3 %vm18467_vm13, %v9251_v21  ;;  %vm18476_vm13 = vmmov %vm18176_vm0 }
 0x79f   : > { %11746 = vmatmul.msk.f32.gmra.mxu1 %vm18468_vm9, %v9653_v54  ;;  %vm18478_vm9 = vmmov %vm18176_vm0 }
 0x7a0   : > { %v9065_v11 = vpop.f32.mrf.mxu2 }
 0x7a1   : > { %v9469_v30 = vpop.f32.mrf.mxu3  ;;  %v9187_v44 = vadd.f32 %v9065_v11, %v8783_v49  ;;  %v8849_v11 = vld [vmem:[#allocation2 + $0x102] sm:$0xff] }
 0x7a3   : > { %v16330_v25 = vadd.f32 %v9469_v30, %v9187_v44  ;;  %v9253_v30 = vld [vmem:[#allocation2 + $0x118] sm:$0xff] }
 0x7a4   : > { %v8667_v52 = vpop.f32.mrf.mxu1 }
 0x7a5   : > { %11795 = vmatmul.msk.f32.gmra.mxu2 %vm18469_vm11, %v8848_v10  ;;  %11893 = vmatmul.msk.f32.gmra.mxu0 %vm18471_vm2, %v9656_v3  ;;  %v9657_v10 = vld [vmem:[#allocation2 + $0x119] sm:$0xff]  ;;  %v8785_v59 = vadd.f32 %v8667_v52, %v15895_v6  ;;  %vm18479_vm11 = vmmov %vm18176_vm0 }
 0x7a6   : > { %11844 = vmatmul.msk.f32.gmra.mxu3 %vm18470_vm4, %v9252_v8  ;;  %v16344_v8 = vpop.f32.mrf.mxu0  ;;  %vm18480_vm4 = vmmov %vm18176_vm0 }
 0x7a7   : > { %11747 = vmatmul.msk.f32.gmra.mxu1 %vm18472_vm10, %v9654_v40  ;;  %vm18481_vm2 = vmmov %vm18176_vm0 }
 0x7a8   : > { %v9068_v2 = vpop.f32.mrf.mxu2  ;;  %vm18483_vm10 = vmmov %vm18176_vm0 }
 0x7a9   : > { %v9472_v54 = vpop.f32.mrf.mxu3  ;;  %v9188_v21 = vadd.f32 %v9068_v2, %v8784_v22 }
 0x7ab   : > { %v16339_v49 = vadd.f32 %v9472_v54, %v9188_v21  ;;  %v8850_v54 = vld [vmem:[#allocation2 + $0x10a] sm:$0xff]  ;;  %v9254_v21 = vld [vmem:[#allocation2 + $0x120] sm:$0xff] }
 0x7ac   : > { %v8670_v44 = vpop.f32.mrf.mxu1 }
 0x7ad   : > { %18473 = vst [vmem:[#allocation80_spill] sm:$0xff] %v16339_v49  ;;  %11796 = vmatmul.msk.f32.gmra.mxu2 %vm18474_vm1, %v8849_v11  ;;  %11894 = vmatmul.msk.f32.gmra.mxu0 %vm18476_vm13, %v9657_v10  ;;  %v9658_v11 = vld [vmem:[#allocation2 + $0x121] sm:$0xff]  ;;  %vm18484_vm1 = vmmov %vm18176_vm0 }
 0x7ae   : > { %11845 = vmatmul.msk.f32.gmra.mxu3 %vm18475_vm3, %v9253_v30  ;;  %v8786_v30 = vadd.f32 %v8670_v44, %v15908_v15  ;;  %v16355_v52 = vpop.f32.mrf.mxu0  ;;  %vm18485_vm3 = vmmov %vm18176_vm0 }
 0x7af   : > { %11748 = vmatmul.msk.f32.gmra.mxu1 %vm18176_vm0, %v9655_v31  ;;  %vm18486_vm13 = vmmov %vm18176_vm0 }
 0x7b0   : > { %v9071_v39 = vpop.f32.mrf.mxu2 }
 0x7b1   : > { %v9475_v40 = vpop.f32.mrf.mxu3  ;;  %v9189_v22 = vadd.f32 %v9071_v39, %v8785_v59 }
 0x7b3   : > { %v16348_v2 = vadd.f32 %v9475_v40, %v9189_v22  ;;  %v8851_v40 = vld [vmem:[#allocation2 + $0x112] sm:$0xff]  ;;  %v9255_v22 = vld [vmem:[#allocation2 + $0x128] sm:$0xff] }
 0x7b4   : > { %v8673_v49 = vpop.f32.mrf.mxu1 }
 0x7b5   : > { %18477 = vst [vmem:[#allocation81_spill] sm:$0xff] %v16348_v2  ;;  %11797 = vmatmul.msk.f32.gmra.mxu2 %vm18478_vm9, %v8850_v54  ;;  %11895 = vmatmul.msk.f32.gmra.mxu0 %vm18480_vm4, %v9658_v11  ;;  %v9659_v54 = vld [vmem:[#allocation2 + $0x129] sm:$0xff]  ;;  %v8787_v15 = vadd.f32 %v8673_v49, %v15924_v27  ;;  %vm18488_vm9 = vmmov %vm18176_vm0 }
 0x7b6   : > { %11846 = vmatmul.msk.f32.gmra.mxu3 %vm18479_vm11, %v9254_v21  ;;  %vm18489_vm11 = vmmov %vm18176_vm0 }
 0x7b7   : > { %11749 = vmatmul.msk.f32.gmra.mxu1 %vm18481_vm2, %v9656_v3  ;;  %vm18490_vm4 = vmmov %vm18176_vm0 }
 0x7b8   : > { %v9074_v6 = vpop.f32.mrf.mxu2  ;;  %vm18491_vm2 = vmmov %vm18176_vm0 }
 0x7b9   : > { %v9478_v31 = vpop.f32.mrf.mxu3  ;;  %v9190_v59 = vadd.f32 %v9074_v6, %v8786_v30  ;;  %v16364_v30 = vpop.f32.mrf.mxu0 }
 0x7bb   : > { %v16357_v39 = vadd.f32 %v9478_v31, %v9190_v59  ;;  %v8852_v31 = vld [vmem:[#allocation2 + $0x11a] sm:$0xff]  ;;  %v9256_v59 = vld [vmem:[#allocation2 + $0x130] sm:$0xff] }
 0x7bc   : > { %v8676_v2 = vpop.f32.mrf.mxu1 }
 0x7bd   : > { %18482 = vst [vmem:[#allocation82_spill] sm:$0xff] %v16357_v39  ;;  %11798 = vmatmul.msk.f32.gmra.mxu2 %vm18483_vm10, %v8851_v40  ;;  %11896 = vmatmul.msk.f32.gmra.mxu0 %vm18485_vm3, %v9659_v54  ;;  %v9660_v40 = vld [vmem:[#allocation2 + $0x131] sm:$0xff]  ;;  %v8788_v27 = vadd.f32 %v8676_v2, %v15939_v62  ;;  %vm18492_vm10 = vmmov %vm18176_vm0 }
 0x7be   : > { %11847 = vmatmul.msk.f32.gmra.mxu3 %vm18484_vm1, %v9255_v22  ;;  %vm18493_vm1 = vmmov %vm18176_vm0 }
 0x7bf   : > { %11750 = vmatmul.msk.f32.gmra.mxu1 %vm18486_vm13, %v9657_v10  ;;  %vm18494_vm3 = vmmov %vm18176_vm0 }
 0x7c0   : > { %v9077_v3 = vpop.f32.mrf.mxu2  ;;  %vm18496_vm13 = vmmov %vm18176_vm0 }
 0x7c1   : > { %v9481_v44 = vpop.f32.mrf.mxu3  ;;  %v9191_v21 = vadd.f32 %v9077_v3, %v8787_v15  ;;  %v8853_v3 = vld [vmem:[#allocation2 + $0x122] sm:$0xff] }
 0x7c3   : > { %v16366_v6 = vadd.f32 %v9481_v44, %v9191_v21  ;;  %v9257_v44 = vld [vmem:[#allocation2 + $0x138] sm:$0xff] }
 0x7c4   : > { %v8679_v39 = vpop.f32.mrf.mxu1 }
 0x7c5   : > { %18487 = vst [vmem:[#allocation83_spill] sm:$0xff] %v16366_v6  ;;  %11799 = vmatmul.msk.f32.gmra.mxu2 %vm18176_vm0, %v8852_v31  ;;  %11897 = vmatmul.msk.f32.gmra.mxu0 %vm18489_vm11, %v9660_v40  ;;  %v16375_v6 = vpop.f32.mrf.mxu0  ;;  %v9661_v31 = vld [vmem:[#allocation2 + $0x139] sm:$0xff]  ;;  %v8789_v62 = vadd.f32 %v8679_v39, %v15952_v13  ;;  %vm18498_vm11 = vmmov %vm18176_vm0 }
 0x7c6   : > { %11848 = vmatmul.msk.f32.gmra.mxu3 %vm18488_vm9, %v9256_v59  ;;  %vm18497_vm9 = vmmov %vm18176_vm0 }
 0x7c7   : > { %11751 = vmatmul.msk.f32.gmra.mxu1 %vm18490_vm4, %v9658_v11  ;;  %vm18500_vm4 = vmmov %vm18176_vm0 }
 0x7c8   : > { %v9080_v49 = vpop.f32.mrf.mxu2 }
 0x7c9   : > { %v9484_v10 = vpop.f32.mrf.mxu3  ;;  %v9192_v22 = vadd.f32 %v9080_v49, %v8788_v27  ;;  %v8854_v49 = vld [vmem:[#allocation2 + $0x12a] sm:$0xff] }
 0x7cb   : > { %v16373_v15 = vadd.f32 %v9484_v10, %v9192_v22  ;;  %v9258_v10 = vld [vmem:[#allocation2 + $0x140] sm:$0xff] }
 0x7cc   : > { %v8682_v21 = vpop.f32.mrf.mxu1 }
 0x7cd   : > { %11800 = vmatmul.msk.f32.gmra.mxu2 %vm18491_vm2, %v8853_v3  ;;  %11898 = vmatmul.msk.f32.gmra.mxu0 %vm18493_vm1, %v9661_v31  ;;  %v9662_v3 = vld [vmem:[#allocation2 + $0x141] sm:$0xff]  ;;  %v8790_v13 = vadd.f32 %v8682_v21, %v15965_v0  ;;  %vm18501_vm2 = vmmov %vm18176_vm0 }
 0x7ce   : > { %11849 = vmatmul.msk.f32.gmra.mxu3 %vm18492_vm10, %v9257_v44  ;;  %v16387_v44 = vpop.f32.mrf.mxu0  ;;  %vm18502_vm10 = vmmov %vm18176_vm0 }
 0x7cf   : > { %11752 = vmatmul.msk.f32.gmra.mxu1 %vm18494_vm3, %v9659_v54  ;;  %vm18503_vm1 = vmmov %vm18176_vm0 }
 0x7d0   : > { %v9083_v2 = vpop.f32.mrf.mxu2  ;;  %vm18505_vm3 = vmmov %vm18176_vm0 }
 0x7d1   : > { %v9487_v11 = vpop.f32.mrf.mxu3  ;;  %v9193_v59 = vadd.f32 %v9083_v2, %v8789_v62 }
 0x7d3   : > { %v16382_v27 = vadd.f32 %v9487_v11, %v9193_v59  ;;  %v8855_v11 = vld [vmem:[#allocation2 + $0x132] sm:$0xff]  ;;  %v9259_v59 = vld [vmem:[#allocation2 + $0x148] sm:$0xff] }
 0x7d4   : > { %v8685_v22 = vpop.f32.mrf.mxu1 }
 0x7d5   : > { %18495 = vst [vmem:[#allocation84_spill] sm:$0xff] %v16382_v27  ;;  %11801 = vmatmul.msk.f32.gmra.mxu2 %vm18496_vm13, %v8854_v49  ;;  %11899 = vmatmul.msk.f32.gmra.mxu0 %vm18497_vm9, %v9662_v3  ;;  %v9663_v49 = vld [vmem:[#allocation2 + $0x149] sm:$0xff]  ;;  %vm18506_vm13 = vmmov %vm18176_vm0 }
 0x7d6   : > { %11850 = vmatmul.msk.f32.gmra.mxu3 %vm18176_vm0, %v9258_v10  ;;  %v8791_v10 = vadd.f32 %v8685_v22, %v15978_v23  ;;  %v16398_v21 = vpop.f32.mrf.mxu0  ;;  %vm18507_vm9 = vmmov %vm18176_vm0 }
 0x7d7   : > { %11753 = vmatmul.msk.f32.gmra.mxu1 %vm18498_vm11, %v9660_v40  ;;  %vm18509_vm11 = vmmov %vm18176_vm0 }
 0x7d8   : > { %v9086_v39 = vpop.f32.mrf.mxu2 }
 0x7d9   : > { %v9490_v54 = vpop.f32.mrf.mxu3  ;;  %v9194_v62 = vadd.f32 %v9086_v39, %v8790_v13 }
 0x7db   : > { %v16391_v2 = vadd.f32 %v9490_v54, %v9194_v62  ;;  %v8856_v54 = vld [vmem:[#allocation2 + $0x13a] sm:$0xff]  ;;  %v9260_v62 = vld [vmem:[#allocation2 + $0x150] sm:$0xff] }
 0x7dc   : > { %v8688_v27 = vpop.f32.mrf.mxu1 }
 0x7dd   : > { %18499 = vst [vmem:[#allocation85_spill] sm:$0xff] %v16391_v2  ;;  %11802 = vmatmul.msk.f32.gmra.mxu2 %vm18500_vm4, %v8855_v11  ;;  %11900 = vmatmul.msk.f32.gmra.mxu0 %vm18502_vm10, %v9663_v49  ;;  %v9664_v11 = vld [vmem:[#allocation2 + $0x151] sm:$0xff]  ;;  %v8792_v23 = vadd.f32 %v8688_v27, %v15999_v16  ;;  %vm18510_vm4 = vmmov %vm18176_vm0 }
 0x7de   : > { %11851 = vmatmul.msk.f32.gmra.mxu3 %vm18501_vm2, %v9259_v59  ;;  %vm18511_vm2 = vmmov %vm18176_vm0 }
 0x7df   : > { %11754 = vmatmul.msk.f32.gmra.mxu1 %vm18503_vm1, %v9661_v31  ;;  %vm18512_vm10 = vmmov %vm18176_vm0 }
 0x7e0   : > { %v9089_v0 = vpop.f32.mrf.mxu2  ;;  %vm18513_vm1 = vmmov %vm18176_vm0 }
 0x7e1   : > { %v9493_v40 = vpop.f32.mrf.mxu3  ;;  %v9195_v13 = vadd.f32 %v9089_v0, %v8791_v10  ;;  %v16407_v10 = vpop.f32.mrf.mxu0 }
 0x7e3   : > { %v16400_v39 = vadd.f32 %v9493_v40, %v9195_v13  ;;  %v8857_v40 = vld [vmem:[#allocation2 + $0x142] sm:$0xff]  ;;  %v9261_v13 = vld [vmem:[#allocation2 + $0x158] sm:$0xff] }
 0x7e4   : > { %v8691_v2 = vpop.f32.mrf.mxu1 }
 0x7e5   : > { %18504 = vst [vmem:[#allocation86_spill] sm:$0xff] %v16400_v39  ;;  %11803 = vmatmul.msk.f32.gmra.mxu2 %vm18505_vm3, %v8856_v54  ;;  %11901 = vmatmul.msk.f32.gmra.mxu0 %vm18176_vm0, %v9664_v11  ;;  %v9665_v54 = vld [vmem:[#allocation2 + $0x159] sm:$0xff]  ;;  %v8793_v16 = vadd.f32 %v8691_v2, %v16024_v63  ;;  %vm18514_vm3 = vmmov %vm18176_vm0 }
 0x7e6   : > { %11852 = vmatmul.msk.f32.gmra.mxu3 %vm18506_vm13, %v9260_v62  ;;  %vm18515_vm13 = vmmov %vm18176_vm0 }
 0x7e7   : > { %11755 = vmatmul.msk.f32.gmra.mxu1 %vm18507_vm9, %v9662_v3  ;;  %vm18517_vm9 = vmmov %vm18176_vm0 }
 0x7e8   : > { %v9092_v31 = vpop.f32.mrf.mxu2 }
 0x7e9   : > { %v9496_v22 = vpop.f32.mrf.mxu3  ;;  %v9196_v59 = vadd.f32 %v9092_v31, %v8792_v23  ;;  %v8858_v31 = vld [vmem:[#allocation2 + $0x14a] sm:$0xff] }
 0x7eb   : > { %v16409_v0 = vadd.f32 %v9496_v22, %v9196_v59  ;;  %v9262_v22 = vld [vmem:[#allocation2 + $0x160] sm:$0xff] }
 0x7ec   : > { %v8694_v39 = vpop.f32.mrf.mxu1 }
 0x7ed   : > { %18508 = vst [vmem:[#allocation87_spill] sm:$0xff] %v16409_v0  ;;  %11804 = vmatmul.msk.f32.gmra.mxu2 %vm18509_vm11, %v8857_v40  ;;  %11902 = vmatmul.msk.f32.gmra.mxu0 %vm18511_vm2, %v9665_v54  ;;  %v16418_v0 = vpop.f32.mrf.mxu0  ;;  %v9666_v40 = vld [vmem:[#allocation2 + $0x161] sm:$0xff]  ;;  %v8794_v63 = vadd.f32 %v8694_v39, %v16039_v47  ;;  %vm18518_vm11 = vmmov %vm18176_vm0 }
 0x7ee   : > { %11853 = vmatmul.msk.f32.gmra.mxu3 %vm18510_vm4, %v9261_v13  ;;  %vm18519_vm4 = vmmov %vm18176_vm0 }
 0x7ef   : > { %11756 = vmatmul.msk.f32.gmra.mxu1 %vm18512_vm10, %v9663_v49  ;;  %vm18520_vm2 = vmmov %vm18176_vm0 }
 0x7f0   : > { %v9095_v27 = vpop.f32.mrf.mxu2  ;;  %vm18522_vm10 = vmmov %vm18176_vm0 }
 0x7f1   : > { %v9499_v3 = vpop.f32.mrf.mxu3  ;;  %v9197_v62 = vadd.f32 %v9095_v27, %v8793_v16  ;;  %v8859_v27 = vld [vmem:[#allocation2 + $0x152] sm:$0xff] }
 0x7f3   : > { %v16416_v23 = vadd.f32 %v9499_v3, %v9197_v62  ;;  %v9263_v3 = vld [vmem:[#allocation2 + $0x168] sm:$0xff] }
 0x7f4   : > { %v8697_v59 = vpop.f32.mrf.mxu1 }
 0x7f5   : > { %11805 = vmatmul.msk.f32.gmra.mxu2 %vm18513_vm1, %v8858_v31  ;;  %11903 = vmatmul.msk.f32.gmra.mxu0 %vm18515_vm13, %v9666_v40  ;;  %v9667_v31 = vld [vmem:[#allocation2 + $0x169] sm:$0xff]  ;;  %v8795_v47 = vadd.f32 %v8697_v59, %v16052_v5  ;;  %vm18523_vm1 = vmmov %vm18176_vm0 }
 0x7f6   : > { %11854 = vmatmul.msk.f32.gmra.mxu3 %vm18514_vm3, %v9262_v22  ;;  %v16430_v22 = vpop.f32.mrf.mxu0  ;;  %vm18524_vm3 = vmmov %vm18176_vm0 }
 0x7f7   : > { %11757 = vmatmul.msk.f32.gmra.mxu1 %vm18176_vm0, %v9664_v11  ;;  %vm18525_vm13 = vmmov %vm18176_vm0 }
 0x7f8   : > { %v9098_v2 = vpop.f32.mrf.mxu2 }
 0x7f9   : > { %v9502_v49 = vpop.f32.mrf.mxu3  ;;  %v9198_v13 = vadd.f32 %v9098_v2, %v8794_v63 }
 0x7fb   : > { %v16425_v16 = vadd.f32 %v9502_v49, %v9198_v13  ;;  %v8860_v49 = vld [vmem:[#allocation2 + $0x15a] sm:$0xff]  ;;  %v9264_v13 = vld [vmem:[#allocation2 + $0x170] sm:$0xff] }
 0x7fc   : > { %v8700_v62 = vpop.f32.mrf.mxu1 }
 0x7fd   : > { %18516 = vst [vmem:[#allocation88_spill] sm:$0xff] %v16425_v16  ;;  %11806 = vmatmul.msk.f32.gmra.mxu2 %vm18517_vm9, %v8859_v27  ;;  %11904 = vmatmul.msk.f32.gmra.mxu0 %vm18519_vm4, %v9667_v31  ;;  %v9668_v27 = vld [vmem:[#allocation2 + $0x171] sm:$0xff]  ;;  %vm18527_vm9 = vmmov %vm18176_vm0 }
 0x7fe   : > { %11855 = vmatmul.msk.f32.gmra.mxu3 %vm18518_vm11, %v9263_v3  ;;  %v8796_v3 = vadd.f32 %v8700_v62, %v16068_v41  ;;  %v16441_v59 = vpop.f32.mrf.mxu0  ;;  %vm18528_vm11 = vmmov %vm18176_vm0 }
 0x7ff   : > { %11758 = vmatmul.msk.f32.gmra.mxu1 %vm18520_vm2, %v9665_v54  ;;  %vm18529_vm4 = vmmov %vm18176_vm0 }
 0x800   : > { %v9101_v39 = vpop.f32.mrf.mxu2  ;;  %vm18531_vm2 = vmmov %vm18176_vm0 }
 0x801   : > { %v9505_v11 = vpop.f32.mrf.mxu3  ;;  %v9199_v63 = vadd.f32 %v9101_v39, %v8795_v47 }
 0x803   : > { %v16434_v2 = vadd.f32 %v9505_v11, %v9199_v63  ;;  %v8861_v11 = vld [vmem:[#allocation2 + $0x162] sm:$0xff]  ;;  %v9265_v63 = vld [vmem:[#allocation2 + $0x178] sm:$0xff] }
 0x804   : > { %v8703_v16 = vpop.f32.mrf.mxu1 }
 0x805   : > { %18521 = vst [vmem:[#allocation89_spill] sm:$0xff] %v16434_v2  ;;  %11807 = vmatmul.msk.f32.gmra.mxu2 %vm18522_vm10, %v8860_v49  ;;  %11905 = vmatmul.msk.f32.gmra.mxu0 %vm18524_vm3, %v9668_v27  ;;  %v9669_v49 = vld [vmem:[#allocation2 + $0x179] sm:$0xff]  ;;  %v8797_v41 = vadd.f32 %v8703_v16, %v16081_v48  ;;  %vm18532_vm10 = vmmov %vm18176_vm0 }
 0x806   : > { %11856 = vmatmul.msk.f32.gmra.mxu3 %vm18523_vm1, %v9264_v13  ;;  %vm18533_vm1 = vmmov %vm18176_vm0 }
 0x807   : > { %11759 = vmatmul.msk.f32.gmra.mxu1 %vm18525_vm13, %v9666_v40  ;;  %vm18534_vm3 = vmmov %vm18176_vm0 }
 0x808   : > { %v9104_v5 = vpop.f32.mrf.mxu2  ;;  %vm18535_vm13 = vmmov %vm18176_vm0 }
 0x809   : > { %v9508_v54 = vpop.f32.mrf.mxu3  ;;  %v9200_v47 = vadd.f32 %v9104_v5, %v8796_v3  ;;  %v16450_v3 = vpop.f32.mrf.mxu0 }
 0x80b   : > { %v16443_v39 = vadd.f32 %v9508_v54, %v9200_v47  ;;  %v8862_v54 = vld [vmem:[#allocation2 + $0x16a] sm:$0xff]  ;;  %v9266_v47 = vld [vmem:[#allocation2 + $0x180] sm:$0xff] }
 0x80c   : > { %v8706_v2 = vpop.f32.mrf.mxu1 }
 0x80d   : > { %18526 = vst [vmem:[#allocation90_spill] sm:$0xff] %v16443_v39  ;;  %11808 = vmatmul.msk.f32.gmra.mxu2 %vm18176_vm0, %v8861_v11  ;;  %11906 = vmatmul.msk.f32.gmra.mxu0 %vm18528_vm11, %v9669_v49  ;;  %v9670_v11 = vld [vmem:[#allocation2 + $0x181] sm:$0xff]  ;;  %v8798_v48 = vadd.f32 %v8706_v2, %v16099_v50  ;;  %vm18537_vm11 = vmmov %vm18176_vm0 }
 0x80e   : > { %11857 = vmatmul.msk.f32.gmra.mxu3 %vm18527_vm9, %v9265_v63  ;;  %vm18536_vm9 = vmmov %vm18176_vm0 }
 0x80f   : > { %11760 = vmatmul.msk.f32.gmra.mxu1 %vm18529_vm4, %v9667_v31  ;;  %vm18539_vm4 = vmmov %vm18176_vm0 }
 0x810   : > { %v9107_v40 = vpop.f32.mrf.mxu2 }
 0x811   : > { %v9511_v62 = vpop.f32.mrf.mxu3  ;;  %v9201_v13 = vadd.f32 %v9107_v40, %v8797_v41  ;;  %v8863_v40 = vld [vmem:[#allocation2 + $0x172] sm:$0xff] }
 0x813   : > { %v16452_v5 = vadd.f32 %v9511_v62, %v9201_v13  ;;  %v9267_v62 = vld [vmem:[#allocation2 + $0x188] sm:$0xff] }
 0x814   : > { %v8709_v39 = vpop.f32.mrf.mxu1 }
 0x815   : > { %18530 = vst [vmem:[#allocation91_spill] sm:$0xff] %v16452_v5  ;;  %11809 = vmatmul.msk.f32.gmra.mxu2 %vm18531_vm2, %v8862_v54  ;;  %11907 = vmatmul.msk.f32.gmra.mxu0 %vm18533_vm1, %v9670_v11  ;;  %v16461_v5 = vpop.f32.mrf.mxu0  ;;  %v9671_v54 = vld [vmem:[#allocation2 + $0x189] sm:$0xff]  ;;  %v8799_v50 = vadd.f32 %v8709_v39, %v16112_v53  ;;  %vm18540_vm2 = vmmov %vm18176_vm0 }
 0x816   : > { %11858 = vmatmul.msk.f32.gmra.mxu3 %vm18532_vm10, %v9266_v47  ;;  %vm18541_vm10 = vmmov %vm18176_vm0 }
 0x817   : > { %11761 = vmatmul.msk.f32.gmra.mxu1 %vm18534_vm3, %v9668_v27  ;;  %vm18542_vm1 = vmmov %vm18176_vm0 }
 0x818   : > { %v9110_v16 = vpop.f32.mrf.mxu2  ;;  %vm18544_vm3 = vmmov %vm18176_vm0 }
 0x819   : > { %v9514_v31 = vpop.f32.mrf.mxu3  ;;  %v9202_v63 = vadd.f32 %v9110_v16, %v8798_v48  ;;  %v8864_v16 = vld [vmem:[#allocation2 + $0x17a] sm:$0xff] }
 0x81b   : > { %v16459_v41 = vadd.f32 %v9514_v31, %v9202_v63  ;;  %v9268_v31 = vld [vmem:[#allocation2 + $0x190] sm:$0xff] }
 0x81c   : > { %v8712_v13 = vpop.f32.mrf.mxu1 }
 0x81d   : > { %11810 = vmatmul.msk.f32.gmra.mxu2 %vm18535_vm13, %v8863_v40  ;;  %11908 = vmatmul.msk.f32.gmra.mxu0 %vm18536_vm9, %v9671_v54  ;;  %v9672_v40 = vld [vmem:[#allocation2 + $0x191] sm:$0xff]  ;;  %v8800_v53 = vadd.f32 %v8712_v13, %v16129_v24  ;;  %vm18545_vm13 = vmmov %vm18176_vm0 }
 0x81e   : > { %11859 = vmatmul.msk.f32.gmra.mxu3 %vm18176_vm0, %v9267_v62  ;;  %v16473_v62 = vpop.f32.mrf.mxu0  ;;  %vm18546_vm9 = vmmov %vm18176_vm0 }
 0x81f   : > { %11762 = vmatmul.msk.f32.gmra.mxu1 %vm18537_vm11, %v9669_v49  ;;  %vm18547_vm11 = vmmov %vm18176_vm0 }
 0x820   : > { %v9113_v2 = vpop.f32.mrf.mxu2 }
 0x821   : > { %v9517_v27 = vpop.f32.mrf.mxu3  ;;  %v9203_v47 = vadd.f32 %v9113_v2, %v8799_v50 }
 0x823   : > { %v16468_v48 = vadd.f32 %v9517_v27, %v9203_v47  ;;  %v8865_v27 = vld [vmem:[#allocation2 + $0x182] sm:$0xff]  ;;  %v9269_v47 = vld [vmem:[#allocation2 + $0x198] sm:$0xff] }
 0x824   : > { %v8715_v63 = vpop.f32.mrf.mxu1 }
 0x825   : > { %18538 = vst [vmem:[#allocation92_spill] sm:$0xff] %v16468_v48  ;;  %11811 = vmatmul.msk.f32.gmra.mxu2 %vm18539_vm4, %v8864_v16  ;;  %11909 = vmatmul.msk.f32.gmra.mxu0 %vm18541_vm10, %v9672_v40  ;;  %v9673_v16 = vld [vmem:[#allocation2 + $0x199] sm:$0xff]  ;;  %vm18548_vm4 = vmmov %vm18176_vm0 }
 0x826   : > { %11860 = vmatmul.msk.f32.gmra.mxu3 %vm18540_vm2, %v9268_v31  ;;  %v8801_v31 = vadd.f32 %v8715_v63, %v16142_v14  ;;  %v16484_v13 = vpop.f32.mrf.mxu0  ;;  %v9674_v14 = vld [vmem:[#allocation2 + $0x1a1] sm:$0xff]  ;;  %vm18549_vm2 = vmmov %vm18176_vm0 }
 0x827   : > { %11763 = vmatmul.msk.f32.gmra.mxu1 %vm18542_vm1, %v9670_v11  ;;  %vm18550_vm10 = vmmov %vm18176_vm0 }
 0x828   : > { %v9116_v39 = vpop.f32.mrf.mxu2  ;;  %vm18551_vm1 = vmmov %vm18176_vm0 }
 0x829   : > { %v9520_v49 = vpop.f32.mrf.mxu3  ;;  %v9204_v50 = vadd.f32 %v9116_v39, %v8800_v53 }
 0x82b   : > { %v16477_v2 = vadd.f32 %v9520_v49, %v9204_v50  ;;  %v8866_v49 = vld [vmem:[#allocation2 + $0x18a] sm:$0xff]  ;;  %v9270_v50 = vld [vmem:[#allocation2 + $0x1a0] sm:$0xff] }
 0x82c   : > { %v8718_v48 = vpop.f32.mrf.mxu1 }
 0x82d   : > { %18543 = vst [vmem:[#allocation93_spill] sm:$0xff] %v16477_v2  ;;  %11812 = vmatmul.msk.f32.gmra.mxu2 %vm18544_vm3, %v8865_v27  ;;  %11910 = vmatmul.msk.f32.gmra.mxu0 %vm18176_vm0, %v9673_v16  ;;  %v8398_v27 = vadd.f32 %v16033_v57, %v16044_v20  ;;  %v9271_v57 = vld [vmem:[#allocation2 + $0x1a8] sm:$0xff]  ;;  %vm18552_vm3 = vmmov %vm18176_vm0 }
 0x82e   : > { %11861 = vmatmul.msk.f32.gmra.mxu3 %vm18545_vm13, %v9269_v47  ;;  %vm18553_vm13 = vmmov %vm18176_vm0 }
 0x82f   : > { %11764 = vmatmul.msk.f32.gmra.mxu1 %vm18546_vm9, %v9671_v54  ;;  %v8802_v54 = vadd.f32 %v8718_v48, %v8398_v27  ;;  %v9675_v48 = vld [vmem:[#allocation2 + $0x1a9] sm:$0xff]  ;;  %vm18554_vm9 = vmmov %vm18176_vm0 }
 0x830   : > { %v9119_v24 = vpop.f32.mrf.mxu2 }
 0x831   : > { %v9523_v11 = vpop.f32.mrf.mxu3  ;;  %v9205_v53 = vadd.f32 %v9119_v24, %v8801_v31  ;;  %v16494_v31 = vpop.f32.mrf.mxu0 }
 0x833   : > { %v16486_v39 = vadd.f32 %v9523_v11, %v9205_v53  ;;  %v16498_v11 = vld [vmem:[#allocation2 + $0x192] sm:$0xff]  ;;  %v8399_v53 = vadd.f32 %v16046_v60, %v16057_v58  ;;  %v8400_v60 = vadd.f32 %v16059_v51, %v16070_v38  ;;  %v10033_v58 = vld [vmem:[#allocation2 + $0x3a] sm:$0xff] }
 0x834   : > { %v8721_v2 = vpop.f32.mrf.mxu1 }
 0x835   : > { %11813 = vmatmul.msk.f32.gmra.mxu2 %vm18547_vm11, %v8866_v49  ;;  %11911 = vmatmul.msk.f32.gmra.mxu0 %vm18549_vm2, %v9674_v14  ;;  %v8803_v49 = vadd.f32 %v8721_v2, %v8399_v53  ;;  %vm18555_vm11 = vmmov %vm18176_vm0 }
 0x836   : > { %11862 = vmatmul.msk.f32.gmra.mxu3 %vm18548_vm4, %v9270_v50  ;;  %vm18556_vm4 = vmmov %vm18176_vm0 }
 0x837   : > { %11765 = vmatmul.msk.f32.gmra.mxu1 %vm18550_vm10, %v9672_v40  ;;  %v10032_v40 = vld [vmem:[#allocation2 + $0x32] sm:$0xff]  ;;  %vm18558_vm2 = vmmov %vm18176_vm0 }
 0x838   : > { %v9122_v63 = vpop.f32.mrf.mxu2  ;;  %vm18561_vm10 = vmmov %vm18176_vm0 }
 0x839   : > { %v9526_v47 = vpop.f32.mrf.mxu3  ;;  %v9206_v16 = vadd.f32 %v9122_v63, %v8802_v54 }
 0x83b   : > { %v16496_v24 = vadd.f32 %v9526_v47, %v9206_v16  ;;  %v16509_v47 = vpop.f32.mrf.mxu0 }
 0x83c   : > { %v8724_v20 = vpop.f32.mrf.mxu1 }
 0x83d   : > { %11814 = vmatmul.msk.f32.gmra.mxu2 %vm18551_vm1, %v16498_v11  ;;  %11912 = vmatmul.msk.f32.gmra.mxu0 %vm18553_vm13, %v9675_v48  ;;  %v8804_v16 = vadd.f32 %v8724_v20, %v8400_v60  ;;  %vm18563_vm1 = vmmov %vm18176_vm0 }
 0x83e   : > { %11863 = vmatmul.msk.f32.gmra.mxu3 %vm18552_vm3, %v9271_v57  ;;  %vm18565_vm3 = vmmov %vm18176_vm0 }
 0x83f   : > { %11914 = vmatmul.msk.f32.vlgmr.msra.gmra.mxu1 %vm18176_vm0, %v10032_v40  ;;  %vm18567_vm13 = vmmov %vm18176_vm0 }
 0x840   : > { %v9125_v50 = vpop.f32.mrf.mxu2 }
 0x841   : > { %v9529_v27 = vpop.f32.mrf.mxu3  ;;  %v9207_v14 = vadd.f32 %v9125_v50, %v8803_v49  ;;  %v8401_v49 = vadd.f32 %v16072_v43, %v16083_v36  ;;  %v10034_v50 = vld [vmem:[#allocation2 + $0x42] sm:$0xff] }
 0x843   : > { %v16507_v54 = vadd.f32 %v9529_v27, %v9207_v14  ;;  %v16518_v27 = vpop.f32.mrf.mxu0 }
 0x844   : > { %v8727_v63 = vpop.f32.mrf.mxu1 }
 0x845   : > { %v8805_v14 = vadd.f32 %v8727_v63, %v8401_v49 }
 0x847   : > { %11915 = vmatmul.msk.f32.gmra.mxu1 %vm18554_vm9, %v10033_v58  ;;  %vm18570_vm9 = vmmov %vm18176_vm0 }
 0x848   : > { %v9128_v57 = vpop.f32.mrf.mxu2 }
 0x849   : > { %v9532_v48 = vpop.f32.mrf.mxu3  ;;  %v9208_v2 = vadd.f32 %v9128_v57, %v8804_v16  ;;  %v8402_v16 = vadd.f32 %v16085_v18, %v16101_v35  ;;  %v10035_v57 = vld [vmem:[#allocation2 + $0x4a] sm:$0xff] }
 0x84b   : > { %v16514_v53 = vadd.f32 %v9532_v48, %v9208_v2  ;;  %v16526_v2 = vpop.f32.mrf.mxu0 }
 0x84c   : > { %v8730_v40 = vpop.f32.mrf.mxu1 }
 0x84d   : > { %v8806_v48 = vadd.f32 %v8730_v40, %v8402_v16 }
 0x84f   : > { %11916 = vmatmul.msk.f32.gmra.mxu1 %vm18555_vm11, %v10034_v50  ;;  %vm18572_vm11 = vmmov %vm18176_vm0 }
 0x850   : > { %v9131_v51 = vpop.f32.mrf.mxu2 }
 0x851   : > { %v9535_v38 = vpop.f32.mrf.mxu3  ;;  %v9209_v20 = vadd.f32 %v9131_v51, %v8805_v14  ;;  %v8403_v14 = vadd.f32 %v16103_v34, %v16114_v56  ;;  %v10036_v51 = vld [vmem:[#allocation2 + $0x52] sm:$0xff] }
 0x853   : > { %v16521_v60 = vadd.f32 %v9535_v38, %v9209_v20  ;;  %v16533_v20 = vpop.f32.mrf.mxu0 }
 0x854   : > { %v8733_v58 = vpop.f32.mrf.mxu1 }
 0x855   : > { %v8807_v38 = vadd.f32 %v8733_v58, %v8403_v14 }
 0x857   : > { %11917 = vmatmul.msk.f32.gmra.mxu1 %vm18556_vm4, %v10035_v57  ;;  %vm18574_vm4 = vmmov %vm18176_vm0 }
 0x858   : > { %v9134_v43 = vpop.f32.mrf.mxu2 }
 0x859   : > { %v9538_v36 = vpop.f32.mrf.mxu3  ;;  %v9210_v63 = vadd.f32 %v9134_v43, %v8806_v48  ;;  %v8404_v48 = vadd.f32 %v16116_v17, %v16123_v26  ;;  %v10037_v43 = vld [vmem:[#allocation2 + $0x5a] sm:$0xff]  ;;  %v10040_v26 = vld [vmem:[#allocation2 + $0x72] sm:$0xff] }
 0x85b   : > { %v16528_v49 = vadd.f32 %v9538_v36, %v9210_v63 }
 0x85c   : > { %v8736_v50 = vpop.f32.mrf.mxu1 }
 0x85d   : > { %18557 = vst [vmem:[#allocation94_spill] sm:$0xff] %v16528_v49  ;;  %v8808_v36 = vadd.f32 %v8736_v50, %v8404_v48 }
 0x85f   : > { %11918 = vmatmul.msk.f32.gmra.mxu1 %vm18558_vm2, %v10036_v51  ;;  %v16544_v51 = vpop.f32.mrf.mxu0  ;;  %vm18576_vm2 = vmmov %vm18176_vm0 }
 0x860   : > { %v9137_v18 = vpop.f32.mrf.mxu2 }
 0x861   : > { %v9541_v35 = vpop.f32.mrf.mxu3  ;;  %v9211_v40 = vadd.f32 %v9137_v18, %v8807_v38  ;;  %v10038_v38 = vld [vmem:[#allocation2 + $0x62] sm:$0xff] }
 0x863   : > { %v16535_v16 = vadd.f32 %v9541_v35, %v9211_v40  ;;  %v10039_v35 = vld [vmem:[#allocation2 + $0x6a] sm:$0xff] }
 0x864   : > { %v16537_v57 = vpop.f32.mrf.mxu1 }
 0x865   : > { %18559 = vst [vmem:[#allocation95_spill] sm:$0xff] %v16535_v16 }
 0x866   : > { %18560 = vst [vmem:[#allocation96_spill] sm:$0xff] %v16537_v57 }
 0x867   : > { %11919 = vmatmul.msk.f32.gmra.mxu1 %vm18561_vm10, %v10037_v43  ;;  %v16549_v40 = vpop.f32.mrf.mxu0  ;;  %v10041_v43 = vld [vmem:[#allocation2 + $0x7a] sm:$0xff]  ;;  %vm18579_vm10 = vmmov %vm18176_vm0 }
 0x868   : > { %v9140_v34 = vpop.f32.mrf.mxu2 }
 0x869   : > { %v9212_v56 = vadd.f32 %v9140_v34, %v8808_v36  ;;  %v9544_v58 = vpop.f32.mrf.mxu3 }
 0x86b   : > { %v9616_v63 = vadd.f32 %v9544_v58, %v9212_v56  ;;  %v10042_v56 = vld [vmem:[#allocation2 + $0x82] sm:$0xff] }
 0x86c   : > { %v16542_v14 = vpop.f32.mrf.mxu1 }
 0x86d   : > { %18562 = vst [vmem:[#allocation97_spill] sm:$0xff] %v16542_v14  ;;  %v10047_v14 = vld [vmem:[#allocation2 + $0xaa] sm:$0xff] }
 0x86f   : > { %11920 = vmatmul.msk.f32.gmra.mxu1 %vm18563_vm1, %v10038_v38  ;;  %v16555_v50 = vpop.f32.mrf.mxu0  ;;  %vm18582_vm1 = vmmov %vm18176_vm0 }
 0x874   : > { %v16547_v18 = vpop.f32.mrf.mxu1 }
 0x875   : > { %18564 = vst [vmem:[#allocation98_spill] sm:$0xff] %v16547_v18  ;;  %v10046_v18 = vld [vmem:[#allocation2 + $0xa2] sm:$0xff] }
 0x877   : > { %11921 = vmatmul.msk.f32.gmra.mxu1 %vm18565_vm3, %v10039_v35  ;;  %v16560_v36 = vpop.f32.mrf.mxu0  ;;  %v10043_v35 = vld [vmem:[#allocation2 + $0x8a] sm:$0xff]  ;;  %vm18584_vm3 = vmmov %vm18176_vm0 }
 0x87c   : > { %v16552_v17 = vpop.f32.mrf.mxu1 }
 0x87d   : > { %18566 = vst [vmem:[#allocation99_spill] sm:$0xff] %v16552_v17 }
 0x87f   : > { %11922 = vmatmul.msk.f32.gmra.mxu1 %vm18567_vm13, %v10040_v26  ;;  %v16567_v38 = vpop.f32.mrf.mxu0  ;;  %vm18585_vm13 = vmmov %vm18176_vm0 }
 0x884   : > { %v16557_v48 = vpop.f32.mrf.mxu1 }
 0x885   : > { %18568 = vst [vmem:[#allocation100_spill] sm:$0xff] %v16557_v48  ;;  %v10044_v48 = vld [vmem:[#allocation2 + $0x92] sm:$0xff] }
 0x887   : > { %11923 = vmatmul.msk.f32.gmra.mxu1 %vm18176_vm0, %v10041_v43  ;;  %v16572_v17 = vpop.f32.mrf.mxu0 }
 0x88c   : > { %v16562_v34 = vpop.f32.mrf.mxu1 }
 0x88d   : > { %18569 = vst [vmem:[#allocation101_spill] sm:$0xff] %v16562_v34  ;;  %v10045_v34 = vld [vmem:[#allocation2 + $0x9a] sm:$0xff] }
 0x88f   : > { %11924 = vmatmul.msk.f32.gmra.mxu1 %vm18570_vm9, %v10042_v56  ;;  %v16578_v56 = vpop.f32.mrf.mxu0  ;;  %vm18588_vm9 = vmmov %vm18176_vm0 }
 0x890   : > { %18577 = vst [vmem:[#allocation105_spill] sm:$0xff] %v16578_v56  ;;  %v10049_v56 = vld [vmem:[#allocation2 + $0xba] sm:$0xff] }
 0x894   : > { %v16565_v58 = vpop.f32.mrf.mxu1 }
 0x895   : > { %18571 = vst [vmem:[#allocation102_spill] sm:$0xff] %v16565_v58 }
 0x897   : > { %11925 = vmatmul.msk.f32.gmra.mxu1 %vm18572_vm11, %v10043_v35  ;;  %v16583_v35 = vpop.f32.mrf.mxu0  ;;  %vm18594_vm11 = vmmov %vm18176_vm0 }
 0x898   : > { %18580 = vst [vmem:[#allocation107_spill] sm:$0xff] %v16583_v35 }
 0x89c   : > { %v16570_v26 = vpop.f32.mrf.mxu1 }
 0x89d   : > { %18573 = vst [vmem:[#allocation103_spill] sm:$0xff] %v16570_v26 }
 0x89f   : > { %11926 = vmatmul.msk.f32.gmra.mxu1 %vm18574_vm4, %v10044_v48  ;;  %v9948_v57 = vpop.f32.mrf.mxu0  ;;  %vm18597_vm4 = vmmov %vm18176_vm0 }
 0x8a0   : > { %v16588_v16 = vadd.f32 %v9948_v57, %v9616_v63  ;;  %v9986_v57 = vadd.f32 %v16269_v37, %v16253_v29  ;;  %v10051_v63 = vld [vmem:[#allocation2 + $0xca] sm:$0xff] }
 0x8a2   : > { %18583 = vst [vmem:[#allocation109_spill] sm:$0xff] %v16588_v16  ;;  %v9987_v16 = vadd.f32 %v16278_v55, %v16262_v12 }
 0x8a4   : > { %v16575_v43 = vpop.f32.mrf.mxu1 }
 0x8a5   : > { %18575 = vst [vmem:[#allocation104_spill] sm:$0xff] %v16575_v43  ;;  %v10048_v43 = vld [vmem:[#allocation2 + $0xb2] sm:$0xff] }
 0x8a7   : > { %11927 = vmatmul.msk.f32.gmra.mxu1 %vm18576_vm2, %v10045_v34  ;;  %vm18598_vm2 = vmmov %vm18176_vm0 }
 0x8ac   : > { %v16580_v58 = vpop.f32.mrf.mxu1 }
 0x8ad   : > { %18578 = vst [vmem:[#allocation106_spill] sm:$0xff] %v16580_v58 }
 0x8af   : > { %11928 = vmatmul.msk.f32.gmra.mxu1 %vm18579_vm10, %v10046_v18  ;;  %v10050_v18 = vld [vmem:[#allocation2 + $0xc2] sm:$0xff]  ;;  %vm18599_vm10 = vmmov %vm18176_vm0 }
 0x8b4   : > { %v16585_v26 = vpop.f32.mrf.mxu1 }
 0x8b5   : > { %18581 = vst [vmem:[#allocation108_spill] sm:$0xff] %v16585_v26  ;;  %v9985_v26 = vadd.f32 %v16258_v7, %v16244_v32 }
 0x8b7   : > { %11929 = vmatmul.msk.f32.gmra.mxu1 %vm18582_vm1, %v10047_v14  ;;  %v9984_v14 = vadd.f32 %v16246_v61, %v16237_v33  ;;  %vm18603_vm1 = vmmov %vm18176_vm0 }
 0x8bc   : > { %v10244_v48 = vpop.f32.mrf.mxu1 }
 0x8bf   : > { %11930 = vmatmul.msk.f32.gmra.mxu1 %vm18584_vm3, %v10048_v43  ;;  %v16601_v43 = vadd.f32 %v10244_v48, %v9984_v14  ;;  %vm18604_vm3 = vmmov %vm18176_vm0 }
 0x8c1   : > { %18587 = vst [vmem:[#allocation111_spill] sm:$0xff] %v16601_v43  ;;  %v10585_v61 = vmul.f32 %v16601_v43, %v16601_v43  ;;  %v10436_v55 = vsel %vm13475_vm14, %v16601_v43, 0.0  ;;  %v10053_v43 = vld [vmem:[#allocation2 + $0xda] sm:$0xff] }
 0x8c2   : > { %v10484_v33 = vsel %vm18597_vm4, %v10436_v55, 0.0  ;;  %vm18616_vm4 = vmmov %vm18176_vm0 }
 0x8c4   : > { %v10247_v34 = vpop.f32.mrf.mxu1 }
 0x8c5   : > { %v16597_v49 = vadd.f32 %v10247_v34, %v9985_v26 }
 0x8c7   : > { %11931 = vmatmul.msk.f32.gmra.mxu1 %vm18585_vm13, %v10049_v56  ;;  %18586 = vst [vmem:[#allocation110_spill] sm:$0xff] %v16597_v49  ;;  %v10586_v32 = vmul.f32 %v16597_v49, %v16597_v49  ;;  %v10437_v29 = vsel %vm13482_vm15, %v16597_v49, 0.0  ;;  %vm18606_vm13 = vmmov %vm18176_vm0 }
 0x8c8   : > { %v10485_v14 = vsel %vm18594_vm11, %v10437_v29, 0.0  ;;  %vm18610_vm11 = vmmov %vm18176_vm0 }
 0x8c9   : > { %v10486_v12 = vadd.f32 %v10485_v14, %v10484_v33 }
 0x8cc   : > { %v10250_v58 = vpop.f32.mrf.mxu1 }
 0x8cd   : > { %v10390_v56 = vadd.f32 %v10250_v58, %v9986_v57  ;;  %v9988_v58 = vadd.f32 %v16289_v4, %v16271_v45  ;;  %v10052_v57 = vld [vmem:[#allocation2 + $0xd2] sm:$0xff]  ;;  %v10633_v4 = vsel %vm13475_vm14, %v10585_v61, 0.0  ;;  %vm18601_vm14 = vmmov %vm18176_vm0 }
 0x8cf   : > { %11932 = vmatmul.msk.f32.gmra.mxu1 %vm18176_vm0, %v10050_v18  ;;  %v10587_v37 = vmul.f32 %v10390_v56, %v10390_v56  ;;  %v10438_v48 = vsel %vm13539_vm12, %v10390_v56, 0.0 }
 0x8d1   : > { %v10635_v45 = vsel %vm13539_vm12, %v10587_v37, 0.0  ;;  %vm18602_vm12 = vmmov %vm18176_vm0 }
 0x8d4   : > { %v10253_v35 = vpop.f32.mrf.mxu1 }
 0x8d5   : > { %v16608_v7 = vadd.f32 %v10253_v35, %v9987_v16  ;;  %v10634_v16 = vsel %vm13482_vm15, %v10586_v32, 0.0  ;;  %vm18596_vm15 = vmmov %vm18176_vm0  ;;  %v10681_v35 = vsel %vm18601_vm14, %v10633_v4, 0.0 }
 0x8d6   : > { %v10682_v29 = vsel %vm18598_vm2, %v10634_v16, 0.0  ;;  %vm18618_vm2 = vmmov %vm18176_vm0 }
 0x8d7   : > { %11933 = vmatmul.msk.f32.gmra.mxu1 %vm18588_vm9, %v10051_v63  ;;  %18589 = vst [vmem:[#allocation112_spill] sm:$0xff] %v16608_v7  ;;  %v10588_v34 = vmul.f32 %v16608_v7, %v16608_v7  ;;  %v10439_v32 = vsel %vm13580_vm6, %v16608_v7, 0.0  ;;  %v10684_v7 = vsel %vm18602_vm12, %v10635_v45, 0.0  ;;  %v10683_v55 = vadd.f32 %v10682_v29, %v10681_v35  ;;  %vm18609_vm9 = vmmov %vm18176_vm0  ;;  %v10054_v35 = vld [vmem:[#allocation2 + $0xe2] sm:$0xff] }
 0x8d8   : > { %vm18623_vm12 = vmmov %vm18176_vm0 }
 0x8d9   : > { %v10636_v61 = vsel %vm13580_vm6, %v10588_v34, 0.0  ;;  %vm18605_vm6 = vmmov %vm18176_vm0  ;;  %v10685_v33 = vadd.f32 %v10684_v7, %v10683_v55 }
 0x8da   : > { %v10686_v34 = vsel %vm18604_vm3, %v10636_v61, 0.0  ;;  %vm18625_vm3 = vmmov %vm18176_vm0 }
 0x8dc   : > { %v10256_v26 = vpop.f32.mrf.mxu1 }
 0x8dd   : > { %v16626_v18 = vadd.f32 %v10256_v26, %v9988_v58  ;;  %v10487_v58 = vsel %vm18599_vm10, %v10438_v48, 0.0  ;;  %v9989_v48 = vadd.f32 %v16301_v9, %v16280_v28  ;;  %vm18619_vm10 = vmmov %vm18176_vm0 }
 0x8de   : > { %v10488_v49 = vadd.f32 %v10487_v58, %v10486_v12  ;;  %v18617_v58 = vld [vmem:[#allocation77_spill] sm:$0xff] }
 0x8df   : > { %18593 = vst [vmem:[#allocation12_spill] sm:$0xff] %v16626_v18  ;;  %v10589_v56 = vmul.f32 %v16626_v18, %v16626_v18  ;;  %11934 = vmatmul.msk.f32.gmra.mxu1 %vm18596_vm15, %v10052_v57  ;;  %v10440_v26 = vsel %vm13676_vm7, %v16626_v18, 0.0  ;;  %v10489_v57 = vsel %vm18603_vm1, %v10439_v32, 0.0  ;;  %v10687_v32 = vadd.f32 %v10686_v34, %v10685_v33  ;;  %vm18624_vm1 = vmmov %vm18176_vm0 }
 0x8e0   : > { %v10491_v14 = vsel %vm18605_vm6, %v10440_v26, 0.0  ;;  %v10490_v18 = vadd.f32 %v10489_v57, %v10488_v49  ;;  %v9990_v57 = vadd.f32 %v16312_v1, %v16287_v46  ;;  %vm18627_vm6 = vmmov %vm18176_vm0 }
 0x8e1   : > { %v10637_v16 = vsel %vm13676_vm7, %v10589_v56, 0.0  ;;  %vm18608_vm7 = vmmov %vm18176_vm0 }
 0x8e2   : > { %v10688_v45 = vsel %vm18606_vm13, %v10637_v16, 0.0  ;;  %v10492_v12 = vadd.f32 %v10491_v14, %v10490_v18  ;;  %v10055_v14 = vld [vmem:[#allocation2 + $0xea] sm:$0xff] }
 0x8e3   : > { %v10689_v7 = vadd.f32 %v10688_v45, %v10687_v32 }
 0x8e4   : > { %v10259_v63 = vpop.f32.mrf.mxu1 }
 0x8e5   : > { %v10393_v4 = vadd.f32 %v10259_v63, %v9989_v48 }
 0x8e7   : > { %v10441_v29 = vsel %vm13680_vm8, %v10393_v4, 0.0  ;;  %v10590_v56 = vmul.f32 %v10393_v4, %v10393_v4  ;;  %11935 = vmatmul.msk.f32.gmra.mxu1 %vm18608_vm7, %v10053_v43  ;;  %v18611_v43 = vld [vmem:[#allocation76_spill] sm:$0xff]  ;;  %vm18631_vm7 = vmmov %vm18176_vm0 }
 0x8e8   : > { %v10493_v28 = vsel %vm18176_vm0, %v10441_v29, 0.0  ;;  %v9991_v55 = vadd.f32 %v16321_v42, %v18611_v43  ;;  %v18614_v42 = vld [vmem:[#allocation25_spill] sm:$0xff]  ;;  %v9992_v29 = vadd.f32 %v16332_v19, %v18617_v58 }
 0x8e9   : > { %v10494_v9 = vadd.f32 %v10493_v28, %v10492_v12  ;;  %v10638_v61 = vsel %vm13680_vm8, %v10590_v56, 0.0  ;;  %vm18613_vm8 = vmmov %vm18176_vm0  ;;  %vm18615_vm15 = vnez %v18614_v42 }
 0x8ea   : > { %v10690_v49 = vsel %vm18609_vm9, %v10638_v61, 0.0  ;;  %vm18634_vm9 = vmmov %vm18624_vm1 }
 0x8eb   : > { %v10691_v37 = vadd.f32 %v10690_v49, %v10689_v7 }
 0x8ec   : > { %v10262_v26 = vpop.f32.mrf.mxu1 }
 0x8ed   : > { %v16667_v18 = vadd.f32 %v10262_v26, %v9990_v57  ;;  %v10056_v26 = vld [vmem:[#allocation2 + $0xf2] sm:$0xff] }
 0x8ee   : > { %v18621_v57 = vld [vmem:[#allocation26_spill] sm:$0xff] }
 0x8ef   : > { %11936 = vmatmul.msk.f32.gmra.mxu1 %vm18610_vm11, %v10054_v35  ;;  %v10591_v48 = vmul.f32 %v16667_v18, %v16667_v18  ;;  %v10442_v33 = vsel %vm13730_vm5, %v16667_v18, 0.0  ;;  %vm18622_vm14 = vnez %v18621_v57  ;;  %v9995_v57 = vadd.f32 %v16364_v30, %v16330_v25  ;;  %vm18635_vm11 = vmmov %vm18624_vm1 }
 0x8f0   : > { %v10495_v45 = vsel %vm18616_vm4, %v10442_v33, 0.0 }
 0x8f1   : > { %v10639_v1 = vsel %vm13730_vm5, %v10591_v48, 0.0  ;;  %v10496_v61 = vadd.f32 %v10495_v45, %v10494_v9  ;;  %vm18620_vm5 = vmmov %vm18176_vm0  ;;  %v18628_v45 = vld [vmem:[#allocation79_spill] sm:$0xff] }
 0x8f2   : > { %v10692_v12 = vsel %vm18618_vm2, %v10639_v1, 0.0  ;;  %v10057_v1 = vld [vmem:[#allocation2 + $0xfa] sm:$0xff]  ;;  %vm18640_vm2 = vmmov %vm18624_vm1 }
 0x8f3   : > { %v10693_v35 = vadd.f32 %v10692_v12, %v10691_v37  ;;  %v18626_v37 = vld [vmem:[#allocation78_spill] sm:$0xff] }
 0x8f4   : > { %v10265_v16 = vpop.f32.mrf.mxu1  ;;  %v9993_v42 = vadd.f32 %v16344_v8, %v18626_v37 }
 0x8f5   : > { %v16673_v34 = vadd.f32 %v10265_v16, %v9991_v55 }
 0x8f7   : > { %v10592_v46 = vmul.f32 %v16673_v34, %v16673_v34  ;;  %11937 = vmatmul.msk.f32.gmra.mxu1 %vm18613_vm8, %v10055_v14  ;;  %v10443_v4 = vsel %vm18615_vm15, %v16673_v34, 0.0  ;;  %vm18636_vm8 = vmmov %vm18624_vm1 }
 0x8f8   : > { %v10497_v56 = vsel %vm18619_vm10, %v10443_v4, 0.0  ;;  %vm18641_vm10 = vmmov %vm18624_vm1 }
 0x8f9   : > { %v10640_v32 = vsel %vm18615_vm15, %v10592_v46, 0.0  ;;  %v10498_v55 = vadd.f32 %v10497_v56, %v10496_v61  ;;  %v10058_v56 = vld [vmem:[#allocation2 + $0x102] sm:$0xff]  ;;  %vm18637_vm15 = vmmov %vm18624_vm1 }
 0x8fa   : > { %v10694_v49 = vsel %vm18620_vm5, %v10640_v32, 0.0  ;;  %v9994_v32 = vadd.f32 %v16355_v52, %v18628_v45  ;;  %v18632_v52 = vld [vmem:[#allocation29_spill] sm:$0xff]  ;;  %vm18642_vm5 = vmmov %vm18624_vm1 }
 0x8fb   : > { %v10695_v63 = vadd.f32 %v10694_v49, %v10693_v35  ;;  %vm18633_vm0 = vnez %v18632_v52 }
 0x8fc   : > { %v10268_v28 = vpop.f32.mrf.mxu1 }
 0x8fd   : > { %v10396_v7 = vadd.f32 %v10268_v28, %v9992_v29  ;;  %v18629_v28 = vld [vmem:[#allocation28_spill] sm:$0xff] }
 0x8fe   : > { %vm18630_vm13 = vnez %v18629_v28  ;;  %v10060_v28 = vld [vmem:[#allocation2 + $0x112] sm:$0xff] }
 0x8ff   : > { %v10444_v43 = vsel %vm18622_vm14, %v10396_v7, 0.0  ;;  %v10593_v16 = vmul.f32 %v10396_v7, %v10396_v7  ;;  %11938 = vmatmul.msk.f32.gmra.mxu1 %vm18623_vm12, %v10056_v26 }
 0x900   : > { %v10499_v19 = vsel %vm18624_vm1, %v10444_v43, 0.0 }
 0x901   : > { %v10500_v48 = vadd.f32 %v10499_v19, %v10498_v55  ;;  %v10641_v14 = vsel %vm18622_vm14, %v10593_v16, 0.0  ;;  %vm18644_vm14 = vmmov %vm18624_vm1 }
 0x902   : > { %v10696_v9 = vsel %vm18625_vm3, %v10641_v14, 0.0 }
 0x903   : > { %v10697_v33 = vadd.f32 %v10696_v9, %v10695_v63  ;;  %v10059_v9 = vld [vmem:[#allocation2 + $0x10a] sm:$0xff] }
 0x904   : > { %v10271_v46 = vpop.f32.mrf.mxu1 }
 0x905   : > { %v16704_v4 = vadd.f32 %v10271_v46, %v9993_v42 }
 0x907   : > { %11939 = vmatmul.msk.f32.gmra.mxu1 %vm18627_vm6, %v10057_v1  ;;  %v10594_v29 = vmul.f32 %v16704_v4, %v16704_v4  ;;  %v10445_v61 = vsel %vm18630_vm13, %v16704_v4, 0.0  ;;  %v18638_v1 = vld [vmem:[#allocation30_spill] sm:$0xff]  ;;  %vm18650_vm6 = vmmov %vm18624_vm1 }
 0x908   : > { %v10501_v26 = vsel %vm18634_vm9, %v10445_v61, 0.0  ;;  %vm18639_vm4 = vnez %v18638_v1 }
 0x909   : > { %v10642_v7 = vsel %vm18630_vm13, %v10594_v29, 0.0  ;;  %v10502_v19 = vadd.f32 %v10501_v26, %v10500_v48  ;;  %vm18652_vm13 = vmmov %vm18624_vm1 }
 0x90a   : > { %v10698_v43 = vsel %vm18635_vm11, %v10642_v7, 0.0  ;;  %v18645_v7 = vld [vmem:[#allocation81_spill] sm:$0xff] }
 0x90b   : > { %v10699_v46 = vadd.f32 %v10698_v43, %v10697_v33  ;;  %v18643_v33 = vld [vmem:[#allocation80_spill] sm:$0xff]  ;;  %v9997_v52 = vadd.f32 %v16387_v44, %v18645_v7  ;;  %v18646_v43 = vld [vmem:[#allocation31_spill] sm:$0xff] }
 0x90c   : > { %v10274_v58 = vpop.f32.mrf.mxu1  ;;  %v9996_v61 = vadd.f32 %v16375_v6, %v18643_v33  ;;  %vm18647_vm12 = vnez %v18646_v43  ;;  %v18648_v44 = vld [vmem:[#allocation32_spill] sm:$0xff] }
 0x90d   : > { %v16710_v12 = vadd.f32 %v10274_v58, %v9994_v32  ;;  %vm18649_vm3 = vnez %v18648_v44  ;;  %v10063_v43 = vld [vmem:[#allocation2 + $0x12a] sm:$0xff] }
 0x90f   : > { %v10595_v8 = vmul.f32 %v16710_v12, %v16710_v12  ;;  %11940 = vmatmul.msk.f32.gmra.mxu1 %vm18631_vm7, %v10058_v56  ;;  %v10446_v49 = vsel %vm18633_vm0, %v16710_v12, 0.0  ;;  %vm18653_vm7 = vmmov %vm18624_vm1 }
 0x910   : > { %v10503_v55 = vsel %vm18636_vm8, %v10446_v49, 0.0 }
 0x911   : > { %v10643_v35 = vsel %vm18633_vm0, %v10595_v8, 0.0  ;;  %v10504_v42 = vadd.f32 %v10503_v55, %v10502_v19  ;;  %vm18654_vm0 = vmmov %vm18624_vm1 }
 0x912   : > { %v10700_v63 = vsel %vm18637_vm15, %v10643_v35, 0.0  ;;  %vm18657_vm11 = vmmov %vm18654_vm0 }
 0x913   : > { %v10701_v58 = vadd.f32 %v10700_v63, %v10699_v46  ;;  %vm18658_vm8 = vmmov %vm18654_vm0 }
 0x914   : > { %v10277_v16 = vpop.f32.mrf.mxu1  ;;  %vm18659_vm15 = vmmov %vm18654_vm0 }
 0x915   : > { %v10399_v14 = vadd.f32 %v10277_v16, %v9995_v57  ;;  %v10061_v57 = vld [vmem:[#allocation2 + $0x11a] sm:$0xff] }
 0x917   : > { %v10447_v37 = vsel %vm18639_vm4, %v10399_v14, 0.0  ;;  %v10596_v45 = vmul.f32 %v10399_v14, %v10399_v14  ;;  %11941 = vmatmul.msk.f32.gmra.mxu1 %vm18640_vm2, %v10059_v9  ;;  %v18651_v9 = vld [vmem:[#allocation82_spill] sm:$0xff] }
 0x918   : > { %v10505_v25 = vsel %vm18641_vm10, %v10447_v37, 0.0  ;;  %v9998_v46 = vadd.f32 %v16398_v21, %v18651_v9  ;;  %v18662_v9 = vld [vmem:[#allocation35_spill] sm:$0xff]  ;;  %vm18664_vm10 = vmmov %vm18654_vm0 }
 0x919   : > { %v10506_v30 = vadd.f32 %v10505_v25, %v10504_v42  ;;  %v10644_v32 = vsel %vm18639_vm4, %v10596_v45, 0.0  ;;  %vm18661_vm4 = vmmov %vm18654_vm0  ;;  %vm18663_vm2 = vnez %v18662_v9 }
 0x91a   : > { %v10702_v48 = vsel %vm18642_vm5, %v10644_v32, 0.0 }
 0x91b   : > { %v10703_v29 = vadd.f32 %v10702_v48, %v10701_v58  ;;  %v10062_v58 = vld [vmem:[#allocation2 + $0x122] sm:$0xff] }
 0x91c   : > { %v10280_v56 = vpop.f32.mrf.mxu1 }
 0x91d   : > { %v16741_v8 = vadd.f32 %v10280_v56, %v9996_v61  ;;  %v18655_v56 = vld [vmem:[#allocation34_spill] sm:$0xff] }
 0x91e   : > { %vm18656_vm9 = vnez %v18655_v56 }
 0x91f   : > { %11942 = vmatmul.msk.f32.gmra.mxu1 %vm18644_vm14, %v10060_v28  ;;  %v10597_v26 = vmul.f32 %v16741_v8, %v16741_v8  ;;  %v10448_v55 = vsel %vm18647_vm12, %v16741_v8, 0.0  ;;  %vm18667_vm14 = vmmov %vm18654_vm0 }
 0x920   : > { %v10507_v14 = vsel %vm18650_vm6, %v10448_v55, 0.0 }
 0x921   : > { %v10645_v16 = vsel %vm18647_vm12, %v10597_v26, 0.0  ;;  %v10508_v45 = vadd.f32 %v10507_v14, %v10506_v30  ;;  %vm18669_vm12 = vmmov %vm18654_vm0 }
 0x922   : > { %v10704_v1 = vsel %vm18652_vm13, %v10645_v16, 0.0  ;;  %v10000_v16 = vadd.f32 %v16418_v0, %v16373_v15  ;;  %v18665_v15 = vld [vmem:[#allocation14_spill] sm:$0xff]  ;;  %vm18674_vm13 = vmmov %vm18654_vm0 }
 0x923   : > { %v10705_v48 = vadd.f32 %v10704_v1, %v10703_v29  ;;  %v18660_v29 = vld [vmem:[#allocation83_spill] sm:$0xff]  ;;  %vm18666_vm5 = vnez %v18665_v15 }
 0x924   : > { %v10283_v49 = vpop.f32.mrf.mxu1  ;;  %v9999_v55 = vadd.f32 %v16407_v10, %v18660_v29 }
 0x925   : > { %v16747_v35 = vadd.f32 %v10283_v49, %v9997_v52 }
 0x927   : > { %v10598_v6 = vmul.f32 %v16747_v35, %v16747_v35  ;;  %11943 = vmatmul.msk.f32.gmra.mxu1 %vm18624_vm1, %v10061_v57  ;;  %v10449_v19 = vsel %vm18649_vm3, %v16747_v35, 0.0  ;;  %vm18670_vm1 = vmmov %vm18654_vm0 }
 0x928   : > { %v10509_v37 = vsel %vm18653_vm7, %v10449_v19, 0.0  ;;  %vm18675_vm7 = vmmov %vm18654_vm0 }
 0x929   : > { %v10646_v63 = vsel %vm18649_vm3, %v10598_v6, 0.0  ;;  %v10510_v33 = vadd.f32 %v10509_v37, %v10508_v45  ;;  %v18668_v45 = vld [vmem:[#allocation84_spill] sm:$0xff]  ;;  %vm18671_vm3 = vmmov %vm18654_vm0 }
 0x92a   : > { %v10706_v32 = vsel %vm18654_vm0, %v10646_v63, 0.0  ;;  %v10064_v63 = vld [vmem:[#allocation2 + $0x132] sm:$0xff] }
 0x92b   : > { %v10707_v49 = vadd.f32 %v10706_v32, %v10705_v48 }
 0x92c   : > { %v10286_v42 = vpop.f32.mrf.mxu1 }
 0x92d   : > { %v10402_v25 = vadd.f32 %v10286_v42, %v9998_v46 }
 0x92f   : > { %v10450_v28 = vsel %vm18656_vm9, %v10402_v25, 0.0  ;;  %v10599_v61 = vmul.f32 %v10402_v25, %v10402_v25  ;;  %11944 = vmatmul.msk.f32.gmra.mxu1 %vm18657_vm11, %v10062_v58  ;;  %v10001_v25 = vadd.f32 %v16430_v22, %v18668_v45 }
 0x930   : > { %v10511_v21 = vsel %vm18658_vm8, %v10450_v28, 0.0  ;;  %vm18681_vm8 = vmmov %vm18654_vm0 }
 0x931   : > { %v10512_v7 = vadd.f32 %v10511_v21, %v10510_v33  ;;  %v10647_v52 = vsel %vm18656_vm9, %v10599_v61, 0.0  ;;  %v10065_v61 = vld [vmem:[#allocation2 + $0x13a] sm:$0xff]  ;;  %vm18677_vm9 = vmmov %vm18654_vm0 }
 0x932   : > { %v10708_v30 = vsel %vm18659_vm15, %v10647_v52, 0.0  ;;  %v18672_v52 = vld [vmem:[#allocation17_spill] sm:$0xff] }
 0x933   : > { %v10709_v26 = vadd.f32 %v10708_v30, %v10707_v49  ;;  %vm18673_vm6 = vnez %v18672_v52 }
 0x934   : > { %v10289_v57 = vpop.f32.mrf.mxu1 }
 0x935   : > { %v16778_v6 = vadd.f32 %v10289_v57, %v9999_v55 }
 0x937   : > { %11945 = vmatmul.msk.f32.gmra.mxu1 %vm18661_vm4, %v10063_v43  ;;  %v10600_v19 = vmul.f32 %v16778_v6, %v16778_v6  ;;  %v10451_v46 = vsel %vm18663_vm2, %v16778_v6, 0.0  ;;  %vm18684_vm4 = vmmov %vm18654_vm0 }
 0x938   : > { %v10513_v37 = vsel %vm18667_vm14, %v10451_v46, 0.0  ;;  %v18678_v46 = vld [vmem:[#allocation86_spill] sm:$0xff] }
 0x939   : > { %v10648_v1 = vsel %vm18663_vm2, %v10600_v19, 0.0  ;;  %v10514_v56 = vadd.f32 %v10513_v37, %v10512_v7  ;;  %v10066_v19 = vld [vmem:[#allocation2 + $0x142] sm:$0xff]  ;;  %v10067_v37 = vld [vmem:[#allocation2 + $0x14a] sm:$0xff]  ;;  %vm18686_vm2 = vmmov %vm18654_vm0 }
 0x93a   : > { %v10710_v32 = vsel %vm18669_vm12, %v10648_v1, 0.0  ;;  %vm18691_vm12 = vmmov %vm18654_vm0 }
 0x93b   : > { %v10711_v21 = vadd.f32 %v10710_v32, %v10709_v26  ;;  %v18676_v26 = vld [vmem:[#allocation85_spill] sm:$0xff] }
 0x93c   : > { %v10292_v44 = vpop.f32.mrf.mxu1 }
 0x93d   : > { %v16784_v14 = vadd.f32 %v10292_v44, %v10000_v16 }
 0x93f   : > { %v10601_v10 = vmul.f32 %v16784_v14, %v16784_v14  ;;  %11946 = vmatmul.msk.f32.gmra.mxu1 %vm18664_vm10, %v10064_v63  ;;  %v10452_v0 = vsel %vm18666_vm5, %v16784_v14, 0.0  ;;  %v10002_v63 = vadd.f32 %v16441_v59, %v18676_v26  ;;  %vm18687_vm10 = vmmov %vm18654_vm0 }
 0x940   : > { %v10515_v58 = vsel %vm18670_vm1, %v10452_v0, 0.0  ;;  %vm18692_vm1 = vmmov %vm18654_vm0 }
 0x941   : > { %v10649_v42 = vsel %vm18666_vm5, %v10601_v10, 0.0  ;;  %v10516_v30 = vadd.f32 %v10515_v58, %v10514_v56  ;;  %v10003_v10 = vadd.f32 %v16450_v3, %v18678_v46  ;;  %v18682_v3 = vld [vmem:[#allocation39_spill] sm:$0xff]  ;;  %vm18688_vm5 = vmmov %vm18654_vm0 }
 0x942   : > { %v10712_v33 = vsel %vm18671_vm3, %v10649_v42, 0.0  ;;  %v18679_v42 = vld [vmem:[#allocation21_spill] sm:$0xff]  ;;  %vm18683_vm15 = vnez %v18682_v3  ;;  %v18685_v56 = vld [vmem:[#allocation87_spill] sm:$0xff]  ;;  %vm18693_vm3 = vmmov %vm18654_vm0 }
 0x943   : > { %v10713_v55 = vadd.f32 %v10712_v33, %v10711_v21  ;;  %vm18680_vm11 = vnez %v18679_v42  ;;  %v10070_v3 = vld [vmem:[#allocation2 + $0x162] sm:$0xff] }
 0x944   : > { %v10295_v48 = vpop.f32.mrf.mxu1 }
 0x945   : > { %v10405_v28 = vadd.f32 %v10295_v48, %v10001_v25 }
 0x947   : > { %v10453_v49 = vsel %vm18673_vm6, %v10405_v28, 0.0  ;;  %v10602_v57 = vmul.f32 %v10405_v28, %v10405_v28  ;;  %11947 = vmatmul.msk.f32.gmra.mxu1 %vm18674_vm13, %v10065_v61  ;;  %v10004_v28 = vadd.f32 %v16461_v5, %v18685_v56 }
 0x948   : > { %v10517_v22 = vsel %vm18675_vm7, %v10453_v49, 0.0  ;;  %vm18698_vm7 = vmmov %vm18654_vm0 }
 0x949   : > { %v10518_v43 = vadd.f32 %v10517_v22, %v10516_v30  ;;  %v10650_v29 = vsel %vm18673_vm6, %v10602_v57, 0.0  ;;  %v10068_v57 = vld [vmem:[#allocation2 + $0x152] sm:$0xff]  ;;  %vm18694_vm6 = vmmov %vm18654_vm0 }
 0x94a   : > { %v10714_v7 = vsel %vm18654_vm0, %v10650_v29, 0.0  ;;  %v18689_v29 = vld [vmem:[#allocation40_spill] sm:$0xff] }
 0x94b   : > { %v10715_v16 = vadd.f32 %v10714_v7, %v10713_v55  ;;  %vm18690_vm14 = vnez %v18689_v29  ;;  %v10071_v29 = vld [vmem:[#allocation2 + $0x16a] sm:$0xff] }
 0x94c   : > { %v10298_v44 = vpop.f32.mrf.mxu1 }
 0x94d   : > { %v16815_v9 = vadd.f32 %v10298_v44, %v10002_v63 }
 0x94f   : > { %11948 = vmatmul.msk.f32.gmra.mxu1 %vm18677_vm9, %v10066_v19  ;;  %v10603_v15 = vmul.f32 %v16815_v9, %v16815_v9  ;;  %v10454_v45 = vsel %vm18680_vm11, %v16815_v9, 0.0  ;;  %vm18701_vm9 = vmmov %vm18692_vm1 }
 0x950   : > { %v10519_v58 = vsel %vm18684_vm4, %v10454_v45, 0.0 }
 0x951   : > { %v10651_v25 = vsel %vm18680_vm11, %v10603_v15, 0.0  ;;  %v10520_v52 = vadd.f32 %v10519_v58, %v10518_v43  ;;  %vm18703_vm11 = vmmov %vm18692_vm1 }
 0x952   : > { %v10716_v33 = vsel %vm18686_vm2, %v10651_v25, 0.0  ;;  %vm18708_vm2 = vmmov %vm18692_vm1 }
 0x953   : > { %v10717_v22 = vadd.f32 %v10716_v33, %v10715_v16  ;;  %v10005_v16 = vadd.f32 %v16473_v62, %v16416_v23  ;;  %v18702_v33 = vld [vmem:[#allocation89_spill] sm:$0xff] }
 0x954   : > { %v10301_v1 = vpop.f32.mrf.mxu1 }
 0x955   : > { %v16821_v0 = vadd.f32 %v10301_v1, %v10003_v10  ;;  %v10069_v1 = vld [vmem:[#allocation2 + $0x15a] sm:$0xff] }
 0x957   : > { %v10604_v59 = vmul.f32 %v16821_v0, %v16821_v0  ;;  %11949 = vmatmul.msk.f32.gmra.mxu1 %vm18681_vm8, %v10067_v37  ;;  %v10455_v32 = vsel %vm18683_vm15, %v16821_v0, 0.0  ;;  %v18695_v37 = vld [vmem:[#allocation88_spill] sm:$0xff]  ;;  %vm18704_vm8 = vmmov %vm18692_vm1 }
 0x958   : > { %v10521_v61 = vsel %vm18687_vm10, %v10455_v32, 0.0  ;;  %v10006_v42 = vadd.f32 %v16484_v13, %v18695_v37  ;;  %v18696_v32 = vld [vmem:[#allocation42_spill] sm:$0xff]  ;;  %v18699_v13 = vld [vmem:[#allocation44_spill] sm:$0xff]  ;;  %vm18709_vm10 = vmmov %vm18692_vm1 }
 0x959   : > { %v10652_v48 = vsel %vm18683_vm15, %v10604_v59, 0.0  ;;  %v10522_v7 = vadd.f32 %v10521_v61, %v10520_v52  ;;  %vm18697_vm13 = vnez %v18696_v32  ;;  %vm18700_vm0 = vnez %v18699_v13  ;;  %vm18705_vm15 = vmmov %vm18692_vm1  ;;  %v18714_v13 = vld [vmem:[#allocation46_spill] sm:$0xff] }
 0x95a   : > { %v10718_v30 = vsel %vm18688_vm5, %v10652_v48, 0.0  ;;  %v10007_v61 = vadd.f32 %v16494_v31, %v18702_v33  ;;  %vm18710_vm5 = vmmov %vm18692_vm1 }
 0x95b   : > { %v10719_v63 = vadd.f32 %v10718_v30, %v10717_v22 }
 0x95c   : > { %v10304_v21 = vpop.f32.mrf.mxu1 }
 0x95d   : > { %v10408_v49 = vadd.f32 %v10304_v21, %v10004_v28 }
 0x95f   : > { %v10456_v55 = vsel %vm18690_vm14, %v10408_v49, 0.0  ;;  %v10605_v44 = vmul.f32 %v10408_v49, %v10408_v49  ;;  %11950 = vmatmul.msk.f32.gmra.mxu1 %vm18691_vm12, %v10068_v57  ;;  %vm18715_vm12 = vnez %v18714_v13  ;;  %v18730_v13 = vld [vmem:[#allocation8_spill] sm:$0xff] }
 0x960   : > { %v10523_v5 = vsel %vm18692_vm1, %v10456_v55, 0.0 }
 0x961   : > { %v10524_v19 = vadd.f32 %v10523_v5, %v10522_v7  ;;  %v10653_v26 = vsel %vm18690_vm14, %v10605_v44, 0.0  ;;  %v18706_v7 = vld [vmem:[#allocation45_spill] sm:$0xff]  ;;  %vm18712_vm14 = vmmov %vm18692_vm1 }
 0x962   : > { %v10720_v43 = vsel %vm18693_vm3, %v10653_v26, 0.0  ;;  %vm18707_vm4 = vnez %v18706_v7 }
 0x963   : > { %v10721_v46 = vadd.f32 %v10720_v43, %v10719_v63 }
 0x964   : > { %v10307_v10 = vpop.f32.mrf.mxu1 }
 0x965   : > { %v16852_v15 = vadd.f32 %v10307_v10, %v10005_v16  ;;  %v18711_v16 = vld [vmem:[#allocation90_spill] sm:$0xff] }
 0x967   : > { %11951 = vmatmul.msk.f32.gmra.mxu1 %vm18694_vm6, %v10069_v1  ;;  %v10606_v59 = vmul.f32 %v16852_v15, %v16852_v15  ;;  %v10457_v58 = vsel %vm18697_vm13, %v16852_v15, 0.0  ;;  %vm18718_vm6 = vmmov %vm18692_vm1 }
 0x968   : > { %v10525_v56 = vsel %vm18701_vm9, %v10457_v58, 0.0 }
 0x969   : > { %v10654_v62 = vsel %vm18697_vm13, %v10606_v59, 0.0  ;;  %v10526_v30 = vadd.f32 %v10525_v56, %v10524_v19  ;;  %v18713_v59 = vld [vmem:[#allocation91_spill] sm:$0xff]  ;;  %vm18719_vm13 = vmmov %vm18692_vm1 }
 0x96a   : > { %v10722_v21 = vsel %vm18703_vm11, %v10654_v62, 0.0  ;;  %v10073_v62 = vld [vmem:[#allocation2 + $0x17a] sm:$0xff] }
 0x96b   : > { %v10723_v55 = vadd.f32 %v10722_v21, %v10721_v46  ;;  %v10008_v46 = vadd.f32 %v16509_v47, %v18711_v16  ;;  %v10010_v21 = vadd.f32 %v16526_v2, %v16459_v41  ;;  %v18727_v16 = vld [vmem:[#allocation92_spill] sm:$0xff] }
 0x96c   : > { %v10310_v45 = vpop.f32.mrf.mxu1 }
 0x96d   : > { %v16858_v25 = vadd.f32 %v10310_v45, %v10006_v42  ;;  %v10072_v45 = vld [vmem:[#allocation2 + $0x172] sm:$0xff] }
 0x96f   : > { %v10607_v23 = vmul.f32 %v16858_v25, %v16858_v25  ;;  %11952 = vmatmul.msk.f32.gmra.mxu1 %vm18698_vm7, %v10070_v3  ;;  %v10458_v48 = vsel %vm18700_vm0, %v16858_v25, 0.0  ;;  %v10009_v3 = vadd.f32 %v16518_v27, %v18713_v59  ;;  %v18716_v27 = vld [vmem:[#allocation47_spill] sm:$0xff]  ;;  %vm18720_vm7 = vmmov %vm18692_vm1  ;;  %v18729_v59 = vld [vmem:[#allocation93_spill] sm:$0xff] }
 0x970   : > { %v10527_v52 = vsel %vm18704_vm8, %v10458_v48, 0.0  ;;  %vm18717_vm3 = vnez %v18716_v27 }
 0x971   : > { %v10655_v28 = vsel %vm18700_vm0, %v10607_v23, 0.0  ;;  %v10528_v5 = vadd.f32 %v10527_v52, %v10526_v30  ;;  %vm18721_vm0 = vmmov %vm18692_vm1 }
 0x972   : > { %v10724_v22 = vsel %vm18705_vm15, %v10655_v28, 0.0  ;;  %vm18724_vm11 = vmmov %vm18721_vm0 }
 0x973   : > { %v10725_v10 = vadd.f32 %v10724_v22, %v10723_v55  ;;  %v10074_v55 = vld [vmem:[#allocation2 + $0x182] sm:$0xff]  ;;  %vm18725_vm8 = vmmov %vm18721_vm0 }
 0x974   : > { %v10313_v49 = vpop.f32.mrf.mxu1  ;;  %vm18726_vm15 = vmmov %vm18721_vm0 }
 0x975   : > { %v10411_v57 = vadd.f32 %v10313_v49, %v10007_v61 }
 0x977   : > { %v10459_v44 = vsel %vm18707_vm4, %v10411_v57, 0.0  ;;  %v10608_v26 = vmul.f32 %v10411_v57, %v10411_v57  ;;  %11953 = vmatmul.msk.f32.gmra.mxu1 %vm18708_vm2, %v10071_v29  ;;  %vm18731_vm2 = vnez %v18730_v13  ;;  %v10016_v13 = vadd.f32 %v16567_v38, %v16514_v53 }
 0x978   : > { %v10529_v31 = vsel %vm18709_vm10, %v10459_v44, 0.0  ;;  %v18722_v44 = vld [vmem:[#allocation36_spill] sm:$0xff]  ;;  %vm18732_vm10 = vmmov %vm18721_vm0 }
 0x979   : > { %v10530_v63 = vadd.f32 %v10529_v31, %v10528_v5  ;;  %v10656_v43 = vsel %vm18707_vm4, %v10608_v26, 0.0  ;;  %vm18723_vm9 = vnez %v18722_v44  ;;  %vm18728_vm4 = vmmov %vm18721_vm0 }
 0x97a   : > { %v10726_v19 = vsel %vm18710_vm5, %v10656_v43, 0.0 }
 0x97b   : > { %v10727_v1 = vadd.f32 %v10726_v19, %v10725_v10 }
 0x97c   : > { %v10316_v37 = vpop.f32.mrf.mxu1 }
 0x97d   : > { %v16888_v42 = vadd.f32 %v10316_v37, %v10008_v46 }
 0x97f   : > { %11954 = vmatmul.msk.f32.gmra.mxu1 %vm18712_vm14, %v10072_v45  ;;  %v10609_v58 = vmul.f32 %v16888_v42, %v16888_v42  ;;  %v10460_v47 = vsel %vm18715_vm12, %v16888_v42, 0.0  ;;  %v10075_v45 = vld [vmem:[#allocation2 + $0x18a] sm:$0xff]  ;;  %vm18735_vm14 = vmmov %vm18721_vm0 }
 0x980   : > { %v10531_v33 = vsel %vm18718_vm6, %v10460_v47, 0.0 }
 0x981   : > { %v10657_v56 = vsel %vm18715_vm12, %v10609_v58, 0.0  ;;  %v10532_v57 = vadd.f32 %v10531_v33, %v10530_v63  ;;  %v10013_v33 = vadd.f32 %v16549_v40, %v16486_v39  ;;  %vm18736_vm12 = vmmov %vm18721_vm0 }
 0x982   : > { %v10728_v52 = vsel %vm18719_vm13, %v10657_v56, 0.0  ;;  %vm18741_vm13 = vmmov %vm18721_vm0 }
 0x983   : > { %v10729_v7 = vadd.f32 %v10728_v52, %v10727_v1  ;;  %v10011_v1 = vadd.f32 %v16533_v20, %v18727_v16 }
 0x984   : > { %v10319_v32 = vpop.f32.mrf.mxu1 }
 0x985   : > { %v16895_v23 = vadd.f32 %v10319_v32, %v10009_v3  ;;  %v10012_v3 = vadd.f32 %v16544_v51, %v18729_v59  ;;  %v18733_v51 = vld [vmem:[#allocation37_spill] sm:$0xff]  ;;  %v18744_v59 = vld [vmem:[#allocation48_spill] sm:$0xff] }
 0x986   : > { %vm18734_vm5 = vnez %v18733_v51 }
 0x987   : > { %v10610_v48 = vmul.f32 %v16895_v23, %v16895_v23  ;;  %11955 = vmatmul.msk.f32.gmra.mxu1 %vm18692_vm1, %v10073_v62  ;;  %v10461_v28 = vsel %vm18717_vm3, %v16895_v23, 0.0  ;;  %vm18737_vm1 = vmmov %vm18721_vm0 }
 0x988   : > { %v10533_v49 = vsel %vm18720_vm7, %v10461_v28, 0.0  ;;  %vm18742_vm7 = vmmov %vm18721_vm0 }
 0x989   : > { %v10658_v61 = vsel %vm18717_vm3, %v10610_v48, 0.0  ;;  %v10534_v26 = vadd.f32 %v10533_v49, %v10532_v57  ;;  %vm18738_vm3 = vmmov %vm18721_vm0  ;;  %v10077_v57 = vld [vmem:[#allocation2 + $0x19a] sm:$0xff] }
 0x98a   : > { %v10730_v29 = vsel %vm18721_vm0, %v10658_v61, 0.0 }
 0x98b   : > { %v10731_v10 = vadd.f32 %v10730_v29, %v10729_v7  ;;  %v18739_v29 = vld [vmem:[#allocation7_spill] sm:$0xff] }
 0x98c   : > { %v10322_v30 = vpop.f32.mrf.mxu1  ;;  %vm18740_vm6 = vnez %v18739_v29  ;;  %v9143_v29 = vpop.f32.mrf.mxu2 }
 0x98d   : > { %v10414_v22 = vadd.f32 %v10322_v30, %v10010_v21 }
 0x98f   : > { %v10462_v5 = vsel %vm18723_vm9, %v10414_v22, 0.0  ;;  %v10611_v31 = vmul.f32 %v10414_v22, %v10414_v22  ;;  %11956 = vmatmul.msk.f32.gmra.mxu1 %vm18724_vm11, %v10074_v55  ;;  %vm18745_vm11 = vnez %v18744_v59 }
 0x990   : > { %v10535_v41 = vsel %vm18725_vm8, %v10462_v5, 0.0  ;;  %vm18746_vm8 = vmmov %vm18721_vm0 }
 0x991   : > { %v10536_v2 = vadd.f32 %v10535_v41, %v10534_v26  ;;  %v10659_v43 = vsel %vm18723_vm9, %v10611_v31, 0.0  ;;  %vm18743_vm9 = vmmov %vm18721_vm0 }
 0x992   : > { %v10732_v63 = vsel %vm18726_vm15, %v10659_v43, 0.0 }
 0x993   : > { %v10733_v19 = vadd.f32 %v10732_v63, %v10731_v10  ;;  %v10078_v63 = vld [vmem:[#allocation2 + $0x1a2] sm:$0xff] }
 0x994   : > { %v10325_v46 = vpop.f32.mrf.mxu1 }
 0x995   : > { %v16925_v37 = vadd.f32 %v10325_v46, %v10011_v1 }
 0x997   : > { %11957 = vmatmul.msk.f32.gmra.mxu1 %vm18728_vm4, %v10075_v45  ;;  %v10612_v58 = vmul.f32 %v16925_v37, %v16925_v37  ;;  %v10463_v47 = vsel %vm18731_vm2, %v16925_v37, 0.0  ;;  %v10079_v45 = vld [vmem:[#allocation2 + $0x1aa] sm:$0xff]  ;;  %vm18749_vm4 = vmmov %vm18721_vm0 }
 0x998   : > { %v10537_v27 = vsel %vm18735_vm14, %v10463_v47, 0.0 }
 0x999   : > { %v10660_v48 = vsel %vm18731_vm2, %v10612_v58, 0.0  ;;  %v10538_v52 = vadd.f32 %v10537_v27, %v10536_v2  ;;  %v10014_v2 = vadd.f32 %v16555_v50, %v16496_v24  ;;  %vm18750_vm2 = vmmov %vm18721_vm0 }
 0x99a   : > { %v10734_v61 = vsel %vm18736_vm12, %v10660_v48, 0.0  ;;  %vm18755_vm12 = vmmov %vm18721_vm0 }
 0x99b   : > { %v10735_v22 = vadd.f32 %v10734_v61, %v10733_v19  ;;  %v10015_v19 = vadd.f32 %v16560_v36, %v16507_v54  ;;  %v18747_v54 = vld [vmem:[#allocation49_spill] sm:$0xff] }
 0x99c   : > { %v10328_v32 = vpop.f32.mrf.mxu1  ;;  %vm18748_vm15 = vnez %v18747_v54 }
 0x99d   : > { %v16932_v62 = vadd.f32 %v10328_v32, %v10012_v3 }
 0x99f   : > { %v10613_v20 = vmul.f32 %v16932_v62, %v16932_v62  ;;  %11958 = vmatmul.msk.f32.gmra.mxu1 %vm18732_vm10, %v16498_v11  ;;  %v10464_v56 = vsel %vm18734_vm5, %v16932_v62, 0.0  ;;  %vm18751_vm10 = vmmov %vm18721_vm0 }
 0x9a0   : > { %v10539_v21 = vsel %vm18737_vm1, %v10464_v56, 0.0  ;;  %vm18756_vm1 = vmmov %vm18721_vm0 }
 0x9a1   : > { %v10661_v28 = vsel %vm18734_vm5, %v10613_v20, 0.0  ;;  %v10540_v7 = vadd.f32 %v10539_v21, %v10538_v52  ;;  %vm18752_vm5 = vmmov %vm18721_vm0 }
 0x9a2   : > { %v10736_v30 = vsel %vm18738_vm3, %v10661_v28, 0.0 }
 0x9a3   : > { %v10737_v26 = vadd.f32 %v10736_v30, %v10735_v22  ;;  %v10017_v22 = vadd.f32 %v16572_v17, %v16521_v60 }
 0x9a4   : > { %v10331_v11 = vpop.f32.mrf.mxu1 }
 0x9a5   : > { %v10417_v49 = vadd.f32 %v10331_v11, %v10013_v33  ;;  %v18753_v33 = vld [vmem:[#allocation50_spill] sm:$0xff] }
 0x9a6   : > { %vm18754_vm14 = vnez %v18753_v33  ;;  %v18770_v33 = vld [vmem:[#allocation52_spill] sm:$0xff] }
 0x9a7   : > { %v10465_v55 = vsel %vm18740_vm6, %v10417_v49, 0.0  ;;  %v10614_v44 = vmul.f32 %v10417_v49, %v10417_v49  ;;  %11959 = vmatmul.msk.f32.gmra.mxu1 %vm18741_vm13, %v10077_v57  ;;  %vm18763_vm13 = vmmov %vm18721_vm0 }
 0x9a8   : > { %v10541_v39 = vsel %vm18742_vm7, %v10465_v55, 0.0  ;;  %vm18766_vm7 = vmmov %vm18721_vm0 }
 0x9a9   : > { %v10542_v40 = vadd.f32 %v10541_v39, %v10540_v7  ;;  %v10662_v5 = vsel %vm18740_vm6, %v10614_v44, 0.0  ;;  %v9547_v44 = vpop.f32.mrf.mxu3  ;;  %v18757_v39 = vld [vmem:[#allocation94_spill] sm:$0xff] }
 0x9aa   : > { %v10738_v31 = vsel %vm18721_vm0, %v10662_v5, 0.0 }
 0x9ab   : > { %v10739_v41 = vadd.f32 %v10738_v31, %v10737_v26  ;;  %v9951_v31 = vpop.f32.mrf.mxu0 }
 0x9ac   : > { %v10334_v43 = vpop.f32.mrf.mxu1 }
 0x9ad   : > { %v16963_v10 = vadd.f32 %v10334_v43, %v10014_v2  ;;  %v9146_v43 = vpop.f32.mrf.mxu2 }
 0x9af   : > { %11960 = vmatmul.msk.f32.gmra.mxu1 %vm18743_vm9, %v10078_v63  ;;  %v10615_v1 = vmul.f32 %v16963_v10, %v16963_v10  ;;  %v10466_v24 = vsel %vm18745_vm11, %v16963_v10, 0.0  ;;  %v18759_v63 = vld [vmem:[#allocation9_spill] sm:$0xff]  ;;  %vm18769_vm9 = vmmov %vm18721_vm0 }
 0x9b0   : > { %v10543_v32 = vsel %vm18749_vm4, %v10466_v24, 0.0  ;;  %vm18760_vm3 = vnez %v18759_v63  ;;  %v18764_v24 = vld [vmem:[#allocation95_spill] sm:$0xff] }
 0x9b1   : > { %v10663_v3 = vsel %vm18745_vm11, %v10615_v1, 0.0  ;;  %v10544_v51 = vadd.f32 %v10543_v32, %v10542_v40  ;;  %v18758_v40 = vld [vmem:[#allocation105_spill] sm:$0xff]  ;;  %v9550_v54 = vpop.f32.mrf.mxu3  ;;  %vm18771_vm11 = vnez %v18770_v33 }
 0x9b2   : > { %v10740_v47 = vsel %vm18750_vm2, %v10663_v3, 0.0  ;;  %v10018_v5 = vadd.f32 %v18758_v40, %v18757_v39 }
 0x9b3   : > { %v10741_v28 = vadd.f32 %v10740_v47, %v10739_v41 }
 0x9b4   : > { %v10337_v16 = vpop.f32.mrf.mxu1 }
 0x9b5   : > { %v16970_v46 = vadd.f32 %v10337_v16, %v10015_v19  ;;  %v18761_v16 = vld [vmem:[#allocation51_spill] sm:$0xff] }
 0x9b6   : > { %vm18762_vm6 = vnez %v18761_v16 }
 0x9b7   : > { %v10616_v50 = vmul.f32 %v16970_v46, %v16970_v46  ;;  %11961 = vmatmul.msk.f32.gmra.mxu1 %vm18746_vm8, %v10079_v45  ;;  %v10467_v36 = vsel %vm18748_vm15, %v16970_v46, 0.0  ;;  %vm18772_vm8 = vmmov %vm18721_vm0 }
 0x9b8   : > { %v10545_v20 = vsel %vm18751_vm10, %v10467_v36, 0.0  ;;  %vm18785_vm10 = vmmov %vm18721_vm0 }
 0x9b9   : > { %v10664_v58 = vsel %vm18748_vm15, %v10616_v50, 0.0  ;;  %v10546_v21 = vadd.f32 %v10545_v20, %v10544_v51  ;;  %v18765_v50 = vld [vmem:[#allocation107_spill] sm:$0xff]  ;;  %v18767_v20 = vld [vmem:[#allocation70_spill] sm:$0xff]  ;;  %vm18774_vm15 = vmmov %vm18721_vm0  ;;  %v9553_v63 = vpop.f32.mrf.mxu3 }
 0x9ba   : > { %v10742_v27 = vsel %vm18752_vm5, %v10664_v58, 0.0  ;;  %v10019_v3 = vadd.f32 %v18765_v50, %v18764_v24  ;;  %vm18787_vm5 = vmmov %vm18721_vm0 }
 0x9bb   : > { %v10743_v38 = vadd.f32 %v10742_v27, %v10741_v28  ;;  %v9954_v27 = vpop.f32.mrf.mxu0 }
 0x9bc   : > { %v10340_v48 = vpop.f32.mrf.mxu1 }
 0x9bd   : > { %v10420_v56 = vadd.f32 %v10340_v48, %v10016_v13  ;;  %v18768_v48 = vld [vmem:[#allocation27_spill] sm:$0xff] }
 0x9be   : > { %v8405_v51 = vadd.f32 %v18768_v48, %v18767_v20 }
 0x9bf   : > { %v10468_v61 = vsel %vm18754_vm14, %v10420_v56, 0.0  ;;  %v10617_v11 = vmul.f32 %v10420_v56, %v10420_v56 }
 0x9c0   : > { %v10547_v52 = vsel %vm18755_vm12, %v10468_v61, 0.0  ;;  %vm18791_vm12 = vmmov %vm18721_vm0 }
 0x9c1   : > { %v10548_v49 = vadd.f32 %v10547_v52, %v10546_v21  ;;  %v10665_v53 = vsel %vm18754_vm14, %v10617_v11, 0.0  ;;  %v9149_v52 = vpop.f32.mrf.mxu2  ;;  %v9556_v20 = vpop.f32.mrf.mxu3  ;;  %vm18788_vm14 = vmmov %vm18721_vm0 }
 0x9c2   : > { %v10744_v30 = vsel %vm18756_vm1, %v10665_v53, 0.0 }
 0x9c3   : > { %v10745_v57 = vadd.f32 %v10744_v30, %v10743_v38  ;;  %v18773_v38 = vld [vmem:[#allocation96_spill] sm:$0xff] }
 0x9c4   : > { %v10343_v55 = vpop.f32.mrf.mxu1  ;;  %v8809_v30 = vadd.f32 %v18773_v38, %v8405_v51  ;;  %v18783_v51 = vld [vmem:[#allocation33_spill] sm:$0xff] }
 0x9c5   : > { %v16999_v7 = vadd.f32 %v10343_v55, %v10017_v22 }
 0x9c6   : > { %v9213_v40 = vadd.f32 %v9143_v29, %v8809_v30 }
 0x9c7   : > { %v10618_v41 = vmul.f32 %v16999_v7, %v16999_v7  ;;  %v10469_v60 = vsel %vm18760_vm3, %v16999_v7, 0.0 }
 0x9c8   : > { %v10549_v45 = vsel %vm18763_vm13, %v10469_v60, 0.0  ;;  %v9617_v60 = vadd.f32 %v9547_v44, %v9213_v40 }
 0x9c9   : > { %v10666_v19 = vsel %vm18760_vm3, %v10618_v41, 0.0  ;;  %v10550_v13 = vadd.f32 %v10549_v45, %v10548_v49  ;;  %v9152_v24 = vpop.f32.mrf.mxu2  ;;  %vm18794_vm3 = vmmov %vm18721_vm0 }
 0x9ca   : > { %v10746_v36 = vsel %vm18766_vm7, %v10666_v19, 0.0  ;;  %v18777_v19 = vld [vmem:[#allocation15_spill] sm:$0xff] }
 0x9cb   : > { %v10747_v28 = vadd.f32 %v10746_v36, %v10745_v57 }
 0x9cc   : > { %v10346_v26 = vpop.f32.mrf.mxu1 }
 0x9cd   : > { %v17005_v2 = vadd.f32 %v10346_v26, %v10018_v5  ;;  %v18775_v26 = vld [vmem:[#allocation109_spill] sm:$0xff] }
 0x9cf   : > { %v10619_v17 = vmul.f32 %v17005_v2, %v17005_v2  ;;  %v10470_v1 = vsel %vm18762_vm6, %v17005_v2, 0.0 }
 0x9d0   : > { %v10551_v32 = vsel %vm18721_vm0, %v10470_v1, 0.0  ;;  %v18778_v1 = vld [vmem:[#allocation97_spill] sm:$0xff] }
 0x9d1   : > { %v10667_v59 = vsel %vm18762_vm6, %v10619_v17, 0.0  ;;  %v10552_v21 = vadd.f32 %v10551_v32, %v10550_v13  ;;  %v18776_v17 = vld [vmem:[#allocation13_spill] sm:$0xff]  ;;  %v9155_v38 = vpop.f32.mrf.mxu2  ;;  %vm18796_vm6 = vmmov %vm18721_vm0 }
 0x9d2   : > { %v10748_v56 = vsel %vm18769_vm9, %v10667_v59, 0.0  ;;  %v8406_v16 = vadd.f32 %v18777_v19, %v18776_v17  ;;  %v9957_v59 = vpop.f32.mrf.mxu0  ;;  %v18779_v13 = vld [vmem:[#allocation53_spill] sm:$0xff]  ;;  %vm18807_vm9 = vmmov %vm18721_vm0 }
 0x9d3   : > { %v10749_v55 = vadd.f32 %v10748_v56, %v10747_v28  ;;  %vm18780_vm4 = vnez %v18779_v13  ;;  %v18784_v56 = vld [vmem:[#allocation71_spill] sm:$0xff]  ;;  %v9559_v13 = vpop.f32.mrf.mxu3 }
 0x9d4   : > { %v10349_v58 = vpop.f32.mrf.mxu1  ;;  %v8810_v45 = vadd.f32 %v18778_v1, %v8406_v16  ;;  %v8407_v28 = vadd.f32 %v18784_v56, %v18783_v51  ;;  %v18792_v1 = vld [vmem:[#allocation55_spill] sm:$0xff] }
 0x9d5   : > { %v10423_v47 = vadd.f32 %v10349_v58, %v10019_v3  ;;  %v10021_v3 = vadd.f32 %v9951_v31, %v9617_v60  ;;  %v18781_v31 = vld [vmem:[#allocation54_spill] sm:$0xff]  ;;  %v18790_v60 = vld [vmem:[#allocation19_spill] sm:$0xff]  ;;  %vm18793_vm1 = vnez %v18792_v1 }
 0x9d6   : > { %v9214_v50 = vadd.f32 %v9146_v43, %v8810_v45  ;;  %vm18782_vm2 = vnez %v18781_v31 }
 0x9d7   : > { %v10471_v61 = vsel %vm18771_vm11, %v10423_v47, 0.0  ;;  %v10620_v11 = vmul.f32 %v10423_v47, %v10423_v47 }
 0x9d8   : > { %v10553_v53 = vsel %vm18772_vm8, %v10471_v61, 0.0  ;;  %v9618_v58 = vadd.f32 %v9550_v54, %v9214_v50  ;;  %vm18811_vm8 = vmmov %vm18721_vm0 }
 0x9d9   : > { %v10554_v22 = vadd.f32 %v10553_v53, %v10552_v21  ;;  %v10668_v49 = vsel %vm18771_vm11, %v10620_v11, 0.0  ;;  %v18786_v11 = vld [vmem:[#allocation98_spill] sm:$0xff]  ;;  %v9158_v51 = vpop.f32.mrf.mxu2  ;;  %vm18808_vm11 = vmmov %vm18721_vm0 }
 0x9da   : > { %v10750_v39 = vsel %vm18774_vm15, %v10668_v49, 0.0  ;;  %v9960_v33 = vpop.f32.mrf.mxu0  ;;  %v10022_v21 = vadd.f32 %v9954_v27, %v9618_v58  ;;  %v8811_v53 = vadd.f32 %v18786_v11, %v8407_v28  ;;  %v18797_v28 = vld [vmem:[#allocation41_spill] sm:$0xff]  ;;  %v18799_v11 = vld [vmem:[#allocation100_spill] sm:$0xff] }
 0x9db   : > { %v10751_v5 = vadd.f32 %v10750_v39, %v10749_v55 }
 0x9dc   : > { %v10352_v57 = vpop.f32.mrf.mxu1 }
 0x9dd   : > { %v17035_v41 = vadd.f32 %v10352_v57, %v18775_v26  ;;  %v9215_v57 = vadd.f32 %v9149_v52, %v8811_v53  ;;  %v18789_v26 = vld [vmem:[#allocation72_spill] sm:$0xff] }
 0x9de   : > { %v8408_v17 = vadd.f32 %v18790_v60, %v18789_v26  ;;  %v18801_v26 = vld [vmem:[#allocation73_spill] sm:$0xff] }
 0x9df   : > { %v10621_v29 = vmul.f32 %v17035_v41, %v17035_v41  ;;  %v10472_v44 = vsel %vm18780_vm4, %v17035_v41, 0.0 }
 0x9e0   : > { %v10555_v54 = vsel %vm18785_vm10, %v10472_v44, 0.0 }
 0x9e1   : > { %v10669_v48 = vsel %vm18780_vm4, %v10621_v29, 0.0  ;;  %v10556_v39 = vadd.f32 %v10555_v54, %v10554_v22  ;;  %v18798_v54 = vld [vmem:[#allocation16_spill] sm:$0xff]  ;;  %v9161_v1 = vpop.f32.mrf.mxu2  ;;  %vm18814_vm4 = vmmov %vm18721_vm0 }
 0x9e2   : > { %v10752_v30 = vsel %vm18787_vm5, %v10669_v48, 0.0  ;;  %vm18821_vm5 = vmmov %vm18721_vm0 }
 0x9e3   : > { %v10753_v16 = vadd.f32 %v10752_v30, %v10751_v5 }
 0x9e4   : > { %v10355_v36 = vpop.f32.mrf.mxu1 }
 0x9e5   : > { %v17042_v32 = vadd.f32 %v10355_v36, %v10021_v3  ;;  %v18795_v36 = vld [vmem:[#allocation99_spill] sm:$0xff] }
 0x9e6   : > { %v8812_v29 = vadd.f32 %v18795_v36, %v8408_v17 }
 0x9e7   : > { %v10622_v47 = vmul.f32 %v17042_v32, %v17042_v32  ;;  %v10473_v43 = vsel %vm18782_vm2, %v17042_v32, 0.0 }
 0x9e8   : > { %v10557_v49 = vsel %vm18788_vm14, %v10473_v43, 0.0  ;;  %v9216_v48 = vadd.f32 %v9152_v24, %v8812_v29  ;;  %v9963_v43 = vpop.f32.mrf.mxu0  ;;  %vm18823_vm14 = vmmov %vm18721_vm0 }
 0x9e9   : > { %v10670_v61 = vsel %vm18782_vm2, %v10622_v47, 0.0  ;;  %v10558_v45 = vadd.f32 %v10557_v49, %v10556_v39  ;;  %v9619_v47 = vadd.f32 %v9553_v63, %v9215_v57  ;;  %v9562_v39 = vpop.f32.mrf.mxu3  ;;  %v18800_v57 = vld [vmem:[#allocation38_spill] sm:$0xff]  ;;  %vm18816_vm2 = vmmov %vm18721_vm0 }
 0x9ea   : > { %v10754_v19 = vsel %vm18791_vm12, %v10670_v61, 0.0  ;;  %v9620_v56 = vadd.f32 %v9556_v20, %v9216_v48  ;;  %v8409_v61 = vadd.f32 %v18798_v54, %v18797_v28  ;;  %v8410_v20 = vadd.f32 %v18801_v26, %v18800_v57  ;;  %v18810_v28 = vld [vmem:[#allocation66_spill] sm:$0xff] }
 0x9eb   : > { %v10755_v52 = vadd.f32 %v10754_v19, %v10753_v16 }
 0x9ec   : > { %v10358_v55 = vpop.f32.mrf.mxu1  ;;  %v8813_v53 = vadd.f32 %v18799_v11, %v8409_v61  ;;  %v18812_v11 = vld [vmem:[#allocation57_spill] sm:$0xff] }
 0x9ed   : > { %v10426_v40 = vadd.f32 %v10358_v55, %v10022_v21  ;;  %v10023_v21 = vadd.f32 %v9957_v59, %v9619_v47  ;;  %v10024_v55 = vadd.f32 %v9960_v33, %v9620_v56  ;;  %v18802_v59 = vld [vmem:[#allocation56_spill] sm:$0xff]  ;;  %v18804_v33 = vld [vmem:[#allocation101_spill] sm:$0xff]  ;;  %vm18813_vm15 = vnez %v18812_v11 }
 0x9ee   : > { %v9217_v49 = vadd.f32 %v9155_v38, %v8813_v53  ;;  %vm18803_vm13 = vnez %v18802_v59  ;;  %v8814_v16 = vadd.f32 %v18804_v33, %v8410_v20  ;;  %v18809_v56 = vld [vmem:[#allocation65_spill] sm:$0xff]  ;;  %v9164_v20 = vpop.f32.mrf.mxu2  ;;  %v18824_v11 = vld [vmem:[#allocation68_spill] sm:$0xff] }
 0x9ef   : > { %v10474_v27 = vsel %vm18793_vm1, %v10426_v40, 0.0  ;;  %v10623_v50 = vmul.f32 %v10426_v40, %v10426_v40  ;;  %v8411_v54 = vadd.f32 %v18810_v28, %v18809_v56 }
 0x9f0   : > { %v10559_v3 = vsel %vm18794_vm3, %v10474_v27, 0.0  ;;  %v9621_v60 = vadd.f32 %v9559_v13, %v9217_v49  ;;  %v9966_v17 = vpop.f32.mrf.mxu0  ;;  %vm18830_vm3 = vmmov %vm18721_vm0 }
 0x9f1   : > { %v10560_v58 = vadd.f32 %v10559_v3, %v10558_v45  ;;  %v10671_v22 = vsel %vm18793_vm1, %v10623_v50, 0.0  ;;  %v18805_v45 = vld [vmem:[#allocation10_spill] sm:$0xff]  ;;  %v9218_v3 = vadd.f32 %v9158_v51, %v8814_v16  ;;  %v9565_v61 = vpop.f32.mrf.mxu3  ;;  %vm18828_vm1 = vmmov %vm18721_vm0 }
 0x9f2   : > { %v10756_v44 = vsel %vm18796_vm6, %v10671_v22, 0.0  ;;  %vm18806_vm7 = vnez %v18805_v45  ;;  %v10025_v22 = vadd.f32 %v9963_v43, %v9621_v60  ;;  %v18818_v45 = vld [vmem:[#allocation43_spill] sm:$0xff] }
 0x9f3   : > { %v10757_v5 = vadd.f32 %v10756_v44, %v10755_v52 }
 0x9f4   : > { %v10361_v31 = vpop.f32.mrf.mxu1 }
 0x9f5   : > { %v17075_v30 = vadd.f32 %v10361_v31, %v10023_v21  ;;  %v9622_v31 = vadd.f32 %v9562_v39, %v9218_v3  ;;  %v18819_v3 = vld [vmem:[#allocation58_spill] sm:$0xff] }
 0x9f6   : > { %vm18820_vm10 = vnez %v18819_v3  ;;  %v18831_v3 = vld [vmem:[#allocation64_spill] sm:$0xff] }
 0x9f7   : > { %v10624_v63 = vmul.f32 %v17075_v30, %v17075_v30  ;;  %v10475_v19 = vsel %vm18803_vm13, %v17075_v30, 0.0 }
 0x9f8   : > { %v10561_v36 = vsel %vm18721_vm0, %v10475_v19, 0.0  ;;  %v9969_v57 = vpop.f32.mrf.mxu0  ;;  %v10026_v19 = vadd.f32 %v9966_v17, %v9622_v31 }
 0x9f9   : > { %v10672_v27 = vsel %vm18803_vm13, %v10624_v63, 0.0  ;;  %v10562_v47 = vadd.f32 %v10561_v36, %v10560_v58  ;;  %vm18835_vm13 = vmmov %vm18721_vm0 }
 0x9fa   : > { %v10758_v52 = vsel %vm18807_vm9, %v10672_v27, 0.0  ;;  %v18817_v27 = vld [vmem:[#allocation74_spill] sm:$0xff]  ;;  %vm18842_vm9 = vmmov %vm18828_vm1 }
 0x9fb   : > { %v10759_v21 = vadd.f32 %v10758_v52, %v10757_v5 }
 0x9fc   : > { %v10364_v40 = vpop.f32.mrf.mxu1 }
 0x9fd   : > { %v17079_v24 = vadd.f32 %v10364_v40, %v10024_v55  ;;  %v18815_v40 = vld [vmem:[#allocation102_spill] sm:$0xff] }
 0x9fe   : > { %v8815_v63 = vadd.f32 %v18815_v40, %v8411_v54  ;;  %v9167_v54 = vpop.f32.mrf.mxu2 }
 0x9ff   : > { %v10625_v38 = vmul.f32 %v17079_v24, %v17079_v24  ;;  %v10476_v50 = vsel %vm18806_vm7, %v17079_v24, 0.0 }
 0xa00   : > { %v10563_v13 = vsel %vm18808_vm11, %v10476_v50, 0.0  ;;  %v9219_v59 = vadd.f32 %v9161_v1, %v8815_v63  ;;  %v8412_v50 = vadd.f32 %v18818_v45, %v18817_v27  ;;  %v18822_v1 = vld [vmem:[#allocation103_spill] sm:$0xff]  ;;  %vm18844_vm11 = vmmov %vm18828_vm1 }
 0xa01   : > { %v10673_v29 = vsel %vm18806_vm7, %v10625_v38, 0.0  ;;  %v10564_v49 = vadd.f32 %v10563_v13, %v10562_v47  ;;  %vm18837_vm7 = vmmov %vm18721_vm0 }
 0xa02   : > { %v10760_v51 = vsel %vm18811_vm8, %v10673_v29, 0.0  ;;  %v9623_v16 = vadd.f32 %v9565_v61, %v9219_v59  ;;  %v8816_v13 = vadd.f32 %v18822_v1, %v8412_v50 }
 0xa03   : > { %v10761_v26 = vadd.f32 %v10760_v51, %v10759_v21 }
 0xa04   : > { %v10367_v44 = vpop.f32.mrf.mxu1  ;;  %v9220_v31 = vadd.f32 %v9164_v20, %v8816_v13  ;;  %v10027_v28 = vadd.f32 %v9969_v57, %v9623_v16 }
 0xa05   : > { %v10429_v48 = vadd.f32 %v10367_v44, %v10025_v22  ;;  %v9568_v22 = vpop.f32.mrf.mxu3 }
 0xa06   : > { %v9624_v21 = vadd.f32 %v9568_v22, %v9220_v31  ;;  %v9170_v45 = vpop.f32.mrf.mxu2  ;;  %v18833_v22 = vld [vmem:[#allocation60_spill] sm:$0xff] }
 0xa07   : > { %v10477_v53 = vsel %vm18813_vm15, %v10429_v48, 0.0  ;;  %v10626_v43 = vmul.f32 %v10429_v48, %v10429_v48  ;;  %v9972_v48 = vpop.f32.mrf.mxu0  ;;  %vm18834_vm6 = vnez %v18833_v22 }
 0xa08   : > { %v10565_v55 = vsel %vm18814_vm4, %v10477_v53, 0.0  ;;  %v18825_v53 = vld [vmem:[#allocation67_spill] sm:$0xff]  ;;  %vm18848_vm4 = vmmov %vm18828_vm1 }
 0xa09   : > { %v10566_v58 = vadd.f32 %v10565_v55, %v10564_v49  ;;  %v10674_v39 = vsel %vm18813_vm15, %v10626_v43, 0.0  ;;  %v8413_v49 = vadd.f32 %v18825_v53, %v18824_v11  ;;  %v18826_v43 = vld [vmem:[#allocation59_spill] sm:$0xff]  ;;  %vm18847_vm15 = vmmov %vm18828_vm1 }
 0xa0a   : > { %v10762_v60 = vsel %vm18816_vm2, %v10674_v39, 0.0  ;;  %vm18827_vm12 = vnez %v18826_v43  ;;  %v18839_v43 = vld [vmem:[#allocation69_spill] sm:$0xff] }
 0xa0b   : > { %v10763_v5 = vadd.f32 %v10762_v60, %v10761_v26 }
 0xa0c   : > { %v10370_v38 = vpop.f32.mrf.mxu1 }
 0xa0d   : > { %v17109_v33 = vadd.f32 %v10370_v38, %v10026_v19  ;;  %v9571_v20 = vpop.f32.mrf.mxu3 }
 0xa0f   : > { %v10478_v36 = vsel %vm18820_vm10, %v17109_v33, 0.0  ;;  %v10627_v29 = vmul.f32 %v17109_v33, %v17109_v33  ;;  %v9975_v27 = vpop.f32.mrf.mxu0 }
 0xa10   : > { %v10567_v52 = vsel %vm18821_vm5, %v10478_v36, 0.0  ;;  %v18832_v36 = vld [vmem:[#allocation75_spill] sm:$0xff]  ;;  %vm18852_vm5 = vmmov %vm18828_vm1 }
 0xa11   : > { %v10568_v17 = vadd.f32 %v10567_v52, %v10566_v58  ;;  %v10675_v44 = vsel %vm18820_vm10, %v10627_v29, 0.0  ;;  %v18829_v58 = vld [vmem:[#allocation104_spill] sm:$0xff]  ;;  %v8414_v29 = vadd.f32 %v18832_v36, %v18831_v3  ;;  %vm18851_vm10 = vmmov %vm18828_vm1 }
 0xa12   : > { %v10764_v47 = vsel %vm18823_vm14, %v10675_v44, 0.0  ;;  %v8817_v39 = vadd.f32 %v18829_v58, %v8413_v49  ;;  %v18838_v49 = vld [vmem:[#allocation6_spill] sm:$0xff] }
 0xa13   : > { %v10765_v56 = vadd.f32 %v10764_v47, %v10763_v5  ;;  %v10028_v5 = vadd.f32 %v9972_v48, %v9624_v21 }
 0xa14   : > { %v10373_v61 = vpop.f32.mrf.mxu1  ;;  %v9221_v59 = vadd.f32 %v9167_v54, %v8817_v39 }
 0xa15   : > { %v17123_v51 = vadd.f32 %v10373_v61, %v10027_v28  ;;  %v9574_v61 = vpop.f32.mrf.mxu3 }
 0xa16   : > { %v9625_v50 = vadd.f32 %v9571_v20, %v9221_v59  ;;  %v18843_v20 = vld [vmem:[#allocation108_spill] sm:$0xff] }
 0xa17   : > { %v10479_v55 = vsel %vm18827_vm12, %v17123_v51, 0.0  ;;  %v10628_v40 = vmul.f32 %v17123_v51, %v17123_v51  ;;  %v9978_v39 = vpop.f32.mrf.mxu0 }
 0xa18   : > { %v10569_v63 = vsel %vm18828_vm1, %v10479_v55, 0.0  ;;  %v10029_v54 = vadd.f32 %v9975_v27, %v9625_v50  ;;  %v8415_v55 = vadd.f32 %v18839_v43, %v18838_v49 }
 0xa19   : > { %v10676_v57 = vsel %vm18827_vm12, %v10628_v40, 0.0  ;;  %v10570_v26 = vadd.f32 %v10569_v63, %v10568_v17  ;;  %v18836_v17 = vld [vmem:[#allocation106_spill] sm:$0xff]  ;;  %v18840_v40 = vld [vmem:[#allocation61_spill] sm:$0xff] }
 0xa1a   : > { %v10766_v60 = vsel %vm18830_vm3, %v10676_v57, 0.0  ;;  %v8818_v44 = vadd.f32 %v18836_v17, %v8414_v29  ;;  %vm18841_vm0 = vnez %v18840_v40  ;;  %v9173_v57 = vpop.f32.mrf.mxu2  ;;  %v18845_v29 = vld [vmem:[#allocation62_spill] sm:$0xff]  ;;  %vm18857_vm3 = vcmask 1043456  }
 0xa1b   : > { %v10767_v19 = vadd.f32 %v10766_v60, %v10765_v56  ;;  %v8819_v60 = vadd.f32 %v18843_v20, %v8415_v55  ;;  %vm18846_vm8 = vnez %v18845_v29 }
 0xa1c   : > { %v10376_v38 = vpop.f32.mrf.mxu1  ;;  %v9222_v56 = vadd.f32 %v9170_v45, %v8818_v44 }
 0xa1d   : > { %v10432_v16 = vadd.f32 %v10376_v38, %v10028_v5  ;;  %v9223_v38 = vadd.f32 %v9173_v57, %v8819_v60  ;;  %v9577_v3 = vpop.f32.mrf.mxu3 }
 0xa1e   : > { %v9626_v53 = vadd.f32 %v9574_v61, %v9222_v56 }
 0xa1f   : > { %v10480_v52 = vsel %vm18834_vm6, %v10432_v16, 0.0  ;;  %v10629_v1 = vmul.f32 %v10432_v16, %v10432_v16  ;;  %v9627_v36 = vadd.f32 %v9577_v3, %v9223_v38  ;;  %v9981_v44 = vpop.f32.mrf.mxu0 }
 0xa20   : > { %v10571_v13 = vsel %vm18835_vm13, %v10480_v52, 0.0  ;;  %v10030_v27 = vadd.f32 %v9978_v39, %v9626_v53 }
 0xa21   : > { %v10572_v47 = vadd.f32 %v10571_v13, %v10570_v26  ;;  %v10677_v48 = vsel %vm18834_vm6, %v10629_v1, 0.0 }
 0xa22   : > { %v10768_v31 = vsel %vm18837_vm7, %v10677_v48, 0.0  ;;  %v10031_v48 = vadd.f32 %v9981_v44, %v9627_v36 }
 0xa23   : > { %v10769_v28 = vadd.f32 %v10768_v31, %v10767_v19 }
 0xa24   : > { %v10379_v21 = vpop.f32.mrf.mxu1 }
 0xa25   : > { %v17146_v11 = vadd.f32 %v10379_v21, %v10029_v54  ;;  %v18849_v54 = vld [vmem:[#allocation63_spill] sm:$0xff] }
 0xa26   : > { %vm18850_vm2 = vnez %v18849_v54  ;;  %v10878_v54 = vld [vmem:[%s12174_s11 + $0x80] sm:$0xff] }
 0xa27   : > { %v10481_v63 = vsel %vm18841_vm0, %v17146_v11, 0.0  ;;  %v10630_v58 = vmul.f32 %v17146_v11, %v17146_v11 }
 0xa28   : > { %v10573_v26 = vsel %vm18842_vm9, %v10481_v63, 0.0 }
 0xa29   : > { %v10574_v59 = vadd.f32 %v10573_v26, %v10572_v47  ;;  %v10678_v5 = vsel %vm18841_vm0, %v10630_v58, 0.0 }
 0xa2a   : > { %v10770_v19 = vsel %vm18844_vm11, %v10678_v5, 0.0 }
 0xa2b   : > { %v10771_v16 = vadd.f32 %v10770_v19, %v10769_v28 }
 0xa2c   : > { %v10382_v45 = vpop.f32.mrf.mxu1 }
 0xa2d   : > { %v17160_v50 = vadd.f32 %v10382_v45, %v10030_v27 }
 0xa2f   : > { %v10482_v22 = vsel %vm18846_vm8, %v17160_v50, 0.0  ;;  %v10631_v52 = vmul.f32 %v17160_v50, %v17160_v50 }
 0xa30   : > { %v10575_v1 = vsel %vm18847_vm15, %v10482_v22, 0.0 }
 0xa31   : > { %v10679_v13 = vsel %vm18846_vm8, %v10631_v52, 0.0  ;;  %v10576_v17 = vadd.f32 %v10575_v1, %v10574_v59 }
 0xa32   : > { %v10772_v47 = vsel %vm18848_vm4, %v10679_v13, 0.0 }
 0xa33   : > { %v10773_v31 = vadd.f32 %v10772_v47, %v10771_v16 }
 0xa34   : > { %v10385_v56 = vpop.f32.mrf.mxu1 }
 0xa35   : > { %v10435_v28 = vadd.f32 %v10385_v56, %v10031_v48 }
 0xa37   : > { %v10483_v61 = vsel %vm18850_vm2, %v10435_v28, 0.0  ;;  %v10632_v21 = vmul.f32 %v10435_v28, %v10435_v28 }
 0xa38   : > { %v10577_v53 = vsel %vm18851_vm10, %v10483_v61, 0.0  ;;  %v10862_v61 = vld [vmem:[%s12174_s11] sm:$0xff] }
 0xa39   : > { %v10578_v49 = vadd.f32 %v10577_v53, %v10576_v17  ;;  %v10680_v43 = vsel %vm18850_vm2, %v10632_v21, 0.0 }
 0xa3a   : > { %v10774_v55 = vsel %vm18852_vm5, %v10680_v43, 0.0 }
 0xa3b   : > { %v10579_v40 = vrot.slane %v10578_v49, 4  ;;  %v10775_v63 = vadd.f32 %v10774_v55, %v10773_v31  ;;  %v18853_v31 = vld [vmem:[#allocation111_spill] sm:$0xff] }
 0xa3d   : > { %v10580_v58 = vadd.f32 %v10579_v40, %v10578_v49  ;;  %v10776_v39 = vrot.slane %v10775_v63, 4 }
 0xa3f   : > { %v10581_v57 = vrot.slane %v10580_v58, 2  ;;  %v10777_v26 = vadd.f32 %v10776_v39, %v10775_v63  ;;  %v10879_v39 = vld [vmem:[%s12174_s11 + $0x88] sm:$0xff] }
 0xa41   : > { %v10582_v20 = vadd.f32 %v10581_v57, %v10580_v58  ;;  %v10778_v60 = vrot.slane %v10777_v26, 2  ;;  %v10863_v57 = vld [vmem:[%s12174_s11 + $0x8] sm:$0xff] }
 0xa43   : > { %v10583_v59 = vrot.slane %v10582_v20, 1  ;;  %v10779_v5 = vadd.f32 %v10778_v60, %v10777_v26 }
 0xa45   : > { %v10584_v19 = vadd.f32 %v10583_v59, %v10582_v20  ;;  %v10780_v38 = vrot.slane %v10779_v5, 1 }
 0xa47   : > { %v10781_v16 = vadd.f32 %v10780_v38, %v10779_v5  ;;  %v17177_v27 = vmul.f32 0.00390625, %v10584_v19  ;;  %v10880_v38 = vld [vmem:[%s12174_s11 + $0x90] sm:$0xff] }
 0xa49   : > { %v10783_v45 = vmul.f32 0.00390625, %v10781_v16  ;;  %v10784_v3 = vmul.f32 %v17177_v27, %v17177_v27  ;;  %v10803_v48 = vsub.f32 %v16888_v42, %v17177_v27  ;;  %v10787_v56 = vsub.f32 %v18853_v31, %v17177_v27  ;;  %v18854_v42 = vld [vmem:[#allocation110_spill] sm:$0xff]  ;;  %v10864_v16 = vld [vmem:[%s12174_s11 + $0x10] sm:$0xff] }
 0xa4a   : > { %v10804_v55 = vsub.f32 %v16895_v23, %v17177_v27  ;;  %v10788_v40 = vsub.f32 %v18854_v42, %v17177_v27  ;;  %v10805_v60 = vsub.f32 %v16925_v37, %v17177_v27  ;;  %v18855_v23 = vld [vmem:[#allocation112_spill] sm:$0xff] }
 0xa4b   : > { %v10785_v36 = vsub.f32 %v10783_v45, %v10784_v3  ;;  %v10789_v59 = vsub.f32 %v18855_v23, %v17177_v27  ;;  %v18856_v37 = vld [vmem:[#allocation12_spill] sm:$0xff] }
 0xa4d   : > { %v10786_v29 = vmax.f32 %v10785_v36, 0.0  ;;  %v10806_v36 = vsub.f32 %v16932_v62, %v17177_v27  ;;  %v10791_v62 = vsub.f32 %v16667_v18, %v17177_v27 }
 0xa4f   : > { %v10819_v22 = vadd.f32 1e-05, %v10786_v29  ;;  %v10790_v29 = vsub.f32 %v18856_v37, %v17177_v27 }
 0xa51   : > { %12016 = vrsqrt.f32 %v10819_v22  ;;  %vm10826_vm12 = vweird.f32 %v10819_v22 }
 0xa57   : > { %v12017_v52 = vpop.eup %12016 }
 0xa58   : > { %v10821_v1 = vmul.f32 %v12017_v52, %v10819_v22  ;;  %vm10827_vm14 = vweird.f32 %v12017_v52 }
 0xa59   : > { %vm10828_vm1 = vmor %vm10826_vm12, %vm10827_vm14 }
 0xa5a   : > { %v10822_v13 = vmul.f32 %v12017_v52, %v10821_v1  ;;  %v10881_v1 = vld [vmem:[%s12174_s11 + $0x98] sm:$0xff] }
 0xa5c   : > { %v10823_v17 = vmul.f32 0.5, %v10822_v13  ;;  %v10865_v13 = vld [vmem:[%s12174_s11 + $0x18] sm:$0xff] }
 0xa5e   : > { %v10824_v44 = vsub.f32 1.5, %v10823_v17 }
 0xa60   : > { %v10825_v47 = vmul.f32 %v12017_v52, %v10824_v44 }
 0xa62   : > { %v17185_v28 = vsel %vm10828_vm1, %v12017_v52, %v10825_v47  ;;  %v10807_v47 = vsub.f32 %v16963_v10, %v17177_v27  ;;  %v10792_v10 = vsub.f32 %v16673_v34, %v17177_v27 }
 0xa63   : > { %v10846_v21 = vmul.f32 %v17185_v28, %v10803_v48  ;;  %v10830_v53 = vmul.f32 %v17185_v28, %v10787_v56  ;;  %v10847_v63 = vmul.f32 %v17185_v28, %v10804_v55  ;;  %v10831_v58 = vmul.f32 %v17185_v28, %v10788_v40  ;;  %v10882_v56 = vld [vmem:[%s12174_s11 + $0xa0] sm:$0xff]  ;;  %v10867_v55 = vld [vmem:[%s12174_s11 + $0x28] sm:$0xff] }
 0xa64   : > { %v10848_v5 = vmul.f32 %v17185_v28, %v10805_v60  ;;  %v10832_v19 = vmul.f32 %v17185_v28, %v10789_v59  ;;  %v10849_v22 = vmul.f32 %v17185_v28, %v10806_v36  ;;  %v10833_v52 = vmul.f32 %v17185_v28, %v10790_v29  ;;  %v10885_v59 = vld [vmem:[%s12174_s11 + $0xb8] sm:$0xff]  ;;  %v10870_v36 = vld [vmem:[%s12174_s11 + $0x40] sm:$0xff] }
 0xa65   : > { %v10910_v49 = vadd.f32 %v10878_v54, %v10846_v21  ;;  %v10894_v43 = vadd.f32 %v10862_v61, %v10830_v53  ;;  %v10911_v26 = vadd.f32 %v10879_v39, %v10847_v63  ;;  %v10895_v20 = vadd.f32 %v10863_v57, %v10831_v58  ;;  %v10866_v54 = vld [vmem:[%s12174_s11 + $0x20] sm:$0xff]  ;;  %v10884_v39 = vld [vmem:[%s12174_s11 + $0xb0] sm:$0xff] }
 0xa66   : > { %v10912_v45 = vadd.f32 %v10880_v38, %v10848_v5  ;;  %v10896_v3 = vadd.f32 %v10864_v16, %v10832_v19  ;;  %v10913_v17 = vadd.f32 %v10881_v1, %v10849_v22  ;;  %v10897_v44 = vadd.f32 %v10865_v13, %v10833_v52  ;;  %v10868_v57 = vld [vmem:[%s12174_s11 + $0x30] sm:$0xff]  ;;  %v10869_v5 = vld [vmem:[%s12174_s11 + $0x38] sm:$0xff]  ;;  %v10887_v1 = vld [vmem:[%s12174_s11 + $0xc8] sm:$0xff] }
 0xa67   : > { %10958 = vxpose.xlu1.b32.start [1/16] (narrow) %v10910_v49, 8  ;;  %10926 = vxpose.xlu0.b32.start [1/16] (narrow) %v10894_v43, 8  ;;  %v10850_v48 = vmul.f32 %v17185_v28, %v10807_v47  ;;  %v10834_v31 = vmul.f32 %v17185_v28, %v10791_v62  ;;  %v10808_v53 = vsub.f32 %v16970_v46, %v17177_v27  ;;  %v10883_v43 = vld [vmem:[%s12174_s11 + $0xa8] sm:$0xff] }
 0xa68   : > { %v10835_v49 = vmul.f32 %v17185_v28, %v10792_v10  ;;  %v10809_v63 = vsub.f32 %v16999_v7, %v17177_v27  ;;  %v10793_v46 = vsub.f32 %v16704_v4, %v17177_v27  ;;  %v10810_v60 = vsub.f32 %v17005_v2, %v17177_v27  ;;  %v10871_v13 = vld [vmem:[%s12174_s11 + $0x48] sm:$0xff]  ;;  %v10873_v10 = vld [vmem:[%s12174_s11 + $0x58] sm:$0xff] }
 0xa69   : > { %v10914_v61 = vadd.f32 %v10882_v56, %v10850_v48  ;;  %v10898_v21 = vadd.f32 %v10866_v54, %v10834_v31  ;;  %v10851_v18 = vmul.f32 %v17185_v28, %v10808_v53  ;;  %v10794_v7 = vsub.f32 %v16710_v12, %v17177_v27  ;;  %v10888_v48 = vld [vmem:[%s12174_s11 + $0xd0] sm:$0xff]  ;;  %v10889_v53 = vld [vmem:[%s12174_s11 + $0xd8] sm:$0xff] }
 0xa6a   : > { %v10899_v40 = vadd.f32 %v10867_v55, %v10835_v49  ;;  %v10852_v34 = vmul.f32 %v17185_v28, %v10809_v63  ;;  %v10836_v58 = vmul.f32 %v17185_v28, %v10793_v46  ;;  %v10853_v4 = vmul.f32 %v17185_v28, %v10810_v60  ;;  %v10872_v31 = vld [vmem:[%s12174_s11 + $0x50] sm:$0xff] }
 0xa6b   : > { %v10915_v42 = vadd.f32 %v10883_v43, %v10851_v18  ;;  %v10837_v23 = vmul.f32 %v17185_v28, %v10794_v7  ;;  %v10811_v16 = vsub.f32 %v17035_v41, %v17177_v27  ;;  %v10795_v2 = vsub.f32 %v16741_v8, %v17177_v27 }
 0xa6c   : > { %v10917_v19 = vadd.f32 %v10885_v59, %v10853_v4  ;;  %v10812_v22 = vsub.f32 %v17042_v32, %v17177_v27  ;;  %v10796_v41 = vsub.f32 %v16747_v35, %v17177_v27  ;;  %v10813_v47 = vsub.f32 %v17075_v30, %v17177_v27  ;;  %v10892_v4 = vld [vmem:[%s12174_s11 + $0xf0] sm:$0xff] }
 0xa6d   : > { %v10901_v38 = vadd.f32 %v10869_v5, %v10837_v23  ;;  %v10854_v12 = vmul.f32 %v17185_v28, %v10811_v16  ;;  %v10797_v32 = vsub.f32 %v16778_v6, %v17177_v27  ;;  %v10798_v30 = vsub.f32 %v16784_v14, %v17177_v27  ;;  %v10876_v23 = vld [vmem:[%s12174_s11 + $0x70] sm:$0xff]  ;;  %v10893_v16 = vld [vmem:[%s12174_s11 + $0xf8] sm:$0xff] }
 0xa6e   : > { %v10855_v8 = vmul.f32 %v17185_v28, %v10812_v22  ;;  %v10839_v52 = vmul.f32 %v17185_v28, %v10796_v41  ;;  %v10856_v35 = vmul.f32 %v17185_v28, %v10813_v47  ;;  %v10815_v43 = vsub.f32 %v17109_v33, %v17177_v27 }
 0xa6f   : > { %10959 = vxpose.xlu1.b32.cont [2/16] (narrow) %v10911_v26, 8  ;;  %10927 = vxpose.xlu0.b32.cont [2/16] (narrow) %v10895_v20, 8  ;;  %v10916_v26 = vadd.f32 %v10884_v39, %v10852_v34  ;;  %v10900_v20 = vadd.f32 %v10868_v57, %v10836_v58  ;;  %v10840_v62 = vmul.f32 %v17185_v28, %v10797_v32  ;;  %v10891_v39 = vld [vmem:[%s12174_s11 + $0xe8] sm:$0xff] }
 0xa70   : > { %v10920_v56 = vadd.f32 %v10888_v48, %v10856_v35  ;;  %v10858_v14 = vmul.f32 %v17185_v28, %v10815_v43  ;;  %v10816_v34 = vsub.f32 %v17123_v51, %v17177_v27  ;;  %v10800_v33 = vsub.f32 %v16821_v0, %v17177_v27  ;;  %v10875_v57 = vld [vmem:[%s12174_s11 + $0x68] sm:$0xff] }
 0xa71   : > { %v10904_v54 = vadd.f32 %v10872_v31, %v10840_v62  ;;  %v10817_v60 = vsub.f32 %v17146_v11, %v17177_v27  ;;  %v10801_v51 = vsub.f32 %v16852_v15, %v17177_v27  ;;  %v10818_v11 = vsub.f32 %v17160_v50, %v17177_v27 }
 0xa72   : > { %v10843_v58 = vmul.f32 %v17185_v28, %v10800_v33 }
 0xa73   : > { %v10860_v0 = vmul.f32 %v17185_v28, %v10817_v60  ;;  %v10844_v7 = vmul.f32 %v17185_v28, %v10801_v51  ;;  %v10861_v15 = vmul.f32 %v17185_v28, %v10818_v11 }
 0xa75   : > { %v10924_v59 = vadd.f32 %v10892_v4, %v10860_v0  ;;  %v10908_v5 = vadd.f32 %v10876_v23, %v10844_v7 }
 0xa77   : > { %10960 = vxpose.xlu1.b32.cont [3/16] (narrow) %v10912_v45, 8  ;;  %10928 = vxpose.xlu0.b32.cont [3/16] (narrow) %v10896_v3, 8  ;;  %v10838_v45 = vmul.f32 %v17185_v28, %v10795_v2  ;;  %v10886_v3 = vld [vmem:[%s12174_s11 + $0xc0] sm:$0xff]  ;;  %v10877_v2 = vld [vmem:[%s12174_s11 + $0x78] sm:$0xff] }
 0xa78   : > { %v10918_v37 = vadd.f32 %v10886_v3, %v10854_v12  ;;  %v10925_v12 = vadd.f32 %v10893_v16, %v10861_v15 }
 0xa79   : > { %v10902_v29 = vadd.f32 %v10870_v36, %v10838_v45 }
 0xa7f   : > { %10961 = vxpose.xlu1.b32.cont [4/16] (narrow) %v10913_v17, 8  ;;  %10929 = vxpose.xlu0.b32.cont [4/16] (narrow) %v10897_v44, 8  ;;  %v10919_v17 = vadd.f32 %v10887_v1, %v10855_v8  ;;  %v10903_v44 = vadd.f32 %v10871_v13, %v10839_v52 }
 0xa87   : > { %10962 = vxpose.xlu1.b32.cont [5/16] (narrow) %v10914_v61, 8  ;;  %10930 = vxpose.xlu0.b32.cont [5/16] (narrow) %v10898_v21, 8  ;;  %v10814_v61 = vsub.f32 %v17079_v24, %v17177_v27  ;;  %v10841_v21 = vmul.f32 %v17185_v28, %v10798_v30  ;;  %v10799_v24 = vsub.f32 %v16815_v9, %v17177_v27 }
 0xa88   : > { %v10859_v9 = vmul.f32 %v17185_v28, %v10816_v34 }
 0xa89   : > { %v10857_v6 = vmul.f32 %v17185_v28, %v10814_v61  ;;  %v10905_v49 = vadd.f32 %v10873_v10, %v10841_v21  ;;  %v10842_v55 = vmul.f32 %v17185_v28, %v10799_v24 }
 0xa8b   : > { %v10921_v18 = vadd.f32 %v10889_v53, %v10857_v6 }
 0xa8f   : > { %10963 = vxpose.xlu1.b32.cont [6/16] (narrow) %v10915_v42, 8  ;;  %10931 = vxpose.xlu0.b32.cont [6/16] (narrow) %v10899_v40, 8  ;;  %v10890_v42 = vld [vmem:[%s12174_s11 + $0xe0] sm:$0xff] }
 0xa90   : > { %v10874_v40 = vld [vmem:[%s12174_s11 + $0x60] sm:$0xff]  ;;  %v10922_v63 = vadd.f32 %v10890_v42, %v10858_v14  ;;  %s10997_s11 = scalar_lea.sflag [#allocation4], %s215_s30 }
 0xa91   : > { %v10906_v46 = vadd.f32 %v10874_v40, %v10842_v55 }
 0xa97   : > { %10964 = vxpose.xlu1.b32.cont [7/16] (narrow) %v10916_v26, 8  ;;  %10932 = vxpose.xlu0.b32.cont [7/16] (narrow) %v10900_v20, 8  ;;  %v10923_v26 = vadd.f32 %v10891_v39, %v10859_v9  ;;  %v10907_v20 = vadd.f32 %v10875_v57, %v10843_v58 }
 0xa9f   : > { %10965 = vxpose.xlu1.b32.cont [8/16] (narrow) %v10917_v19, 8  ;;  %10933 = vxpose.xlu0.b32.cont [8/16] (narrow) %v10901_v38, 8  ;;  %v10802_v19 = vsub.f32 %v16858_v25, %v17177_v27 }
 0xaa1   : > { %v10845_v38 = vmul.f32 %v17185_v28, %v10802_v19 }
 0xaa3   : > { %v10909_v45 = vadd.f32 %v10877_v2, %v10845_v38 }
 0xaa7   : > { %10966 = vxpose.xlu1.b32.cont [9/16] (narrow) %v10918_v37, 8  ;;  %10934 = vxpose.xlu0.b32.cont [9/16] (narrow) %v10902_v29, 8 }
 0xaaf   : > { %10967 = vxpose.xlu1.b32.cont [10/16] (narrow) %v10919_v17, 8  ;;  %10935 = vxpose.xlu0.b32.cont [10/16] (narrow) %v10903_v44, 8 }
 0xab7   : > { %10968 = vxpose.xlu1.b32.cont [11/16] (narrow) %v10920_v56, 8  ;;  %10936 = vxpose.xlu0.b32.cont [11/16] (narrow) %v10904_v54, 8 }
 0xabf   : > { %10969 = vxpose.xlu1.b32.cont [12/16] (narrow) %v10921_v18, 8  ;;  %10937 = vxpose.xlu0.b32.cont [12/16] (narrow) %v10905_v49, 8 }
 0xac7   : > { %10970 = vxpose.xlu1.b32.cont [13/16] (narrow) %v10922_v63, 8  ;;  %10938 = vxpose.xlu0.b32.cont [13/16] (narrow) %v10906_v46, 8 }
 0xacf   : > { %10971 = vxpose.xlu1.b32.cont [14/16] (narrow) %v10923_v26, 8  ;;  %10939 = vxpose.xlu0.b32.cont [14/16] (narrow) %v10907_v20, 8 }
 0xad7   : > { %10972 = vxpose.xlu1.b32.cont [15/16] (narrow) %v10924_v59, 8  ;;  %10940 = vxpose.xlu0.b32.cont [15/16] (narrow) %v10908_v5, 8 }
 0xadf   : > { %10973 = vxpose.xlu1.b32.end [16/16] (narrow) %v10925_v12, 8  ;;  %10941 = vxpose.xlu0.b32.end [16/16] (narrow) %v10909_v45, 8 }
 0xb0b   : > { %v10974_v25 = vpop.trf.xlu1  ;;  %v10942_v50 = vpop.trf.xlu0 }
 0xb0c   : > { %v10992_v27 = vrot.slane %v10974_v25, 4 }
 0xb0e   : > { %v10993_v28 = vsel %vm18857_vm3, %v10942_v50, %v10992_v27 }
 0xb0f   : > { %10995 = vst [vmem:[%s217_s12] sm:$0xff] %v10993_v28 }
 0xb10   : > { %12047 = shalt.err (!%p12044_p4)
}
 0xb11   : > { %11971 = dma.vmem_to_hbm [thread:$0]  (%p12154_p5), %s11011_s13, 128, %s11013_s14, %s10997_s11  }
 0xb12 PF: > { %p11977_p7 = scmp.ge.s32.totalorder %s12082_s21, 2  ;;  %s11024_s30 = sand.u32 1, %s12070_s18  }
 0xb13   : > { %s11025_s6 = scalar_lea.sflag [#allocation4], %s11024_s30 }
 0xb14   : > { %p11974_p8 = pnand %p11977_p7, %p12158_p6 }
 0xb16   : > { %p11975_p9 = pneg %p11974_p8 }
 0xb18   : > { %12065 = dma.done.wait (%p11975_p9), %s11025_s6, 128  }
 0xb19   : > { %12067 = vsyncadd (%p11975_p9), %s11025_s6, 4294967168  ;;  %p15_p10 = scmp.ge.s32.totalorder %s12141_s24, 4   ;;  %s18858_s18 = smov %s12074_s19 }
 0xb1a   : > { %s18859_s19 = smov %s12078_s20  ;;  %s18860_s20 = smov %s12152_s27 }
 0xb1b   : > { %s18861_s21 = smov %s12141_s24  ;;  %17 = sbr.rel (!%p15_p10) target bundleno = 3 (0x3), region = 79 }
 0xb20   :  { %11031 = vsyncpa [#allocation4], 1 }
 0xb21   :  { %11033 = vsyncpa [#allocation4 + $0x1], 1 }

</bundles_post_ra>
